<compile_context>
chip_gen: v7x
topology: tpu7x:2x2x1
jax: 0.10.0
libtpu: 0.0.40
codegen_flags: <defaults>
</compile_context>

<pallas_src>
import functools

import jax
import jax.numpy as jnp
from jax.experimental import pallas as pl
from jax.experimental.pallas import tpu as pltpu

EPS = 1e-5     # nn.BatchNorm2d default eps
LANE = 128     # channel lane padding (lane-dense loads/stores everywhere)
KPAD = 32      # padded contraction dim for conv / linear matmuls (max Cin = 16)


def _rup8(n):
    return ((n + 7) // 8) * 8


# --------------------------- in-kernel building blocks ----------------------

def _conv_bn_tanh(src_ref, w_ref, bn_ref, m_ref, y_ref, *, B, Hp, Wp, Ho, Wo):
    """3x3 conv as 9 shifted matmuls over the padded grid, then training-mode
    BatchNorm (masked batch stats over the B*Ho*Wo valid rows) and tanh.
    Result stays on the padded grid in y_ref (row b*Hp*Wp + i*Wp + j)."""
    rpad = y_ref.shape[0]
    y_ref[...] = jnp.zeros_like(y_ref)
    for di in range(3):
        for dj in range(3):
            lhs = src_ref[pl.ds(di * Wp + dj, rpad), :]
            y_ref[...] += jnp.dot(lhs[:, :KPAD], w_ref[di * 3 + dj],
                                  preferred_element_type=jnp.float32)
    acc = y_ref[...]
    mask = m_ref[...]                                  # [rpad, 1]; 1.0 on valid rows
    inv_n = 1.0 / float(B * Ho * Wo)
    mean = jnp.sum(acc * mask, axis=0, keepdims=True) * inv_n
    cen = acc - mean
    var = jnp.sum(cen * cen * mask, axis=0, keepdims=True) * inv_n
    y = cen * jax.lax.rsqrt(var + EPS) * bn_ref[0:1, :] + bn_ref[1:2, :]
    y_ref[...] = jnp.tanh(y)


def _maxpool_into(y_ref, dst_ref, *, B, Hp, Wp, Hpool, Wpool,
                  hw_next, wp_next, pad_next):
    """MaxPool2d(2,2) of the valid region of y_ref; pooled rows are written
    directly into the (pre-zeroed) padded grid of the next stage."""
    for b in range(B):
        for oi in range(Hpool):
            base = b * Hp * Wp + 2 * oi * Wp
            row = jnp.maximum(
                jnp.maximum(y_ref[pl.ds(base, Wpool, 2), :],
                            y_ref[pl.ds(base + 1, Wpool, 2), :]),
                jnp.maximum(y_ref[pl.ds(base + Wp, Wpool, 2), :],
                            y_ref[pl.ds(base + Wp + 1, Wpool, 2), :]))
            dst = b * hw_next + (oi + pad_next) * wp_next + pad_next
            dst_ref[pl.ds(dst, Wpool), :] = row


def _fused_kernel(x_ref, w1_ref, bn1_ref, m1_ref,
                  w2_ref, bn2_ref, m2_ref,
                  w3_ref, bn3_ref, m3_ref,
                  wl_ref, bl_ref,
                  o_ref,
                  y1_ref, xp2_ref, y2_ref, xp3_ref, y3_ref, p_ref, *, B):
    # Padded-input scratches: pad ring / tail rows must be exact zeros.
    xp2_ref[...] = jnp.zeros_like(xp2_ref)
    xp3_ref[...] = jnp.zeros_like(xp3_ref)

    # conv1 3->5 (pad=1) on the 10x10 grid; pool 8x8 -> 4x4 into xp2 (pad=2, 8x8)
    _conv_bn_tanh(x_ref, w1_ref, bn1_ref, m1_ref, y1_ref,
                  B=B, Hp=10, Wp=10, Ho=8, Wo=8)
    _maxpool_into(y1_ref, xp2_ref, B=B, Hp=10, Wp=10, Hpool=4, Wpool=4,
                  hw_next=64, wp_next=8, pad_next=2)

    # conv2 5->9 (pad=2) on the 8x8 grid; pool 6x6 -> 3x3 into xp3 (pad=2, 7x7)
    _conv_bn_tanh(xp2_ref, w2_ref, bn2_ref, m2_ref, y2_ref,
                  B=B, Hp=8, Wp=8, Ho=6, Wo=6)
    _maxpool_into(y2_ref, xp3_ref, B=B, Hp=8, Wp=8, Hpool=3, Wpool=3,
                  hw_next=49, wp_next=7, pad_next=2)

    # conv3 9->16 (pad=2) on the 7x7 grid; pool 5x5 -> 2x2 into the flatten buffer
    _conv_bn_tanh(xp3_ref, w3_ref, bn3_ref, m3_ref, y3_ref,
                  B=B, Hp=7, Wp=7, Ho=5, Wo=5)
    _maxpool_into(y3_ref, p_ref, B=B, Hp=7, Wp=7, Hpool=2, Wpool=2,
                  hw_next=4, wp_next=2, pad_next=0)

    # Fused Linear(64,16) . Linear(16,16) with the CHW flatten folded into the
    # weight:  out[b, n] = sum_{c, r} p[b*4 + r, c] * Wf[c*4 + r, n] + bf[n]
    out = jnp.zeros((B, LANE), dtype=jnp.float32)
    for r in range(4):
        rows = p_ref[pl.ds(r, B, 4), :]                # rows (b, r) for all b
        out = out + jnp.dot(rows[:, :KPAD], wl_ref[r],
                            preferred_element_type=jnp.float32)
    out = out + bl_ref[...]
    o_ref[...] = out[:, :16]


# ------------------------------ host-side prep ------------------------------

def _prep_conv_weight(w, cin, cout):
    # [Cout, Cin, 3, 3] -> [9, KPAD, LANE] of per-tap (Cin, Cout) matrices.
    wt = jnp.transpose(w, (2, 3, 1, 0)).reshape(9, cin, cout)
    return jnp.pad(wt, ((0, 0), (0, KPAD - cin), (0, LANE - cout)))


def _prep_bn(gamma, beta):
    c = gamma.shape[0]
    g = jnp.pad(gamma, (0, LANE - c)).reshape(1, LANE)
    b = jnp.pad(beta, (0, LANE - c)).reshape(1, LANE)
    return jnp.concatenate([g, b], axis=0)             # [2, LANE]


def _valid_mask(B, Hp, Wp, Ho, Wo, rpad):
    r = jnp.arange(rpad)
    bidx = r // (Hp * Wp)
    rem = r % (Hp * Wp)
    i = rem // Wp
    j = rem % Wp
    m = (bidx < B) & (i < Ho) & (j < Wo)
    return m.astype(jnp.float32).reshape(rpad, 1)


def _prep_linear(lw1, lb1, lw2, lb2):
    # No nonlinearity between the two Linears in the spec -> exact host fusion.
    wf = lw1.T @ lw2.T                                  # [64, 16]
    bf = lb1 @ lw2.T + lb2                              # [16]
    w4 = jnp.transpose(wf.reshape(16, 4, 16), (1, 0, 2))  # [r, c, n]
    w4 = jnp.pad(w4, ((0, 0), (0, KPAD - 16), (0, LANE - 16)))
    bl = jnp.pad(bf, (0, LANE - 16)).reshape(1, LANE)
    return w4, bl


def _prep_input(x, xp_rows):
    # NCHW [B,3,8,8] -> padded channels-last rows [xp_rows, KPAD]
    B = x.shape[0]
    xc = jnp.transpose(x, (0, 2, 3, 1))                 # [B, 8, 8, 3]
    xc = jnp.pad(xc, ((0, 0), (1, 1), (1, 1), (0, 0)))  # [B, 10, 10, 3]
    x2 = xc.reshape(B * 100, 3)
    return jnp.pad(x2, ((0, xp_rows - B * 100), (0, KPAD - 3)))


@jax.jit
def matrix_cnn_forward(x, params):
    B = x.shape[0]
    # geometry fixed by the module for 8x8 inputs: padded grids 10/8/7
    HPS = (10, 8, 7)
    rpad = tuple(_rup8(B * h * h) for h in HPS)                       # conv-out rows
    xrows = tuple(_rup8(r + 2 * h + 2) for r, h in zip(rpad, HPS))    # padded-in rows

    x2d = _prep_input(x, xrows[0])
    w1 = _prep_conv_weight(params["w1"], 3, 5)
    w2 = _prep_conv_weight(params["w2"], 5, 9)
    w3 = _prep_conv_weight(params["w3"], 9, 16)
    bn1 = _prep_bn(params["g1"], params["be1"])
    bn2 = _prep_bn(params["g2"], params["be2"])
    bn3 = _prep_bn(params["g3"], params["be3"])
    m1 = _valid_mask(B, 10, 10, 8, 8, rpad[0])
    m2 = _valid_mask(B, 8, 8, 6, 6, rpad[1])
    m3 = _valid_mask(B, 7, 7, 5, 5, rpad[2])
    wl, bl = _prep_linear(params["lw1"], params["lb1"],
                          params["lw2"], params["lb2"])
    # NOTE: conv biases b1/b2/b3 cancel exactly under training-mode BatchNorm
    # (a per-channel constant shifts the batch mean identically), so they are
    # intentionally not passed into the kernel.

    vmem = pl.BlockSpec(memory_space=pltpu.MemorySpace.VMEM)
    kernel = functools.partial(_fused_kernel, B=B)
    return pl.pallas_call(
        kernel,
        out_shape=jax.ShapeDtypeStruct((B, 16), jnp.float32),
        in_specs=[vmem] * 12,
        out_specs=vmem,
        scratch_shapes=[
            pltpu.VMEM((rpad[0], LANE), jnp.float32),    # conv1 output (padded grid)
            pltpu.VMEM((xrows[1], LANE), jnp.float32),   # stage-2 padded input
            pltpu.VMEM((rpad[1], LANE), jnp.float32),    # conv2 output
            pltpu.VMEM((xrows[2], LANE), jnp.float32),   # stage-3 padded input
            pltpu.VMEM((rpad[2], LANE), jnp.float32),    # conv3 output
            pltpu.VMEM((_rup8(4 * B), LANE), jnp.float32),  # pooled conv3 / flatten rows
        ],
    )(x2d, w1, bn1, m1, w2, bn2, m2, w3, bn3, m3, wl, bl)


# ------------------------------ pure-JAX reference ---------------------------

def _reference_forward(x, params):
    def conv_bn_tanh(x, w, b, g, be, pad):
        y = jax.lax.conv_general_dilated(
            x, w, window_strides=(1, 1), padding=[(pad, pad), (pad, pad)],
            dimension_numbers=("NCHW", "OIHW", "NCHW"))
        y = y + b[None, :, None, None]
        mean = jnp.mean(y, axis=(0, 2, 3), keepdims=True)
        var = jnp.mean((y - mean) ** 2, axis=(0, 2, 3), keepdims=True)
        y = (y - mean) * jax.lax.rsqrt(var + EPS)
        y = y * g[None, :, None, None] + be[None, :, None, None]
        return jnp.tanh(y)

    def maxpool(x):
        return jax.lax.reduce_window(x, -jnp.inf, jax.lax.max,
                                     (1, 1, 2, 2), (1, 1, 2, 2), "VALID")

    y = conv_bn_tanh(x, params["w1"], params["b1"], params["g1"], params["be1"], 1)
    y = maxpool(y)
    y = conv_bn_tanh(y, params["w2"], params["b2"], params["g2"], params["be2"], 2)
    y = maxpool(y)
    y = conv_bn_tanh(y, params["w3"], params["b3"], params["g3"], params["be3"], 2)
    y = maxpool(y)
    yf = y.reshape(y.shape[0], -1)
    h = yf @ params["lw1"].T + params["lb1"]
    return h @ params["lw2"].T + params["lb2"]


def init_params(key):
    ks = jax.random.split(key, 10)
    f32 = jnp.float32
    return {
        # Conv2d(3,5,3), Conv2d(5,9,3), Conv2d(9,16,3)
        "w1": 0.1 * jax.random.normal(ks[0], (5, 3, 3, 3), f32),
        "b1": 0.1 * jax.random.normal(ks[1], (5,), f32),
        "g1": jnp.ones((5,), f32), "be1": jnp.zeros((5,), f32),
        "w2": 0.1 * jax.random.normal(ks[2], (9, 5, 3, 3), f32),
        "b2": 0.1 * jax.random.normal(ks[3], (9,), f32),
        "g2": jnp.ones((9,), f32), "be2": jnp.zeros((9,), f32),
        "w3": 0.1 * jax.random.normal(ks[4], (16, 9, 3, 3), f32),
        "b3": 0.1 * jax.random.normal(ks[5], (16,), f32),
        "g3": jnp.ones((16,), f32), "be3": jnp.zeros((16,), f32),
        # Linear(64,16), Linear(16,16)  (PyTorch weight layout [out, in])
        "lw1": 0.1 * jax.random.normal(ks[6], (16, 64), f32),
        "lb1": 0.1 * jax.random.normal(ks[7], (16,), f32),
        "lw2": 0.1 * jax.random.normal(ks[8], (16, 16), f32),
        "lb2": 0.1 * jax.random.normal(ks[9], (16,), f32),
    }


if __name__ == "__main__":
    key = jax.random.PRNGKey(0)
    pkey, xkey = jax.random.split(key)
    params = init_params(pkey)
    # Input 8x8 spatial is what makes the flatten produce 2*2*16 = 64 features.
    x = jax.random.normal(xkey, (2, 3, 8, 8), jnp.float32)

    out = matrix_cnn_forward(x, params)
    out = jax.block_until_ready(out)
    assert out.shape == (2, 16) and out.dtype == jnp.float32

    # Correctness check against a pure-JAX reference (loose tol: default TPU
    # matmul precision differs in accumulation order / bf16 passes).
    # TODO(synk): BatchNorm uses training-mode batch statistics and does not
    # update running_mean/running_var (same semantics as the original kernel).
    ref = jax.block_until_ready(_reference_forward(x, params))
    assert float(jnp.max(jnp.abs(out - ref))) < 5e-2, "mismatch vs reference"

    print("KERNEL_OK")
</pallas_src>

<mosaic_0001>
module attributes {stable_mosaic.version = 11 : i64} {
  func.func @_fused_kernel(%arg0: memref<224x32xf32, #tpu.memory_space<vmem>>, %arg1: memref<9x32x128xf32, #tpu.memory_space<vmem>>, %arg2: memref<2x128xf32, #tpu.memory_space<vmem>>, %arg3: memref<200x1xf32, #tpu.memory_space<vmem>>, %arg4: memref<9x32x128xf32, #tpu.memory_space<vmem>>, %arg5: memref<2x128xf32, #tpu.memory_space<vmem>>, %arg6: memref<128x1xf32, #tpu.memory_space<vmem>>, %arg7: memref<9x32x128xf32, #tpu.memory_space<vmem>>, %arg8: memref<2x128xf32, #tpu.memory_space<vmem>>, %arg9: memref<104x1xf32, #tpu.memory_space<vmem>>, %arg10: memref<4x32x128xf32, #tpu.memory_space<vmem>>, %arg11: memref<1x128xf32, #tpu.memory_space<vmem>>, %arg12: memref<2x16xf32, #tpu.memory_space<vmem>>, %arg13: memref<200x128xf32, #tpu.memory_space<vmem>>, %arg14: memref<152x128xf32, #tpu.memory_space<vmem>>, %arg15: memref<128x128xf32, #tpu.memory_space<vmem>>, %arg16: memref<120x128xf32, #tpu.memory_space<vmem>>, %arg17: memref<104x128xf32, #tpu.memory_space<vmem>>, %arg18: memref<8x128xf32, #tpu.memory_space<vmem>>) attributes {dimension_semantics = [], scalar_prefetch = 0 : i64, scratch_operands = 6 : i64, tpu.core_type = #tpu.core_type<tc>} {
    %cst = arith.constant 0.000000e+00 : f32
    %0 = vector.broadcast %cst : f32 to vector<152x128xf32>
    %c0 = arith.constant 0 : index
    %c0_0 = arith.constant 0 : index
    %1 = vector.load %arg14[%c0, %c0_0] : memref<152x128xf32, #tpu.memory_space<vmem>>, vector<152x128xf32>
    tpu.vector_store %arg14[%c0, %c0_0], %0 {strides = array<i32>} : memref<152x128xf32, #tpu.memory_space<vmem>>, vector<152x128xf32>,
    %cst_1 = arith.constant 0.000000e+00 : f32
    %2 = vector.broadcast %cst_1 : f32 to vector<120x128xf32>
    %c0_2 = arith.constant 0 : index
    %c0_3 = arith.constant 0 : index
    %3 = vector.load %arg16[%c0_2, %c0_3] : memref<120x128xf32, #tpu.memory_space<vmem>>, vector<120x128xf32>
    tpu.vector_store %arg16[%c0_2, %c0_3], %2 {strides = array<i32>} : memref<120x128xf32, #tpu.memory_space<vmem>>, vector<120x128xf32>,
    %cst_4 = arith.constant 0.000000e+00 : f32
    %4 = vector.broadcast %cst_4 : f32 to vector<200x128xf32>
    %c0_5 = arith.constant 0 : index
    %c0_6 = arith.constant 0 : index
    %5 = vector.load %arg13[%c0_5, %c0_6] : memref<200x128xf32, #tpu.memory_space<vmem>>, vector<200x128xf32>
    tpu.vector_store %arg13[%c0_5, %c0_6], %4 {strides = array<i32>} : memref<200x128xf32, #tpu.memory_space<vmem>>, vector<200x128xf32>,
    %c0_7 = arith.constant 0 : index
    %c0_8 = arith.constant 0 : index
    %6 = vector.load %arg0[%c0_7, %c0_8] : memref<224x32xf32, #tpu.memory_space<vmem>>, vector<200x32xf32>
    %c0_9 = arith.constant 0 : index
    %c0_10 = arith.constant 0 : index
    %7 = vector.load %arg13[%c0_9, %c0_10] : memref<200x128xf32, #tpu.memory_space<vmem>>, vector<200x128xf32>
    %c0_11 = arith.constant 0 : index
    %c0_12 = arith.constant 0 : index
    %c0_13 = arith.constant 0 : index
    %8 = vector.load %arg1[%c0_11, %c0_12, %c0_13] : memref<9x32x128xf32, #tpu.memory_space<vmem>>, vector<1x32x128xf32>
    %9 = vector.shape_cast %8 : vector<1x32x128xf32> to vector<32x128xf32>
    %cst_14 = arith.constant dense<0.000000e+00> : vector<200x128xf32>
    %10 = tpu.matmul %6, %9, %cst_14 {dimension_numbers = #tpu.dot_dimension_numbers<[1], [0], [0], [1], [0, 0, 1, 1], [], []>} : vector<200x32xf32>, vector<32x128xf32>, vector<200x128xf32> -> vector<200x128xf32>
    %11 = arith.addf %7, %10 : vector<200x128xf32>
    %c0_15 = arith.constant 0 : index
    %c0_16 = arith.constant 0 : index
    %12 = vector.load %arg13[%c0_15, %c0_16] : memref<200x128xf32, #tpu.memory_space<vmem>>, vector<200x128xf32>
    tpu.vector_store %arg13[%c0_15, %c0_16], %11 {strides = array<i32>} : memref<200x128xf32, #tpu.memory_space<vmem>>, vector<200x128xf32>,
    %c1 = arith.constant 1 : index
    %c0_17 = arith.constant 0 : index
    %13 = vector.load %arg0[%c1, %c0_17] : memref<224x32xf32, #tpu.memory_space<vmem>>, vector<200x32xf32>
    %c0_18 = arith.constant 0 : index
    %c0_19 = arith.constant 0 : index
    %14 = vector.load %arg13[%c0_18, %c0_19] : memref<200x128xf32, #tpu.memory_space<vmem>>, vector<200x128xf32>
    %c1_20 = arith.constant 1 : index
    %c0_21 = arith.constant 0 : index
    %c0_22 = arith.constant 0 : index
    %15 = vector.load %arg1[%c1_20, %c0_21, %c0_22] : memref<9x32x128xf32, #tpu.memory_space<vmem>>, vector<1x32x128xf32>
    %16 = vector.shape_cast %15 : vector<1x32x128xf32> to vector<32x128xf32>
    %cst_23 = arith.constant dense<0.000000e+00> : vector<200x128xf32>
    %17 = tpu.matmul %13, %16, %cst_23 {dimension_numbers = #tpu.dot_dimension_numbers<[1], [0], [0], [1], [0, 0, 1, 1], [], []>} : vector<200x32xf32>, vector<32x128xf32>, vector<200x128xf32> -> vector<200x128xf32>
    %18 = arith.addf %14, %17 : vector<200x128xf32>
    %c0_24 = arith.constant 0 : index
    %c0_25 = arith.constant 0 : index
    %19 = vector.load %arg13[%c0_24, %c0_25] : memref<200x128xf32, #tpu.memory_space<vmem>>, vector<200x128xf32>
    tpu.vector_store %arg13[%c0_24, %c0_25], %18 {strides = array<i32>} : memref<200x128xf32, #tpu.memory_space<vmem>>, vector<200x128xf32>,
    %c2 = arith.constant 2 : index
    %c0_26 = arith.constant 0 : index
    %20 = vector.load %arg0[%c2, %c0_26] : memref<224x32xf32, #tpu.memory_space<vmem>>, vector<200x32xf32>
    %c0_27 = arith.constant 0 : index
    %c0_28 = arith.constant 0 : index
    %21 = vector.load %arg13[%c0_27, %c0_28] : memref<200x128xf32, #tpu.memory_space<vmem>>, vector<200x128xf32>
    %c2_29 = arith.constant 2 : index
    %c0_30 = arith.constant 0 : index
    %c0_31 = arith.constant 0 : index
    %22 = vector.load %arg1[%c2_29, %c0_30, %c0_31] : memref<9x32x128xf32, #tpu.memory_space<vmem>>, vector<1x32x128xf32>
    %23 = vector.shape_cast %22 : vector<1x32x128xf32> to vector<32x128xf32>
    %cst_32 = arith.constant dense<0.000000e+00> : vector<200x128xf32>
    %24 = tpu.matmul %20, %23, %cst_32 {dimension_numbers = #tpu.dot_dimension_numbers<[1], [0], [0], [1], [0, 0, 1, 1], [], []>} : vector<200x32xf32>, vector<32x128xf32>, vector<200x128xf32> -> vector<200x128xf32>
    %25 = arith.addf %21, %24 : vector<200x128xf32>
    %c0_33 = arith.constant 0 : index
    %c0_34 = arith.constant 0 : index
    %26 = vector.load %arg13[%c0_33, %c0_34] : memref<200x128xf32, #tpu.memory_space<vmem>>, vector<200x128xf32>
    tpu.vector_store %arg13[%c0_33, %c0_34], %25 {strides = array<i32>} : memref<200x128xf32, #tpu.memory_space<vmem>>, vector<200x128xf32>,
    %c10 = arith.constant 10 : index
    %c0_35 = arith.constant 0 : index
    %27 = vector.load %arg0[%c10, %c0_35] : memref<224x32xf32, #tpu.memory_space<vmem>>, vector<200x32xf32>
    %c0_36 = arith.constant 0 : index
    %c0_37 = arith.constant 0 : index
    %28 = vector.load %arg13[%c0_36, %c0_37] : memref<200x128xf32, #tpu.memory_space<vmem>>, vector<200x128xf32>
    %c3 = arith.constant 3 : index
    %c0_38 = arith.constant 0 : index
    %c0_39 = arith.constant 0 : index
    %29 = vector.load %arg1[%c3, %c0_38, %c0_39] : memref<9x32x128xf32, #tpu.memory_space<vmem>>, vector<1x32x128xf32>
    %30 = vector.shape_cast %29 : vector<1x32x128xf32> to vector<32x128xf32>
    %cst_40 = arith.constant dense<0.000000e+00> : vector<200x128xf32>
    %31 = tpu.matmul %27, %30, %cst_40 {dimension_numbers = #tpu.dot_dimension_numbers<[1], [0], [0], [1], [0, 0, 1, 1], [], []>} : vector<200x32xf32>, vector<32x128xf32>, vector<200x128xf32> -> vector<200x128xf32>
    %32 = arith.addf %28, %31 : vector<200x128xf32>
    %c0_41 = arith.constant 0 : index
    %c0_42 = arith.constant 0 : index
    %33 = vector.load %arg13[%c0_41, %c0_42] : memref<200x128xf32, #tpu.memory_space<vmem>>, vector<200x128xf32>
    tpu.vector_store %arg13[%c0_41, %c0_42], %32 {strides = array<i32>} : memref<200x128xf32, #tpu.memory_space<vmem>>, vector<200x128xf32>,
    %c11 = arith.constant 11 : index
    %c0_43 = arith.constant 0 : index
    %34 = vector.load %arg0[%c11, %c0_43] : memref<224x32xf32, #tpu.memory_space<vmem>>, vector<200x32xf32>
    %c0_44 = arith.constant 0 : index
    %c0_45 = arith.constant 0 : index
    %35 = vector.load %arg13[%c0_44, %c0_45] : memref<200x128xf32, #tpu.memory_space<vmem>>, vector<200x128xf32>
    %c4 = arith.constant 4 : index
    %c0_46 = arith.constant 0 : index
    %c0_47 = arith.constant 0 : index
    %36 = vector.load %arg1[%c4, %c0_46, %c0_47] : memref<9x32x128xf32, #tpu.memory_space<vmem>>, vector<1x32x128xf32>
    %37 = vector.shape_cast %36 : vector<1x32x128xf32> to vector<32x128xf32>
    %cst_48 = arith.constant dense<0.000000e+00> : vector<200x128xf32>
    %38 = tpu.matmul %34, %37, %cst_48 {dimension_numbers = #tpu.dot_dimension_numbers<[1], [0], [0], [1], [0, 0, 1, 1], [], []>} : vector<200x32xf32>, vector<32x128xf32>, vector<200x128xf32> -> vector<200x128xf32>
    %39 = arith.addf %35, %38 : vector<200x128xf32>
    %c0_49 = arith.constant 0 : index
    %c0_50 = arith.constant 0 : index
    %40 = vector.load %arg13[%c0_49, %c0_50] : memref<200x128xf32, #tpu.memory_space<vmem>>, vector<200x128xf32>
    tpu.vector_store %arg13[%c0_49, %c0_50], %39 {strides = array<i32>} : memref<200x128xf32, #tpu.memory_space<vmem>>, vector<200x128xf32>,
    %c12 = arith.constant 12 : index
    %c0_51 = arith.constant 0 : index
    %41 = vector.load %arg0[%c12, %c0_51] : memref<224x32xf32, #tpu.memory_space<vmem>>, vector<200x32xf32>
    %c0_52 = arith.constant 0 : index
    %c0_53 = arith.constant 0 : index
    %42 = vector.load %arg13[%c0_52, %c0_53] : memref<200x128xf32, #tpu.memory_space<vmem>>, vector<200x128xf32>
    %c5 = arith.constant 5 : index
    %c0_54 = arith.constant 0 : index
    %c0_55 = arith.constant 0 : index
    %43 = vector.load %arg1[%c5, %c0_54, %c0_55] : memref<9x32x128xf32, #tpu.memory_space<vmem>>, vector<1x32x128xf32>
    %44 = vector.shape_cast %43 : vector<1x32x128xf32> to vector<32x128xf32>
    %cst_56 = arith.constant dense<0.000000e+00> : vector<200x128xf32>
    %45 = tpu.matmul %41, %44, %cst_56 {dimension_numbers = #tpu.dot_dimension_numbers<[1], [0], [0], [1], [0, 0, 1, 1], [], []>} : vector<200x32xf32>, vector<32x128xf32>, vector<200x128xf32> -> vector<200x128xf32>
    %46 = arith.addf %42, %45 : vector<200x128xf32>
    %c0_57 = arith.constant 0 : index
    %c0_58 = arith.constant 0 : index
    %47 = vector.load %arg13[%c0_57, %c0_58] : memref<200x128xf32, #tpu.memory_space<vmem>>, vector<200x128xf32>
    tpu.vector_store %arg13[%c0_57, %c0_58], %46 {strides = array<i32>} : memref<200x128xf32, #tpu.memory_space<vmem>>, vector<200x128xf32>,
    %c20 = arith.constant 20 : index
    %c0_59 = arith.constant 0 : index
    %48 = vector.load %arg0[%c20, %c0_59] : memref<224x32xf32, #tpu.memory_space<vmem>>, vector<200x32xf32>
    %c0_60 = arith.constant 0 : index
    %c0_61 = arith.constant 0 : index
    %49 = vector.load %arg13[%c0_60, %c0_61] : memref<200x128xf32, #tpu.memory_space<vmem>>, vector<200x128xf32>
    %c6 = arith.constant 6 : index
    %c0_62 = arith.constant 0 : index
    %c0_63 = arith.constant 0 : index
    %50 = vector.load %arg1[%c6, %c0_62, %c0_63] : memref<9x32x128xf32, #tpu.memory_space<vmem>>, vector<1x32x128xf32>
    %51 = vector.shape_cast %50 : vector<1x32x128xf32> to vector<32x128xf32>
    %cst_64 = arith.constant dense<0.000000e+00> : vector<200x128xf32>
    %52 = tpu.matmul %48, %51, %cst_64 {dimension_numbers = #tpu.dot_dimension_numbers<[1], [0], [0], [1], [0, 0, 1, 1], [], []>} : vector<200x32xf32>, vector<32x128xf32>, vector<200x128xf32> -> vector<200x128xf32>
    %53 = arith.addf %49, %52 : vector<200x128xf32>
    %c0_65 = arith.constant 0 : index
    %c0_66 = arith.constant 0 : index
    %54 = vector.load %arg13[%c0_65, %c0_66] : memref<200x128xf32, #tpu.memory_space<vmem>>, vector<200x128xf32>
    tpu.vector_store %arg13[%c0_65, %c0_66], %53 {strides = array<i32>} : memref<200x128xf32, #tpu.memory_space<vmem>>, vector<200x128xf32>,
    %c21 = arith.constant 21 : index
    %c0_67 = arith.constant 0 : index
    %55 = vector.load %arg0[%c21, %c0_67] : memref<224x32xf32, #tpu.memory_space<vmem>>, vector<200x32xf32>
    %c0_68 = arith.constant 0 : index
    %c0_69 = arith.constant 0 : index
    %56 = vector.load %arg13[%c0_68, %c0_69] : memref<200x128xf32, #tpu.memory_space<vmem>>, vector<200x128xf32>
    %c7 = arith.constant 7 : index
    %c0_70 = arith.constant 0 : index
    %c0_71 = arith.constant 0 : index
    %57 = vector.load %arg1[%c7, %c0_70, %c0_71] : memref<9x32x128xf32, #tpu.memory_space<vmem>>, vector<1x32x128xf32>
    %58 = vector.shape_cast %57 : vector<1x32x128xf32> to vector<32x128xf32>
    %cst_72 = arith.constant dense<0.000000e+00> : vector<200x128xf32>
    %59 = tpu.matmul %55, %58, %cst_72 {dimension_numbers = #tpu.dot_dimension_numbers<[1], [0], [0], [1], [0, 0, 1, 1], [], []>} : vector<200x32xf32>, vector<32x128xf32>, vector<200x128xf32> -> vector<200x128xf32>
    %60 = arith.addf %56, %59 : vector<200x128xf32>
    %c0_73 = arith.constant 0 : index
    %c0_74 = arith.constant 0 : index
    %61 = vector.load %arg13[%c0_73, %c0_74] : memref<200x128xf32, #tpu.memory_space<vmem>>, vector<200x128xf32>
    tpu.vector_store %arg13[%c0_73, %c0_74], %60 {strides = array<i32>} : memref<200x128xf32, #tpu.memory_space<vmem>>, vector<200x128xf32>,
    %c22 = arith.constant 22 : index
    %c0_75 = arith.constant 0 : index
    %62 = vector.load %arg0[%c22, %c0_75] : memref<224x32xf32, #tpu.memory_space<vmem>>, vector<200x32xf32>
    %c0_76 = arith.constant 0 : index
    %c0_77 = arith.constant 0 : index
    %63 = vector.load %arg13[%c0_76, %c0_77] : memref<200x128xf32, #tpu.memory_space<vmem>>, vector<200x128xf32>
    %c8 = arith.constant 8 : index
    %c0_78 = arith.constant 0 : index
    %c0_79 = arith.constant 0 : index
    %64 = vector.load %arg1[%c8, %c0_78, %c0_79] : memref<9x32x128xf32, #tpu.memory_space<vmem>>, vector<1x32x128xf32>
    %65 = vector.shape_cast %64 : vector<1x32x128xf32> to vector<32x128xf32>
    %cst_80 = arith.constant dense<0.000000e+00> : vector<200x128xf32>
    %66 = tpu.matmul %62, %65, %cst_80 {dimension_numbers = #tpu.dot_dimension_numbers<[1], [0], [0], [1], [0, 0, 1, 1], [], []>} : vector<200x32xf32>, vector<32x128xf32>, vector<200x128xf32> -> vector<200x128xf32>
    %67 = arith.addf %63, %66 : vector<200x128xf32>
    %c0_81 = arith.constant 0 : index
    %c0_82 = arith.constant 0 : index
    %68 = vector.load %arg13[%c0_81, %c0_82] : memref<200x128xf32, #tpu.memory_space<vmem>>, vector<200x128xf32>
    tpu.vector_store %arg13[%c0_81, %c0_82], %67 {strides = array<i32>} : memref<200x128xf32, #tpu.memory_space<vmem>>, vector<200x128xf32>,
    %c0_83 = arith.constant 0 : index
    %c0_84 = arith.constant 0 : index
    %69 = vector.load %arg13[%c0_83, %c0_84] : memref<200x128xf32, #tpu.memory_space<vmem>>, vector<200x128xf32>
    %c0_85 = arith.constant 0 : index
    %c0_86 = arith.constant 0 : index
    %70 = vector.load %arg3[%c0_85, %c0_86] : memref<200x1xf32, #tpu.memory_space<vmem>>, vector<200x1xf32>
    %71 = vector.broadcast %70 : vector<200x1xf32> to vector<200x128xf32>
    %72 = arith.mulf %69, %71 : vector<200x128xf32>
    %cst_87 = arith.constant dense<0.000000e+00> : vector<128xf32>
    %73 = vector.multi_reduction <add>, %72, %cst_87 [0] : vector<200x128xf32> to vector<128xf32>
    %74 = vector.shape_cast %73 : vector<128xf32> to vector<1x128xf32>
    %cst_88 = arith.constant 7.812500e-03 : f32
    %75 = vector.broadcast %cst_88 : f32 to vector<1x128xf32>
    %76 = arith.mulf %74, %75 : vector<1x128xf32>
    %77 = vector.broadcast %76 : vector<1x128xf32> to vector<200x128xf32>
    %78 = arith.subf %69, %77 : vector<200x128xf32>
    %79 = arith.mulf %78, %78 : vector<200x128xf32>
    %80 = vector.broadcast %70 : vector<200x1xf32> to vector<200x128xf32>
    %81 = arith.mulf %79, %80 : vector<200x128xf32>
    %cst_89 = arith.constant dense<0.000000e+00> : vector<128xf32>
    %82 = vector.multi_reduction <add>, %81, %cst_89 [0] : vector<200x128xf32> to vector<128xf32>
    %83 = vector.shape_cast %82 : vector<128xf32> to vector<1x128xf32>
    %cst_90 = arith.constant 7.812500e-03 : f32
    %84 = vector.broadcast %cst_90 : f32 to vector<1x128xf32>
    %85 = arith.mulf %83, %84 : vector<1x128xf32>
    %cst_91 = arith.constant 9.99999974E-6 : f32
    %86 = vector.broadcast %cst_91 : f32 to vector<1x128xf32>
    %87 = arith.addf %85, %86 : vector<1x128xf32>
    %88 = math.rsqrt %87 : vector<1x128xf32>
    %89 = vector.broadcast %88 : vector<1x128xf32> to vector<200x128xf32>
    %90 = arith.mulf %78, %89 : vector<200x128xf32>
    %c0_92 = arith.constant 0 : index
    %c0_93 = arith.constant 0 : index
    %91 = vector.load %arg2[%c0_92, %c0_93] : memref<2x128xf32, #tpu.memory_space<vmem>>, vector<1x128xf32>
    %92 = vector.broadcast %91 : vector<1x128xf32> to vector<200x128xf32>
    %93 = arith.mulf %90, %92 : vector<200x128xf32>
    %c1_94 = arith.constant 1 : index
    %c0_95 = arith.constant 0 : index
    %94 = vector.load %arg2[%c1_94, %c0_95] : memref<2x128xf32, #tpu.memory_space<vmem>>, vector<1x128xf32>
    %95 = vector.broadcast %94 : vector<1x128xf32> to vector<200x128xf32>
    %96 = arith.addf %93, %95 : vector<200x128xf32>
    %97 = math.tanh %96 : vector<200x128xf32>
    %c0_96 = arith.constant 0 : index
    %c0_97 = arith.constant 0 : index
    %98 = vector.load %arg13[%c0_96, %c0_97] : memref<200x128xf32, #tpu.memory_space<vmem>>, vector<200x128xf32>
    tpu.vector_store %arg13[%c0_96, %c0_97], %97 {strides = array<i32>} : memref<200x128xf32, #tpu.memory_space<vmem>>, vector<200x128xf32>,
    %c0_98 = arith.constant 0 : index
    %c0_99 = arith.constant 0 : index
    %99 = tpu.strided_load %arg13[%c0_98, %c0_99] {strides = array<i32: 2, 1>} : memref<200x128xf32, #tpu.memory_space<vmem>>, vector<4x128xf32>
    %c1_100 = arith.constant 1 : index
    %c0_101 = arith.constant 0 : index
    %100 = tpu.strided_load %arg13[%c1_100, %c0_101] {strides = array<i32: 2, 1>} : memref<200x128xf32, #tpu.memory_space<vmem>>, vector<4x128xf32>
    %101 = arith.maximumf %99, %100 : vector<4x128xf32>
    %c10_102 = arith.constant 10 : index
    %c0_103 = arith.constant 0 : index
    %102 = tpu.strided_load %arg13[%c10_102, %c0_103] {strides = array<i32: 2, 1>} : memref<200x128xf32, #tpu.memory_space<vmem>>, vector<4x128xf32>
    %c11_104 = arith.constant 11 : index
    %c0_105 = arith.constant 0 : index
    %103 = tpu.strided_load %arg13[%c11_104, %c0_105] {strides = array<i32: 2, 1>} : memref<200x128xf32, #tpu.memory_space<vmem>>, vector<4x128xf32>
    %104 = arith.maximumf %102, %103 : vector<4x128xf32>
    %105 = arith.maximumf %101, %104 : vector<4x128xf32>
    %c18 = arith.constant 18 : index
    %c0_106 = arith.constant 0 : index
    %106 = vector.load %arg14[%c18, %c0_106] : memref<152x128xf32, #tpu.memory_space<vmem>>, vector<4x128xf32>
    tpu.vector_store %arg14[%c18, %c0_106], %105 {strides = array<i32>} : memref<152x128xf32, #tpu.memory_space<vmem>>, vector<4x128xf32>,
    %c20_107 = arith.constant 20 : index
    %c0_108 = arith.constant 0 : index
    %107 = tpu.strided_load %arg13[%c20_107, %c0_108] {strides = array<i32: 2, 1>} : memref<200x128xf32, #tpu.memory_space<vmem>>, vector<4x128xf32>
    %c21_109 = arith.constant 21 : index
    %c0_110 = arith.constant 0 : index
    %108 = tpu.strided_load %arg13[%c21_109, %c0_110] {strides = array<i32: 2, 1>} : memref<200x128xf32, #tpu.memory_space<vmem>>, vector<4x128xf32>
    %109 = arith.maximumf %107, %108 : vector<4x128xf32>
    %c30 = arith.constant 30 : index
    %c0_111 = arith.constant 0 : index
    %110 = tpu.strided_load %arg13[%c30, %c0_111] {strides = array<i32: 2, 1>} : memref<200x128xf32, #tpu.memory_space<vmem>>, vector<4x128xf32>
    %c31 = arith.constant 31 : index
    %c0_112 = arith.constant 0 : index
    %111 = tpu.strided_load %arg13[%c31, %c0_112] {strides = array<i32: 2, 1>} : memref<200x128xf32, #tpu.memory_space<vmem>>, vector<4x128xf32>
    %112 = arith.maximumf %110, %111 : vector<4x128xf32>
    %113 = arith.maximumf %109, %112 : vector<4x128xf32>
    %c26 = arith.constant 26 : index
    %c0_113 = arith.constant 0 : index
    %114 = vector.load %arg14[%c26, %c0_113] : memref<152x128xf32, #tpu.memory_space<vmem>>, vector<4x128xf32>
    tpu.vector_store %arg14[%c26, %c0_113], %113 {strides = array<i32>} : memref<152x128xf32, #tpu.memory_space<vmem>>, vector<4x128xf32>,
    %c40 = arith.constant 40 : index
    %c0_114 = arith.constant 0 : index
    %115 = tpu.strided_load %arg13[%c40, %c0_114] {strides = array<i32: 2, 1>} : memref<200x128xf32, #tpu.memory_space<vmem>>, vector<4x128xf32>
    %c41 = arith.constant 41 : index
    %c0_115 = arith.constant 0 : index
    %116 = tpu.strided_load %arg13[%c41, %c0_115] {strides = array<i32: 2, 1>} : memref<200x128xf32, #tpu.memory_space<vmem>>, vector<4x128xf32>
    %117 = arith.maximumf %115, %116 : vector<4x128xf32>
    %c50 = arith.constant 50 : index
    %c0_116 = arith.constant 0 : index
    %118 = tpu.strided_load %arg13[%c50, %c0_116] {strides = array<i32: 2, 1>} : memref<200x128xf32, #tpu.memory_space<vmem>>, vector<4x128xf32>
    %c51 = arith.constant 51 : index
    %c0_117 = arith.constant 0 : index
    %119 = tpu.strided_load %arg13[%c51, %c0_117] {strides = array<i32: 2, 1>} : memref<200x128xf32, #tpu.memory_space<vmem>>, vector<4x128xf32>
    %120 = arith.maximumf %118, %119 : vector<4x128xf32>
    %121 = arith.maximumf %117, %120 : vector<4x128xf32>
    %c34 = arith.constant 34 : index
    %c0_118 = arith.constant 0 : index
    %122 = vector.load %arg14[%c34, %c0_118] : memref<152x128xf32, #tpu.memory_space<vmem>>, vector<4x128xf32>
    tpu.vector_store %arg14[%c34, %c0_118], %121 {strides = array<i32>} : memref<152x128xf32, #tpu.memory_space<vmem>>, vector<4x128xf32>,
    %c60 = arith.constant 60 : index
    %c0_119 = arith.constant 0 : index
    %123 = tpu.strided_load %arg13[%c60, %c0_119] {strides = array<i32: 2, 1>} : memref<200x128xf32, #tpu.memory_space<vmem>>, vector<4x128xf32>
    %c61 = arith.constant 61 : index
    %c0_120 = arith.constant 0 : index
    %124 = tpu.strided_load %arg13[%c61, %c0_120] {strides = array<i32: 2, 1>} : memref<200x128xf32, #tpu.memory_space<vmem>>, vector<4x128xf32>
    %125 = arith.maximumf %123, %124 : vector<4x128xf32>
    %c70 = arith.constant 70 : index
    %c0_121 = arith.constant 0 : index
    %126 = tpu.strided_load %arg13[%c70, %c0_121] {strides = array<i32: 2, 1>} : memref<200x128xf32, #tpu.memory_space<vmem>>, vector<4x128xf32>
    %c71 = arith.constant 71 : index
    %c0_122 = arith.constant 0 : index
    %127 = tpu.strided_load %arg13[%c71, %c0_122] {strides = array<i32: 2, 1>} : memref<200x128xf32, #tpu.memory_space<vmem>>, vector<4x128xf32>
    %128 = arith.maximumf %126, %127 : vector<4x128xf32>
    %129 = arith.maximumf %125, %128 : vector<4x128xf32>
    %c42 = arith.constant 42 : index
    %c0_123 = arith.constant 0 : index
    %130 = vector.load %arg14[%c42, %c0_123] : memref<152x128xf32, #tpu.memory_space<vmem>>, vector<4x128xf32>
    tpu.vector_store %arg14[%c42, %c0_123], %129 {strides = array<i32>} : memref<152x128xf32, #tpu.memory_space<vmem>>, vector<4x128xf32>,
    %c100 = arith.constant 100 : index
    %c0_124 = arith.constant 0 : index
    %131 = tpu.strided_load %arg13[%c100, %c0_124] {strides = array<i32: 2, 1>} : memref<200x128xf32, #tpu.memory_space<vmem>>, vector<4x128xf32>
    %c101 = arith.constant 101 : index
    %c0_125 = arith.constant 0 : index
    %132 = tpu.strided_load %arg13[%c101, %c0_125] {strides = array<i32: 2, 1>} : memref<200x128xf32, #tpu.memory_space<vmem>>, vector<4x128xf32>
    %133 = arith.maximumf %131, %132 : vector<4x128xf32>
    %c110 = arith.constant 110 : index
    %c0_126 = arith.constant 0 : index
    %134 = tpu.strided_load %arg13[%c110, %c0_126] {strides = array<i32: 2, 1>} : memref<200x128xf32, #tpu.memory_space<vmem>>, vector<4x128xf32>
    %c111 = arith.constant 111 : index
    %c0_127 = arith.constant 0 : index
    %135 = tpu.strided_load %arg13[%c111, %c0_127] {strides = array<i32: 2, 1>} : memref<200x128xf32, #tpu.memory_space<vmem>>, vector<4x128xf32>
    %136 = arith.maximumf %134, %135 : vector<4x128xf32>
    %137 = arith.maximumf %133, %136 : vector<4x128xf32>
    %c82 = arith.constant 82 : index
    %c0_128 = arith.constant 0 : index
    %138 = vector.load %arg14[%c82, %c0_128] : memref<152x128xf32, #tpu.memory_space<vmem>>, vector<4x128xf32>
    tpu.vector_store %arg14[%c82, %c0_128], %137 {strides = array<i32>} : memref<152x128xf32, #tpu.memory_space<vmem>>, vector<4x128xf32>,
    %c120 = arith.constant 120 : index
    %c0_129 = arith.constant 0 : index
    %139 = tpu.strided_load %arg13[%c120, %c0_129] {strides = array<i32: 2, 1>} : memref<200x128xf32, #tpu.memory_space<vmem>>, vector<4x128xf32>
    %c121 = arith.constant 121 : index
    %c0_130 = arith.constant 0 : index
    %140 = tpu.strided_load %arg13[%c121, %c0_130] {strides = array<i32: 2, 1>} : memref<200x128xf32, #tpu.memory_space<vmem>>, vector<4x128xf32>
    %141 = arith.maximumf %139, %140 : vector<4x128xf32>
    %c130 = arith.constant 130 : index
    %c0_131 = arith.constant 0 : index
    %142 = tpu.strided_load %arg13[%c130, %c0_131] {strides = array<i32: 2, 1>} : memref<200x128xf32, #tpu.memory_space<vmem>>, vector<4x128xf32>
    %c131 = arith.constant 131 : index
    %c0_132 = arith.constant 0 : index
    %143 = tpu.strided_load %arg13[%c131, %c0_132] {strides = array<i32: 2, 1>} : memref<200x128xf32, #tpu.memory_space<vmem>>, vector<4x128xf32>
    %144 = arith.maximumf %142, %143 : vector<4x128xf32>
    %145 = arith.maximumf %141, %144 : vector<4x128xf32>
    %c90 = arith.constant 90 : index
    %c0_133 = arith.constant 0 : index
    %146 = vector.load %arg14[%c90, %c0_133] : memref<152x128xf32, #tpu.memory_space<vmem>>, vector<4x128xf32>
    tpu.vector_store %arg14[%c90, %c0_133], %145 {strides = array<i32>} : memref<152x128xf32, #tpu.memory_space<vmem>>, vector<4x128xf32>,
    %c140 = arith.constant 140 : index
    %c0_134 = arith.constant 0 : index
    %147 = tpu.strided_load %arg13[%c140, %c0_134] {strides = array<i32: 2, 1>} : memref<200x128xf32, #tpu.memory_space<vmem>>, vector<4x128xf32>
    %c141 = arith.constant 141 : index
    %c0_135 = arith.constant 0 : index
    %148 = tpu.strided_load %arg13[%c141, %c0_135] {strides = array<i32: 2, 1>} : memref<200x128xf32, #tpu.memory_space<vmem>>, vector<4x128xf32>
    %149 = arith.maximumf %147, %148 : vector<4x128xf32>
    %c150 = arith.constant 150 : index
    %c0_136 = arith.constant 0 : index
    %150 = tpu.strided_load %arg13[%c150, %c0_136] {strides = array<i32: 2, 1>} : memref<200x128xf32, #tpu.memory_space<vmem>>, vector<4x128xf32>
    %c151 = arith.constant 151 : index
    %c0_137 = arith.constant 0 : index
    %151 = tpu.strided_load %arg13[%c151, %c0_137] {strides = array<i32: 2, 1>} : memref<200x128xf32, #tpu.memory_space<vmem>>, vector<4x128xf32>
    %152 = arith.maximumf %150, %151 : vector<4x128xf32>
    %153 = arith.maximumf %149, %152 : vector<4x128xf32>
    %c98 = arith.constant 98 : index
    %c0_138 = arith.constant 0 : index
    %154 = vector.load %arg14[%c98, %c0_138] : memref<152x128xf32, #tpu.memory_space<vmem>>, vector<4x128xf32>
    tpu.vector_store %arg14[%c98, %c0_138], %153 {strides = array<i32>} : memref<152x128xf32, #tpu.memory_space<vmem>>, vector<4x128xf32>,
    %c160 = arith.constant 160 : index
    %c0_139 = arith.constant 0 : index
    %155 = tpu.strided_load %arg13[%c160, %c0_139] {strides = array<i32: 2, 1>} : memref<200x128xf32, #tpu.memory_space<vmem>>, vector<4x128xf32>
    %c161 = arith.constant 161 : index
    %c0_140 = arith.constant 0 : index
    %156 = tpu.strided_load %arg13[%c161, %c0_140] {strides = array<i32: 2, 1>} : memref<200x128xf32, #tpu.memory_space<vmem>>, vector<4x128xf32>
    %157 = arith.maximumf %155, %156 : vector<4x128xf32>
    %c170 = arith.constant 170 : index
    %c0_141 = arith.constant 0 : index
    %158 = tpu.strided_load %arg13[%c170, %c0_141] {strides = array<i32: 2, 1>} : memref<200x128xf32, #tpu.memory_space<vmem>>, vector<4x128xf32>
    %c171 = arith.constant 171 : index
    %c0_142 = arith.constant 0 : index
    %159 = tpu.strided_load %arg13[%c171, %c0_142] {strides = array<i32: 2, 1>} : memref<200x128xf32, #tpu.memory_space<vmem>>, vector<4x128xf32>
    %160 = arith.maximumf %158, %159 : vector<4x128xf32>
    %161 = arith.maximumf %157, %160 : vector<4x128xf32>
    %c106 = arith.constant 106 : index
    %c0_143 = arith.constant 0 : index
    %162 = vector.load %arg14[%c106, %c0_143] : memref<152x128xf32, #tpu.memory_space<vmem>>, vector<4x128xf32>
    tpu.vector_store %arg14[%c106, %c0_143], %161 {strides = array<i32>} : memref<152x128xf32, #tpu.memory_space<vmem>>, vector<4x128xf32>,
    %cst_144 = arith.constant 0.000000e+00 : f32
    %163 = vector.broadcast %cst_144 : f32 to vector<128x128xf32>
    %c0_145 = arith.constant 0 : index
    %c0_146 = arith.constant 0 : index
    %164 = vector.load %arg15[%c0_145, %c0_146] : memref<128x128xf32, #tpu.memory_space<vmem>>, vector<128x128xf32>
    tpu.vector_store %arg15[%c0_145, %c0_146], %163 {strides = array<i32>} : memref<128x128xf32, #tpu.memory_space<vmem>>, vector<128x128xf32>,
    %c0_147 = arith.constant 0 : index
    %c0_148 = arith.constant 0 : index
    %165 = vector.load %arg14[%c0_147, %c0_148] : memref<152x128xf32, #tpu.memory_space<vmem>>, vector<128x128xf32>
    %c0_149 = arith.constant 0 : index
    %c0_150 = arith.constant 0 : index
    %166 = vector.load %arg15[%c0_149, %c0_150] : memref<128x128xf32, #tpu.memory_space<vmem>>, vector<128x128xf32>
    %167 = vector.extract_strided_slice %165 {offsets = [0, 0], sizes = [128, 32], strides = [1, 1]} : vector<128x128xf32> to vector<128x32xf32>
    %c0_151 = arith.constant 0 : index
    %c0_152 = arith.constant 0 : index
    %c0_153 = arith.constant 0 : index
    %168 = vector.load %arg4[%c0_151, %c0_152, %c0_153] : memref<9x32x128xf32, #tpu.memory_space<vmem>>, vector<1x32x128xf32>
    %169 = vector.shape_cast %168 : vector<1x32x128xf32> to vector<32x128xf32>
    %cst_154 = arith.constant dense<0.000000e+00> : vector<128x128xf32>
    %170 = tpu.matmul %167, %169, %cst_154 {dimension_numbers = #tpu.dot_dimension_numbers<[1], [0], [0], [1], [0, 0, 1, 1], [], []>} : vector<128x32xf32>, vector<32x128xf32>, vector<128x128xf32> -> vector<128x128xf32>
    %171 = arith.addf %166, %170 : vector<128x128xf32>
    %c0_155 = arith.constant 0 : index
    %c0_156 = arith.constant 0 : index
    %172 = vector.load %arg15[%c0_155, %c0_156] : memref<128x128xf32, #tpu.memory_space<vmem>>, vector<128x128xf32>
    tpu.vector_store %arg15[%c0_155, %c0_156], %171 {strides = array<i32>} : memref<128x128xf32, #tpu.memory_space<vmem>>, vector<128x128xf32>,
    %c1_157 = arith.constant 1 : index
    %c0_158 = arith.constant 0 : index
    %173 = vector.load %arg14[%c1_157, %c0_158] : memref<152x128xf32, #tpu.memory_space<vmem>>, vector<128x128xf32>
    %c0_159 = arith.constant 0 : index
    %c0_160 = arith.constant 0 : index
    %174 = vector.load %arg15[%c0_159, %c0_160] : memref<128x128xf32, #tpu.memory_space<vmem>>, vector<128x128xf32>
    %175 = vector.extract_strided_slice %173 {offsets = [0, 0], sizes = [128, 32], strides = [1, 1]} : vector<128x128xf32> to vector<128x32xf32>
    %c1_161 = arith.constant 1 : index
    %c0_162 = arith.constant 0 : index
    %c0_163 = arith.constant 0 : index
    %176 = vector.load %arg4[%c1_161, %c0_162, %c0_163] : memref<9x32x128xf32, #tpu.memory_space<vmem>>, vector<1x32x128xf32>
    %177 = vector.shape_cast %176 : vector<1x32x128xf32> to vector<32x128xf32>
    %cst_164 = arith.constant dense<0.000000e+00> : vector<128x128xf32>
    %178 = tpu.matmul %175, %177, %cst_164 {dimension_numbers = #tpu.dot_dimension_numbers<[1], [0], [0], [1], [0, 0, 1, 1], [], []>} : vector<128x32xf32>, vector<32x128xf32>, vector<128x128xf32> -> vector<128x128xf32>
    %179 = arith.addf %174, %178 : vector<128x128xf32>
    %c0_165 = arith.constant 0 : index
    %c0_166 = arith.constant 0 : index
    %180 = vector.load %arg15[%c0_165, %c0_166] : memref<128x128xf32, #tpu.memory_space<vmem>>, vector<128x128xf32>
    tpu.vector_store %arg15[%c0_165, %c0_166], %179 {strides = array<i32>} : memref<128x128xf32, #tpu.memory_space<vmem>>, vector<128x128xf32>,
    %c2_167 = arith.constant 2 : index
    %c0_168 = arith.constant 0 : index
    %181 = vector.load %arg14[%c2_167, %c0_168] : memref<152x128xf32, #tpu.memory_space<vmem>>, vector<128x128xf32>
    %c0_169 = arith.constant 0 : index
    %c0_170 = arith.constant 0 : index
    %182 = vector.load %arg15[%c0_169, %c0_170] : memref<128x128xf32, #tpu.memory_space<vmem>>, vector<128x128xf32>
    %183 = vector.extract_strided_slice %181 {offsets = [0, 0], sizes = [128, 32], strides = [1, 1]} : vector<128x128xf32> to vector<128x32xf32>
    %c2_171 = arith.constant 2 : index
    %c0_172 = arith.constant 0 : index
    %c0_173 = arith.constant 0 : index
    %184 = vector.load %arg4[%c2_171, %c0_172, %c0_173] : memref<9x32x128xf32, #tpu.memory_space<vmem>>, vector<1x32x128xf32>
    %185 = vector.shape_cast %184 : vector<1x32x128xf32> to vector<32x128xf32>
    %cst_174 = arith.constant dense<0.000000e+00> : vector<128x128xf32>
    %186 = tpu.matmul %183, %185, %cst_174 {dimension_numbers = #tpu.dot_dimension_numbers<[1], [0], [0], [1], [0, 0, 1, 1], [], []>} : vector<128x32xf32>, vector<32x128xf32>, vector<128x128xf32> -> vector<128x128xf32>
    %187 = arith.addf %182, %186 : vector<128x128xf32>
    %c0_175 = arith.constant 0 : index
    %c0_176 = arith.constant 0 : index
    %188 = vector.load %arg15[%c0_175, %c0_176] : memref<128x128xf32, #tpu.memory_space<vmem>>, vector<128x128xf32>
    tpu.vector_store %arg15[%c0_175, %c0_176], %187 {strides = array<i32>} : memref<128x128xf32, #tpu.memory_space<vmem>>, vector<128x128xf32>,
    %c8_177 = arith.constant 8 : index
    %c0_178 = arith.constant 0 : index
    %189 = vector.load %arg14[%c8_177, %c0_178] : memref<152x128xf32, #tpu.memory_space<vmem>>, vector<128x128xf32>
    %c0_179 = arith.constant 0 : index
    %c0_180 = arith.constant 0 : index
    %190 = vector.load %arg15[%c0_179, %c0_180] : memref<128x128xf32, #tpu.memory_space<vmem>>, vector<128x128xf32>
    %191 = vector.extract_strided_slice %189 {offsets = [0, 0], sizes = [128, 32], strides = [1, 1]} : vector<128x128xf32> to vector<128x32xf32>
    %c3_181 = arith.constant 3 : index
    %c0_182 = arith.constant 0 : index
    %c0_183 = arith.constant 0 : index
    %192 = vector.load %arg4[%c3_181, %c0_182, %c0_183] : memref<9x32x128xf32, #tpu.memory_space<vmem>>, vector<1x32x128xf32>
    %193 = vector.shape_cast %192 : vector<1x32x128xf32> to vector<32x128xf32>
    %cst_184 = arith.constant dense<0.000000e+00> : vector<128x128xf32>
    %194 = tpu.matmul %191, %193, %cst_184 {dimension_numbers = #tpu.dot_dimension_numbers<[1], [0], [0], [1], [0, 0, 1, 1], [], []>} : vector<128x32xf32>, vector<32x128xf32>, vector<128x128xf32> -> vector<128x128xf32>
    %195 = arith.addf %190, %194 : vector<128x128xf32>
    %c0_185 = arith.constant 0 : index
    %c0_186 = arith.constant 0 : index
    %196 = vector.load %arg15[%c0_185, %c0_186] : memref<128x128xf32, #tpu.memory_space<vmem>>, vector<128x128xf32>
    tpu.vector_store %arg15[%c0_185, %c0_186], %195 {strides = array<i32>} : memref<128x128xf32, #tpu.memory_space<vmem>>, vector<128x128xf32>,
    %c9 = arith.constant 9 : index
    %c0_187 = arith.constant 0 : index
    %197 = vector.load %arg14[%c9, %c0_187] : memref<152x128xf32, #tpu.memory_space<vmem>>, vector<128x128xf32>
    %c0_188 = arith.constant 0 : index
    %c0_189 = arith.constant 0 : index
    %198 = vector.load %arg15[%c0_188, %c0_189] : memref<128x128xf32, #tpu.memory_space<vmem>>, vector<128x128xf32>
    %199 = vector.extract_strided_slice %197 {offsets = [0, 0], sizes = [128, 32], strides = [1, 1]} : vector<128x128xf32> to vector<128x32xf32>
    %c4_190 = arith.constant 4 : index
    %c0_191 = arith.constant 0 : index
    %c0_192 = arith.constant 0 : index
    %200 = vector.load %arg4[%c4_190, %c0_191, %c0_192] : memref<9x32x128xf32, #tpu.memory_space<vmem>>, vector<1x32x128xf32>
    %201 = vector.shape_cast %200 : vector<1x32x128xf32> to vector<32x128xf32>
    %cst_193 = arith.constant dense<0.000000e+00> : vector<128x128xf32>
    %202 = tpu.matmul %199, %201, %cst_193 {dimension_numbers = #tpu.dot_dimension_numbers<[1], [0], [0], [1], [0, 0, 1, 1], [], []>} : vector<128x32xf32>, vector<32x128xf32>, vector<128x128xf32> -> vector<128x128xf32>
    %203 = arith.addf %198, %202 : vector<128x128xf32>
    %c0_194 = arith.constant 0 : index
    %c0_195 = arith.constant 0 : index
    %204 = vector.load %arg15[%c0_194, %c0_195] : memref<128x128xf32, #tpu.memory_space<vmem>>, vector<128x128xf32>
    tpu.vector_store %arg15[%c0_194, %c0_195], %203 {strides = array<i32>} : memref<128x128xf32, #tpu.memory_space<vmem>>, vector<128x128xf32>,
    %c10_196 = arith.constant 10 : index
    %c0_197 = arith.constant 0 : index
    %205 = vector.load %arg14[%c10_196, %c0_197] : memref<152x128xf32, #tpu.memory_space<vmem>>, vector<128x128xf32>
    %c0_198 = arith.constant 0 : index
    %c0_199 = arith.constant 0 : index
    %206 = vector.load %arg15[%c0_198, %c0_199] : memref<128x128xf32, #tpu.memory_space<vmem>>, vector<128x128xf32>
    %207 = vector.extract_strided_slice %205 {offsets = [0, 0], sizes = [128, 32], strides = [1, 1]} : vector<128x128xf32> to vector<128x32xf32>
    %c5_200 = arith.constant 5 : index
    %c0_201 = arith.constant 0 : index
    %c0_202 = arith.constant 0 : index
    %208 = vector.load %arg4[%c5_200, %c0_201, %c0_202] : memref<9x32x128xf32, #tpu.memory_space<vmem>>, vector<1x32x128xf32>
    %209 = vector.shape_cast %208 : vector<1x32x128xf32> to vector<32x128xf32>
    %cst_203 = arith.constant dense<0.000000e+00> : vector<128x128xf32>
    %210 = tpu.matmul %207, %209, %cst_203 {dimension_numbers = #tpu.dot_dimension_numbers<[1], [0], [0], [1], [0, 0, 1, 1], [], []>} : vector<128x32xf32>, vector<32x128xf32>, vector<128x128xf32> -> vector<128x128xf32>
    %211 = arith.addf %206, %210 : vector<128x128xf32>
    %c0_204 = arith.constant 0 : index
    %c0_205 = arith.constant 0 : index
    %212 = vector.load %arg15[%c0_204, %c0_205] : memref<128x128xf32, #tpu.memory_space<vmem>>, vector<128x128xf32>
    tpu.vector_store %arg15[%c0_204, %c0_205], %211 {strides = array<i32>} : memref<128x128xf32, #tpu.memory_space<vmem>>, vector<128x128xf32>,
    %c16 = arith.constant 16 : index
    %c0_206 = arith.constant 0 : index
    %213 = vector.load %arg14[%c16, %c0_206] : memref<152x128xf32, #tpu.memory_space<vmem>>, vector<128x128xf32>
    %c0_207 = arith.constant 0 : index
    %c0_208 = arith.constant 0 : index
    %214 = vector.load %arg15[%c0_207, %c0_208] : memref<128x128xf32, #tpu.memory_space<vmem>>, vector<128x128xf32>
    %215 = vector.extract_strided_slice %213 {offsets = [0, 0], sizes = [128, 32], strides = [1, 1]} : vector<128x128xf32> to vector<128x32xf32>
    %c6_209 = arith.constant 6 : index
    %c0_210 = arith.constant 0 : index
    %c0_211 = arith.constant 0 : index
    %216 = vector.load %arg4[%c6_209, %c0_210, %c0_211] : memref<9x32x128xf32, #tpu.memory_space<vmem>>, vector<1x32x128xf32>
    %217 = vector.shape_cast %216 : vector<1x32x128xf32> to vector<32x128xf32>
    %cst_212 = arith.constant dense<0.000000e+00> : vector<128x128xf32>
    %218 = tpu.matmul %215, %217, %cst_212 {dimension_numbers = #tpu.dot_dimension_numbers<[1], [0], [0], [1], [0, 0, 1, 1], [], []>} : vector<128x32xf32>, vector<32x128xf32>, vector<128x128xf32> -> vector<128x128xf32>
    %219 = arith.addf %214, %218 : vector<128x128xf32>
    %c0_213 = arith.constant 0 : index
    %c0_214 = arith.constant 0 : index
    %220 = vector.load %arg15[%c0_213, %c0_214] : memref<128x128xf32, #tpu.memory_space<vmem>>, vector<128x128xf32>
    tpu.vector_store %arg15[%c0_213, %c0_214], %219 {strides = array<i32>} : memref<128x128xf32, #tpu.memory_space<vmem>>, vector<128x128xf32>,
    %c17 = arith.constant 17 : index
    %c0_215 = arith.constant 0 : index
    %221 = vector.load %arg14[%c17, %c0_215] : memref<152x128xf32, #tpu.memory_space<vmem>>, vector<128x128xf32>
    %c0_216 = arith.constant 0 : index
    %c0_217 = arith.constant 0 : index
    %222 = vector.load %arg15[%c0_216, %c0_217] : memref<128x128xf32, #tpu.memory_space<vmem>>, vector<128x128xf32>
    %223 = vector.extract_strided_slice %221 {offsets = [0, 0], sizes = [128, 32], strides = [1, 1]} : vector<128x128xf32> to vector<128x32xf32>
    %c7_218 = arith.constant 7 : index
    %c0_219 = arith.constant 0 : index
    %c0_220 = arith.constant 0 : index
    %224 = vector.load %arg4[%c7_218, %c0_219, %c0_220] : memref<9x32x128xf32, #tpu.memory_space<vmem>>, vector<1x32x128xf32>
    %225 = vector.shape_cast %224 : vector<1x32x128xf32> to vector<32x128xf32>
    %cst_221 = arith.constant dense<0.000000e+00> : vector<128x128xf32>
    %226 = tpu.matmul %223, %225, %cst_221 {dimension_numbers = #tpu.dot_dimension_numbers<[1], [0], [0], [1], [0, 0, 1, 1], [], []>} : vector<128x32xf32>, vector<32x128xf32>, vector<128x128xf32> -> vector<128x128xf32>
    %227 = arith.addf %222, %226 : vector<128x128xf32>
    %c0_222 = arith.constant 0 : index
    %c0_223 = arith.constant 0 : index
    %228 = vector.load %arg15[%c0_222, %c0_223] : memref<128x128xf32, #tpu.memory_space<vmem>>, vector<128x128xf32>
    tpu.vector_store %arg15[%c0_222, %c0_223], %227 {strides = array<i32>} : memref<128x128xf32, #tpu.memory_space<vmem>>, vector<128x128xf32>,
    %c18_224 = arith.constant 18 : index
    %c0_225 = arith.constant 0 : index
    %229 = vector.load %arg14[%c18_224, %c0_225] : memref<152x128xf32, #tpu.memory_space<vmem>>, vector<128x128xf32>
    %c0_226 = arith.constant 0 : index
    %c0_227 = arith.constant 0 : index
    %230 = vector.load %arg15[%c0_226, %c0_227] : memref<128x128xf32, #tpu.memory_space<vmem>>, vector<128x128xf32>
    %231 = vector.extract_strided_slice %229 {offsets = [0, 0], sizes = [128, 32], strides = [1, 1]} : vector<128x128xf32> to vector<128x32xf32>
    %c8_228 = arith.constant 8 : index
    %c0_229 = arith.constant 0 : index
    %c0_230 = arith.constant 0 : index
    %232 = vector.load %arg4[%c8_228, %c0_229, %c0_230] : memref<9x32x128xf32, #tpu.memory_space<vmem>>, vector<1x32x128xf32>
    %233 = vector.shape_cast %232 : vector<1x32x128xf32> to vector<32x128xf32>
    %cst_231 = arith.constant dense<0.000000e+00> : vector<128x128xf32>
    %234 = tpu.matmul %231, %233, %cst_231 {dimension_numbers = #tpu.dot_dimension_numbers<[1], [0], [0], [1], [0, 0, 1, 1], [], []>} : vector<128x32xf32>, vector<32x128xf32>, vector<128x128xf32> -> vector<128x128xf32>
    %235 = arith.addf %230, %234 : vector<128x128xf32>
    %c0_232 = arith.constant 0 : index
    %c0_233 = arith.constant 0 : index
    %236 = vector.load %arg15[%c0_232, %c0_233] : memref<128x128xf32, #tpu.memory_space<vmem>>, vector<128x128xf32>
    tpu.vector_store %arg15[%c0_232, %c0_233], %235 {strides = array<i32>} : memref<128x128xf32, #tpu.memory_space<vmem>>, vector<128x128xf32>,
    %c0_234 = arith.constant 0 : index
    %c0_235 = arith.constant 0 : index
    %237 = vector.load %arg15[%c0_234, %c0_235] : memref<128x128xf32, #tpu.memory_space<vmem>>, vector<128x128xf32>
    %c0_236 = arith.constant 0 : index
    %c0_237 = arith.constant 0 : index
    %238 = vector.load %arg6[%c0_236, %c0_237] : memref<128x1xf32, #tpu.memory_space<vmem>>, vector<128x1xf32>
    %239 = vector.broadcast %238 : vector<128x1xf32> to vector<128x128xf32>
    %240 = arith.mulf %237, %239 : vector<128x128xf32>
    %cst_238 = arith.constant dense<0.000000e+00> : vector<128xf32>
    %241 = vector.multi_reduction <add>, %240, %cst_238 [0] : vector<128x128xf32> to vector<128xf32>
    %242 = vector.shape_cast %241 : vector<128xf32> to vector<1x128xf32>
    %cst_239 = arith.constant 0.013888889 : f32
    %243 = vector.broadcast %cst_239 : f32 to vector<1x128xf32>
    %244 = arith.mulf %242, %243 : vector<1x128xf32>
    %245 = vector.broadcast %244 : vector<1x128xf32> to vector<128x128xf32>
    %246 = arith.subf %237, %245 : vector<128x128xf32>
    %247 = arith.mulf %246, %246 : vector<128x128xf32>
    %248 = vector.broadcast %238 : vector<128x1xf32> to vector<128x128xf32>
    %249 = arith.mulf %247, %248 : vector<128x128xf32>
    %cst_240 = arith.constant dense<0.000000e+00> : vector<128xf32>
    %250 = vector.multi_reduction <add>, %249, %cst_240 [0] : vector<128x128xf32> to vector<128xf32>
    %251 = vector.shape_cast %250 : vector<128xf32> to vector<1x128xf32>
    %cst_241 = arith.constant 0.013888889 : f32
    %252 = vector.broadcast %cst_241 : f32 to vector<1x128xf32>
    %253 = arith.mulf %251, %252 : vector<1x128xf32>
    %cst_242 = arith.constant 9.99999974E-6 : f32
    %254 = vector.broadcast %cst_242 : f32 to vector<1x128xf32>
    %255 = arith.addf %253, %254 : vector<1x128xf32>
    %256 = math.rsqrt %255 : vector<1x128xf32>
    %257 = vector.broadcast %256 : vector<1x128xf32> to vector<128x128xf32>
    %258 = arith.mulf %246, %257 : vector<128x128xf32>
    %c0_243 = arith.constant 0 : index
    %c0_244 = arith.constant 0 : index
    %259 = vector.load %arg5[%c0_243, %c0_244] : memref<2x128xf32, #tpu.memory_space<vmem>>, vector<1x128xf32>
    %260 = vector.broadcast %259 : vector<1x128xf32> to vector<128x128xf32>
    %261 = arith.mulf %258, %260 : vector<128x128xf32>
    %c1_245 = arith.constant 1 : index
    %c0_246 = arith.constant 0 : index
    %262 = vector.load %arg5[%c1_245, %c0_246] : memref<2x128xf32, #tpu.memory_space<vmem>>, vector<1x128xf32>
    %263 = vector.broadcast %262 : vector<1x128xf32> to vector<128x128xf32>
    %264 = arith.addf %261, %263 : vector<128x128xf32>
    %265 = math.tanh %264 : vector<128x128xf32>
    %c0_247 = arith.constant 0 : index
    %c0_248 = arith.constant 0 : index
    %266 = vector.load %arg15[%c0_247, %c0_248] : memref<128x128xf32, #tpu.memory_space<vmem>>, vector<128x128xf32>
    tpu.vector_store %arg15[%c0_247, %c0_248], %265 {strides = array<i32>} : memref<128x128xf32, #tpu.memory_space<vmem>>, vector<128x128xf32>,
    %c0_249 = arith.constant 0 : index
    %c0_250 = arith.constant 0 : index
    %267 = tpu.strided_load %arg15[%c0_249, %c0_250] {strides = array<i32: 2, 1>} : memref<128x128xf32, #tpu.memory_space<vmem>>, vector<3x128xf32>
    %c1_251 = arith.constant 1 : index
    %c0_252 = arith.constant 0 : index
    %268 = tpu.strided_load %arg15[%c1_251, %c0_252] {strides = array<i32: 2, 1>} : memref<128x128xf32, #tpu.memory_space<vmem>>, vector<3x128xf32>
    %269 = arith.maximumf %267, %268 : vector<3x128xf32>
    %c8_253 = arith.constant 8 : index
    %c0_254 = arith.constant 0 : index
    %270 = tpu.strided_load %arg15[%c8_253, %c0_254] {strides = array<i32: 2, 1>} : memref<128x128xf32, #tpu.memory_space<vmem>>, vector<3x128xf32>
    %c9_255 = arith.constant 9 : index
    %c0_256 = arith.constant 0 : index
    %271 = tpu.strided_load %arg15[%c9_255, %c0_256] {strides = array<i32: 2, 1>} : memref<128x128xf32, #tpu.memory_space<vmem>>, vector<3x128xf32>
    %272 = arith.maximumf %270, %271 : vector<3x128xf32>
    %273 = arith.maximumf %269, %272 : vector<3x128xf32>
    %c16_257 = arith.constant 16 : index
    %c0_258 = arith.constant 0 : index
    %274 = vector.load %arg16[%c16_257, %c0_258] : memref<120x128xf32, #tpu.memory_space<vmem>>, vector<3x128xf32>
    tpu.vector_store %arg16[%c16_257, %c0_258], %273 {strides = array<i32>} : memref<120x128xf32, #tpu.memory_space<vmem>>, vector<3x128xf32>,
    %c16_259 = arith.constant 16 : index
    %c0_260 = arith.constant 0 : index
    %275 = tpu.strided_load %arg15[%c16_259, %c0_260] {strides = array<i32: 2, 1>} : memref<128x128xf32, #tpu.memory_space<vmem>>, vector<3x128xf32>
    %c17_261 = arith.constant 17 : index
    %c0_262 = arith.constant 0 : index
    %276 = tpu.strided_load %arg15[%c17_261, %c0_262] {strides = array<i32: 2, 1>} : memref<128x128xf32, #tpu.memory_space<vmem>>, vector<3x128xf32>
    %277 = arith.maximumf %275, %276 : vector<3x128xf32>
    %c24 = arith.constant 24 : index
    %c0_263 = arith.constant 0 : index
    %278 = tpu.strided_load %arg15[%c24, %c0_263] {strides = array<i32: 2, 1>} : memref<128x128xf32, #tpu.memory_space<vmem>>, vector<3x128xf32>
    %c25 = arith.constant 25 : index
    %c0_264 = arith.constant 0 : index
    %279 = tpu.strided_load %arg15[%c25, %c0_264] {strides = array<i32: 2, 1>} : memref<128x128xf32, #tpu.memory_space<vmem>>, vector<3x128xf32>
    %280 = arith.maximumf %278, %279 : vector<3x128xf32>
    %281 = arith.maximumf %277, %280 : vector<3x128xf32>
    %c23 = arith.constant 23 : index
    %c0_265 = arith.constant 0 : index
    %282 = vector.load %arg16[%c23, %c0_265] : memref<120x128xf32, #tpu.memory_space<vmem>>, vector<3x128xf32>
    tpu.vector_store %arg16[%c23, %c0_265], %281 {strides = array<i32>} : memref<120x128xf32, #tpu.memory_space<vmem>>, vector<3x128xf32>,
    %c32 = arith.constant 32 : index
    %c0_266 = arith.constant 0 : index
    %283 = tpu.strided_load %arg15[%c32, %c0_266] {strides = array<i32: 2, 1>} : memref<128x128xf32, #tpu.memory_space<vmem>>, vector<3x128xf32>
    %c33 = arith.constant 33 : index
    %c0_267 = arith.constant 0 : index
    %284 = tpu.strided_load %arg15[%c33, %c0_267] {strides = array<i32: 2, 1>} : memref<128x128xf32, #tpu.memory_space<vmem>>, vector<3x128xf32>
    %285 = arith.maximumf %283, %284 : vector<3x128xf32>
    %c40_268 = arith.constant 40 : index
    %c0_269 = arith.constant 0 : index
    %286 = tpu.strided_load %arg15[%c40_268, %c0_269] {strides = array<i32: 2, 1>} : memref<128x128xf32, #tpu.memory_space<vmem>>, vector<3x128xf32>
    %c41_270 = arith.constant 41 : index
    %c0_271 = arith.constant 0 : index
    %287 = tpu.strided_load %arg15[%c41_270, %c0_271] {strides = array<i32: 2, 1>} : memref<128x128xf32, #tpu.memory_space<vmem>>, vector<3x128xf32>
    %288 = arith.maximumf %286, %287 : vector<3x128xf32>
    %289 = arith.maximumf %285, %288 : vector<3x128xf32>
    %c30_272 = arith.constant 30 : index
    %c0_273 = arith.constant 0 : index
    %290 = vector.load %arg16[%c30_272, %c0_273] : memref<120x128xf32, #tpu.memory_space<vmem>>, vector<3x128xf32>
    tpu.vector_store %arg16[%c30_272, %c0_273], %289 {strides = array<i32>} : memref<120x128xf32, #tpu.memory_space<vmem>>, vector<3x128xf32>,
    %c64 = arith.constant 64 : index
    %c0_274 = arith.constant 0 : index
    %291 = tpu.strided_load %arg15[%c64, %c0_274] {strides = array<i32: 2, 1>} : memref<128x128xf32, #tpu.memory_space<vmem>>, vector<3x128xf32>
    %c65 = arith.constant 65 : index
    %c0_275 = arith.constant 0 : index
    %292 = tpu.strided_load %arg15[%c65, %c0_275] {strides = array<i32: 2, 1>} : memref<128x128xf32, #tpu.memory_space<vmem>>, vector<3x128xf32>
    %293 = arith.maximumf %291, %292 : vector<3x128xf32>
    %c72 = arith.constant 72 : index
    %c0_276 = arith.constant 0 : index
    %294 = tpu.strided_load %arg15[%c72, %c0_276] {strides = array<i32: 2, 1>} : memref<128x128xf32, #tpu.memory_space<vmem>>, vector<3x128xf32>
    %c73 = arith.constant 73 : index
    %c0_277 = arith.constant 0 : index
    %295 = tpu.strided_load %arg15[%c73, %c0_277] {strides = array<i32: 2, 1>} : memref<128x128xf32, #tpu.memory_space<vmem>>, vector<3x128xf32>
    %296 = arith.maximumf %294, %295 : vector<3x128xf32>
    %297 = arith.maximumf %293, %296 : vector<3x128xf32>
    %c65_278 = arith.constant 65 : index
    %c0_279 = arith.constant 0 : index
    %298 = vector.load %arg16[%c65_278, %c0_279] : memref<120x128xf32, #tpu.memory_space<vmem>>, vector<3x128xf32>
    tpu.vector_store %arg16[%c65_278, %c0_279], %297 {strides = array<i32>} : memref<120x128xf32, #tpu.memory_space<vmem>>, vector<3x128xf32>,
    %c80 = arith.constant 80 : index
    %c0_280 = arith.constant 0 : index
    %299 = tpu.strided_load %arg15[%c80, %c0_280] {strides = array<i32: 2, 1>} : memref<128x128xf32, #tpu.memory_space<vmem>>, vector<3x128xf32>
    %c81 = arith.constant 81 : index
    %c0_281 = arith.constant 0 : index
    %300 = tpu.strided_load %arg15[%c81, %c0_281] {strides = array<i32: 2, 1>} : memref<128x128xf32, #tpu.memory_space<vmem>>, vector<3x128xf32>
    %301 = arith.maximumf %299, %300 : vector<3x128xf32>
    %c88 = arith.constant 88 : index
    %c0_282 = arith.constant 0 : index
    %302 = tpu.strided_load %arg15[%c88, %c0_282] {strides = array<i32: 2, 1>} : memref<128x128xf32, #tpu.memory_space<vmem>>, vector<3x128xf32>
    %c89 = arith.constant 89 : index
    %c0_283 = arith.constant 0 : index
    %303 = tpu.strided_load %arg15[%c89, %c0_283] {strides = array<i32: 2, 1>} : memref<128x128xf32, #tpu.memory_space<vmem>>, vector<3x128xf32>
    %304 = arith.maximumf %302, %303 : vector<3x128xf32>
    %305 = arith.maximumf %301, %304 : vector<3x128xf32>
    %c72_284 = arith.constant 72 : index
    %c0_285 = arith.constant 0 : index
    %306 = vector.load %arg16[%c72_284, %c0_285] : memref<120x128xf32, #tpu.memory_space<vmem>>, vector<3x128xf32>
    tpu.vector_store %arg16[%c72_284, %c0_285], %305 {strides = array<i32>} : memref<120x128xf32, #tpu.memory_space<vmem>>, vector<3x128xf32>,
    %c96 = arith.constant 96 : index
    %c0_286 = arith.constant 0 : index
    %307 = tpu.strided_load %arg15[%c96, %c0_286] {strides = array<i32: 2, 1>} : memref<128x128xf32, #tpu.memory_space<vmem>>, vector<3x128xf32>
    %c97 = arith.constant 97 : index
    %c0_287 = arith.constant 0 : index
    %308 = tpu.strided_load %arg15[%c97, %c0_287] {strides = array<i32: 2, 1>} : memref<128x128xf32, #tpu.memory_space<vmem>>, vector<3x128xf32>
    %309 = arith.maximumf %307, %308 : vector<3x128xf32>
    %c104 = arith.constant 104 : index
    %c0_288 = arith.constant 0 : index
    %310 = tpu.strided_load %arg15[%c104, %c0_288] {strides = array<i32: 2, 1>} : memref<128x128xf32, #tpu.memory_space<vmem>>, vector<3x128xf32>
    %c105 = arith.constant 105 : index
    %c0_289 = arith.constant 0 : index
    %311 = tpu.strided_load %arg15[%c105, %c0_289] {strides = array<i32: 2, 1>} : memref<128x128xf32, #tpu.memory_space<vmem>>, vector<3x128xf32>
    %312 = arith.maximumf %310, %311 : vector<3x128xf32>
    %313 = arith.maximumf %309, %312 : vector<3x128xf32>
    %c79 = arith.constant 79 : index
    %c0_290 = arith.constant 0 : index
    %314 = vector.load %arg16[%c79, %c0_290] : memref<120x128xf32, #tpu.memory_space<vmem>>, vector<3x128xf32>
    tpu.vector_store %arg16[%c79, %c0_290], %313 {strides = array<i32>} : memref<120x128xf32, #tpu.memory_space<vmem>>, vector<3x128xf32>,
    %cst_291 = arith.constant 0.000000e+00 : f32
    %315 = vector.broadcast %cst_291 : f32 to vector<104x128xf32>
    %c0_292 = arith.constant 0 : index
    %c0_293 = arith.constant 0 : index
    %316 = vector.load %arg17[%c0_292, %c0_293] : memref<104x128xf32, #tpu.memory_space<vmem>>, vector<104x128xf32>
    tpu.vector_store %arg17[%c0_292, %c0_293], %315 {strides = array<i32>} : memref<104x128xf32, #tpu.memory_space<vmem>>, vector<104x128xf32>,
    %c0_294 = arith.constant 0 : index
    %c0_295 = arith.constant 0 : index
    %317 = vector.load %arg16[%c0_294, %c0_295] : memref<120x128xf32, #tpu.memory_space<vmem>>, vector<104x128xf32>
    %c0_296 = arith.constant 0 : index
    %c0_297 = arith.constant 0 : index
    %318 = vector.load %arg17[%c0_296, %c0_297] : memref<104x128xf32, #tpu.memory_space<vmem>>, vector<104x128xf32>
    %319 = vector.extract_strided_slice %317 {offsets = [0, 0], sizes = [104, 32], strides = [1, 1]} : vector<104x128xf32> to vector<104x32xf32>
    %c0_298 = arith.constant 0 : index
    %c0_299 = arith.constant 0 : index
    %c0_300 = arith.constant 0 : index
    %320 = vector.load %arg7[%c0_298, %c0_299, %c0_300] : memref<9x32x128xf32, #tpu.memory_space<vmem>>, vector<1x32x128xf32>
    %321 = vector.shape_cast %320 : vector<1x32x128xf32> to vector<32x128xf32>
    %cst_301 = arith.constant dense<0.000000e+00> : vector<104x128xf32>
    %322 = tpu.matmul %319, %321, %cst_301 {dimension_numbers = #tpu.dot_dimension_numbers<[1], [0], [0], [1], [0, 0, 1, 1], [], []>} : vector<104x32xf32>, vector<32x128xf32>, vector<104x128xf32> -> vector<104x128xf32>
    %323 = arith.addf %318, %322 : vector<104x128xf32>
    %c0_302 = arith.constant 0 : index
    %c0_303 = arith.constant 0 : index
    %324 = vector.load %arg17[%c0_302, %c0_303] : memref<104x128xf32, #tpu.memory_space<vmem>>, vector<104x128xf32>
    tpu.vector_store %arg17[%c0_302, %c0_303], %323 {strides = array<i32>} : memref<104x128xf32, #tpu.memory_space<vmem>>, vector<104x128xf32>,
    %c1_304 = arith.constant 1 : index
    %c0_305 = arith.constant 0 : index
    %325 = vector.load %arg16[%c1_304, %c0_305] : memref<120x128xf32, #tpu.memory_space<vmem>>, vector<104x128xf32>
    %c0_306 = arith.constant 0 : index
    %c0_307 = arith.constant 0 : index
    %326 = vector.load %arg17[%c0_306, %c0_307] : memref<104x128xf32, #tpu.memory_space<vmem>>, vector<104x128xf32>
    %327 = vector.extract_strided_slice %325 {offsets = [0, 0], sizes = [104, 32], strides = [1, 1]} : vector<104x128xf32> to vector<104x32xf32>
    %c1_308 = arith.constant 1 : index
    %c0_309 = arith.constant 0 : index
    %c0_310 = arith.constant 0 : index
    %328 = vector.load %arg7[%c1_308, %c0_309, %c0_310] : memref<9x32x128xf32, #tpu.memory_space<vmem>>, vector<1x32x128xf32>
    %329 = vector.shape_cast %328 : vector<1x32x128xf32> to vector<32x128xf32>
    %cst_311 = arith.constant dense<0.000000e+00> : vector<104x128xf32>
    %330 = tpu.matmul %327, %329, %cst_311 {dimension_numbers = #tpu.dot_dimension_numbers<[1], [0], [0], [1], [0, 0, 1, 1], [], []>} : vector<104x32xf32>, vector<32x128xf32>, vector<104x128xf32> -> vector<104x128xf32>
    %331 = arith.addf %326, %330 : vector<104x128xf32>
    %c0_312 = arith.constant 0 : index
    %c0_313 = arith.constant 0 : index
    %332 = vector.load %arg17[%c0_312, %c0_313] : memref<104x128xf32, #tpu.memory_space<vmem>>, vector<104x128xf32>
    tpu.vector_store %arg17[%c0_312, %c0_313], %331 {strides = array<i32>} : memref<104x128xf32, #tpu.memory_space<vmem>>, vector<104x128xf32>,
    %c2_314 = arith.constant 2 : index
    %c0_315 = arith.constant 0 : index
    %333 = vector.load %arg16[%c2_314, %c0_315] : memref<120x128xf32, #tpu.memory_space<vmem>>, vector<104x128xf32>
    %c0_316 = arith.constant 0 : index
    %c0_317 = arith.constant 0 : index
    %334 = vector.load %arg17[%c0_316, %c0_317] : memref<104x128xf32, #tpu.memory_space<vmem>>, vector<104x128xf32>
    %335 = vector.extract_strided_slice %333 {offsets = [0, 0], sizes = [104, 32], strides = [1, 1]} : vector<104x128xf32> to vector<104x32xf32>
    %c2_318 = arith.constant 2 : index
    %c0_319 = arith.constant 0 : index
    %c0_320 = arith.constant 0 : index
    %336 = vector.load %arg7[%c2_318, %c0_319, %c0_320] : memref<9x32x128xf32, #tpu.memory_space<vmem>>, vector<1x32x128xf32>
    %337 = vector.shape_cast %336 : vector<1x32x128xf32> to vector<32x128xf32>
    %cst_321 = arith.constant dense<0.000000e+00> : vector<104x128xf32>
    %338 = tpu.matmul %335, %337, %cst_321 {dimension_numbers = #tpu.dot_dimension_numbers<[1], [0], [0], [1], [0, 0, 1, 1], [], []>} : vector<104x32xf32>, vector<32x128xf32>, vector<104x128xf32> -> vector<104x128xf32>
    %339 = arith.addf %334, %338 : vector<104x128xf32>
    %c0_322 = arith.constant 0 : index
    %c0_323 = arith.constant 0 : index
    %340 = vector.load %arg17[%c0_322, %c0_323] : memref<104x128xf32, #tpu.memory_space<vmem>>, vector<104x128xf32>
    tpu.vector_store %arg17[%c0_322, %c0_323], %339 {strides = array<i32>} : memref<104x128xf32, #tpu.memory_space<vmem>>, vector<104x128xf32>,
    %c7_324 = arith.constant 7 : index
    %c0_325 = arith.constant 0 : index
    %341 = vector.load %arg16[%c7_324, %c0_325] : memref<120x128xf32, #tpu.memory_space<vmem>>, vector<104x128xf32>
    %c0_326 = arith.constant 0 : index
    %c0_327 = arith.constant 0 : index
    %342 = vector.load %arg17[%c0_326, %c0_327] : memref<104x128xf32, #tpu.memory_space<vmem>>, vector<104x128xf32>
    %343 = vector.extract_strided_slice %341 {offsets = [0, 0], sizes = [104, 32], strides = [1, 1]} : vector<104x128xf32> to vector<104x32xf32>
    %c3_328 = arith.constant 3 : index
    %c0_329 = arith.constant 0 : index
    %c0_330 = arith.constant 0 : index
    %344 = vector.load %arg7[%c3_328, %c0_329, %c0_330] : memref<9x32x128xf32, #tpu.memory_space<vmem>>, vector<1x32x128xf32>
    %345 = vector.shape_cast %344 : vector<1x32x128xf32> to vector<32x128xf32>
    %cst_331 = arith.constant dense<0.000000e+00> : vector<104x128xf32>
    %346 = tpu.matmul %343, %345, %cst_331 {dimension_numbers = #tpu.dot_dimension_numbers<[1], [0], [0], [1], [0, 0, 1, 1], [], []>} : vector<104x32xf32>, vector<32x128xf32>, vector<104x128xf32> -> vector<104x128xf32>
    %347 = arith.addf %342, %346 : vector<104x128xf32>
    %c0_332 = arith.constant 0 : index
    %c0_333 = arith.constant 0 : index
    %348 = vector.load %arg17[%c0_332, %c0_333] : memref<104x128xf32, #tpu.memory_space<vmem>>, vector<104x128xf32>
    tpu.vector_store %arg17[%c0_332, %c0_333], %347 {strides = array<i32>} : memref<104x128xf32, #tpu.memory_space<vmem>>, vector<104x128xf32>,
    %c8_334 = arith.constant 8 : index
    %c0_335 = arith.constant 0 : index
    %349 = vector.load %arg16[%c8_334, %c0_335] : memref<120x128xf32, #tpu.memory_space<vmem>>, vector<104x128xf32>
    %c0_336 = arith.constant 0 : index
    %c0_337 = arith.constant 0 : index
    %350 = vector.load %arg17[%c0_336, %c0_337] : memref<104x128xf32, #tpu.memory_space<vmem>>, vector<104x128xf32>
    %351 = vector.extract_strided_slice %349 {offsets = [0, 0], sizes = [104, 32], strides = [1, 1]} : vector<104x128xf32> to vector<104x32xf32>
    %c4_338 = arith.constant 4 : index
    %c0_339 = arith.constant 0 : index
    %c0_340 = arith.constant 0 : index
    %352 = vector.load %arg7[%c4_338, %c0_339, %c0_340] : memref<9x32x128xf32, #tpu.memory_space<vmem>>, vector<1x32x128xf32>
    %353 = vector.shape_cast %352 : vector<1x32x128xf32> to vector<32x128xf32>
    %cst_341 = arith.constant dense<0.000000e+00> : vector<104x128xf32>
    %354 = tpu.matmul %351, %353, %cst_341 {dimension_numbers = #tpu.dot_dimension_numbers<[1], [0], [0], [1], [0, 0, 1, 1], [], []>} : vector<104x32xf32>, vector<32x128xf32>, vector<104x128xf32> -> vector<104x128xf32>
    %355 = arith.addf %350, %354 : vector<104x128xf32>
    %c0_342 = arith.constant 0 : index
    %c0_343 = arith.constant 0 : index
    %356 = vector.load %arg17[%c0_342, %c0_343] : memref<104x128xf32, #tpu.memory_space<vmem>>, vector<104x128xf32>
    tpu.vector_store %arg17[%c0_342, %c0_343], %355 {strides = array<i32>} : memref<104x128xf32, #tpu.memory_space<vmem>>, vector<104x128xf32>,
    %c9_344 = arith.constant 9 : index
    %c0_345 = arith.constant 0 : index
    %357 = vector.load %arg16[%c9_344, %c0_345] : memref<120x128xf32, #tpu.memory_space<vmem>>, vector<104x128xf32>
    %c0_346 = arith.constant 0 : index
    %c0_347 = arith.constant 0 : index
    %358 = vector.load %arg17[%c0_346, %c0_347] : memref<104x128xf32, #tpu.memory_space<vmem>>, vector<104x128xf32>
    %359 = vector.extract_strided_slice %357 {offsets = [0, 0], sizes = [104, 32], strides = [1, 1]} : vector<104x128xf32> to vector<104x32xf32>
    %c5_348 = arith.constant 5 : index
    %c0_349 = arith.constant 0 : index
    %c0_350 = arith.constant 0 : index
    %360 = vector.load %arg7[%c5_348, %c0_349, %c0_350] : memref<9x32x128xf32, #tpu.memory_space<vmem>>, vector<1x32x128xf32>
    %361 = vector.shape_cast %360 : vector<1x32x128xf32> to vector<32x128xf32>
    %cst_351 = arith.constant dense<0.000000e+00> : vector<104x128xf32>
    %362 = tpu.matmul %359, %361, %cst_351 {dimension_numbers = #tpu.dot_dimension_numbers<[1], [0], [0], [1], [0, 0, 1, 1], [], []>} : vector<104x32xf32>, vector<32x128xf32>, vector<104x128xf32> -> vector<104x128xf32>
    %363 = arith.addf %358, %362 : vector<104x128xf32>
    %c0_352 = arith.constant 0 : index
    %c0_353 = arith.constant 0 : index
    %364 = vector.load %arg17[%c0_352, %c0_353] : memref<104x128xf32, #tpu.memory_space<vmem>>, vector<104x128xf32>
    tpu.vector_store %arg17[%c0_352, %c0_353], %363 {strides = array<i32>} : memref<104x128xf32, #tpu.memory_space<vmem>>, vector<104x128xf32>,
    %c14 = arith.constant 14 : index
    %c0_354 = arith.constant 0 : index
    %365 = vector.load %arg16[%c14, %c0_354] : memref<120x128xf32, #tpu.memory_space<vmem>>, vector<104x128xf32>
    %c0_355 = arith.constant 0 : index
    %c0_356 = arith.constant 0 : index
    %366 = vector.load %arg17[%c0_355, %c0_356] : memref<104x128xf32, #tpu.memory_space<vmem>>, vector<104x128xf32>
    %367 = vector.extract_strided_slice %365 {offsets = [0, 0], sizes = [104, 32], strides = [1, 1]} : vector<104x128xf32> to vector<104x32xf32>
    %c6_357 = arith.constant 6 : index
    %c0_358 = arith.constant 0 : index
    %c0_359 = arith.constant 0 : index
    %368 = vector.load %arg7[%c6_357, %c0_358, %c0_359] : memref<9x32x128xf32, #tpu.memory_space<vmem>>, vector<1x32x128xf32>
    %369 = vector.shape_cast %368 : vector<1x32x128xf32> to vector<32x128xf32>
    %cst_360 = arith.constant dense<0.000000e+00> : vector<104x128xf32>
    %370 = tpu.matmul %367, %369, %cst_360 {dimension_numbers = #tpu.dot_dimension_numbers<[1], [0], [0], [1], [0, 0, 1, 1], [], []>} : vector<104x32xf32>, vector<32x128xf32>, vector<104x128xf32> -> vector<104x128xf32>
    %371 = arith.addf %366, %370 : vector<104x128xf32>
    %c0_361 = arith.constant 0 : index
    %c0_362 = arith.constant 0 : index
    %372 = vector.load %arg17[%c0_361, %c0_362] : memref<104x128xf32, #tpu.memory_space<vmem>>, vector<104x128xf32>
    tpu.vector_store %arg17[%c0_361, %c0_362], %371 {strides = array<i32>} : memref<104x128xf32, #tpu.memory_space<vmem>>, vector<104x128xf32>,
    %c15 = arith.constant 15 : index
    %c0_363 = arith.constant 0 : index
    %373 = vector.load %arg16[%c15, %c0_363] : memref<120x128xf32, #tpu.memory_space<vmem>>, vector<104x128xf32>
    %c0_364 = arith.constant 0 : index
    %c0_365 = arith.constant 0 : index
    %374 = vector.load %arg17[%c0_364, %c0_365] : memref<104x128xf32, #tpu.memory_space<vmem>>, vector<104x128xf32>
    %375 = vector.extract_strided_slice %373 {offsets = [0, 0], sizes = [104, 32], strides = [1, 1]} : vector<104x128xf32> to vector<104x32xf32>
    %c7_366 = arith.constant 7 : index
    %c0_367 = arith.constant 0 : index
    %c0_368 = arith.constant 0 : index
    %376 = vector.load %arg7[%c7_366, %c0_367, %c0_368] : memref<9x32x128xf32, #tpu.memory_space<vmem>>, vector<1x32x128xf32>
    %377 = vector.shape_cast %376 : vector<1x32x128xf32> to vector<32x128xf32>
    %cst_369 = arith.constant dense<0.000000e+00> : vector<104x128xf32>
    %378 = tpu.matmul %375, %377, %cst_369 {dimension_numbers = #tpu.dot_dimension_numbers<[1], [0], [0], [1], [0, 0, 1, 1], [], []>} : vector<104x32xf32>, vector<32x128xf32>, vector<104x128xf32> -> vector<104x128xf32>
    %379 = arith.addf %374, %378 : vector<104x128xf32>
    %c0_370 = arith.constant 0 : index
    %c0_371 = arith.constant 0 : index
    %380 = vector.load %arg17[%c0_370, %c0_371] : memref<104x128xf32, #tpu.memory_space<vmem>>, vector<104x128xf32>
    tpu.vector_store %arg17[%c0_370, %c0_371], %379 {strides = array<i32>} : memref<104x128xf32, #tpu.memory_space<vmem>>, vector<104x128xf32>,
    %c16_372 = arith.constant 16 : index
    %c0_373 = arith.constant 0 : index
    %381 = vector.load %arg16[%c16_372, %c0_373] : memref<120x128xf32, #tpu.memory_space<vmem>>, vector<104x128xf32>
    %c0_374 = arith.constant 0 : index
    %c0_375 = arith.constant 0 : index
    %382 = vector.load %arg17[%c0_374, %c0_375] : memref<104x128xf32, #tpu.memory_space<vmem>>, vector<104x128xf32>
    %383 = vector.extract_strided_slice %381 {offsets = [0, 0], sizes = [104, 32], strides = [1, 1]} : vector<104x128xf32> to vector<104x32xf32>
    %c8_376 = arith.constant 8 : index
    %c0_377 = arith.constant 0 : index
    %c0_378 = arith.constant 0 : index
    %384 = vector.load %arg7[%c8_376, %c0_377, %c0_378] : memref<9x32x128xf32, #tpu.memory_space<vmem>>, vector<1x32x128xf32>
    %385 = vector.shape_cast %384 : vector<1x32x128xf32> to vector<32x128xf32>
    %cst_379 = arith.constant dense<0.000000e+00> : vector<104x128xf32>
    %386 = tpu.matmul %383, %385, %cst_379 {dimension_numbers = #tpu.dot_dimension_numbers<[1], [0], [0], [1], [0, 0, 1, 1], [], []>} : vector<104x32xf32>, vector<32x128xf32>, vector<104x128xf32> -> vector<104x128xf32>
    %387 = arith.addf %382, %386 : vector<104x128xf32>
    %c0_380 = arith.constant 0 : index
    %c0_381 = arith.constant 0 : index
    %388 = vector.load %arg17[%c0_380, %c0_381] : memref<104x128xf32, #tpu.memory_space<vmem>>, vector<104x128xf32>
    tpu.vector_store %arg17[%c0_380, %c0_381], %387 {strides = array<i32>} : memref<104x128xf32, #tpu.memory_space<vmem>>, vector<104x128xf32>,
    %c0_382 = arith.constant 0 : index
    %c0_383 = arith.constant 0 : index
    %389 = vector.load %arg17[%c0_382, %c0_383] : memref<104x128xf32, #tpu.memory_space<vmem>>, vector<104x128xf32>
    %c0_384 = arith.constant 0 : index
    %c0_385 = arith.constant 0 : index
    %390 = vector.load %arg9[%c0_384, %c0_385] : memref<104x1xf32, #tpu.memory_space<vmem>>, vector<104x1xf32>
    %391 = vector.broadcast %390 : vector<104x1xf32> to vector<104x128xf32>
    %392 = arith.mulf %389, %391 : vector<104x128xf32>
    %cst_386 = arith.constant dense<0.000000e+00> : vector<128xf32>
    %393 = vector.multi_reduction <add>, %392, %cst_386 [0] : vector<104x128xf32> to vector<128xf32>
    %394 = vector.shape_cast %393 : vector<128xf32> to vector<1x128xf32>
    %cst_387 = arith.constant 2.000000e-02 : f32
    %395 = vector.broadcast %cst_387 : f32 to vector<1x128xf32>
    %396 = arith.mulf %394, %395 : vector<1x128xf32>
    %397 = vector.broadcast %396 : vector<1x128xf32> to vector<104x128xf32>
    %398 = arith.subf %389, %397 : vector<104x128xf32>
    %399 = arith.mulf %398, %398 : vector<104x128xf32>
    %400 = vector.broadcast %390 : vector<104x1xf32> to vector<104x128xf32>
    %401 = arith.mulf %399, %400 : vector<104x128xf32>
    %cst_388 = arith.constant dense<0.000000e+00> : vector<128xf32>
    %402 = vector.multi_reduction <add>, %401, %cst_388 [0] : vector<104x128xf32> to vector<128xf32>
    %403 = vector.shape_cast %402 : vector<128xf32> to vector<1x128xf32>
    %cst_389 = arith.constant 2.000000e-02 : f32
    %404 = vector.broadcast %cst_389 : f32 to vector<1x128xf32>
    %405 = arith.mulf %403, %404 : vector<1x128xf32>
    %cst_390 = arith.constant 9.99999974E-6 : f32
    %406 = vector.broadcast %cst_390 : f32 to vector<1x128xf32>
    %407 = arith.addf %405, %406 : vector<1x128xf32>
    %408 = math.rsqrt %407 : vector<1x128xf32>
    %409 = vector.broadcast %408 : vector<1x128xf32> to vector<104x128xf32>
    %410 = arith.mulf %398, %409 : vector<104x128xf32>
    %c0_391 = arith.constant 0 : index
    %c0_392 = arith.constant 0 : index
    %411 = vector.load %arg8[%c0_391, %c0_392] : memref<2x128xf32, #tpu.memory_space<vmem>>, vector<1x128xf32>
    %412 = vector.broadcast %411 : vector<1x128xf32> to vector<104x128xf32>
    %413 = arith.mulf %410, %412 : vector<104x128xf32>
    %c1_393 = arith.constant 1 : index
    %c0_394 = arith.constant 0 : index
    %414 = vector.load %arg8[%c1_393, %c0_394] : memref<2x128xf32, #tpu.memory_space<vmem>>, vector<1x128xf32>
    %415 = vector.broadcast %414 : vector<1x128xf32> to vector<104x128xf32>
    %416 = arith.addf %413, %415 : vector<104x128xf32>
    %417 = math.tanh %416 : vector<104x128xf32>
    %c0_395 = arith.constant 0 : index
    %c0_396 = arith.constant 0 : index
    %418 = vector.load %arg17[%c0_395, %c0_396] : memref<104x128xf32, #tpu.memory_space<vmem>>, vector<104x128xf32>
    tpu.vector_store %arg17[%c0_395, %c0_396], %417 {strides = array<i32>} : memref<104x128xf32, #tpu.memory_space<vmem>>, vector<104x128xf32>,
    %c0_397 = arith.constant 0 : index
    %c0_398 = arith.constant 0 : index
    %419 = tpu.strided_load %arg17[%c0_397, %c0_398] {strides = array<i32: 2, 1>} : memref<104x128xf32, #tpu.memory_space<vmem>>, vector<2x128xf32>
    %c1_399 = arith.constant 1 : index
    %c0_400 = arith.constant 0 : index
    %420 = tpu.strided_load %arg17[%c1_399, %c0_400] {strides = array<i32: 2, 1>} : memref<104x128xf32, #tpu.memory_space<vmem>>, vector<2x128xf32>
    %421 = arith.maximumf %419, %420 : vector<2x128xf32>
    %c7_401 = arith.constant 7 : index
    %c0_402 = arith.constant 0 : index
    %422 = tpu.strided_load %arg17[%c7_401, %c0_402] {strides = array<i32: 2, 1>} : memref<104x128xf32, #tpu.memory_space<vmem>>, vector<2x128xf32>
    %c8_403 = arith.constant 8 : index
    %c0_404 = arith.constant 0 : index
    %423 = tpu.strided_load %arg17[%c8_403, %c0_404] {strides = array<i32: 2, 1>} : memref<104x128xf32, #tpu.memory_space<vmem>>, vector<2x128xf32>
    %424 = arith.maximumf %422, %423 : vector<2x128xf32>
    %425 = arith.maximumf %421, %424 : vector<2x128xf32>
    %c0_405 = arith.constant 0 : index
    %c0_406 = arith.constant 0 : index
    %426 = vector.load %arg18[%c0_405, %c0_406] : memref<8x128xf32, #tpu.memory_space<vmem>>, vector<2x128xf32>
    tpu.vector_store %arg18[%c0_405, %c0_406], %425 {strides = array<i32>} : memref<8x128xf32, #tpu.memory_space<vmem>>, vector<2x128xf32>,
    %c14_407 = arith.constant 14 : index
    %c0_408 = arith.constant 0 : index
    %427 = tpu.strided_load %arg17[%c14_407, %c0_408] {strides = array<i32: 2, 1>} : memref<104x128xf32, #tpu.memory_space<vmem>>, vector<2x128xf32>
    %c15_409 = arith.constant 15 : index
    %c0_410 = arith.constant 0 : index
    %428 = tpu.strided_load %arg17[%c15_409, %c0_410] {strides = array<i32: 2, 1>} : memref<104x128xf32, #tpu.memory_space<vmem>>, vector<2x128xf32>
    %429 = arith.maximumf %427, %428 : vector<2x128xf32>
    %c21_411 = arith.constant 21 : index
    %c0_412 = arith.constant 0 : index
    %430 = tpu.strided_load %arg17[%c21_411, %c0_412] {strides = array<i32: 2, 1>} : memref<104x128xf32, #tpu.memory_space<vmem>>, vector<2x128xf32>
    %c22_413 = arith.constant 22 : index
    %c0_414 = arith.constant 0 : index
    %431 = tpu.strided_load %arg17[%c22_413, %c0_414] {strides = array<i32: 2, 1>} : memref<104x128xf32, #tpu.memory_space<vmem>>, vector<2x128xf32>
    %432 = arith.maximumf %430, %431 : vector<2x128xf32>
    %433 = arith.maximumf %429, %432 : vector<2x128xf32>
    %c2_415 = arith.constant 2 : index
    %c0_416 = arith.constant 0 : index
    %434 = vector.load %arg18[%c2_415, %c0_416] : memref<8x128xf32, #tpu.memory_space<vmem>>, vector<2x128xf32>
    tpu.vector_store %arg18[%c2_415, %c0_416], %433 {strides = array<i32>} : memref<8x128xf32, #tpu.memory_space<vmem>>, vector<2x128xf32>,
    %c49 = arith.constant 49 : index
    %c0_417 = arith.constant 0 : index
    %435 = tpu.strided_load %arg17[%c49, %c0_417] {strides = array<i32: 2, 1>} : memref<104x128xf32, #tpu.memory_space<vmem>>, vector<2x128xf32>
    %c50_418 = arith.constant 50 : index
    %c0_419 = arith.constant 0 : index
    %436 = tpu.strided_load %arg17[%c50_418, %c0_419] {strides = array<i32: 2, 1>} : memref<104x128xf32, #tpu.memory_space<vmem>>, vector<2x128xf32>
    %437 = arith.maximumf %435, %436 : vector<2x128xf32>
    %c56 = arith.constant 56 : index
    %c0_420 = arith.constant 0 : index
    %438 = tpu.strided_load %arg17[%c56, %c0_420] {strides = array<i32: 2, 1>} : memref<104x128xf32, #tpu.memory_space<vmem>>, vector<2x128xf32>
    %c57 = arith.constant 57 : index
    %c0_421 = arith.constant 0 : index
    %439 = tpu.strided_load %arg17[%c57, %c0_421] {strides = array<i32: 2, 1>} : memref<104x128xf32, #tpu.memory_space<vmem>>, vector<2x128xf32>
    %440 = arith.maximumf %438, %439 : vector<2x128xf32>
    %441 = arith.maximumf %437, %440 : vector<2x128xf32>
    %c4_422 = arith.constant 4 : index
    %c0_423 = arith.constant 0 : index
    %442 = vector.load %arg18[%c4_422, %c0_423] : memref<8x128xf32, #tpu.memory_space<vmem>>, vector<2x128xf32>
    tpu.vector_store %arg18[%c4_422, %c0_423], %441 {strides = array<i32>} : memref<8x128xf32, #tpu.memory_space<vmem>>, vector<2x128xf32>,
    %c63 = arith.constant 63 : index
    %c0_424 = arith.constant 0 : index
    %443 = tpu.strided_load %arg17[%c63, %c0_424] {strides = array<i32: 2, 1>} : memref<104x128xf32, #tpu.memory_space<vmem>>, vector<2x128xf32>
    %c64_425 = arith.constant 64 : index
    %c0_426 = arith.constant 0 : index
    %444 = tpu.strided_load %arg17[%c64_425, %c0_426] {strides = array<i32: 2, 1>} : memref<104x128xf32, #tpu.memory_space<vmem>>, vector<2x128xf32>
    %445 = arith.maximumf %443, %444 : vector<2x128xf32>
    %c70_427 = arith.constant 70 : index
    %c0_428 = arith.constant 0 : index
    %446 = tpu.strided_load %arg17[%c70_427, %c0_428] {strides = array<i32: 2, 1>} : memref<104x128xf32, #tpu.memory_space<vmem>>, vector<2x128xf32>
    %c71_429 = arith.constant 71 : index
    %c0_430 = arith.constant 0 : index
    %447 = tpu.strided_load %arg17[%c71_429, %c0_430] {strides = array<i32: 2, 1>} : memref<104x128xf32, #tpu.memory_space<vmem>>, vector<2x128xf32>
    %448 = arith.maximumf %446, %447 : vector<2x128xf32>
    %449 = arith.maximumf %445, %448 : vector<2x128xf32>
    %c6_431 = arith.constant 6 : index
    %c0_432 = arith.constant 0 : index
    %450 = vector.load %arg18[%c6_431, %c0_432] : memref<8x128xf32, #tpu.memory_space<vmem>>, vector<2x128xf32>
    tpu.vector_store %arg18[%c6_431, %c0_432], %449 {strides = array<i32>} : memref<8x128xf32, #tpu.memory_space<vmem>>, vector<2x128xf32>,
    %cst_433 = arith.constant 0.000000e+00 : f32
    %451 = vector.broadcast %cst_433 : f32 to vector<2x128xf32>
    %c0_434 = arith.constant 0 : index
    %c0_435 = arith.constant 0 : index
    %452 = tpu.strided_load %arg18[%c0_434, %c0_435] {strides = array<i32: 4, 1>} : memref<8x128xf32, #tpu.memory_space<vmem>>, vector<2x128xf32>
    %453 = vector.extract_strided_slice %452 {offsets = [0, 0], sizes = [2, 32], strides = [1, 1]} : vector<2x128xf32> to vector<2x32xf32>
    %c0_436 = arith.constant 0 : index
    %c0_437 = arith.constant 0 : index
    %c0_438 = arith.constant 0 : index
    %454 = vector.load %arg10[%c0_436, %c0_437, %c0_438] : memref<4x32x128xf32, #tpu.memory_space<vmem>>, vector<1x32x128xf32>
    %455 = vector.shape_cast %454 : vector<1x32x128xf32> to vector<32x128xf32>
    %cst_439 = arith.constant dense<0.000000e+00> : vector<2x128xf32>
    %456 = tpu.matmul %453, %455, %cst_439 {dimension_numbers = #tpu.dot_dimension_numbers<[1], [0], [0], [1], [0, 0, 1, 1], [], []>} : vector<2x32xf32>, vector<32x128xf32>, vector<2x128xf32> -> vector<2x128xf32>
    %457 = arith.addf %451, %456 : vector<2x128xf32>
    %c1_440 = arith.constant 1 : index
    %c0_441 = arith.constant 0 : index
    %458 = tpu.strided_load %arg18[%c1_440, %c0_441] {strides = array<i32: 4, 1>} : memref<8x128xf32, #tpu.memory_space<vmem>>, vector<2x128xf32>
    %459 = vector.extract_strided_slice %458 {offsets = [0, 0], sizes = [2, 32], strides = [1, 1]} : vector<2x128xf32> to vector<2x32xf32>
    %c1_442 = arith.constant 1 : index
    %c0_443 = arith.constant 0 : index
    %c0_444 = arith.constant 0 : index
    %460 = vector.load %arg10[%c1_442, %c0_443, %c0_444] : memref<4x32x128xf32, #tpu.memory_space<vmem>>, vector<1x32x128xf32>
    %461 = vector.shape_cast %460 : vector<1x32x128xf32> to vector<32x128xf32>
    %cst_445 = arith.constant dense<0.000000e+00> : vector<2x128xf32>
    %462 = tpu.matmul %459, %461, %cst_445 {dimension_numbers = #tpu.dot_dimension_numbers<[1], [0], [0], [1], [0, 0, 1, 1], [], []>} : vector<2x32xf32>, vector<32x128xf32>, vector<2x128xf32> -> vector<2x128xf32>
    %463 = arith.addf %457, %462 : vector<2x128xf32>
    %c2_446 = arith.constant 2 : index
    %c0_447 = arith.constant 0 : index
    %464 = tpu.strided_load %arg18[%c2_446, %c0_447] {strides = array<i32: 4, 1>} : memref<8x128xf32, #tpu.memory_space<vmem>>, vector<2x128xf32>
    %465 = vector.extract_strided_slice %464 {offsets = [0, 0], sizes = [2, 32], strides = [1, 1]} : vector<2x128xf32> to vector<2x32xf32>
    %c2_448 = arith.constant 2 : index
    %c0_449 = arith.constant 0 : index
    %c0_450 = arith.constant 0 : index
    %466 = vector.load %arg10[%c2_448, %c0_449, %c0_450] : memref<4x32x128xf32, #tpu.memory_space<vmem>>, vector<1x32x128xf32>
    %467 = vector.shape_cast %466 : vector<1x32x128xf32> to vector<32x128xf32>
    %cst_451 = arith.constant dense<0.000000e+00> : vector<2x128xf32>
    %468 = tpu.matmul %465, %467, %cst_451 {dimension_numbers = #tpu.dot_dimension_numbers<[1], [0], [0], [1], [0, 0, 1, 1], [], []>} : vector<2x32xf32>, vector<32x128xf32>, vector<2x128xf32> -> vector<2x128xf32>
    %469 = arith.addf %463, %468 : vector<2x128xf32>
    %c3_452 = arith.constant 3 : index
    %c0_453 = arith.constant 0 : index
    %470 = tpu.strided_load %arg18[%c3_452, %c0_453] {strides = array<i32: 4, 1>} : memref<8x128xf32, #tpu.memory_space<vmem>>, vector<2x128xf32>
    %471 = vector.extract_strided_slice %470 {offsets = [0, 0], sizes = [2, 32], strides = [1, 1]} : vector<2x128xf32> to vector<2x32xf32>
    %c3_454 = arith.constant 3 : index
    %c0_455 = arith.constant 0 : index
    %c0_456 = arith.constant 0 : index
    %472 = vector.load %arg10[%c3_454, %c0_455, %c0_456] : memref<4x32x128xf32, #tpu.memory_space<vmem>>, vector<1x32x128xf32>
    %473 = vector.shape_cast %472 : vector<1x32x128xf32> to vector<32x128xf32>
    %cst_457 = arith.constant dense<0.000000e+00> : vector<2x128xf32>
    %474 = tpu.matmul %471, %473, %cst_457 {dimension_numbers = #tpu.dot_dimension_numbers<[1], [0], [0], [1], [0, 0, 1, 1], [], []>} : vector<2x32xf32>, vector<32x128xf32>, vector<2x128xf32> -> vector<2x128xf32>
    %475 = arith.addf %469, %474 : vector<2x128xf32>
    %c0_458 = arith.constant 0 : index
    %c0_459 = arith.constant 0 : index
    %476 = vector.load %arg11[%c0_458, %c0_459] : memref<1x128xf32, #tpu.memory_space<vmem>>, vector<1x128xf32>
    %477 = vector.broadcast %476 : vector<1x128xf32> to vector<2x128xf32>
    %478 = arith.addf %475, %477 : vector<2x128xf32>
    %479 = vector.extract_strided_slice %478 {offsets = [0, 0], sizes = [2, 16], strides = [1, 1]} : vector<2x128xf32> to vector<2x16xf32>
    %c0_460 = arith.constant 0 : index
    %c0_461 = arith.constant 0 : index
    %480 = vector.load %arg12[%c0_460, %c0_461] : memref<2x16xf32, #tpu.memory_space<vmem>>, vector<2x16xf32>
    tpu.vector_store %arg12[%c0_460, %c0_461], %479 {strides = array<i32>} : memref<2x16xf32, #tpu.memory_space<vmem>>, vector<2x16xf32>,
    return
  }
}

</mosaic_0001>

<bundles_post_ra>
// kernel: matrix_cnn_forward.1
= control target key start
LH: loop header
LB: loop body
LE: loop exit
PB: predicated region body
PF: predicated region fallthrough
CT: control target
= control target key end

     0   :  { %v17140_v3 = vmov 0.0|0.0   ;;  %vm13415_vm0 = vmmov 0   ;;  %v13416_v6 = vmov 0.0   ;;  %vm155_vm1 = vcmask 261120   ;;  %s17127_s0 = inlined_call_operand.vmem [shape: f32[224,32], index: 0, kind: input, shape index: {}]   ;;  %s17128_s1 = inlined_call_operand.vmem [shape: f32[9,32,128], index: 1, kind: input, shape index: {}]   ;;  %s17129_s2 = inlined_call_operand.vmem [shape: f32[2,128], index: 2, kind: input, shape index: {}]   ;;  %s17130_s3 = inlined_call_operand.vmem [shape: f32[200,1], index: 3, kind: input, shape index: {}]   ;;  %s17131_s4 = inlined_call_operand.vmem [shape: f32[9,32,128], index: 4, kind: input, shape index: {}]   ;;  %s17132_s5 = inlined_call_operand.vmem [shape: f32[2,128], index: 5, kind: input, shape index: {}]   ;;  %s17133_s6 = inlined_call_operand.vmem [shape: f32[128,1], index: 6, kind: input, shape index: {}]   ;;  %s17134_s7 = inlined_call_operand.vmem [shape: f32[9,32,128], index: 7, kind: input, shape index: {}]   ;;  %s17135_s8 = inlined_call_operand.vmem [shape: f32[2,128], index: 8, kind: input, shape index: {}]   ;;  %s17136_s9 = inlined_call_operand.vmem [shape: f32[104,1], index: 9, kind: input, shape index: {}]   ;;  %s17137_s10 = inlined_call_operand.vmem [shape: f32[4,32,128], index: 10, kind: input, shape index: {}]   ;;  %s17138_s11 = inlined_call_operand.vmem [shape: f32[1,128], index: 11, kind: input, shape index: {}]   ;;  %s17139_s12 = inlined_call_operand.hbm [shape: f32[2,16], index: 12, kind: output, shape index: {}]  }
   0x1   :  { %v151_v0 = vld [vmem:[%s17128_s1] sm:$0xff]  ;;  %v152_v1 = vld [vmem:[%s17128_s1 + $0x8] sm:$0xff]  ;;  %v153_v2 = vld [vmem:[%s17128_s1 + $0x10] sm:$0xff]  ;;  %12172 = vmatprep.subr.bf16.mxu0 %v17140_v3  ;;  %10678 = vmatprep.mubr.msk.f32.mxu0 %vm13415_vm0, %v13416_v6  ;;  %42 = vst [vmem:[#allocation3] sm:$0xff] %v13416_v6 }
   0x2   :  { %v12173_v4 = vpack.c.bf16 %v152_v1, %v151_v0  ;;  %v154_v5 = vld [vmem:[%s17128_s1 + $0x18] sm:$0xff]  ;;  %43 = vst [vmem:[#allocation3 + $0x8] sm:$0xff] %v13416_v6  ;;  %44 = vst [vmem:[#allocation3 + $0x10] sm:$0xff] %v13416_v6  ;;  %12376 = vmatprep.subr.bf16.mxu1 %v17140_v3  ;;  %10711 = vmatprep.mubr.msk.f32.mxu1 %vm13415_vm0, %v13416_v6  ;;  %v9476_v8 = vld [vmem:[%s17128_s1 + $0x20] sm:$0xff] }
   0x3   :  { %45 = vst [vmem:[#allocation3 + $0x18] sm:$0xff] %v13416_v6  ;;  %46 = vst [vmem:[#allocation3 + $0x20] sm:$0xff] %v13416_v6  ;;  %v12176_v7 = vpack.c.bf16 %v154_v5, %v153_v2  ;;  %v9477_v9 = vld [vmem:[%s17128_s1 + $0x28] sm:$0xff]  ;;  %v101_v10 = vld [vmem:[%s17127_s0] sm:$0xff] }
   0x4   :  { %47 = vst [vmem:[#allocation3 + $0x28] sm:$0xff] %v13416_v6  ;;  %48 = vst [vmem:[#allocation3 + $0x30] sm:$0xff] %v13416_v6  ;;  %12174 = vmatpush3.bf16.msra.mxu0 %v12173_v4  ;;  %12378 = vmatpush3.bf16.msra.mxu1 %v12173_v4  ;;  %v12179_v11 = vpack.c.bf16 %v9477_v9, %v9476_v8  ;;  %v9478_v12 = vld [vmem:[%s17128_s1 + $0x30] sm:$0xff]  ;;  %v9479_v13 = vld [vmem:[%s17128_s1 + $0x38] sm:$0xff] }
   0x5   :  { %49 = vst [vmem:[#allocation3 + $0x38] sm:$0xff] %v13416_v6  ;;  %50 = vst [vmem:[#allocation3 + $0x40] sm:$0xff] %v13416_v6  ;;  %12175 = vmatprep.subr.bf16.mxu0 %v17140_v3  ;;  %12377 = vmatprep.subr.bf16.mxu1 %v17140_v3  ;;  %v102_v14 = vld [vmem:[%s17127_s0 + $0x8] sm:$0xff]  ;;  %v12182_v15 = vpack.c.bf16 %v9479_v13, %v9478_v12  ;;  %v103_v16 = vld [vmem:[%s17127_s0 + $0x10] sm:$0xff] }
   0x6   :  { %51 = vst [vmem:[#allocation3 + $0x48] sm:$0xff] %v13416_v6  ;;  %52 = vst [vmem:[#allocation3 + $0x50] sm:$0xff] %v13416_v6 }
   0x7   :  { %53 = vst [vmem:[#allocation3 + $0x58] sm:$0xff] %v13416_v6  ;;  %54 = vst [vmem:[#allocation3 + $0x60] sm:$0xff] %v13416_v6 }
   0x8   :  { %55 = vst [vmem:[#allocation3 + $0x68] sm:$0xff] %v13416_v6  ;;  %56 = vst [vmem:[#allocation3 + $0x70] sm:$0xff] %v13416_v6  ;;  %12177 = vmatpush3.bf16.msra.mxu0 %v12176_v7  ;;  %12379 = vmatpush3.bf16.msra.mxu1 %v12176_v7 }
   0x9   :  { %57 = vst [vmem:[#allocation3 + $0x78] sm:$0xff] %v13416_v6  ;;  %58 = vst [vmem:[#allocation3 + $0x80] sm:$0xff] %v13416_v6  ;;  %12178 = vmatprep.subr.bf16.mxu0 %v17140_v3 }
   0xa   :  { %59 = vst [vmem:[#allocation3 + $0x88] sm:$0xff] %v13416_v6  ;;  %60 = vst [vmem:[#allocation3 + $0x90] sm:$0xff] %v13416_v6 }
   0xb   :  { %61 = vst [vmem:[#allocation5] sm:$0xff] %v13416_v6  ;;  %62 = vst [vmem:[#allocation5 + $0x8] sm:$0xff] %v13416_v6  ;;  %10679 = vmatmul.mubr.msk.f32.vlgmr.msra.gmra.mrb[0].mxu0 %vm155_vm1, %v101_v10 }
   0xc   :  { %63 = vst [vmem:[#allocation5 + $0x10] sm:$0xff] %v13416_v6  ;;  %64 = vst [vmem:[#allocation5 + $0x18] sm:$0xff] %v13416_v6  ;;  %12180 = vmatpush3.bf16.msra.mxu0 %v12179_v11  ;;  %10681 = vmatprep.mubr.msk.f32.mxu0 %vm13415_vm0, %v13416_v6 }
   0xd   :  { %65 = vst [vmem:[#allocation5 + $0x20] sm:$0xff] %v13416_v6  ;;  %66 = vst [vmem:[#allocation5 + $0x28] sm:$0xff] %v13416_v6  ;;  %12181 = vmatprep.subr.bf16.mxu0 %v17140_v3 }
   0xe   :  { %67 = vst [vmem:[#allocation5 + $0x30] sm:$0xff] %v13416_v6  ;;  %68 = vst [vmem:[#allocation5 + $0x38] sm:$0xff] %v13416_v6 }
   0xf   :  { %69 = vst [vmem:[#allocation5 + $0x40] sm:$0xff] %v13416_v6  ;;  %70 = vst [vmem:[#allocation5 + $0x48] sm:$0xff] %v13416_v6  ;;  %10682 = vmatmul.mubr.msk.f32.gmra.mrb[2].mxu0 %vm155_vm1, %v102_v14 }
  0x10   :  { %71 = vst [vmem:[#allocation5 + $0x50] sm:$0xff] %v13416_v6  ;;  %72 = vst [vmem:[#allocation5 + $0x58] sm:$0xff] %v13416_v6  ;;  %10684 = vmatprep.mubr.msk.f32.mxu0 %vm13415_vm0, %v13416_v6  ;;  %12183 = vmatpush3.bf16.msra.mxu0 %v12182_v15 }
  0x11   :  { %73 = vst [vmem:[#allocation5 + $0x60] sm:$0xff] %v13416_v6  ;;  %74 = vst [vmem:[#allocation5 + $0x68] sm:$0xff] %v13416_v6 }
  0x12   :  { %75 = vst [vmem:[#allocation5 + $0x70] sm:$0xff] %v13416_v6 }
  0x13   :  { %17 = vsyncpa [#allocation9], 0  ;;  %12184 = vmatprep.subr.bf16.mxu0 %v17140_v3  ;;  %10685 = vmatmul.mubr.msk.f32.gmra.mrb[4].mxu0 %vm155_vm1, %v103_v16  ;;  %v104_v17 = vld [vmem:[%s17127_s0 + $0x18] sm:$0xff]  ;;  %v105_v18 = vld [vmem:[%s17127_s0 + $0x20] sm:$0xff]  ;;  %s13418_s15 = smov [#allocation8]   ;;  %vm9435_vm2 = vcmask 123904  }
  0x14   :  { %10687 = vmatprep.mubr.msk.f32.mxu0 %vm13415_vm0, %v13416_v6  ;;  %v106_v19 = vld [vmem:[%s17127_s0 + $0x28] sm:$0xff]  ;;  %v107_v20 = vld [vmem:[%s17127_s0 + $0x30] sm:$0xff]  ;;  %v108_v21 = vld [vmem:[%s17127_s0 + $0x38] sm:$0xff] }
  0x15   :  { %v109_v22 = vld [vmem:[%s17127_s0 + $0x40] sm:$0xff]  ;;  %v110_v23 = vld [vmem:[%s17127_s0 + $0x48] sm:$0xff]  ;;  %v111_v24 = vld [vmem:[%s17127_s0 + $0x50] sm:$0xff] }
  0x16   :  { %v9505_v25 = vld [vmem:[%s17128_s1 + $0x40] sm:$0xff]  ;;  %v9506_v26 = vld [vmem:[%s17128_s1 + $0x48] sm:$0xff]  ;;  %v9507_v29 = vld [vmem:[%s17128_s1 + $0x50] sm:$0xff] }
  0x17   :  { %10688 = vmatmul.mubr.msk.f32.gmra.mrb[6].mxu0 %vm155_vm1, %v104_v17  ;;  %v471_v27 = vld [vmem:[%s17127_s0 + $0x1] sm:$0xff]  ;;  %v12185_v28 = vpack.c.bf16 %v9506_v26, %v9505_v25  ;;  %v9508_v30 = vld [vmem:[%s17128_s1 + $0x58] sm:$0xff]  ;;  %v472_v31 = vld [vmem:[%s17127_s0 + $0x9] sm:$0xff] }
  0x18   :  { %10690 = vmatprep.mubr.msk.f32.mxu0 %vm13415_vm0, %v13416_v6  ;;  %v12188_v32 = vpack.c.bf16 %v9508_v30, %v9507_v29  ;;  %v473_v33 = vld [vmem:[%s17127_s0 + $0x11] sm:$0xff]  ;;  %v474_v34 = vld [vmem:[%s17127_s0 + $0x19] sm:$0xff]  ;;  %v475_v35 = vld [vmem:[%s17127_s0 + $0x21] sm:$0xff] }
  0x19   :  { %v476_v36 = vld [vmem:[%s17127_s0 + $0x29] sm:$0xff]  ;;  %v477_v37 = vld [vmem:[%s17127_s0 + $0x31] sm:$0xff]  ;;  %v478_v38 = vld [vmem:[%s17127_s0 + $0x39] sm:$0xff] }
  0x1a   :  { %v479_v39 = vld [vmem:[%s17127_s0 + $0x41] sm:$0xff]  ;;  %v480_v40 = vld [vmem:[%s17127_s0 + $0x49] sm:$0xff]  ;;  %v481_v41 = vld [vmem:[%s17127_s0 + $0x51] sm:$0xff] }
  0x1b   :  { %10691 = vmatmul.mubr.msk.f32.gmra.mrb[8].mxu0 %vm155_vm1, %v105_v18  ;;  %v482_v42 = vld [vmem:[%s17127_s0 + $0x59] sm:$0xff]  ;;  %v483_v43 = vld [vmem:[%s17127_s0 + $0x61] sm:$0xff]  ;;  %v484_v44 = vld [vmem:[%s17127_s0 + $0x69] sm:$0xff] }
  0x1c   :  { %10693 = vmatprep.mubr.msk.f32.mxu0 %vm13415_vm0, %v13416_v6  ;;  %v485_v45 = vld [vmem:[%s17127_s0 + $0x71] sm:$0xff]  ;;  %v486_v46 = vld [vmem:[%s17127_s0 + $0x79] sm:$0xff]  ;;  %v487_v47 = vld [vmem:[%s17127_s0 + $0x81] sm:$0xff] }
  0x1d   :  { %v488_v48 = vld [vmem:[%s17127_s0 + $0x89] sm:$0xff]  ;;  %v489_v49 = vld [vmem:[%s17127_s0 + $0x91] sm:$0xff]  ;;  %v490_v50 = vld [vmem:[%s17127_s0 + $0x99] sm:$0xff] }
  0x1e   :  { %v491_v51 = vld [vmem:[%s17127_s0 + $0xa1] sm:$0xff]  ;;  %v492_v52 = vld [vmem:[%s17127_s0 + $0xa9] sm:$0xff]  ;;  %v493_v53 = vld [vmem:[%s17127_s0 + $0xb1] sm:$0xff] }
  0x1f   :  { %10694 = vmatmul.mubr.msk.f32.gmra.mrb[10].mxu0 %vm155_vm1, %v106_v19  ;;  %v494_v54 = vld [vmem:[%s17127_s0 + $0xb9] sm:$0xff]  ;;  %v495_v55 = vld [vmem:[%s17127_s0 + $0xc1] sm:$0xff]  ;;  %v9536_v60 = vld [vmem:[%s17128_s1 + $0x70] sm:$0xff] }
  0x20   :  { %10696 = vmatprep.mubr.msk.f32.mxu0 %vm13415_vm0, %v13416_v6  ;;  %v9534_v56 = vld [vmem:[%s17128_s1 + $0x60] sm:$0xff]  ;;  %v9535_v57 = vld [vmem:[%s17128_s1 + $0x68] sm:$0xff]  ;;  %v9537_v61 = vld [vmem:[%s17128_s1 + $0x78] sm:$0xff] }
  0x21   :  { %v841_v58 = vld [vmem:[%s17127_s0 + $0x2] sm:$0xff]  ;;  %v12191_v59 = vpack.c.bf16 %v9535_v57, %v9534_v56  ;;  %v13804_v62 = vld [vmem:[%s17127_s0 + $0xa] sm:$0xff]  ;;  %v12194_v63 = vpack.c.bf16 %v9537_v61, %v9536_v60  ;;  %v13814_v0 = vld [vmem:[%s17127_s0 + $0x12] sm:$0xff] }
  0x22   :  { %v13824_v1 = vld [vmem:[%s17127_s0 + $0x1a] sm:$0xff]  ;;  %v13833_v2 = vld [vmem:[%s17127_s0 + $0x22] sm:$0xff]  ;;  %v13842_v4 = vld [vmem:[%s17127_s0 + $0x2a] sm:$0xff] }
  0x23   :  { %10697 = vmatmul.mubr.msk.f32.gmra.mrb[12].mxu0 %vm155_vm1, %v107_v20  ;;  %v13851_v5 = vld [vmem:[%s17127_s0 + $0x32] sm:$0xff]  ;;  %v13860_v7 = vld [vmem:[%s17127_s0 + $0x3a] sm:$0xff]  ;;  %v13869_v8 = vld [vmem:[%s17127_s0 + $0x42] sm:$0xff] }
  0x24   :  { %10699 = vmatprep.mubr.msk.f32.mxu0 %vm13415_vm0, %v13416_v6  ;;  %v13878_v9 = vld [vmem:[%s17127_s0 + $0x4a] sm:$0xff]  ;;  %v13887_v10 = vld [vmem:[%s17127_s0 + $0x52] sm:$0xff]  ;;  %v13896_v11 = vld [vmem:[%s17127_s0 + $0x5a] sm:$0xff] }
  0x25   :  { %v13905_v12 = vld [vmem:[%s17127_s0 + $0x62] sm:$0xff]  ;;  %v13914_v13 = vld [vmem:[%s17127_s0 + $0x6a] sm:$0xff]  ;;  %v13923_v14 = vld [vmem:[%s17127_s0 + $0x72] sm:$0xff] }
  0x26   :  { %v13932_v15 = vld [vmem:[%s17127_s0 + $0x7a] sm:$0xff]  ;;  %v13941_v16 = vld [vmem:[%s17127_s0 + $0x82] sm:$0xff]  ;;  %v13950_v17 = vld [vmem:[%s17127_s0 + $0x8a] sm:$0xff] }
  0x27   :  { %10700 = vmatmul.mubr.msk.f32.gmra.mrb[14].mxu0 %vm155_vm1, %v108_v21  ;;  %v13959_v18 = vld [vmem:[%s17127_s0 + $0x92] sm:$0xff]  ;;  %v13968_v19 = vld [vmem:[%s17127_s0 + $0x9a] sm:$0xff]  ;;  %v13977_v20 = vld [vmem:[%s17127_s0 + $0xa2] sm:$0xff] }
  0x28   :  { %10702 = vmatprep.mubr.msk.f32.mxu0 %vm13415_vm0, %v13416_v6  ;;  %v862_v21 = vld [vmem:[%s17127_s0 + $0xaa] sm:$0xff]  ;;  %v9563_v25 = vld [vmem:[%s17128_s1 + $0x80] sm:$0xff]  ;;  %v9566_v29 = vld [vmem:[%s17128_s1 + $0x98] sm:$0xff] }
  0x29   :  { %v9564_v26 = vld [vmem:[%s17128_s1 + $0x88] sm:$0xff]  ;;  %v1599_v56 = vld [vmem:[%s17127_s0 + $0x9b] sm:$0xff] }
  0x2a   :  { %v1600_v57 = vld [vmem:[%s17127_s0 + $0xa3] sm:$0xff]  ;;  %v1603_v60 = vld [vmem:[%s17127_s0 + $0xbb] sm:$0xff] }
  0x2b   :  { %10703 = vmatmul.mubr.msk.f32.gmra.mrb[16].mxu0 %vm155_vm1, %v109_v22  ;;  %v863_v22 = vld [vmem:[%s17127_s0 + $0xb2] sm:$0xff]  ;;  %v1604_v61 = vld [vmem:[%s17127_s0 + $0xc3] sm:$0xff] }
  0x2c   :  { %10705 = vmatprep.mubr.msk.f32.mxu0 %vm13415_vm0, %v13416_v6 }
  0x2f   :  { %10706 = vmatmul.mubr.msk.f32.gmra.mrb[18].mxu0 %vm155_vm1, %v110_v23  ;;  %v864_v23 = vld [vmem:[%s17127_s0 + $0xba] sm:$0xff] }
  0x30   :  { %10708 = vmatprep.mubr.msk.f32.mxu0 %vm13415_vm0, %v13416_v6 }
  0x33   :  { %10709 = vmatmul.mubr.msk.f32.gmra.mrb[20].mxu0 %vm155_vm1, %v111_v24  ;;  %v865_v24 = vld [vmem:[%s17127_s0 + $0xc2] sm:$0xff] }
  0x34   :  { %10761 = vmatprep.mubr.msk.f32.mxu0 %vm13415_vm0, %v13416_v6 }
  0x37   :  { %10762 = vmatmul.mubr.msk.f32.vlgmr.msra.gmra.mrb[0].mxu0 %vm155_vm1, %v471_v27  ;;  %v12197_v27 = vpack.c.bf16 %v9564_v26, %v9563_v25  ;;  %v14459_v25 = vld [vmem:[%s17127_s0 + $0x9c] sm:$0xff]  ;;  %v14468_v26 = vld [vmem:[%s17127_s0 + $0xa4] sm:$0xff] }
  0x38   :  { %12186 = vmatpush3.bf16.msra.mxu0 %v12185_v28  ;;  %10764 = vmatprep.mubr.msk.f32.mxu0 %vm13415_vm0, %v13416_v6  ;;  %v9565_v28 = vld [vmem:[%s17128_s1 + $0x90] sm:$0xff] }
  0x39   :  { %12187 = vmatprep.subr.bf16.mxu0 %v17140_v3  ;;  %v12200_v30 = vpack.c.bf16 %v9566_v29, %v9565_v28  ;;  %v14486_v28 = vld [vmem:[%s17127_s0 + $0xb4] sm:$0xff]  ;;  %v1973_v29 = vld [vmem:[%s17127_s0 + $0xbc] sm:$0xff] }
  0x3b   :  { %10765 = vmatmul.mubr.msk.f32.gmra.mrb[2].mxu0 %vm155_vm1, %v472_v31  ;;  %v1235_v31 = vld [vmem:[%s17127_s0 + $0xca] sm:$0xff] }
  0x3c   :  { %10767 = vmatprep.mubr.msk.f32.mxu0 %vm13415_vm0, %v13416_v6  ;;  %12189 = vmatpush3.bf16.msra.mxu0 %v12188_v32  ;;  %v9592_v32 = vld [vmem:[%s17128_s1 + $0xa0] sm:$0xff] }
  0x3d   :  { %12190 = vmatprep.subr.bf16.mxu0 %v17140_v3 }
  0x3f   :  { %10768 = vmatmul.mubr.msk.f32.gmra.mrb[4].mxu0 %vm155_vm1, %v473_v33  ;;  %v9593_v33 = vld [vmem:[%s17128_s1 + $0xa8] sm:$0xff] }
  0x40   :  { %10770 = vmatprep.mubr.msk.f32.mxu0 %vm13415_vm0, %v13416_v6 }
  0x43   :  { %10771 = vmatmul.mubr.msk.f32.gmra.mrb[6].mxu0 %vm155_vm1, %v474_v34  ;;  %v1581_v34 = vld [vmem:[%s17127_s0 + $0xb] sm:$0xff] }
  0x44   :  { %10773 = vmatprep.mubr.msk.f32.mxu0 %vm13415_vm0, %v13416_v6 }
  0x47   :  { %10774 = vmatmul.mubr.msk.f32.gmra.mrb[8].mxu0 %vm155_vm1, %v475_v35  ;;  %v12203_v35 = vpack.c.bf16 %v9593_v33, %v9592_v32  ;;  %v9650_v32 = vld [vmem:[%s17128_s1 + $0xe0] sm:$0xff]  ;;  %v9651_v33 = vld [vmem:[%s17128_s1 + $0xe8] sm:$0xff] }
  0x48   :  { %10776 = vmatprep.mubr.msk.f32.mxu0 %vm13415_vm0, %v13416_v6 }
  0x4b   :  { %10777 = vmatmul.mubr.msk.f32.gmra.mrb[10].mxu0 %vm155_vm1, %v476_v36  ;;  %v9594_v36 = vld [vmem:[%s17128_s1 + $0xb0] sm:$0xff] }
  0x4c   :  { %10779 = vmatprep.mubr.msk.f32.mxu0 %vm13415_vm0, %v13416_v6 }
  0x4f   :  { %10780 = vmatmul.mubr.msk.f32.gmra.mrb[12].mxu0 %vm155_vm1, %v477_v37  ;;  %v9595_v37 = vld [vmem:[%s17128_s1 + $0xb8] sm:$0xff] }
  0x50   :  { %10782 = vmatprep.mubr.msk.f32.mxu0 %vm13415_vm0, %v13416_v6 }
  0x53   :  { %10783 = vmatmul.mubr.msk.f32.gmra.mrb[14].mxu0 %vm155_vm1, %v478_v38  ;;  %v1582_v38 = vld [vmem:[%s17127_s0 + $0x13] sm:$0xff] }
  0x54   :  { %10785 = vmatprep.mubr.msk.f32.mxu0 %vm13415_vm0, %v13416_v6 }
  0x57   :  { %10786 = vmatmul.mubr.msk.f32.gmra.mrb[16].mxu0 %vm155_vm1, %v479_v39  ;;  %v12206_v39 = vpack.c.bf16 %v9595_v37, %v9594_v36  ;;  %v9653_v36 = vld [vmem:[%s17128_s1 + $0xf8] sm:$0xff] }
  0x58   :  { %10788 = vmatprep.mubr.msk.f32.mxu0 %vm13415_vm0, %v13416_v6 }
  0x5b   :  { %10789 = vmatmul.mubr.msk.f32.gmra.mrb[18].mxu0 %vm155_vm1, %v480_v40  ;;  %v1583_v40 = vld [vmem:[%s17127_s0 + $0x1b] sm:$0xff] }
  0x5c   :  { %10791 = vmatprep.mubr.msk.f32.mxu0 %vm13415_vm0, %v13416_v6 }
  0x5f   :  { %10792 = vmatmul.mubr.msk.f32.gmra.mrb[20].mxu0 %vm155_vm1, %v481_v41  ;;  %v1584_v41 = vld [vmem:[%s17127_s0 + $0x23] sm:$0xff] }
  0x60   :  { %10794 = vmatprep.mubr.msk.f32.mxu0 %vm13415_vm0, %v13416_v6 }
  0x63   :  { %10795 = vmatmul.mubr.msk.f32.gmra.mrb[22].mxu0 %vm155_vm1, %v482_v42  ;;  %v1585_v42 = vld [vmem:[%s17127_s0 + $0x2b] sm:$0xff] }
  0x64   :  { %10797 = vmatprep.mubr.msk.f32.mxu0 %vm13415_vm0, %v13416_v6 }
  0x67   :  { %10798 = vmatmul.mubr.msk.f32.gmra.mrb[24].mxu0 %vm155_vm1, %v483_v43  ;;  %v1586_v43 = vld [vmem:[%s17127_s0 + $0x33] sm:$0xff] }
  0x68   :  { %10800 = vmatprep.mubr.msk.f32.mxu0 %vm13415_vm0, %v13416_v6 }
  0x6b   :  { %10801 = vmatmul.mubr.msk.f32.gmra.mrb[26].mxu0 %vm155_vm1, %v484_v44  ;;  %v1587_v44 = vld [vmem:[%s17127_s0 + $0x3b] sm:$0xff] }
  0x6c   :  { %10803 = vmatprep.mubr.msk.f32.mxu0 %vm13415_vm0, %v13416_v6 }
  0x6f   :  { %10804 = vmatmul.mubr.msk.f32.gmra.mrb[28].mxu0 %vm155_vm1, %v485_v45  ;;  %v1588_v45 = vld [vmem:[%s17127_s0 + $0x43] sm:$0xff] }
  0x70   :  { %10806 = vmatprep.mubr.msk.f32.mxu0 %vm13415_vm0, %v13416_v6 }
  0x73   :  { %10807 = vmatmul.mubr.msk.f32.gmra.mrb[30].mxu0 %vm155_vm1, %v486_v46  ;;  %v1589_v46 = vld [vmem:[%s17127_s0 + $0x4b] sm:$0xff] }
  0x74   :  { %10809 = vmatprep.mubr.msk.f32.mxu0 %vm13415_vm0, %v13416_v6 }
  0x77   :  { %10810 = vmatmul.mubr.msk.f32.gmra.mrb[32].mxu0 %vm155_vm1, %v487_v47  ;;  %v1590_v47 = vld [vmem:[%s17127_s0 + $0x53] sm:$0xff] }
  0x78   :  { %10812 = vmatprep.mubr.msk.f32.mxu0 %vm13415_vm0, %v13416_v6 }
  0x7b   :  { %10813 = vmatmul.mubr.msk.f32.gmra.mrb[34].mxu0 %vm155_vm1, %v488_v48  ;;  %v1591_v48 = vld [vmem:[%s17127_s0 + $0x5b] sm:$0xff] }
  0x7c   :  { %10815 = vmatprep.mubr.msk.f32.mxu0 %vm13415_vm0, %v13416_v6 }
  0x7f   :  { %10816 = vmatmul.mubr.msk.f32.gmra.mrb[36].mxu0 %vm155_vm1, %v489_v49  ;;  %v1592_v49 = vld [vmem:[%s17127_s0 + $0x63] sm:$0xff] }
  0x80   :  { %10818 = vmatprep.mubr.msk.f32.mxu0 %vm13415_vm0, %v13416_v6 }
  0x83   :  { %10819 = vmatmul.mubr.msk.f32.gmra.mrb[38].mxu0 %vm155_vm1, %v490_v50  ;;  %v1593_v50 = vld [vmem:[%s17127_s0 + $0x6b] sm:$0xff] }
  0x84   :  { %10821 = vmatprep.mubr.msk.f32.mxu0 %vm13415_vm0, %v13416_v6 }
  0x87   :  { %10822 = vmatmul.mubr.msk.f32.gmra.mrb[40].mxu0 %vm155_vm1, %v491_v51  ;;  %v1594_v51 = vld [vmem:[%s17127_s0 + $0x73] sm:$0xff] }
  0x88   :  { %10824 = vmatprep.mubr.msk.f32.mxu0 %vm13415_vm0, %v13416_v6 }
  0x8b   :  { %10825 = vmatmul.mubr.msk.f32.gmra.mrb[42].mxu0 %vm155_vm1, %v492_v52  ;;  %v1595_v52 = vld [vmem:[%s17127_s0 + $0x7b] sm:$0xff] }
  0x8c   :  { %10827 = vmatprep.mubr.msk.f32.mxu0 %vm13415_vm0, %v13416_v6 }
  0x8f   :  { %10828 = vmatmul.mubr.msk.f32.gmra.mrb[44].mxu0 %vm155_vm1, %v493_v53  ;;  %v1596_v53 = vld [vmem:[%s17127_s0 + $0x83] sm:$0xff] }
  0x90   :  { %10830 = vmatprep.mubr.msk.f32.mxu0 %vm13415_vm0, %v13416_v6 }
  0x93   :  { %10831 = vmatmul.mubr.msk.f32.gmra.mrb[46].mxu0 %vm155_vm1, %v494_v54  ;;  %v1597_v54 = vld [vmem:[%s17127_s0 + $0x8b] sm:$0xff] }
  0x94   :  { %10833 = vmatprep.mubr.msk.f32.mxu0 %vm13415_vm0, %v13416_v6 }
  0x97   :  { %10834 = vmatmul.mubr.msk.f32.gmra.mrb[48].mxu0 %vm155_vm1, %v495_v55  ;;  %v1598_v55 = vld [vmem:[%s17127_s0 + $0x93] sm:$0xff] }
  0x98   :  { %10844 = vmatprep.mubr.msk.f32.mxu0 %vm13415_vm0, %v13416_v6 }
  0x9b   :  { %10845 = vmatmul.mubr.msk.f32.vlgmr.msra.gmra.mrb[0].mxu0 %vm155_vm1, %v841_v58  ;;  %v1601_v58 = vld [vmem:[%s17127_s0 + $0xab] sm:$0xff] }
  0x9c   :  { %12192 = vmatpush3.bf16.msra.mxu0 %v12191_v59  ;;  %10847 = vmatprep.mubr.msk.f32.mxu0 %vm13415_vm0, %v13416_v6  ;;  %v1602_v59 = vld [vmem:[%s17127_s0 + $0xb3] sm:$0xff] }
  0x9d   :  { %12193 = vmatprep.subr.bf16.mxu0 %v17140_v3 }
  0x9f   :  { %10848 = vmatmul.mubr.msk.f32.gmra.mrb[2].mxu0 %vm155_vm1, %v13804_v62 }
  0xa0   :  { %10850 = vmatprep.mubr.msk.f32.mxu0 %vm13415_vm0, %v13416_v6  ;;  %12195 = vmatpush3.bf16.msra.mxu0 %v12194_v63  ;;  %v9621_v63 = vld [vmem:[%s17128_s1 + $0xc0] sm:$0xff] }
  0xa1   :  { %12196 = vmatprep.subr.bf16.mxu0 %v17140_v3 }
  0xa3   :  { %10851 = vmatmul.mubr.msk.f32.gmra.mrb[4].mxu0 %vm155_vm1, %v13814_v0 }
  0xa4   :  { %10853 = vmatprep.mubr.msk.f32.mxu0 %vm13415_vm0, %v13416_v6 }
  0xa7   :  { %10854 = vmatmul.mubr.msk.f32.gmra.mrb[6].mxu0 %vm155_vm1, %v13824_v1 }
  0xa8   :  { %10856 = vmatprep.mubr.msk.f32.mxu0 %vm13415_vm0, %v13416_v6 }
  0xab   :  { %10857 = vmatmul.mubr.msk.f32.gmra.mrb[8].mxu0 %vm155_vm1, %v13833_v2 }
  0xac   :  { %10859 = vmatprep.mubr.msk.f32.mxu0 %vm13415_vm0, %v13416_v6 }
  0xaf   :  { %10860 = vmatmul.mubr.msk.f32.gmra.mrb[10].mxu0 %vm155_vm1, %v13842_v4 }
  0xb0   :  { %10862 = vmatprep.mubr.msk.f32.mxu0 %vm13415_vm0, %v13416_v6 }
  0xb3   :  { %10863 = vmatmul.mubr.msk.f32.gmra.mrb[12].mxu0 %vm155_vm1, %v13851_v5 }
  0xb4   :  { %10865 = vmatprep.mubr.msk.f32.mxu0 %vm13415_vm0, %v13416_v6 }
  0xb7   :  { %10866 = vmatmul.mubr.msk.f32.gmra.mrb[14].mxu0 %vm155_vm1, %v13860_v7 }
  0xb8   :  { %10868 = vmatprep.mubr.msk.f32.mxu0 %vm13415_vm0, %v13416_v6 }
  0xbb   :  { %10869 = vmatmul.mubr.msk.f32.gmra.mrb[16].mxu0 %vm155_vm1, %v13869_v8 }
  0xbc   :  { %10871 = vmatprep.mubr.msk.f32.mxu0 %vm13415_vm0, %v13416_v6 }
  0xbf   :  { %10872 = vmatmul.mubr.msk.f32.gmra.mrb[18].mxu0 %vm155_vm1, %v13878_v9 }
  0xc0   :  { %10874 = vmatprep.mubr.msk.f32.mxu0 %vm13415_vm0, %v13416_v6 }
  0xc3   :  { %10875 = vmatmul.mubr.msk.f32.gmra.mrb[20].mxu0 %vm155_vm1, %v13887_v10 }
  0xc4   :  { %10877 = vmatprep.mubr.msk.f32.mxu0 %vm13415_vm0, %v13416_v6 }
  0xc7   :  { %10878 = vmatmul.mubr.msk.f32.gmra.mrb[22].mxu0 %vm155_vm1, %v13896_v11 }
  0xc8   :  { %10880 = vmatprep.mubr.msk.f32.mxu0 %vm13415_vm0, %v13416_v6 }
  0xcb   :  { %10881 = vmatmul.mubr.msk.f32.gmra.mrb[24].mxu0 %vm155_vm1, %v13905_v12 }
  0xcc   :  { %10883 = vmatprep.mubr.msk.f32.mxu0 %vm13415_vm0, %v13416_v6 }
  0xcf   :  { %10884 = vmatmul.mubr.msk.f32.gmra.mrb[26].mxu0 %vm155_vm1, %v13914_v13 }
  0xd0   :  { %10886 = vmatprep.mubr.msk.f32.mxu0 %vm13415_vm0, %v13416_v6 }
  0xd3   :  { %10887 = vmatmul.mubr.msk.f32.gmra.mrb[28].mxu0 %vm155_vm1, %v13923_v14 }
  0xd4   :  { %10889 = vmatprep.mubr.msk.f32.mxu0 %vm13415_vm0, %v13416_v6 }
  0xd7   :  { %10890 = vmatmul.mubr.msk.f32.gmra.mrb[30].mxu0 %vm155_vm1, %v13932_v15 }
  0xd8   :  { %10892 = vmatprep.mubr.msk.f32.mxu0 %vm13415_vm0, %v13416_v6 }
  0xdb   :  { %10893 = vmatmul.mubr.msk.f32.gmra.mrb[32].mxu0 %vm155_vm1, %v13941_v16 }
  0xdc   :  { %10895 = vmatprep.mubr.msk.f32.mxu0 %vm13415_vm0, %v13416_v6 }
  0xdf   :  { %10896 = vmatmul.mubr.msk.f32.gmra.mrb[34].mxu0 %vm155_vm1, %v13950_v17 }
  0xe0   :  { %10898 = vmatprep.mubr.msk.f32.mxu0 %vm13415_vm0, %v13416_v6 }
  0xe3   :  { %10899 = vmatmul.mubr.msk.f32.gmra.mrb[36].mxu0 %vm155_vm1, %v13959_v18 }
  0xe4   :  { %10901 = vmatprep.mubr.msk.f32.mxu0 %vm13415_vm0, %v13416_v6 }
  0xe7   :  { %10902 = vmatmul.mubr.msk.f32.gmra.mrb[38].mxu0 %vm155_vm1, %v13968_v19 }
  0xe8   :  { %10904 = vmatprep.mubr.msk.f32.mxu0 %vm13415_vm0, %v13416_v6 }
  0xeb   :  { %10905 = vmatmul.mubr.msk.f32.gmra.mrb[40].mxu0 %vm155_vm1, %v13977_v20 }
  0xec   :  { %10907 = vmatprep.mubr.msk.f32.mxu0 %vm13415_vm0, %v13416_v6 }
  0xef   :  { %10908 = vmatmul.mubr.msk.f32.gmra.mrb[42].mxu0 %vm155_vm1, %v862_v21 }
  0xf0   :  { %10910 = vmatprep.mubr.msk.f32.mxu0 %vm13415_vm0, %v13416_v6 }
  0xf3   :  { %10911 = vmatmul.mubr.msk.f32.gmra.mrb[44].mxu0 %vm155_vm1, %v863_v22 }
  0xf4   :  { %10913 = vmatprep.mubr.msk.f32.mxu0 %vm13415_vm0, %v13416_v6 }
  0xf7   :  { %10914 = vmatmul.mubr.msk.f32.gmra.mrb[46].mxu0 %vm155_vm1, %v864_v23 }
  0xf8   :  { %10916 = vmatprep.mubr.msk.f32.mxu0 %vm13415_vm0, %v13416_v6 }
  0xfb   :  { %10917 = vmatmul.mubr.msk.f32.gmra.mrb[48].mxu0 %vm155_vm1, %v865_v24 }
  0xfc   :  { %10927 = vmatprep.mubr.msk.f32.mxu0 %vm13415_vm0, %v13416_v6 }
  0xff   :  { %10928 = vmatmul.mubr.msk.f32.vlgmr.msra.gmra.mrb[0].mxu0 %vm155_vm1, %v13804_v62  ;;  %v1605_v62 = vld [vmem:[%s17127_s0 + $0xcb] sm:$0xff] }
 0x100   :  { %12198 = vmatpush3.bf16.msra.mxu0 %v12197_v27  ;;  %10930 = vmatprep.mubr.msk.f32.mxu0 %vm13415_vm0, %v13416_v6  ;;  %v14477_v27 = vld [vmem:[%s17127_s0 + $0xac] sm:$0xff] }
 0x101   :  { %12199 = vmatprep.subr.bf16.mxu0 %v17140_v3 }
 0x103   :  { %10931 = vmatmul.mubr.msk.f32.gmra.mrb[2].mxu0 %vm155_vm1, %v13814_v0  ;;  %v9622_v0 = vld [vmem:[%s17128_s1 + $0xc8] sm:$0xff] }
 0x104   :  { %10933 = vmatprep.mubr.msk.f32.mxu0 %vm13415_vm0, %v13416_v6  ;;  %12201 = vmatpush3.bf16.msra.mxu0 %v12200_v30  ;;  %v1974_v30 = vld [vmem:[%s17127_s0 + $0xc4] sm:$0xff] }
 0x105   :  { %12202 = vmatprep.subr.bf16.mxu0 %v17140_v3 }
 0x107   :  { %10934 = vmatmul.mubr.msk.f32.gmra.mrb[4].mxu0 %vm155_vm1, %v13824_v1  ;;  %v1951_v1 = vld [vmem:[%s17127_s0 + $0xc] sm:$0xff] }
 0x108   :  { %10936 = vmatprep.mubr.msk.f32.mxu0 %vm13415_vm0, %v13416_v6 }
 0x10b   :  { %10937 = vmatmul.mubr.msk.f32.gmra.mrb[6].mxu0 %vm155_vm1, %v13833_v2  ;;  %v12209_v2 = vpack.c.bf16 %v9622_v0, %v9621_v63  ;;  %v115_v63 = vld [vmem:[%s17127_s0 + $0x70] sm:$0xff]  ;;  %v2696_v0 = vld [vmem:[%s17127_s0 + $0x3d] sm:$0xff] }
 0x10c   :  { %10939 = vmatprep.mubr.msk.f32.mxu0 %vm13415_vm0, %v13416_v6 }
 0x10f   :  { %10940 = vmatmul.mubr.msk.f32.gmra.mrb[8].mxu0 %vm155_vm1, %v13842_v4  ;;  %v9623_v4 = vld [vmem:[%s17128_s1 + $0xd0] sm:$0xff] }
 0x110   :  { %10942 = vmatprep.mubr.msk.f32.mxu0 %vm13415_vm0, %v13416_v6 }
 0x113   :  { %10943 = vmatmul.mubr.msk.f32.gmra.mrb[10].mxu0 %vm155_vm1, %v13851_v5  ;;  %v9624_v5 = vld [vmem:[%s17128_s1 + $0xd8] sm:$0xff] }
 0x114   :  { %10945 = vmatprep.mubr.msk.f32.mxu0 %vm13415_vm0, %v13416_v6 }
 0x117   :  { %10946 = vmatmul.mubr.msk.f32.gmra.mrb[12].mxu0 %vm155_vm1, %v13860_v7  ;;  %v14304_v7 = vld [vmem:[%s17127_s0 + $0x14] sm:$0xff] }
 0x118   :  { %10948 = vmatprep.mubr.msk.f32.mxu0 %vm13415_vm0, %v13416_v6 }
 0x11b   :  { %10949 = vmatmul.mubr.msk.f32.gmra.mrb[14].mxu0 %vm155_vm1, %v13869_v8  ;;  %v12212_v8 = vpack.c.bf16 %v9624_v5, %v9623_v4  ;;  %v116_v4 = vld [vmem:[%s17127_s0 + $0x78] sm:$0xff]  ;;  %v2697_v5 = vld [vmem:[%s17127_s0 + $0x45] sm:$0xff] }
 0x11c   :  { %10951 = vmatprep.mubr.msk.f32.mxu0 %vm13415_vm0, %v13416_v6 }
 0x11f   :  { %10952 = vmatmul.mubr.msk.f32.gmra.mrb[16].mxu0 %vm155_vm1, %v13878_v9  ;;  %v14314_v9 = vld [vmem:[%s17127_s0 + $0x1c] sm:$0xff] }
 0x120   :  { %10954 = vmatprep.mubr.msk.f32.mxu0 %vm13415_vm0, %v13416_v6 }
 0x123   :  { %10955 = vmatmul.mubr.msk.f32.gmra.mrb[18].mxu0 %vm155_vm1, %v13887_v10  ;;  %v14324_v10 = vld [vmem:[%s17127_s0 + $0x24] sm:$0xff] }
 0x124   :  { %10957 = vmatprep.mubr.msk.f32.mxu0 %vm13415_vm0, %v13416_v6 }
 0x127   :  { %10958 = vmatmul.mubr.msk.f32.gmra.mrb[20].mxu0 %vm155_vm1, %v13896_v11  ;;  %v14333_v11 = vld [vmem:[%s17127_s0 + $0x2c] sm:$0xff] }
 0x128   :  { %10960 = vmatprep.mubr.msk.f32.mxu0 %vm13415_vm0, %v13416_v6 }
 0x12b   :  { %10961 = vmatmul.mubr.msk.f32.gmra.mrb[22].mxu0 %vm155_vm1, %v13905_v12  ;;  %v14342_v12 = vld [vmem:[%s17127_s0 + $0x34] sm:$0xff] }
 0x12c   :  { %10963 = vmatprep.mubr.msk.f32.mxu0 %vm13415_vm0, %v13416_v6 }
 0x12f   :  { %10964 = vmatmul.mubr.msk.f32.gmra.mrb[24].mxu0 %vm155_vm1, %v13914_v13  ;;  %v14351_v13 = vld [vmem:[%s17127_s0 + $0x3c] sm:$0xff] }
 0x130   :  { %10966 = vmatprep.mubr.msk.f32.mxu0 %vm13415_vm0, %v13416_v6 }
 0x133   :  { %10967 = vmatmul.mubr.msk.f32.gmra.mrb[26].mxu0 %vm155_vm1, %v13923_v14  ;;  %v14360_v14 = vld [vmem:[%s17127_s0 + $0x44] sm:$0xff] }
 0x134   :  { %10969 = vmatprep.mubr.msk.f32.mxu0 %vm13415_vm0, %v13416_v6 }
 0x137   :  { %10970 = vmatmul.mubr.msk.f32.gmra.mrb[28].mxu0 %vm155_vm1, %v13932_v15  ;;  %v14369_v15 = vld [vmem:[%s17127_s0 + $0x4c] sm:$0xff] }
 0x138   :  { %10972 = vmatprep.mubr.msk.f32.mxu0 %vm13415_vm0, %v13416_v6 }
 0x13b   :  { %10973 = vmatmul.mubr.msk.f32.gmra.mrb[30].mxu0 %vm155_vm1, %v13941_v16  ;;  %v14378_v16 = vld [vmem:[%s17127_s0 + $0x54] sm:$0xff] }
 0x13c   :  { %10975 = vmatprep.mubr.msk.f32.mxu0 %vm13415_vm0, %v13416_v6 }
 0x13f   :  { %10976 = vmatmul.mubr.msk.f32.gmra.mrb[32].mxu0 %vm155_vm1, %v13950_v17  ;;  %v14387_v17 = vld [vmem:[%s17127_s0 + $0x5c] sm:$0xff] }
 0x140   :  { %10978 = vmatprep.mubr.msk.f32.mxu0 %vm13415_vm0, %v13416_v6 }
 0x143   :  { %10979 = vmatmul.mubr.msk.f32.gmra.mrb[34].mxu0 %vm155_vm1, %v13959_v18  ;;  %v14396_v18 = vld [vmem:[%s17127_s0 + $0x64] sm:$0xff] }
 0x144   :  { %10981 = vmatprep.mubr.msk.f32.mxu0 %vm13415_vm0, %v13416_v6 }
 0x147   :  { %10982 = vmatmul.mubr.msk.f32.gmra.mrb[36].mxu0 %vm155_vm1, %v13968_v19  ;;  %v14405_v19 = vld [vmem:[%s17127_s0 + $0x6c] sm:$0xff] }
 0x148   :  { %10984 = vmatprep.mubr.msk.f32.mxu0 %vm13415_vm0, %v13416_v6 }
 0x14b   :  { %10985 = vmatmul.mubr.msk.f32.gmra.mrb[38].mxu0 %vm155_vm1, %v13977_v20  ;;  %v14414_v20 = vld [vmem:[%s17127_s0 + $0x74] sm:$0xff] }
 0x14c   :  { %10987 = vmatprep.mubr.msk.f32.mxu0 %vm13415_vm0, %v13416_v6 }
 0x14f   :  { %10988 = vmatmul.mubr.msk.f32.gmra.mrb[40].mxu0 %vm155_vm1, %v862_v21  ;;  %v14423_v21 = vld [vmem:[%s17127_s0 + $0x7c] sm:$0xff] }
 0x150   :  { %10990 = vmatprep.mubr.msk.f32.mxu0 %vm13415_vm0, %v13416_v6 }
 0x153   :  { %10991 = vmatmul.mubr.msk.f32.gmra.mrb[42].mxu0 %vm155_vm1, %v863_v22  ;;  %v14432_v22 = vld [vmem:[%s17127_s0 + $0x84] sm:$0xff] }
 0x154   :  { %10993 = vmatprep.mubr.msk.f32.mxu0 %vm13415_vm0, %v13416_v6 }
 0x157   :  { %10994 = vmatmul.mubr.msk.f32.gmra.mrb[44].mxu0 %vm155_vm1, %v864_v23  ;;  %v14441_v23 = vld [vmem:[%s17127_s0 + $0x8c] sm:$0xff] }
 0x158   :  { %10996 = vmatprep.mubr.msk.f32.mxu0 %vm13415_vm0, %v13416_v6 }
 0x15b   :  { %10997 = vmatmul.mubr.msk.f32.gmra.mrb[46].mxu0 %vm155_vm1, %v865_v24  ;;  %v14450_v24 = vld [vmem:[%s17127_s0 + $0x94] sm:$0xff] }
 0x15c   :  { %10999 = vmatprep.mubr.msk.f32.mxu0 %vm13415_vm0, %v13416_v6 }
 0x15f   :  { %11000 = vmatmul.mubr.msk.f32.gmra.mrb[48].mxu0 %vm155_vm1, %v1235_v31  ;;  %v1975_v31 = vld [vmem:[%s17127_s0 + $0xcc] sm:$0xff] }
 0x160   :  { %11010 = vmatprep.mubr.msk.f32.mxu0 %vm13415_vm0, %v13416_v6 }
 0x163   :  { %11011 = vmatmul.mubr.msk.f32.vlgmr.msra.gmra.mrb[0].mxu0 %vm155_vm1, %v1581_v34  ;;  %v12215_v34 = vpack.c.bf16 %v9651_v33, %v9650_v32  ;;  %v3480_v32 = vld [vmem:[%s17130_s3 + $0xc0] sm:$0xff]  ;;  %v123_v33 = vld [vmem:[%s17127_s0 + $0xb0] sm:$0xff] }
 0x164   :  { %12204 = vmatpush3.bf16.msra.mxu0 %v12203_v35  ;;  %11013 = vmatprep.mubr.msk.f32.mxu0 %vm13415_vm0, %v13416_v6  ;;  %v9652_v35 = vld [vmem:[%s17128_s1 + $0xf0] sm:$0xff] }
 0x165   :  { %12205 = vmatprep.subr.bf16.mxu0 %v17140_v3  ;;  %v12218_v37 = vpack.c.bf16 %v9653_v36, %v9652_v35  ;;  %v6389_v35 = vld [vmem:[%s17133_s6] sm:$0xff]  ;;  %v6390_v36 = vld [vmem:[%s17133_s6 + $0x8] sm:$0xff] }
 0x167   :  { %11014 = vmatmul.mubr.msk.f32.gmra.mrb[2].mxu0 %vm155_vm1, %v1582_v38  ;;  %v14550_v38 = vld [vmem:[#allocation3] sm:$0xff] }
 0x168   :  { %11016 = vmatprep.mubr.msk.f32.mxu0 %vm13415_vm0, %v13416_v6  ;;  %12207 = vmatpush3.bf16.msra.mxu0 %v12206_v39  ;;  %v9679_v39 = vld [vmem:[%s17128_s1 + $0x100] sm:$0xff] }
 0x169   :  { %12208 = vmatprep.subr.bf16.mxu0 %v17140_v3 }
 0x16b   :  { %11017 = vmatmul.mubr.msk.f32.gmra.mrb[4].mxu0 %vm155_vm1, %v1583_v40  ;;  %v9680_v40 = vld [vmem:[%s17128_s1 + $0x108] sm:$0xff] }
 0x16c   :  { %11019 = vmatprep.mubr.msk.f32.mxu0 %vm13415_vm0, %v13416_v6 }
 0x16f   :  { %11020 = vmatmul.mubr.msk.f32.gmra.mrb[6].mxu0 %vm155_vm1, %v1584_v41  ;;  %v2691_v41 = vld [vmem:[%s17127_s0 + $0x15] sm:$0xff] }
 0x170   :  { %11022 = vmatprep.mubr.msk.f32.mxu0 %vm13415_vm0, %v13416_v6 }
 0x173   :  { %11023 = vmatmul.mubr.msk.f32.gmra.mrb[8].mxu0 %vm155_vm1, %v1585_v42  ;;  %v12221_v42 = vpack.c.bf16 %v9680_v40, %v9679_v39  ;;  %v6391_v39 = vld [vmem:[%s17133_s6 + $0x10] sm:$0xff]  ;;  %v6392_v40 = vld [vmem:[%s17133_s6 + $0x18] sm:$0xff] }
 0x174   :  { %11025 = vmatprep.mubr.msk.f32.mxu0 %vm13415_vm0, %v13416_v6 }
 0x177   :  { %11026 = vmatmul.mubr.msk.f32.gmra.mrb[10].mxu0 %vm155_vm1, %v1586_v43  ;;  %v9681_v43 = vld [vmem:[%s17128_s1 + $0x110] sm:$0xff] }
 0x178   :  { %11028 = vmatprep.mubr.msk.f32.mxu0 %vm13415_vm0, %v13416_v6 }
 0x17b   :  { %11029 = vmatmul.mubr.msk.f32.gmra.mrb[12].mxu0 %vm155_vm1, %v1587_v44  ;;  %v9682_v44 = vld [vmem:[%s17128_s1 + $0x118] sm:$0xff] }
 0x17c   :  { %11031 = vmatprep.mubr.msk.f32.mxu0 %vm13415_vm0, %v13416_v6 }
 0x17f   :  { %11032 = vmatmul.mubr.msk.f32.gmra.mrb[14].mxu0 %vm155_vm1, %v1588_v45  ;;  %v13417_v45 = vmov 0  }
 0x180   :  { %11034 = vmatprep.mubr.msk.f32.mxu0 %vm13415_vm0, %v13416_v6  ;;  %13269 = vset.pattern.permute.xlu0 %v13417_v45 }
 0x181   :  { %13270 = vset.pattern.permute.xlu1 %v13417_v45  ;;  %v2707_v45 = vld [vmem:[%s17127_s0 + $0x95] sm:$0xff] }
 0x183   :  { %11035 = vmatmul.mubr.msk.f32.gmra.mrb[16].mxu0 %vm155_vm1, %v1589_v46  ;;  %v3456_v46 = vld [vmem:[%s17130_s3] sm:$0xff] }
 0x184   :  { %11037 = vmatprep.mubr.msk.f32.mxu0 %vm13415_vm0, %v13416_v6  ;;  %3483 = vperm.xlu0 %13269, %v3456_v46   ;;  %v6395_v46 = vld [vmem:[%s17133_s6 + $0x30] sm:$0xff] }
 0x187   :  { %11038 = vmatmul.mubr.msk.f32.gmra.mrb[18].mxu0 %vm155_vm1, %v1590_v47  ;;  %v2692_v47 = vld [vmem:[%s17127_s0 + $0x1d] sm:$0xff] }
 0x188   :  { %11040 = vmatprep.mubr.msk.f32.mxu0 %vm13415_vm0, %v13416_v6 }
 0x18b   :  { %11041 = vmatmul.mubr.msk.f32.gmra.mrb[20].mxu0 %vm155_vm1, %v1591_v48  ;;  %v12224_v48 = vpack.c.bf16 %v9682_v44, %v9681_v43  ;;  %v6393_v43 = vld [vmem:[%s17133_s6 + $0x20] sm:$0xff]  ;;  %v6394_v44 = vld [vmem:[%s17133_s6 + $0x28] sm:$0xff] }
 0x18c   :  { %11043 = vmatprep.mubr.msk.f32.mxu0 %vm13415_vm0, %v13416_v6 }
 0x18f   :  { %11044 = vmatmul.mubr.msk.f32.gmra.mrb[22].mxu0 %vm155_vm1, %v1592_v49  ;;  %v3458_v49 = vld [vmem:[%s17130_s3 + $0x10] sm:$0xff] }
 0x190   :  { %11046 = vmatprep.mubr.msk.f32.mxu0 %vm13415_vm0, %v13416_v6  ;;  %3493 = vperm.xlu1 %13270, %v3458_v49   ;;  %v6397_v49 = vld [vmem:[%s17133_s6 + $0x40] sm:$0xff] }
 0x193   :  { %11047 = vmatmul.mubr.msk.f32.gmra.mrb[24].mxu0 %vm155_vm1, %v1593_v50  ;;  %v3457_v50 = vld [vmem:[%s17130_s3 + $0x8] sm:$0xff] }
 0x194   :  { %11049 = vmatprep.mubr.msk.f32.mxu0 %vm13415_vm0, %v13416_v6  ;;  %3488 = vperm.xlu0 %13269, %v3457_v50   ;;  %v6398_v50 = vld [vmem:[%s17133_s6 + $0x48] sm:$0xff] }
 0x197   :  { %11050 = vmatmul.mubr.msk.f32.gmra.mrb[26].mxu0 %vm155_vm1, %v1594_v51  ;;  %v112_v51 = vld [vmem:[%s17127_s0 + $0x58] sm:$0xff] }
 0x198   :  { %11052 = vmatprep.mubr.msk.f32.mxu0 %vm13415_vm0, %v13416_v6  ;;  %10712 = vmatmul.mubr.msk.f32.vlgmr.msra.gmra.mrb[0].mxu1 %vm155_vm1, %v112_v51  ;;  %v2709_v51 = vld [vmem:[%s17127_s0 + $0xa5] sm:$0xff] }
 0x199   :  { %10714 = vmatprep.mubr.msk.f32.mxu1 %vm13415_vm0, %v14550_v38 }
 0x19b   :  { %11053 = vmatmul.mubr.msk.f32.gmra.mrb[28].mxu0 %vm155_vm1, %v1595_v52  ;;  %v2693_v52 = vld [vmem:[%s17127_s0 + $0x25] sm:$0xff] }
 0x19c   :  { %11055 = vmatprep.mubr.msk.f32.mxu0 %vm13415_vm0, %v13416_v6 }
 0x19f   :  { %11056 = vmatmul.mubr.msk.f32.gmra.mrb[30].mxu0 %vm155_vm1, %v1596_v53  ;;  %v3459_v53 = vld [vmem:[%s17130_s3 + $0x18] sm:$0xff] }
 0x1a0   :  { %11058 = vmatprep.mubr.msk.f32.mxu0 %vm13415_vm0, %v13416_v6  ;;  %3498 = vperm.xlu1 %13270, %v3459_v53   ;;  %v6400_v53 = vld [vmem:[%s17133_s6 + $0x58] sm:$0xff] }
 0x1a3   :  { %11059 = vmatmul.mubr.msk.f32.gmra.mrb[32].mxu0 %vm155_vm1, %v1597_v54  ;;  %v3460_v54 = vld [vmem:[%s17130_s3 + $0x20] sm:$0xff] }
 0x1a4   :  { %11061 = vmatprep.mubr.msk.f32.mxu0 %vm13415_vm0, %v13416_v6  ;;  %3503 = vperm.xlu0 %13269, %v3460_v54   ;;  %v2710_v54 = vld [vmem:[%s17127_s0 + $0xad] sm:$0xff] }
 0x1a7   :  { %11062 = vmatmul.mubr.msk.f32.gmra.mrb[34].mxu0 %vm155_vm1, %v1598_v55  ;;  %v113_v55 = vld [vmem:[%s17127_s0 + $0x60] sm:$0xff] }
 0x1a8   :  { %11064 = vmatprep.mubr.msk.f32.mxu0 %vm13415_vm0, %v13416_v6  ;;  %10715 = vmatmul.mubr.msk.f32.gmra.mrb[2].mxu1 %vm155_vm1, %v113_v55  ;;  %v6401_v55 = vld [vmem:[%s17133_s6 + $0x60] sm:$0xff] }
 0x1a9   :  { %10717 = vmatprep.mubr.msk.f32.mxu1 %vm13415_vm0, %v14550_v38 }
 0x1ab   :  { %11065 = vmatmul.mubr.msk.f32.gmra.mrb[36].mxu0 %vm155_vm1, %v1599_v56  ;;  %v2694_v56 = vld [vmem:[%s17127_s0 + $0x2d] sm:$0xff] }
 0x1ac   :  { %11067 = vmatprep.mubr.msk.f32.mxu0 %vm13415_vm0, %v13416_v6 }
 0x1af   :  { %11068 = vmatmul.mubr.msk.f32.gmra.mrb[38].mxu0 %vm155_vm1, %v1600_v57  ;;  %v3461_v57 = vld [vmem:[%s17130_s3 + $0x28] sm:$0xff] }
 0x1b0   :  { %11070 = vmatprep.mubr.msk.f32.mxu0 %vm13415_vm0, %v13416_v6  ;;  %3508 = vperm.xlu1 %13270, %v3461_v57   ;;  %v2711_v57 = vld [vmem:[%s17127_s0 + $0xb5] sm:$0xff] }
 0x1b3   :  { %11071 = vmatmul.mubr.msk.f32.gmra.mrb[40].mxu0 %vm155_vm1, %v1601_v58  ;;  %v3462_v58 = vld [vmem:[%s17130_s3 + $0x30] sm:$0xff] }
 0x1b4   :  { %11073 = vmatprep.mubr.msk.f32.mxu0 %vm13415_vm0, %v13416_v6  ;;  %3513 = vperm.xlu0 %13269, %v3462_v58   ;;  %v6403_v58 = vld [vmem:[%s17133_s6 + $0x70] sm:$0xff] }
 0x1b7   :  { %11074 = vmatmul.mubr.msk.f32.gmra.mrb[42].mxu0 %vm155_vm1, %v1602_v59  ;;  %v114_v59 = vld [vmem:[%s17127_s0 + $0x68] sm:$0xff] }
 0x1b8   :  { %11076 = vmatprep.mubr.msk.f32.mxu0 %vm13415_vm0, %v13416_v6  ;;  %10718 = vmatmul.mubr.msk.f32.gmra.mrb[4].mxu1 %vm155_vm1, %v114_v59  ;;  %v6404_v59 = vld [vmem:[%s17133_s6 + $0x78] sm:$0xff] }
 0x1b9   :  { %10720 = vmatprep.mubr.msk.f32.mxu1 %vm13415_vm0, %v14550_v38 }
 0x1bb   :  { %11077 = vmatmul.mubr.msk.f32.gmra.mrb[44].mxu0 %vm155_vm1, %v1603_v60  ;;  %v2695_v60 = vld [vmem:[%s17127_s0 + $0x35] sm:$0xff] }
 0x1bc   :  { %11079 = vmatprep.mubr.msk.f32.mxu0 %vm13415_vm0, %v13416_v6  ;;  %10721 = vmatmul.mubr.msk.f32.gmra.mrb[6].mxu1 %vm155_vm1, %v115_v63  ;;  %v2713_v63 = vld [vmem:[%s17127_s0 + $0xc5] sm:$0xff] }
 0x1bd   :  { %10723 = vmatprep.mubr.msk.f32.mxu1 %vm13415_vm0, %v14550_v38 }
 0x1bf   :  { %11080 = vmatmul.mubr.msk.f32.gmra.mrb[46].mxu0 %vm155_vm1, %v1604_v61  ;;  %v3463_v61 = vld [vmem:[%s17130_s3 + $0x38] sm:$0xff] }
 0x1c0   :  { %11082 = vmatprep.mubr.msk.f32.mxu0 %vm13415_vm0, %v13416_v6  ;;  %3518 = vperm.xlu1 %13270, %v3463_v61   ;;  %v8815_v61 = vld [vmem:[%s17136_s9] sm:$0xff] }
 0x1c1   :  { %10724 = vmatmul.mubr.msk.f32.gmra.mrb[8].mxu1 %vm155_vm1, %v116_v4  ;;  %v8819_v4 = vld [vmem:[%s17136_s9 + $0x20] sm:$0xff] }
 0x1c2   :  { %10726 = vmatprep.mubr.msk.f32.mxu1 %vm13415_vm0, %v14550_v38 }
 0x1c3   :  { %11083 = vmatmul.mubr.msk.f32.gmra.mrb[48].mxu0 %vm155_vm1, %v1605_v62  ;;  %v3464_v62 = vld [vmem:[%s17130_s3 + $0x40] sm:$0xff] }
 0x1c4   :  { %11093 = vmatprep.mubr.msk.f32.mxu0 %vm13415_vm0, %v13416_v6  ;;  %3523 = vperm.xlu0 %13269, %v3464_v62   ;;  %v8816_v62 = vld [vmem:[%s17136_s9 + $0x8] sm:$0xff] }
 0x1c7   :  { %11094 = vmatmul.mubr.msk.f32.vlgmr.msra.gmra.mrb[0].mxu0 %vm155_vm1, %v1951_v1  ;;  %v3465_v1 = vld [vmem:[%s17130_s3 + $0x48] sm:$0xff] }
 0x1c8   :  { %12210 = vmatpush3.bf16.msra.mxu0 %v12209_v2  ;;  %11096 = vmatprep.mubr.msk.f32.mxu0 %vm13415_vm0, %v13416_v6  ;;  %v3466_v2 = vld [vmem:[%s17130_s3 + $0x50] sm:$0xff] }
 0x1c9   :  { %12211 = vmatprep.subr.bf16.mxu0 %v17140_v3  ;;  %3528 = vperm.xlu1 %13270, %v3465_v1   ;;  %v8818_v1 = vld [vmem:[%s17136_s9 + $0x18] sm:$0xff] }
 0x1ca   :  { %3533 = vperm.xlu0 %13269, %v3466_v2   ;;  %v2714_v2 = vld [vmem:[%s17127_s0 + $0xcd] sm:$0xff] }
 0x1cb   :  { %11097 = vmatmul.mubr.msk.f32.gmra.mrb[2].mxu0 %vm155_vm1, %v14304_v7 }
 0x1cc   :  { %11099 = vmatprep.mubr.msk.f32.mxu0 %vm13415_vm0, %v13416_v6  ;;  %12213 = vmatpush3.bf16.msra.mxu0 %v12212_v8  ;;  %v3468_v8 = vld [vmem:[%s17130_s3 + $0x60] sm:$0xff] }
 0x1cd   :  { %12214 = vmatprep.subr.bf16.mxu0 %v17140_v3 }
 0x1ce   :  { %3543 = vperm.xlu0 %13269, %v3468_v8   ;;  %v8821_v8 = vld [vmem:[%s17136_s9 + $0x30] sm:$0xff] }
 0x1cf   :  { %11100 = vmatmul.mubr.msk.f32.gmra.mrb[4].mxu0 %vm155_vm1, %v14314_v9 }
 0x1d0   :  { %11102 = vmatprep.mubr.msk.f32.mxu0 %vm13415_vm0, %v13416_v6 }
 0x1d3   :  { %11103 = vmatmul.mubr.msk.f32.gmra.mrb[6].mxu0 %vm155_vm1, %v14324_v10 }
 0x1d4   :  { %11105 = vmatprep.mubr.msk.f32.mxu0 %vm13415_vm0, %v13416_v6 }
 0x1d7   :  { %11106 = vmatmul.mubr.msk.f32.gmra.mrb[8].mxu0 %vm155_vm1, %v14333_v11 }
 0x1d8   :  { %11108 = vmatprep.mubr.msk.f32.mxu0 %vm13415_vm0, %v13416_v6 }
 0x1db   :  { %11109 = vmatmul.mubr.msk.f32.gmra.mrb[10].mxu0 %vm155_vm1, %v14342_v12 }
 0x1dc   :  { %11111 = vmatprep.mubr.msk.f32.mxu0 %vm13415_vm0, %v13416_v6 }
 0x1df   :  { %11112 = vmatmul.mubr.msk.f32.gmra.mrb[12].mxu0 %vm155_vm1, %v14351_v13 }
 0x1e0   :  { %11114 = vmatprep.mubr.msk.f32.mxu0 %vm13415_vm0, %v13416_v6 }
 0x1e3   :  { %11115 = vmatmul.mubr.msk.f32.gmra.mrb[14].mxu0 %vm155_vm1, %v14360_v14 }
 0x1e4   :  { %11117 = vmatprep.mubr.msk.f32.mxu0 %vm13415_vm0, %v13416_v6 }
 0x1e7   :  { %11118 = vmatmul.mubr.msk.f32.gmra.mrb[16].mxu0 %vm155_vm1, %v14369_v15 }
 0x1e8   :  { %11120 = vmatprep.mubr.msk.f32.mxu0 %vm13415_vm0, %v13416_v6 }
 0x1eb   :  { %11121 = vmatmul.mubr.msk.f32.gmra.mrb[18].mxu0 %vm155_vm1, %v14378_v16 }
 0x1ec   :  { %11123 = vmatprep.mubr.msk.f32.mxu0 %vm13415_vm0, %v13416_v6 }
 0x1ef   :  { %11124 = vmatmul.mubr.msk.f32.gmra.mrb[20].mxu0 %vm155_vm1, %v14387_v17 }
 0x1f0   :  { %11126 = vmatprep.mubr.msk.f32.mxu0 %vm13415_vm0, %v13416_v6 }
 0x1f3   :  { %11127 = vmatmul.mubr.msk.f32.gmra.mrb[22].mxu0 %vm155_vm1, %v14396_v18 }
 0x1f4   :  { %11129 = vmatprep.mubr.msk.f32.mxu0 %vm13415_vm0, %v13416_v6 }
 0x1f7   :  { %11130 = vmatmul.mubr.msk.f32.gmra.mrb[24].mxu0 %vm155_vm1, %v14405_v19 }
 0x1f8   :  { %11132 = vmatprep.mubr.msk.f32.mxu0 %vm13415_vm0, %v13416_v6 }
 0x1fb   :  { %11133 = vmatmul.mubr.msk.f32.gmra.mrb[26].mxu0 %vm155_vm1, %v14414_v20 }
 0x1fc   :  { %11135 = vmatprep.mubr.msk.f32.mxu0 %vm13415_vm0, %v13416_v6 }
 0x1ff   :  { %11136 = vmatmul.mubr.msk.f32.gmra.mrb[28].mxu0 %vm155_vm1, %v14423_v21 }
 0x200   :  { %11138 = vmatprep.mubr.msk.f32.mxu0 %vm13415_vm0, %v13416_v6 }
 0x203   :  { %11139 = vmatmul.mubr.msk.f32.gmra.mrb[30].mxu0 %vm155_vm1, %v14432_v22 }
 0x204   :  { %11141 = vmatprep.mubr.msk.f32.mxu0 %vm13415_vm0, %v13416_v6 }
 0x207   :  { %11142 = vmatmul.mubr.msk.f32.gmra.mrb[32].mxu0 %vm155_vm1, %v14441_v23 }
 0x208   :  { %11144 = vmatprep.mubr.msk.f32.mxu0 %vm13415_vm0, %v13416_v6 }
 0x20b   :  { %11145 = vmatmul.mubr.msk.f32.gmra.mrb[34].mxu0 %vm155_vm1, %v14450_v24 }
 0x20c   :  { %11147 = vmatprep.mubr.msk.f32.mxu0 %vm13415_vm0, %v13416_v6 }
 0x20f   :  { %11148 = vmatmul.mubr.msk.f32.gmra.mrb[36].mxu0 %vm155_vm1, %v14459_v25 }
 0x210   :  { %11150 = vmatprep.mubr.msk.f32.mxu0 %vm13415_vm0, %v13416_v6 }
 0x213   :  { %11151 = vmatmul.mubr.msk.f32.gmra.mrb[38].mxu0 %vm155_vm1, %v14468_v26 }
 0x214   :  { %11153 = vmatprep.mubr.msk.f32.mxu0 %vm13415_vm0, %v13416_v6 }
 0x217   :  { %11154 = vmatmul.mubr.msk.f32.gmra.mrb[40].mxu0 %vm155_vm1, %v14477_v27 }
 0x218   :  { %11156 = vmatprep.mubr.msk.f32.mxu0 %vm13415_vm0, %v13416_v6 }
 0x21b   :  { %11157 = vmatmul.mubr.msk.f32.gmra.mrb[42].mxu0 %vm155_vm1, %v14486_v28 }
 0x21c   :  { %11159 = vmatprep.mubr.msk.f32.mxu0 %vm13415_vm0, %v13416_v6 }
 0x21f   :  { %11160 = vmatmul.mubr.msk.f32.gmra.mrb[44].mxu0 %vm155_vm1, %v1973_v29 }
 0x220   :  { %11162 = vmatprep.mubr.msk.f32.mxu0 %vm13415_vm0, %v13416_v6 }
 0x223   :  { %11163 = vmatmul.mubr.msk.f32.gmra.mrb[46].mxu0 %vm155_vm1, %v1974_v30 }
 0x224   :  { %11165 = vmatprep.mubr.msk.f32.mxu0 %vm13415_vm0, %v13416_v6 }
 0x227   :  { %11166 = vmatmul.mubr.msk.f32.gmra.mrb[48].mxu0 %vm155_vm1, %v1975_v31 }
 0x228   :  { %11176 = vmatprep.mubr.msk.f32.mxu0 %vm13415_vm0, %v13416_v6 }
 0x22b   :  { %11177 = vmatmul.mubr.msk.f32.vlgmr.msra.gmra.mrb[0].mxu0 %vm155_vm1, %v14304_v7  ;;  %v3467_v7 = vld [vmem:[%s17130_s3 + $0x58] sm:$0xff] }
 0x22c   :  { %12216 = vmatpush3.bf16.msra.mxu0 %v12215_v34  ;;  %11179 = vmatprep.mubr.msk.f32.mxu0 %vm13415_vm0, %v13416_v6  ;;  %v2704_v34 = vld [vmem:[%s17127_s0 + $0x7d] sm:$0xff] }
 0x22d   :  { %12217 = vmatprep.subr.bf16.mxu0 %v17140_v3  ;;  %3538 = vperm.xlu1 %13270, %v3467_v7   ;;  %v2715_v7 = vld [vmem:[%s17127_s0 + $0xd5] sm:$0xff] }
 0x22f   :  { %11180 = vmatmul.mubr.msk.f32.gmra.mrb[2].mxu0 %vm155_vm1, %v14314_v9  ;;  %v117_v9 = vld [vmem:[%s17127_s0 + $0x80] sm:$0xff] }
 0x230   :  { %11182 = vmatprep.mubr.msk.f32.mxu0 %vm13415_vm0, %v13416_v6  ;;  %12219 = vmatpush3.bf16.msra.mxu0 %v12218_v37  ;;  %v124_v37 = vld [vmem:[%s17127_s0 + $0xb8] sm:$0xff] }
 0x231   :  { %12220 = vmatprep.subr.bf16.mxu0 %v17140_v3  ;;  %10727 = vmatmul.mubr.msk.f32.gmra.mrb[10].mxu1 %vm155_vm1, %v117_v9  ;;  %v8822_v9 = vld [vmem:[%s17136_s9 + $0x38] sm:$0xff] }
 0x232   :  { %10729 = vmatprep.mubr.msk.f32.mxu1 %vm13415_vm0, %v14550_v38 }
 0x233   :  { %11183 = vmatmul.mubr.msk.f32.gmra.mrb[4].mxu0 %vm155_vm1, %v14324_v10  ;;  %v2698_v10 = vld [vmem:[%s17127_s0 + $0x4d] sm:$0xff] }
 0x234   :  { %11185 = vmatprep.mubr.msk.f32.mxu0 %vm13415_vm0, %v13416_v6 }
 0x237   :  { %11186 = vmatmul.mubr.msk.f32.gmra.mrb[6].mxu0 %vm155_vm1, %v14333_v11  ;;  %v3469_v11 = vld [vmem:[%s17130_s3 + $0x68] sm:$0xff] }
 0x238   :  { %11188 = vmatprep.mubr.msk.f32.mxu0 %vm13415_vm0, %v13416_v6  ;;  %3548 = vperm.xlu1 %13270, %v3469_v11   ;;  %v8823_v11 = vld [vmem:[%s17136_s9 + $0x40] sm:$0xff] }
 0x23b   :  { %11189 = vmatmul.mubr.msk.f32.gmra.mrb[8].mxu0 %vm155_vm1, %v14342_v12  ;;  %v3470_v12 = vld [vmem:[%s17130_s3 + $0x70] sm:$0xff] }
 0x23c   :  { %11191 = vmatprep.mubr.msk.f32.mxu0 %vm13415_vm0, %v13416_v6  ;;  %3553 = vperm.xlu0 %13269, %v3470_v12   ;;  %v8824_v12 = vld [vmem:[%s17136_s9 + $0x48] sm:$0xff] }
 0x23f   :  { %11192 = vmatmul.mubr.msk.f32.gmra.mrb[10].mxu0 %vm155_vm1, %v14351_v13  ;;  %v118_v13 = vld [vmem:[%s17127_s0 + $0x88] sm:$0xff] }
 0x240   :  { %11194 = vmatprep.mubr.msk.f32.mxu0 %vm13415_vm0, %v13416_v6  ;;  %v2345_v6 = vld [vmem:[%s17127_s0 + $0xd4] sm:$0xff]  ;;  %10730 = vmatmul.mubr.msk.f32.gmra.mrb[12].mxu1 %vm155_vm1, %v118_v13  ;;  %v3062_v13 = vld [vmem:[%s17127_s0 + $0x1e] sm:$0xff] }
 0x241   :  { %10732 = vmatprep.mubr.msk.f32.mxu1 %vm13415_vm0, %v14550_v38 }
 0x243   :  { %11195 = vmatmul.mubr.msk.f32.gmra.mrb[12].mxu0 %vm155_vm1, %v14360_v14  ;;  %v2699_v14 = vld [vmem:[%s17127_s0 + $0x55] sm:$0xff] }
 0x244   :  { %11197 = vmatprep.mubr.msk.f32.mxu0 %vm13415_vm0, %v14550_v38 }
 0x247   :  { %11198 = vmatmul.mubr.msk.f32.gmra.mrb[14].mxu0 %vm155_vm1, %v14369_v15  ;;  %v3471_v15 = vld [vmem:[%s17130_s3 + $0x78] sm:$0xff] }
 0x248   :  { %11200 = vmatprep.mubr.msk.f32.mxu0 %vm13415_vm0, %v14550_v38  ;;  %3558 = vperm.xlu1 %13270, %v3471_v15   ;;  %v8826_v15 = vld [vmem:[%s17136_s9 + $0x58] sm:$0xff] }
 0x24b   :  { %11201 = vmatmul.mubr.msk.f32.gmra.mrb[16].mxu0 %vm155_vm1, %v14378_v16  ;;  %v3472_v16 = vld [vmem:[%s17130_s3 + $0x80] sm:$0xff] }
 0x24c   :  { %11203 = vmatprep.mubr.msk.f32.mxu0 %vm13415_vm0, %v14550_v38  ;;  %3563 = vperm.xlu0 %13269, %v3472_v16   ;;  %v3063_v16 = vld [vmem:[%s17127_s0 + $0x26] sm:$0xff] }
 0x24f   :  { %11204 = vmatmul.mubr.msk.f32.gmra.mrb[18].mxu0 %vm155_vm1, %v14387_v17  ;;  %v119_v17 = vld [vmem:[%s17127_s0 + $0x90] sm:$0xff] }
 0x250   :  { %11206 = vmatprep.mubr.msk.f32.mxu0 %vm13415_vm0, %v14550_v38  ;;  %10733 = vmatmul.mubr.msk.f32.gmra.mrb[14].mxu1 %vm155_vm1, %v119_v17  ;;  %v8827_v17 = vld [vmem:[%s17136_s9 + $0x60] sm:$0xff] }
 0x251   :  { %10735 = vmatprep.mubr.msk.f32.mxu1 %vm13415_vm0, %v14550_v38 }
 0x253   :  { %11207 = vmatmul.mubr.msk.f32.gmra.mrb[20].mxu0 %vm155_vm1, %v14396_v18  ;;  %v2700_v18 = vld [vmem:[%s17127_s0 + $0x5d] sm:$0xff] }
 0x254   :  { %11209 = vmatprep.mubr.msk.f32.mxu0 %vm13415_vm0, %v14550_v38 }
 0x257   :  { %11210 = vmatmul.mubr.msk.f32.gmra.mrb[22].mxu0 %vm155_vm1, %v14405_v19  ;;  %v3473_v19 = vld [vmem:[%s17130_s3 + $0x88] sm:$0xff] }
 0x258   :  { %11212 = vmatprep.mubr.msk.f32.mxu0 %vm13415_vm0, %v14550_v38  ;;  %3568 = vperm.xlu1 %13270, %v3473_v19   ;;  %v3065_v19 = vld [vmem:[%s17127_s0 + $0x36] sm:$0xff] }
 0x25b   :  { %11213 = vmatmul.mubr.msk.f32.gmra.mrb[24].mxu0 %vm155_vm1, %v14414_v20  ;;  %v3474_v20 = vld [vmem:[%s17130_s3 + $0x90] sm:$0xff] }
 0x25c   :  { %11215 = vmatprep.mubr.msk.f32.mxu0 %vm13415_vm0, %v14550_v38  ;;  %3573 = vperm.xlu0 %13269, %v3474_v20   ;;  %v3066_v20 = vld [vmem:[%s17127_s0 + $0x3e] sm:$0xff] }
 0x25f   :  { %11216 = vmatmul.mubr.msk.f32.gmra.mrb[26].mxu0 %vm155_vm1, %v14423_v21  ;;  %v120_v21 = vld [vmem:[%s17127_s0 + $0x98] sm:$0xff] }
 0x260   :  { %11218 = vmatprep.mubr.msk.f32.mxu0 %vm13415_vm0, %v14550_v38  ;;  %10736 = vmatmul.mubr.msk.f32.gmra.mrb[16].mxu1 %vm155_vm1, %v120_v21  ;;  %v3067_v21 = vld [vmem:[%s17127_s0 + $0x46] sm:$0xff] }
 0x261   :  { %10738 = vmatprep.mubr.msk.f32.mxu1 %vm13415_vm0, %v14550_v38 }
 0x263   :  { %11219 = vmatmul.mubr.msk.f32.gmra.mrb[28].mxu0 %vm155_vm1, %v14432_v22  ;;  %v2701_v22 = vld [vmem:[%s17127_s0 + $0x65] sm:$0xff] }
 0x264   :  { %11221 = vmatprep.mubr.msk.f32.mxu0 %vm13415_vm0, %v14550_v38 }
 0x267   :  { %11222 = vmatmul.mubr.msk.f32.gmra.mrb[30].mxu0 %vm155_vm1, %v14441_v23  ;;  %v3475_v23 = vld [vmem:[%s17130_s3 + $0x98] sm:$0xff] }
 0x268   :  { %11224 = vmatprep.mubr.msk.f32.mxu0 %vm13415_vm0, %v14550_v38  ;;  %3578 = vperm.xlu1 %13270, %v3475_v23   ;;  %v3069_v23 = vld [vmem:[%s17127_s0 + $0x56] sm:$0xff] }
 0x26b   :  { %11225 = vmatmul.mubr.msk.f32.gmra.mrb[32].mxu0 %vm155_vm1, %v14450_v24  ;;  %v3476_v24 = vld [vmem:[%s17130_s3 + $0xa0] sm:$0xff] }
 0x26c   :  { %11227 = vmatprep.mubr.msk.f32.mxu0 %vm13415_vm0, %v14550_v38  ;;  %3583 = vperm.xlu0 %13269, %v3476_v24   ;;  %v3070_v24 = vld [vmem:[%s17127_s0 + $0x5e] sm:$0xff] }
 0x26f   :  { %11228 = vmatmul.mubr.msk.f32.gmra.mrb[34].mxu0 %vm155_vm1, %v14459_v25  ;;  %v121_v25 = vld [vmem:[%s17127_s0 + $0xa0] sm:$0xff] }
 0x270   :  { %11230 = vmatprep.mubr.msk.f32.mxu0 %vm13415_vm0, %v14550_v38  ;;  %10739 = vmatmul.mubr.msk.f32.gmra.mrb[18].mxu1 %vm155_vm1, %v121_v25  ;;  %v3071_v25 = vld [vmem:[%s17127_s0 + $0x66] sm:$0xff] }
 0x271   :  { %10741 = vmatprep.mubr.msk.f32.mxu1 %vm13415_vm0, %v14550_v38 }
 0x273   :  { %11231 = vmatmul.mubr.msk.f32.gmra.mrb[36].mxu0 %vm155_vm1, %v14468_v26  ;;  %v2702_v26 = vld [vmem:[%s17127_s0 + $0x6d] sm:$0xff] }
 0x274   :  { %11233 = vmatprep.mubr.msk.f32.mxu0 %vm13415_vm0, %v14550_v38 }
 0x277   :  { %11234 = vmatmul.mubr.msk.f32.gmra.mrb[38].mxu0 %vm155_vm1, %v14477_v27  ;;  %v3477_v27 = vld [vmem:[%s17130_s3 + $0xa8] sm:$0xff] }
 0x278   :  { %11236 = vmatprep.mubr.msk.f32.mxu0 %vm13415_vm0, %v14550_v38  ;;  %3588 = vperm.xlu1 %13270, %v3477_v27   ;;  %v3073_v27 = vld [vmem:[%s17127_s0 + $0x76] sm:$0xff] }
 0x27b   :  { %11237 = vmatmul.mubr.msk.f32.gmra.mrb[40].mxu0 %vm155_vm1, %v14486_v28  ;;  %v3478_v28 = vld [vmem:[%s17130_s3 + $0xb0] sm:$0xff] }
 0x27c   :  { %11239 = vmatprep.mubr.msk.f32.mxu0 %vm13415_vm0, %v14550_v38  ;;  %3593 = vperm.xlu0 %13269, %v3478_v28   ;;  %v3074_v28 = vld [vmem:[%s17127_s0 + $0x7e] sm:$0xff] }
 0x27f   :  { %11240 = vmatmul.mubr.msk.f32.gmra.mrb[42].mxu0 %vm155_vm1, %v1973_v29  ;;  %v122_v29 = vld [vmem:[%s17127_s0 + $0xa8] sm:$0xff] }
 0x280   :  { %11242 = vmatprep.mubr.msk.f32.mxu0 %vm13415_vm0, %v14550_v38  ;;  %10742 = vmatmul.mubr.msk.f32.gmra.mrb[20].mxu1 %vm155_vm1, %v122_v29  ;;  %v3075_v29 = vld [vmem:[%s17127_s0 + $0x86] sm:$0xff] }
 0x281   :  { %10744 = vmatprep.mubr.msk.f32.mxu1 %vm13415_vm0, %v14550_v38  ;;  %3603 = vperm.xlu0 %13269, %v3480_v32   ;;  %v3078_v32 = vld [vmem:[%s17127_s0 + $0x9e] sm:$0xff] }
 0x283   :  { %11243 = vmatmul.mubr.msk.f32.gmra.mrb[44].mxu0 %vm155_vm1, %v1974_v30  ;;  %v2703_v30 = vld [vmem:[%s17127_s0 + $0x75] sm:$0xff] }
 0x284   :  { %11245 = vmatprep.mubr.msk.f32.mxu0 %vm13415_vm0, %v14550_v38  ;;  %10745 = vmatmul.mubr.msk.f32.gmra.mrb[22].mxu1 %vm155_vm1, %v123_v33  ;;  %v3079_v33 = vld [vmem:[%s17127_s0 + $0xa6] sm:$0xff] }
 0x285   :  { %10747 = vmatprep.mubr.msk.f32.mxu1 %vm13415_vm0, %v14550_v38  ;;  %6412 = vperm.xlu0 %13269, %v6390_v36   ;;  %v3082_v36 = vld [vmem:[%s17127_s0 + $0xbe] sm:$0xff] }
 0x287   :  { %11246 = vmatmul.mubr.msk.f32.gmra.mrb[46].mxu0 %vm155_vm1, %v1975_v31  ;;  %v3479_v31 = vld [vmem:[%s17130_s3 + $0xb8] sm:$0xff] }
 0x288   :  { %11248 = vmatprep.mubr.msk.f32.mxu0 %vm13415_vm0, %v14550_v38  ;;  %3598 = vperm.xlu1 %13270, %v3479_v31   ;;  %v3077_v31 = vld [vmem:[%s17127_s0 + $0x96] sm:$0xff] }
 0x289   :  { %10748 = vmatmul.mubr.msk.f32.gmra.mrb[24].mxu1 %vm155_vm1, %v124_v37  ;;  %6422 = vperm.xlu0 %13269, %v6392_v40   ;;  %v3083_v37 = vld [vmem:[%s17127_s0 + $0xc6] sm:$0xff]  ;;  %v15182_v40 = vpop.f32.mrb[0].mxu1 }
 0x28a   :  { %10750 = vmatprep.mubr.msk.f32.mxu1 %vm13415_vm0, %v14550_v38 }
 0x28b   :  { %11249 = vmatmul.mubr.msk.f32.gmra.mrb[48].mxu0 %vm155_vm1, %v2345_v6  ;;  %v2705_v6 = vld [vmem:[%s17127_s0 + $0x85] sm:$0xff] }
 0x28c   :  { %11259 = vmatprep.mubr.msk.f32.mxu0 %vm13415_vm0, %v14550_v38  ;;  %6407 = vperm.xlu1 %13270, %v6389_v35   ;;  %v3081_v35 = vld [vmem:[%s17127_s0 + $0xb6] sm:$0xff] }
 0x28d   :  { %6432 = vperm.xlu0 %13269, %v6394_v44  }
 0x28f   :  { %11260 = vmatmul.mubr.msk.f32.vlgmr.msra.gmra.mrb[0].mxu0 %vm155_vm1, %v2691_v41  ;;  %v125_v41 = vld [vmem:[%s17127_s0 + $0xc0] sm:$0xff] }
 0x290   :  { %12222 = vmatpush3.bf16.msra.mxu0 %v12221_v42  ;;  %11262 = vmatprep.mubr.msk.f32.mxu0 %vm13415_vm0, %v14550_v38  ;;  %v2706_v42 = vld [vmem:[%s17127_s0 + $0x8d] sm:$0xff] }
 0x291   :  { %12223 = vmatprep.subr.bf16.mxu0 %v17140_v3  ;;  %6417 = vperm.xlu1 %13270, %v6391_v39   ;;  %v3085_v39 = vld [vmem:[%s17127_s0 + $0xd6] sm:$0xff] }
 0x292   :  { %10751 = vmatmul.mubr.msk.f32.gmra.mrb[26].mxu1 %vm155_vm1, %v125_v41  ;;  %v10713_v41 = vpop.f32.mrb[1].mxu1 }
 0x293   :  { %11263 = vmatmul.mubr.msk.f32.gmra.mrb[2].mxu0 %vm155_vm1, %v2692_v47  ;;  %11425 = vmatprep.mubr.msk.f32.mxu1 %vm155_vm1, %v14550_v38  ;;  %v6396_v47 = vld [vmem:[%s17133_s6 + $0x38] sm:$0xff] }
 0x294   :  { %11265 = vmatprep.mubr.msk.f32.mxu0 %vm13415_vm0, %v14550_v38  ;;  %12225 = vmatpush3.bf16.msra.mxu0 %v12224_v48  ;;  %v2708_v48 = vld [vmem:[%s17127_s0 + $0x9d] sm:$0xff] }
 0x295   :  { %6427 = vperm.xlu1 %13270, %v6393_v43   ;;  %6442 = vperm.xlu0 %13269, %v6396_v47  }
 0x297   :  { %11266 = vmatmul.mubr.msk.f32.gmra.mrb[4].mxu0 %vm155_vm1, %v2693_v52  ;;  %v6399_v52 = vld [vmem:[%s17133_s6 + $0x50] sm:$0xff] }
 0x298   :  { %11268 = vmatprep.mubr.msk.f32.mxu0 %vm13415_vm0, %v14550_v38 }
 0x299   :  { %6437 = vperm.xlu1 %13270, %v6395_v46   ;;  %6452 = vperm.xlu0 %13269, %v6398_v50  }
 0x29b   :  { %11269 = vmatmul.mubr.msk.f32.gmra.mrb[6].mxu0 %vm155_vm1, %v2694_v56  ;;  %v6402_v56 = vld [vmem:[%s17133_s6 + $0x68] sm:$0xff]  ;;  %s9443_s6 = sshll.u32 %s13418_s15, 4  ;;  %s9444_s6 = int_to_ptr.vmem [resolvable:$true] %s9443_s6 }
 0x29c   :  { %11271 = vmatprep.mubr.msk.f32.mxu0 %vm13415_vm0, %v14550_v38  ;;  %s13390_s16 = scalar_lea.vmem %s9444_s6, 32  ;;  %p13395_p1 = scmp.lt.s32.totalorder %s9444_s6, %s9444_s6 }
 0x29d   :  { %6447 = vperm.xlu1 %13270, %v6397_v49   ;;  %6462 = vperm.xlu0 %13269, %v6400_v53   ;;  %p13391_p0 = scmp.ne.s32.totalorder %s9444_s6, %s13390_s16  ;;  %p13396_p2 = scmp.lt.s32.totalorder %s13390_s16, %s13390_s16 }
 0x29f   :  { %11272 = vmatmul.mubr.msk.f32.gmra.mrb[8].mxu0 %vm155_vm1, %v2695_v60  ;;  %v2712_v60 = vld [vmem:[%s17127_s0 + $0xbd] sm:$0xff]  ;;  %p13397_p3 = por %p13396_p2, %p13395_p1 }
 0x2a0   :  { %11274 = vmatprep.mubr.msk.f32.mxu0 %vm13415_vm0, %v14550_v38 }
 0x2a1   :  { %6457 = vperm.xlu1 %13270, %v6399_v52   ;;  %6472 = vperm.xlu0 %13269, %v6402_v56   ;;  %p13398_p4 = pnand %p13397_p3, %p13391_p0 }
 0x2a3   :  { %11275 = vmatmul.mubr.msk.f32.gmra.mrb[10].mxu0 %vm155_vm1, %v2696_v0  ;;  %v8817_v0 = vld [vmem:[%s17136_s9 + $0x10] sm:$0xff] }
 0x2a4   :  { %11277 = vmatprep.mubr.msk.f32.mxu0 %vm13415_vm0, %v14550_v38 }
 0x2a5   :  { %6467 = vperm.xlu1 %13270, %v6401_v55   ;;  %6482 = vperm.xlu0 %13269, %v6404_v59  }
 0x2a7   :  { %11278 = vmatmul.mubr.msk.f32.gmra.mrb[12].mxu0 %vm155_vm1, %v2697_v5  ;;  %v8820_v5 = vld [vmem:[%s17136_s9 + $0x28] sm:$0xff] }
 0x2a8   :  { %11280 = vmatprep.mubr.msk.f32.mxu0 %vm13415_vm0, %v14550_v38 }
 0x2a9   :  { %6477 = vperm.xlu1 %13270, %v6403_v58   ;;  %8835 = vperm.xlu0 %13269, %v8816_v62  }
 0x2ab   :  { %11281 = vmatmul.mubr.msk.f32.gmra.mrb[14].mxu0 %vm155_vm1, %v2698_v10  ;;  %v3061_v10 = vld [vmem:[%s17127_s0 + $0x16] sm:$0xff] }
 0x2ac   :  { %11283 = vmatprep.mubr.msk.f32.mxu0 %vm13415_vm0, %v14550_v38 }
 0x2ad   :  { %8830 = vperm.xlu1 %13270, %v8815_v61   ;;  %8845 = vperm.xlu0 %13269, %v8818_v1  }
 0x2af   :  { %11284 = vmatmul.mubr.msk.f32.gmra.mrb[16].mxu0 %vm155_vm1, %v2699_v14  ;;  %v8825_v14 = vld [vmem:[%s17136_s9 + $0x50] sm:$0xff] }
 0x2b0   :  { %11286 = vmatprep.mubr.msk.f32.mxu0 %vm13415_vm0, %v14550_v38 }
 0x2b1   :  { %8840 = vperm.xlu1 %13270, %v8817_v0   ;;  %8855 = vperm.xlu0 %13269, %v8820_v5   ;;  %v15210_v5 = vpop.permute.xlu0 %3483 }
 0x2b3   :  { %11287 = vmatmul.mubr.msk.f32.gmra.mrb[18].mxu0 %vm155_vm1, %v2700_v18  ;;  %v3064_v18 = vld [vmem:[%s17127_s0 + $0x2e] sm:$0xff] }
 0x2b4   :  { %11289 = vmatprep.mubr.msk.f32.mxu0 %vm13415_vm0, %v14550_v38 }
 0x2b5   :  { %8850 = vperm.xlu1 %13270, %v8819_v4   ;;  %8865 = vperm.xlu0 %13269, %v8822_v9  }
 0x2b7   :  { %11290 = vmatmul.mubr.msk.f32.gmra.mrb[20].mxu0 %vm155_vm1, %v2701_v22  ;;  %v3068_v22 = vld [vmem:[%s17127_s0 + $0x4e] sm:$0xff] }
 0x2b8   :  { %11292 = vmatprep.mubr.msk.f32.mxu0 %vm13415_vm0, %v14550_v38 }
 0x2b9   :  { %8860 = vperm.xlu1 %13270, %v8821_v8   ;;  %8875 = vperm.xlu0 %13269, %v8824_v12  }
 0x2bb   :  { %11293 = vmatmul.mubr.msk.f32.gmra.mrb[22].mxu0 %vm155_vm1, %v2702_v26  ;;  %v3072_v26 = vld [vmem:[%s17127_s0 + $0x6e] sm:$0xff] }
 0x2bc   :  { %11295 = vmatprep.mubr.msk.f32.mxu0 %vm13415_vm0, %v14550_v38 }
 0x2bd   :  { %8870 = vperm.xlu1 %13270, %v8823_v11   ;;  %8885 = vperm.xlu0 %13269, %v8826_v15  }
 0x2bf   :  { %11296 = vmatmul.mubr.msk.f32.gmra.mrb[24].mxu0 %vm155_vm1, %v2703_v30  ;;  %v3076_v30 = vld [vmem:[%s17127_s0 + $0x8e] sm:$0xff] }
 0x2c0   :  { %11298 = vmatprep.mubr.msk.f32.mxu0 %vm13415_vm0, %v14550_v38 }
 0x2c1   :  { %8880 = vperm.xlu1 %13270, %v8825_v14  }
 0x2c3   :  { %11299 = vmatmul.mubr.msk.f32.gmra.mrb[26].mxu0 %vm155_vm1, %v2704_v34  ;;  %v3080_v34 = vld [vmem:[%s17127_s0 + $0xae] sm:$0xff] }
 0x2c4   :  { %11301 = vmatprep.mubr.msk.f32.mxu0 %vm13415_vm0, %v14550_v38 }
 0x2c5   :  { %8890 = vperm.xlu1 %13270, %v8827_v17  }
 0x2c7   :  { %11302 = vmatmul.mubr.msk.f32.gmra.mrb[28].mxu0 %vm155_vm1, %v2705_v6  ;;  %v3084_v6 = vld [vmem:[%s17127_s0 + $0xce] sm:$0xff] }
 0x2c8   :  { %11304 = vmatprep.mubr.msk.f32.mxu0 %vm13415_vm0, %v14550_v38 }
 0x2cb   :  { %11305 = vmatmul.mubr.msk.f32.gmra.mrb[30].mxu0 %vm155_vm1, %v2706_v42  ;;  %v15184_v42 = vpop.f32.mrb[2].mxu1 }
 0x2cc   :  { %11307 = vmatprep.mubr.msk.f32.mxu0 %vm13415_vm0, %v14550_v38  ;;  %v10716_v43 = vpop.f32.mrb[3].mxu1 }
 0x2cd   :  { %v15186_v44 = vpop.f32.mrb[4].mxu1 }
 0x2cf   :  { %11308 = vmatmul.mubr.msk.f32.gmra.mrb[32].mxu0 %vm155_vm1, %v2707_v45  ;;  %v10719_v45 = vpop.f32.mrb[5].mxu1 }
 0x2d0   :  { %11310 = vmatprep.mubr.msk.f32.mxu0 %vm13415_vm0, %v14550_v38  ;;  %v15188_v46 = vpop.f32.mrb[6].mxu1 }
 0x2d1   :  { %v10722_v47 = vpop.f32.mrb[7].mxu1 }
 0x2d3   :  { %11311 = vmatmul.mubr.msk.f32.gmra.mrb[34].mxu0 %vm155_vm1, %v2708_v48  ;;  %v15190_v48 = vpop.f32.mrb[8].mxu1 }
 0x2d4   :  { %11313 = vmatprep.mubr.msk.f32.mxu0 %vm13415_vm0, %v14550_v38  ;;  %v10725_v49 = vpop.f32.mrb[9].mxu1 }
 0x2d7   :  { %11314 = vmatmul.mubr.msk.f32.gmra.mrb[36].mxu0 %vm155_vm1, %v2709_v51 }
 0x2d8   :  { %11316 = vmatprep.mubr.msk.f32.mxu0 %vm13415_vm0, %v14550_v38 }
 0x2db   :  { %11317 = vmatmul.mubr.msk.f32.gmra.mrb[38].mxu0 %vm155_vm1, %v2710_v54 }
 0x2dc   :  { %11319 = vmatprep.mubr.msk.f32.mxu0 %vm13415_vm0, %v14550_v38 }
 0x2df   :  { %11320 = vmatmul.mubr.msk.f32.gmra.mrb[40].mxu0 %vm155_vm1, %v2711_v57 }
 0x2e0   :  { %11322 = vmatprep.mubr.msk.f32.mxu0 %vm13415_vm0, %v14550_v38 }
 0x2e3   :  { %11323 = vmatmul.mubr.msk.f32.gmra.mrb[42].mxu0 %vm155_vm1, %v2712_v60 }
 0x2e4   :  { %11325 = vmatprep.mubr.msk.f32.mxu0 %vm13415_vm0, %v14550_v38 }
 0x2e7   :  { %11326 = vmatmul.mubr.msk.f32.gmra.mrb[44].mxu0 %vm155_vm1, %v2713_v63 }
 0x2e8   :  { %11328 = vmatprep.mubr.msk.f32.mxu0 %vm13415_vm0, %v14550_v38 }
 0x2eb   :  { %11329 = vmatmul.mubr.msk.f32.gmra.mrb[46].mxu0 %vm155_vm1, %v2714_v2 }
 0x2ec   :  { %11331 = vmatprep.mubr.msk.f32.mxu0 %vm13415_vm0, %v14550_v38 }
 0x2ef   :  { %11332 = vmatmul.mubr.msk.f32.gmra.mrb[48].mxu0 %vm155_vm1, %v2715_v7 }
 0x2f0   :  { %11342 = vmatprep.mubr.msk.f32.mxu0 %vm13415_vm0, %v14550_v38 }
 0x2f3   :  { %11343 = vmatmul.mubr.msk.f32.vlgmr.msra.gmra.mrb[0].mxu0 %vm155_vm1, %v3061_v10 }
 0x2f4   :  { %11345 = vmatprep.mubr.msk.f32.mxu0 %vm13415_vm0, %v14550_v38 }
 0x2f7   :  { %11346 = vmatmul.mubr.msk.f32.gmra.mrb[2].mxu0 %vm155_vm1, %v3062_v13  ;;  %v15218_v13 = vpop.permute.xlu0 %3488 }
 0x2f8   :  { %11348 = vmatprep.mubr.msk.f32.mxu0 %vm13415_vm0, %v14550_v38 }
 0x2fb   :  { %11349 = vmatmul.mubr.msk.f32.gmra.mrb[4].mxu0 %vm155_vm1, %v3063_v16  ;;  %v15224_v16 = vpop.permute.xlu1 %3493 }
 0x2fc   :  { %11351 = vmatprep.mubr.msk.f32.mxu0 %vm13415_vm0, %v14550_v38 }
 0x2ff   :  { %11352 = vmatmul.mubr.msk.f32.gmra.mrb[6].mxu0 %vm155_vm1, %v3064_v18 }
 0x300   :  { %11354 = vmatprep.mubr.msk.f32.mxu0 %vm13415_vm0, %v14550_v38 }
 0x303   :  { %11355 = vmatmul.mubr.msk.f32.gmra.mrb[8].mxu0 %vm155_vm1, %v3065_v19 }
 0x304   :  { %11357 = vmatprep.mubr.msk.f32.mxu0 %vm13415_vm0, %v14550_v38  ;;  %v15192_v50 = vpop.f32.mrb[10].mxu1 }
 0x305   :  { %v10728_v51 = vpop.f32.mrb[11].mxu1 }
 0x307   :  { %11358 = vmatmul.mubr.msk.f32.gmra.mrb[10].mxu0 %vm155_vm1, %v3066_v20 }
 0x308   :  { %11360 = vmatprep.mubr.msk.f32.mxu0 %vm13415_vm0, %v14550_v38 }
 0x30b   :  { %11361 = vmatmul.mubr.msk.f32.gmra.mrb[12].mxu0 %vm155_vm1, %v3067_v21 }
 0x30c   :  { %11363 = vmatprep.mubr.msk.f32.mxu0 %vm13415_vm0, %v14550_v38 }
 0x30f   :  { %11364 = vmatmul.mubr.msk.f32.gmra.mrb[14].mxu0 %vm155_vm1, %v3068_v22 }
 0x310   :  { %11366 = vmatprep.mubr.msk.f32.mxu0 %vm13415_vm0, %v14550_v38 }
 0x313   :  { %11367 = vmatmul.mubr.msk.f32.gmra.mrb[16].mxu0 %vm155_vm1, %v3069_v23  ;;  %v15194_v52 = vpop.f32.mrb[12].mxu1 }
 0x314   :  { %11369 = vmatprep.mubr.msk.f32.mxu0 %vm13415_vm0, %v14550_v38  ;;  %v10731_v53 = vpop.f32.mrb[13].mxu1 }
 0x317   :  { %11370 = vmatmul.mubr.msk.f32.gmra.mrb[18].mxu0 %vm155_vm1, %v3070_v24 }
 0x318   :  { %11372 = vmatprep.mubr.msk.f32.mxu0 %vm13415_vm0, %v14550_v38 }
 0x31b   :  { %11373 = vmatmul.mubr.msk.f32.gmra.mrb[20].mxu0 %vm155_vm1, %v3071_v25 }
 0x31c   :  { %11375 = vmatprep.mubr.msk.f32.mxu0 %vm13415_vm0, %v14550_v38 }
 0x31f   :  { %11376 = vmatmul.mubr.msk.f32.gmra.mrb[22].mxu0 %vm155_vm1, %v3072_v26  ;;  %v15234_v26 = vpop.permute.xlu1 %3498 }
 0x320   :  { %11378 = vmatprep.mubr.msk.f32.mxu0 %vm13415_vm0, %v14550_v38 }
 0x323   :  { %11379 = vmatmul.mubr.msk.f32.gmra.mrb[24].mxu0 %vm155_vm1, %v3073_v27  ;;  %v15196_v54 = vpop.f32.mrb[14].mxu1 }
 0x324   :  { %11381 = vmatprep.mubr.msk.f32.mxu0 %vm13415_vm0, %v14550_v38  ;;  %v10734_v55 = vpop.f32.mrb[15].mxu1 }
 0x327   :  { %11382 = vmatmul.mubr.msk.f32.gmra.mrb[26].mxu0 %vm155_vm1, %v3074_v28 }
 0x328   :  { %11384 = vmatprep.mubr.msk.f32.mxu0 %vm13415_vm0, %v14550_v38 }
 0x32b   :  { %11385 = vmatmul.mubr.msk.f32.gmra.mrb[28].mxu0 %vm155_vm1, %v3075_v29 }
 0x32c   :  { %11387 = vmatprep.mubr.msk.f32.mxu0 %vm13415_vm0, %v14550_v38 }
 0x32f   :  { %11388 = vmatmul.mubr.msk.f32.gmra.mrb[30].mxu0 %vm155_vm1, %v3076_v30 }
 0x330   :  { %11390 = vmatprep.mubr.msk.f32.mxu0 %vm13415_vm0, %v14550_v38 }
 0x333   :  { %11391 = vmatmul.mubr.msk.f32.gmra.mrb[32].mxu0 %vm155_vm1, %v3077_v31  ;;  %v15198_v56 = vpop.f32.mrb[16].mxu1 }
 0x334   :  { %11393 = vmatprep.mubr.msk.f32.mxu0 %vm13415_vm0, %v14550_v38  ;;  %v10737_v57 = vpop.f32.mrb[17].mxu1 }
 0x337   :  { %11394 = vmatmul.mubr.msk.f32.gmra.mrb[34].mxu0 %vm155_vm1, %v3078_v32  ;;  %v15241_v32 = vpop.permute.xlu0 %3503 }
 0x338   :  { %11396 = vmatprep.mubr.msk.f32.mxu0 %vm13415_vm0, %v14550_v38 }
 0x33b   :  { %11397 = vmatmul.mubr.msk.f32.gmra.mrb[36].mxu0 %vm155_vm1, %v3079_v33  ;;  %v15255_v49 = vpop.permute.xlu0 %3513 }
 0x33c   :  { %11399 = vmatprep.mubr.msk.f32.mxu0 %vm13415_vm0, %v14550_v38 }
 0x33f   :  { %11400 = vmatmul.mubr.msk.f32.gmra.mrb[38].mxu0 %vm155_vm1, %v3080_v34 }
 0x340   :  { %11402 = vmatprep.mubr.msk.f32.mxu0 %vm13415_vm0, %v14550_v38 }
 0x343   :  { %11403 = vmatmul.mubr.msk.f32.gmra.mrb[40].mxu0 %vm155_vm1, %v3081_v35  ;;  %v15200_v58 = vpop.f32.mrb[18].mxu1 }
 0x344   :  { %11405 = vmatprep.mubr.msk.f32.mxu0 %vm13415_vm0, %v14550_v38  ;;  %v10740_v59 = vpop.f32.mrb[19].mxu1 }
 0x347   :  { %11406 = vmatmul.mubr.msk.f32.gmra.mrb[42].mxu0 %vm155_vm1, %v3082_v36 }
 0x348   :  { %11408 = vmatprep.mubr.msk.f32.mxu0 %vm13415_vm0, %v14550_v38 }
 0x34b   :  { %11409 = vmatmul.mubr.msk.f32.gmra.mrb[44].mxu0 %vm155_vm1, %v3083_v37 }
 0x34c   :  { %11411 = vmatprep.mubr.msk.f32.mxu0 %vm13415_vm0, %v14550_v38 }
 0x34f   :  { %11412 = vmatmul.mubr.msk.f32.gmra.mrb[46].mxu0 %vm155_vm1, %v3084_v6  ;;  %v15248_v6 = vpop.permute.xlu1 %3508 }
 0x350   :  { %11414 = vmatprep.mubr.msk.f32.mxu0 %vm13415_vm0, %v14550_v38 }
 0x353   :  { %11415 = vmatmul.mubr.msk.f32.gmra.mrb[48].mxu0 %vm155_vm1, %v3085_v39  ;;  %v15202_v60 = vpop.f32.mrb[20].mxu1 }
 0x354   :  { %v10743_v61 = vpop.f32.mrb[21].mxu1 }
 0x355   :  { %v15262_v61 = vpop.permute.xlu1 %3518 }
 0x357   :  { %v15204_v62 = vpop.f32.mrb[22].mxu1 }
 0x358   :  { %v10746_v63 = vpop.f32.mrb[23].mxu1 }
 0x35c   :  { %v15206_v0 = vpop.f32.mrb[24].mxu1 }
 0x35d   :  { %v10749_v1 = vpop.f32.mrb[25].mxu1 }
 0x365   :  { %v15208_v2 = vpop.f32.mrb[26].mxu1 }
 0x366   :  { %v10752_v4 = vpop.f32.mrb[27].mxu1 }
 0x3c6   :  { %v3257_v7 = vpop.f32.mrb[0].mxu0 }
 0x3c7   :  { %v11344_v8 = vpop.f32.mrb[1].mxu0  ;;  %v15213_v9 = vadd.f32 %v14550_v38, %v3257_v7 }
 0x3c9   :  { %v3606_v14 = vmul.f32 %v15213_v9, %v15210_v5 }
 0x3ca   :  { %v3262_v10 = vpop.f32.mrb[2].mxu0 }
 0x3cb   :  { %v15216_v11 = vadd.f32 %v14550_v38, %v3262_v10  ;;  %v11347_v12 = vpop.f32.mrb[3].mxu0  ;;  %v15269_v10 = vpop.permute.xlu0 %3523 }
 0x3cd   :  { %v3607_v15 = vmul.f32 %v15216_v11, %v15218_v13 }
 0x3ce   :  { %v3267_v17 = vpop.f32.mrb[4].mxu0 }
 0x3cf   :  { %v3631_v18 = vadd.f32 %v3607_v15, %v3606_v14  ;;  %v15227_v19 = vadd.f32 %v14550_v38, %v3267_v17  ;;  %v11350_v20 = vpop.f32.mrb[5].mxu0 }
 0x3d0   :  { %v15276_v20 = vpop.permute.xlu1 %3528 }
 0x3d1   :  { %v3608_v21 = vmul.f32 %v15227_v19, %v15224_v16 }
 0x3d2   :  { %v3272_v22 = vpop.f32.mrb[6].mxu0 }
 0x3d3   :  { %v3632_v23 = vadd.f32 %v3631_v18, %v3608_v21  ;;  %v15232_v24 = vadd.f32 %v14550_v38, %v3272_v22  ;;  %v11353_v25 = vpop.f32.mrb[7].mxu0 }
 0x3d5   :  { %v3609_v27 = vmul.f32 %v15232_v24, %v15234_v26 }
 0x3d6   :  { %v3277_v28 = vpop.f32.mrb[8].mxu0 }
 0x3d7   :  { %v3633_v29 = vadd.f32 %v3632_v23, %v3609_v27  ;;  %v15239_v30 = vadd.f32 %v14550_v38, %v3277_v28  ;;  %v11356_v31 = vpop.f32.mrb[9].mxu0  ;;  %v432_v23 = vadd.f32 %v14550_v38, %v15182_v40 }
 0x3d9   :  { %v3610_v33 = vmul.f32 %v15239_v30, %v15241_v32 }
 0x3da   :  { %v3282_v34 = vpop.f32.mrb[10].mxu0 }
 0x3db   :  { %v3634_v35 = vadd.f32 %v3633_v29, %v3610_v33  ;;  %v15246_v36 = vadd.f32 %v14550_v38, %v3282_v34  ;;  %v11359_v37 = vpop.f32.mrb[11].mxu0  ;;  %v15285_v29 = vpop.permute.xlu0 %3533  ;;  %v433_v34 = vadd.f32 %v14550_v38, %v15184_v42 }
 0x3dd   :  { %v3611_v39 = vmul.f32 %v15246_v36, %v15248_v6 }
 0x3de   :  { %v3287_v41 = vpop.f32.mrb[12].mxu0 }
 0x3df   :  { %v3635_v43 = vadd.f32 %v3634_v35, %v3611_v39  ;;  %v15253_v45 = vadd.f32 %v14550_v38, %v3287_v41  ;;  %v11362_v47 = vpop.f32.mrb[13].mxu0  ;;  %v15293_v41 = vpop.permute.xlu1 %3538 }
 0x3e0   :  { %v434_v47 = vadd.f32 %v14550_v38, %v15186_v44 }
 0x3e1   :  { %v3612_v51 = vmul.f32 %v15253_v45, %v15255_v49 }
 0x3e2   :  { %v3292_v53 = vpop.f32.mrb[14].mxu0 }
 0x3e3   :  { %v3636_v55 = vadd.f32 %v3635_v43, %v3612_v51  ;;  %v15260_v57 = vadd.f32 %v14550_v38, %v3292_v53  ;;  %v11365_v59 = vpop.f32.mrb[15].mxu0 }
 0x3e4   :  { %v15301_v59 = vpop.permute.xlu0 %3543 }
 0x3e5   :  { %v3613_v63 = vmul.f32 %v15260_v57, %v15262_v61 }
 0x3e6   :  { %v3297_v1 = vpop.f32.mrb[16].mxu0 }
 0x3e7   :  { %v3637_v4 = vadd.f32 %v3636_v55, %v3613_v63  ;;  %v15267_v7 = vadd.f32 %v14550_v38, %v3297_v1  ;;  %v11368_v8 = vpop.f32.mrb[17].mxu0  ;;  %v435_v1 = vadd.f32 %v14550_v38, %v15188_v46 }
 0x3e9   :  { %v3614_v12 = vmul.f32 %v15267_v7, %v15269_v10 }
 0x3ea   :  { %v3302_v14 = vpop.f32.mrb[18].mxu0 }
 0x3eb   :  { %v3638_v15 = vadd.f32 %v3637_v4, %v3614_v12  ;;  %v15274_v17 = vadd.f32 %v14550_v38, %v3302_v14  ;;  %v11371_v18 = vpop.f32.mrb[19].mxu0  ;;  %v15309_v14 = vpop.permute.xlu1 %3548 }
 0x3ec   :  { %v436_v18 = vadd.f32 %v14550_v38, %v15190_v48 }
 0x3ed   :  { %v3615_v21 = vmul.f32 %v15274_v17, %v15276_v20 }
 0x3ee   :  { %v3307_v22 = vpop.f32.mrb[20].mxu0 }
 0x3ef   :  { %v3639_v25 = vadd.f32 %v3638_v15, %v3615_v21  ;;  %v15283_v27 = vadd.f32 %v14550_v38, %v3307_v22  ;;  %v11374_v28 = vpop.f32.mrb[21].mxu0 }
 0x3f1   :  { %v3616_v31 = vmul.f32 %v15283_v27, %v15285_v29 }
 0x3f2   :  { %v3312_v33 = vpop.f32.mrb[22].mxu0 }
 0x3f3   :  { %v3640_v35 = vadd.f32 %v3639_v25, %v3616_v31  ;;  %v15291_v37 = vadd.f32 %v3312_v33, %v432_v23  ;;  %v11377_v39 = vpop.f32.mrb[23].mxu0  ;;  %v15317_v25 = vpop.permute.xlu0 %3553  ;;  %v437_v31 = vadd.f32 %v14550_v38, %v15192_v50 }
 0x3f4   :  { %v15325_v39 = vpop.permute.xlu1 %3558 }
 0x3f5   :  { %v3617_v40 = vmul.f32 %v15291_v37, %v15293_v41 }
 0x3f6   :  { %v3317_v43 = vpop.f32.mrb[24].mxu0 }
 0x3f7   :  { %v15299_v51 = vadd.f32 %v3317_v43, %v433_v34  ;;  %v11380_v53 = vpop.f32.mrb[25].mxu0  ;;  %v3641_v55 = vadd.f32 %v3640_v35, %v3617_v40  ;;  %v438_v43 = vadd.f32 %v14550_v38, %v15194_v52 }
 0x3f9   :  { %v3618_v42 = vmul.f32 %v15299_v51, %v15301_v59 }
 0x3fa   :  { %v3322_v63 = vpop.f32.mrb[26].mxu0 }
 0x3fb   :  { %v15307_v4 = vadd.f32 %v3322_v63, %v434_v47  ;;  %v11383_v8 = vpop.f32.mrb[27].mxu0  ;;  %v3642_v12 = vadd.f32 %v3641_v55, %v3618_v42  ;;  %v15333_v42 = vpop.permute.xlu0 %3563 }
 0x3fd   :  { %v3619_v44 = vmul.f32 %v15307_v4, %v15309_v14 }
 0x3fe   :  { %v3327_v15 = vpop.f32.mrb[28].mxu0 }
 0x3ff   :  { %v15315_v21 = vadd.f32 %v3327_v15, %v435_v1  ;;  %v11386_v22 = vpop.f32.mrb[29].mxu0  ;;  %v3643_v23 = vadd.f32 %v3642_v12, %v3619_v44  ;;  %v439_v1 = vadd.f32 %v14550_v38, %v15196_v54  ;;  %v15341_v15 = vpop.permute.xlu1 %3568 }
 0x400   :  { %v440_v22 = vadd.f32 %v14550_v38, %v15198_v56 }
 0x401   :  { %v3620_v46 = vmul.f32 %v15315_v21, %v15317_v25 }
 0x402   :  { %v3332_v28 = vpop.f32.mrb[30].mxu0 }
 0x403   :  { %v15323_v33 = vadd.f32 %v3332_v28, %v436_v18  ;;  %v11389_v34 = vpop.f32.mrb[31].mxu0  ;;  %v3644_v35 = vadd.f32 %v3643_v23, %v3620_v46 }
 0x405   :  { %v3621_v48 = vmul.f32 %v15323_v33, %v15325_v39 }
 0x406   :  { %v3337_v40 = vpop.f32.mrb[32].mxu0 }
 0x407   :  { %v15331_v47 = vadd.f32 %v3337_v40, %v437_v31  ;;  %v11392_v53 = vpop.f32.mrb[33].mxu0  ;;  %v3645_v55 = vadd.f32 %v3644_v35, %v3621_v48  ;;  %v15349_v31 = vpop.permute.xlu0 %3573  ;;  %v441_v35 = vadd.f32 %v14550_v38, %v15200_v58 }
 0x408   :  { %v15357_v53 = vpop.permute.xlu1 %3578 }
 0x409   :  { %v3622_v50 = vmul.f32 %v15331_v47, %v15333_v42  ;;  %17146 = vst [vmem:[#allocation11_spill] sm:$0xff] %v15357_v53 }
 0x40a   :  { %v3342_v63 = vpop.f32.mrb[34].mxu0 }
 0x40b   :  { %v15339_v8 = vadd.f32 %v3342_v63, %v438_v43  ;;  %v11395_v12 = vpop.f32.mrb[35].mxu0  ;;  %v3646_v44 = vadd.f32 %v3645_v55, %v3622_v50  ;;  %v442_v50 = vadd.f32 %v14550_v38, %v15202_v60 }
 0x40d   :  { %v3623_v52 = vmul.f32 %v15339_v8, %v15341_v15 }
 0x40e   :  { %v3347_v18 = vpop.f32.mrb[36].mxu0 }
 0x40f   :  { %v15347_v23 = vadd.f32 %v3347_v18, %v439_v1  ;;  %v11398_v46 = vpop.f32.mrb[37].mxu0  ;;  %v3647_v28 = vadd.f32 %v3646_v44, %v3623_v52  ;;  %v15363_v44 = vpop.permute.xlu0 %3583  ;;  %v15366_v18 = vld [vmem:[#allocation3] sm:$0xff] }
 0x410   :  { %17147 = vst [vmem:[#allocation12_spill] sm:$0xff] %v15363_v44 }
 0x411   :  { %v3624_v54 = vmul.f32 %v15347_v23, %v15349_v31 }
 0x412   :  { %v3352_v34 = vpop.f32.mrb[38].mxu0 }
 0x413   :  { %v15355_v48 = vadd.f32 %v3352_v34, %v440_v22  ;;  %v11401_v40 = vpop.f32.mrb[39].mxu0  ;;  %v3648_v43 = vadd.f32 %v3647_v28, %v3624_v54  ;;  %v443_v22 = vadd.f32 %v15366_v18, %v15204_v62  ;;  %v15370_v34 = vpop.permute.xlu1 %3588  ;;  %v445_v62 = vadd.f32 %v15366_v18, %v15208_v2 }
 0x414   :  { %17148 = vst [vmem:[#allocation13_spill] sm:$0xff] %v15370_v34 }
 0x415   :  { %v3625_v56 = vmul.f32 %v15355_v48, %v15357_v53 }
 0x416   :  { %v3357_v55 = vpop.f32.mrb[40].mxu0 }
 0x417   :  { %v12452_v63 = vadd.f32 %v3357_v55, %v441_v35  ;;  %v11404_v1 = vpop.f32.mrb[41].mxu0  ;;  %v3649_v12 = vadd.f32 %v3648_v43, %v3625_v56  ;;  %v444_v35 = vadd.f32 %v15366_v18, %v15206_v0  ;;  %v15375_v55 = vpop.permute.xlu0 %3593 }
 0x418   :  { %17149 = vst [vmem:[#allocation14_spill] sm:$0xff] %v15375_v55 }
 0x419   :  { %v3626_v58 = vmul.f32 %v12452_v63, %v15363_v44 }
 0x41a   :  { %v3362_v52 = vpop.f32.mrb[42].mxu0 }
 0x41b   :  { %v12456_v46 = vadd.f32 %v3362_v52, %v442_v50  ;;  %v11407_v28 = vpop.f32.mrb[43].mxu0  ;;  %v3650_v54 = vadd.f32 %v3649_v12, %v3626_v58  ;;  %v15380_v52 = vpop.permute.xlu1 %3598 }
 0x41d   :  { %v3627_v38 = vmul.f32 %v12456_v46, %v15370_v34 }
 0x41e   :  { %v3367_v60 = vpop.f32.mrb[44].mxu0 }
 0x41f   :  { %v12460_v40 = vadd.f32 %v3367_v60, %v443_v22  ;;  %v11410_v43 = vpop.f32.mrb[45].mxu0  ;;  %v3651_v56 = vadd.f32 %v3650_v54, %v3627_v38  ;;  %v15383_v54 = vpop.permute.xlu0 %3603 }
 0x421   :  { %v3628_v1 = vmul.f32 %v12460_v40, %v15375_v55 }
 0x422   :  { %v3372_v3 = vpop.f32.mrb[46].mxu0 }
 0x423   :  { %v12464_v50 = vadd.f32 %v3372_v3, %v444_v35  ;;  %v11413_v12 = vpop.f32.mrb[47].mxu0  ;;  %v3652_v58 = vadd.f32 %v3651_v56, %v3628_v1 }
 0x425   :  { %v3629_v28 = vmul.f32 %v12464_v50, %v15380_v52 }
 0x426   :  { %v3377_v34 = vpop.f32.mrb[48].mxu0 }
 0x427   :  { %v12468_v0 = vadd.f32 %v3377_v34, %v445_v62  ;;  %v3653_v22 = vadd.f32 %v3652_v58, %v3629_v28  ;;  %v11416_v60 = vpop.f32.mrb[49].mxu0 }
 0x428   :  { %v4049_v60 = vld [vmem:[%s17131_s4 + $0x8] sm:$0xff] }
 0x429   :  { %v3630_v38 = vmul.f32 %v12468_v0, %v15383_v54 }
 0x42b   :  { %v3654_v43 = vadd.f32 %v3653_v22, %v3630_v38  ;;  %v4048_v22 = vld [vmem:[%s17131_s4] sm:$0xff]  ;;  %v4051_v38 = vld [vmem:[%s17131_s4 + $0x18] sm:$0xff] }
 0x42d   :  { %v3655_v55 = vrot.slane %v3654_v43, 4 }
 0x42f   :  { %v3656_v44 = vadd.f32 %v3655_v55, %v3654_v43 }
 0x431   :  { %v3657_v53 = vrot.slane %v3656_v44, 2 }
 0x433   :  { %v3658_v2 = vadd.f32 %v3657_v53, %v3656_v44 }
 0x435   :  { %v3659_v3 = vrot.slane %v3658_v2, 1 }
 0x437   :  { %v3660_v35 = vadd.f32 %v3659_v3, %v3658_v2 }
 0x439   :  { %v3661_v56 = vmul.f32 0.0078125, %v3660_v35  ;;  %v9726_v35 = vld [vmem:[%s17131_s4 + $0x20] sm:$0xff] }
 0x43b   :  { %v15387_v1 = vsub.f32 %v15213_v9, %v3661_v56  ;;  %v15390_v12 = vsub.f32 %v15216_v11, %v3661_v56  ;;  %v15393_v34 = vsub.f32 %v15227_v19, %v3661_v56  ;;  %v15396_v62 = vsub.f32 %v15232_v24, %v3661_v56 }
 0x43c   :  { %v15399_v58 = vsub.f32 %v15239_v30, %v3661_v56  ;;  %v15402_v53 = vsub.f32 %v15246_v36, %v3661_v56  ;;  %v15405_v44 = vsub.f32 %v15253_v45, %v3661_v56  ;;  %v15408_v9 = vsub.f32 %v15260_v57, %v3661_v56 }
 0x43d   :  { %v15411_v11 = vsub.f32 %v15267_v7, %v3661_v56  ;;  %v15414_v19 = vsub.f32 %v15274_v17, %v3661_v56  ;;  %v15417_v24 = vsub.f32 %v15283_v27, %v3661_v56  ;;  %v15420_v30 = vsub.f32 %v15291_v37, %v3661_v56 }
 0x43e   :  { %v15423_v36 = vsub.f32 %v15299_v51, %v3661_v56  ;;  %v15426_v45 = vsub.f32 %v15307_v4, %v3661_v56  ;;  %v15429_v57 = vsub.f32 %v15315_v21, %v3661_v56  ;;  %v15432_v7 = vsub.f32 %v15323_v33, %v3661_v56 }
 0x43f   :  { %v15435_v17 = vsub.f32 %v15331_v47, %v3661_v56  ;;  %v15438_v27 = vsub.f32 %v15339_v8, %v3661_v56  ;;  %v15441_v37 = vsub.f32 %v15347_v23, %v3661_v56  ;;  %v15444_v51 = vsub.f32 %v15355_v48, %v3661_v56 }
 0x440   :  { %v15446_v4 = vsub.f32 %v12452_v63, %v3661_v56  ;;  %v15448_v55 = vsub.f32 %v12456_v46, %v3661_v56  ;;  %v15450_v21 = vsub.f32 %v12460_v40, %v3661_v56  ;;  %v15452_v33 = vsub.f32 %v12464_v50, %v3661_v56 }
 0x441   :  { %v15454_v28 = vsub.f32 %v12468_v0, %v3661_v56  ;;  %v3687_v47 = vmul.f32 %v15387_v1, %v15387_v1  ;;  %v3688_v8 = vmul.f32 %v15390_v12, %v15390_v12  ;;  %v3689_v23 = vmul.f32 %v15393_v34, %v15393_v34  ;;  %v9727_v56 = vld [vmem:[%s17131_s4 + $0x28] sm:$0xff] }
 0x442   :  { %v3690_v46 = vmul.f32 %v15396_v62, %v15396_v62  ;;  %v3691_v40 = vmul.f32 %v15399_v58, %v15399_v58 }
 0x443   :  { %v3712_v48 = vmul.f32 %v3687_v47, %v15210_v5  ;;  %v3713_v63 = vmul.f32 %v3688_v8, %v15218_v13  ;;  %v3714_v50 = vmul.f32 %v3689_v23, %v15224_v16  ;;  %v4050_v5 = vld [vmem:[%s17131_s4 + $0x10] sm:$0xff]  ;;  %v12226_v13 = vpack.c.bf16 %v4049_v60, %v4048_v22 }
 0x444   :  { %v3692_v16 = vmul.f32 %v15402_v53, %v15402_v53  ;;  %v3715_v43 = vmul.f32 %v3690_v46, %v15234_v26  ;;  %v12230_v3 = vpack.c.bf16 %v4051_v38, %v4050_v5  ;;  %v3693_v47 = vmul.f32 %v15405_v44, %v15405_v44  ;;  %v9729_v38 = vld [vmem:[%s17131_s4 + $0x38] sm:$0xff] }
 0x445   :  { %v3737_v0 = vadd.f32 %v3713_v63, %v3712_v48  ;;  %12227 = vmatprep.subr.bf16.mxu1 %v12226_v13  ;;  %v3716_v8 = vmul.f32 %v3691_v40, %v15241_v32  ;;  %v12234_v26 = vpack.c.bf16 %v9727_v56, %v9726_v35  ;;  %v3694_v48 = vmul.f32 %v15408_v9, %v15408_v9 }
 0x446   :  { %12229 = vmatpush3.bf16.msra.mxu1 %v12226_v13  ;;  %v3717_v63 = vmul.f32 %v3692_v16, %v15248_v6  ;;  %v3696_v32 = vmul.f32 %v15414_v19, %v15414_v19  ;;  %v3697_v6 = vmul.f32 %v15417_v24, %v15417_v24  ;;  %v3700_v56 = vmul.f32 %v15426_v45, %v15426_v45 }
 0x447   :  { %v3738_v2 = vadd.f32 %v3737_v0, %v3714_v50  ;;  %12231 = vmatprep.subr.bf16.mxu1 %v12230_v3  ;;  %v3695_v50 = vmul.f32 %v15411_v11, %v15411_v11  ;;  %v3718_v0 = vmul.f32 %v3693_v47, %v15255_v49  ;;  %v3719_v40 = vmul.f32 %v3694_v48, %v15262_v61  ;;  %v9728_v49 = vld [vmem:[%s17131_s4 + $0x30] sm:$0xff] }
 0x448   :  { %v3698_v61 = vmul.f32 %v15420_v30, %v15420_v30  ;;  %v3721_v16 = vmul.f32 %v3696_v32, %v15276_v20  ;;  %v3702_v48 = vmul.f32 %v15432_v7, %v15432_v7 }
 0x449   :  { %v3739_v23 = vadd.f32 %v3738_v2, %v3715_v43  ;;  %v3720_v5 = vmul.f32 %v3695_v50, %v15269_v10  ;;  %v12238_v2 = vpack.c.bf16 %v9729_v38, %v9728_v49  ;;  %v3699_v10 = vmul.f32 %v15423_v36, %v15423_v36 }
 0x44a   :  { %12233 = vmatpush3.bf16.msra.mxu1 %v12230_v3  ;;  %v3722_v3 = vmul.f32 %v3697_v6, %v15285_v29  ;;  %v3723_v47 = vmul.f32 %v3698_v61, %v15293_v41  ;;  %v3725_v29 = vmul.f32 %v3700_v56, %v15309_v14  ;;  %v3704_v41 = vmul.f32 %v15438_v27, %v15438_v27  ;;  %v9746_v14 = vld [vmem:[%s17131_s4 + $0x40] sm:$0xff] }
 0x44b   :  { %v3740_v46 = vadd.f32 %v3739_v23, %v3716_v8  ;;  %12235 = vmatprep.subr.bf16.mxu1 %v12234_v26  ;;  %v3701_v23 = vmul.f32 %v15429_v57, %v15429_v57  ;;  %v3724_v20 = vmul.f32 %v3699_v10, %v15301_v59  ;;  %v3705_v59 = vmul.f32 %v15441_v37, %v15441_v37  ;;  %v17151_v10 = vld [vmem:[#allocation12_spill] sm:$0xff] }
 0x44c   :  { %v3706_v6 = vmul.f32 %v15444_v51, %v15444_v51  ;;  %v3708_v61 = vmul.f32 %v15448_v55, %v15448_v55  ;;  %v3710_v56 = vmul.f32 %v15452_v33, %v15452_v33 }
 0x44d   :  { %v3741_v22 = vadd.f32 %v3740_v46, %v3717_v63  ;;  %11426 = vmatmul.mubr.msk.f32.vlgmr.msra.gmra.mrb[28].mxu1 %vm155_vm1, %v15366_v18  ;;  %v3703_v46 = vmul.f32 %v15435_v17, %v15435_v17  ;;  %v3726_v50 = vmul.f32 %v3701_v23, %v15317_v25  ;;  %v9747_v25 = vld [vmem:[%s17131_s4 + $0x48] sm:$0xff]  ;;  %v3730_v49 = vmul.f32 %v3705_v59, %v15349_v31 }
 0x44e   :  { %12237 = vmatpush3.bf16.msra.mxu1 %v12234_v26  ;;  %v3711_v23 = vmul.f32 %v15454_v28, %v15454_v28 }
 0x44f   :  { %v3742_v60 = vadd.f32 %v3741_v22, %v3718_v0  ;;  %12239 = vmatprep.subr.bf16.mxu1 %v12238_v2  ;;  %v3727_v22 = vmul.f32 %v3702_v48, %v15325_v39  ;;  %v3729_v39 = vmul.f32 %v3704_v41, %v15341_v15  ;;  %v3709_v15 = vmul.f32 %v15450_v21, %v15450_v21 }
 0x451   :  { %v3743_v13 = vadd.f32 %v3742_v60, %v3719_v40  ;;  %v3728_v40 = vmul.f32 %v3703_v46, %v15333_v42  ;;  %v3707_v42 = vmul.f32 %v15446_v4, %v15446_v4  ;;  %v3736_v46 = vmul.f32 %v3711_v23, %v15383_v54 }
 0x452   :  { %12241 = vmatpush3.bf16.msra.mxu1 %v12238_v2 }
 0x453   :  { %v3744_v43 = vadd.f32 %v3743_v13, %v3720_v5  ;;  %v15546_v13 = vpack.c.bf16 %v9747_v25, %v9746_v14 }
 0x455   :  { %v3745_v35 = vadd.f32 %v3744_v43, %v3721_v16  ;;  %12243 = vmatprep.subr.bf16.mxu1 %v15546_v13  ;;  %v17150_v16 = vld [vmem:[#allocation11_spill] sm:$0xff] }
 0x456   :  { %v3731_v43 = vmul.f32 %v3706_v6, %v17150_v16 }
 0x457   :  { %v3746_v8 = vadd.f32 %v3745_v35, %v3722_v3  ;;  %v3732_v3 = vmul.f32 %v3707_v42, %v17151_v10 }
 0x459   :  { %v3747_v26 = vadd.f32 %v3746_v8, %v3723_v47  ;;  %v17152_v47 = vld [vmem:[#allocation13_spill] sm:$0xff] }
 0x45a   :  { %v3733_v31 = vmul.f32 %v3708_v61, %v17152_v47 }
 0x45b   :  { %v3748_v63 = vadd.f32 %v3747_v26, %v3724_v20  ;;  %v17153_v20 = vld [vmem:[#allocation14_spill] sm:$0xff] }
 0x45c   :  { %v3734_v26 = vmul.f32 %v3709_v15, %v17153_v20 }
 0x45d   :  { %v3749_v0 = vadd.f32 %v3748_v63, %v3725_v29  ;;  %v3735_v29 = vmul.f32 %v3710_v56, %v15380_v52 }
 0x45f   :  { %v3750_v32 = vadd.f32 %v3749_v0, %v3726_v50 }
 0x461   :  { %v3751_v60 = vadd.f32 %v3750_v32, %v3727_v22 }
 0x463   :  { %v3752_v5 = vadd.f32 %v3751_v60, %v3728_v40 }
 0x465   :  { %v3753_v38 = vadd.f32 %v3752_v5, %v3729_v39 }
 0x467   :  { %v3754_v2 = vadd.f32 %v3753_v38, %v3730_v49 }
 0x469   :  { %v3755_v35 = vadd.f32 %v3754_v2, %v3731_v43 }
 0x46b   :  { %v3756_v8 = vadd.f32 %v3755_v35, %v3732_v3 }
 0x46d   :  { %v3757_v48 = vadd.f32 %v3756_v8, %v3733_v31 }
 0x46f   :  { %v3758_v63 = vadd.f32 %v3757_v48, %v3734_v26 }
 0x471   :  { %v3759_v50 = vadd.f32 %v3758_v63, %v3735_v29 }
 0x473   :  { %v3760_v0 = vadd.f32 %v3759_v50, %v3736_v46 }
 0x475   :  { %v3761_v41 = vrot.slane %v3760_v0, 4 }
 0x477   :  { %v3762_v22 = vadd.f32 %v3761_v41, %v3760_v0 }
 0x479   :  { %v3763_v32 = vrot.slane %v3762_v22, 2 }
 0x47b   :  { %v3764_v59 = vadd.f32 %v3763_v32, %v3762_v22 }
 0x47d   :  { %v3765_v40 = vrot.slane %v3764_v59, 1 }
 0x47f   :  { %v3766_v60 = vadd.f32 %v3765_v40, %v3764_v59 }
 0x481   :  { %v3767_v14 = vmul.f32 0.0078125, %v3766_v60 }
 0x483   :  { %v3768_v25 = vadd.f32 1e-05, %v3767_v14 }
 0x485   :  { %13271 = vrsqrt.f32 %v3768_v25 }
 0x48f   :  { %v13272_v6 = vpop.eup %13271 }
 0x490   :  { %v15567_v39 = vmul.f32 %v13272_v6, %v15438_v27  ;;  %v15570_v52 = vmul.f32 %v13272_v6, %v15441_v37  ;;  %v15573_v54 = vmul.f32 %v13272_v6, %v15444_v51  ;;  %v15576_v5 = vmul.f32 %v13272_v6, %v15446_v4  ;;  %v15595_v4 = vld [vmem:[%s17129_s2] ss:$0 sm:$0xff] }
 0x491   :  { %v15579_v42 = vmul.f32 %v13272_v6, %v15448_v55  ;;  %v15582_v49 = vmul.f32 %v13272_v6, %v15450_v21  ;;  %v15585_v38 = vmul.f32 %v13272_v6, %v15452_v33  ;;  %v3770_v27 = vmul.f32 %v13272_v6, %v15387_v1 }
 0x492   :  { %v15589_v37 = vmul.f32 %v13272_v6, %v15454_v28  ;;  %v3771_v51 = vmul.f32 %v13272_v6, %v15390_v12  ;;  %v3772_v55 = vmul.f32 %v13272_v6, %v15393_v34  ;;  %v3773_v21 = vmul.f32 %v13272_v6, %v15396_v62  ;;  %v15606_v12 = vld [vmem:[%s17129_s2 + $0x1] ss:$0 sm:$0xff] }
 0x493   :  { %v3774_v61 = vmul.f32 %v13272_v6, %v15399_v58  ;;  %v3800_v33 = vmul.f32 %v15595_v4, %v3770_v27  ;;  %v3775_v1 = vmul.f32 %v13272_v6, %v15402_v53  ;;  %v3776_v16 = vmul.f32 %v13272_v6, %v15405_v44 }
 0x494   :  { %v3801_v28 = vmul.f32 %v15595_v4, %v3771_v51  ;;  %v3802_v43 = vmul.f32 %v15595_v4, %v3772_v55  ;;  %v3777_v34 = vmul.f32 %v13272_v6, %v15408_v9  ;;  %v3803_v62 = vmul.f32 %v15595_v4, %v3773_v21 }
 0x495   :  { %v3778_v58 = vmul.f32 %v13272_v6, %v15411_v11  ;;  %v3804_v2 = vmul.f32 %v15595_v4, %v3774_v61  ;;  %v3830_v53 = vadd.f32 %v15606_v12, %v3800_v33  ;;  %v3779_v15 = vmul.f32 %v13272_v6, %v15414_v19 }
 0x496   :  { %v3805_v10 = vmul.f32 %v15595_v4, %v3775_v1  ;;  %v3831_v3 = vadd.f32 %v15606_v12, %v3801_v28  ;;  %v3780_v44 = vmul.f32 %v13272_v6, %v15417_v24  ;;  %v3806_v35 = vmul.f32 %v15595_v4, %v3776_v16 }
 0x497   :  { %v3832_v9 = vadd.f32 %v15606_v12, %v3802_v43  ;;  %v3781_v56 = vmul.f32 %v13272_v6, %v15420_v30  ;;  %v3807_v11 = vmul.f32 %v15595_v4, %v3777_v34  ;;  %v3833_v47 = vadd.f32 %v15606_v12, %v3803_v62 }
 0x498   :  { %v3782_v31 = vmul.f32 %v13272_v6, %v15423_v36  ;;  %v3808_v19 = vmul.f32 %v15595_v4, %v3778_v58  ;;  %v3834_v8 = vadd.f32 %v15606_v12, %v3804_v2  ;;  %13273 = vtanh.f32 %v3830_v53 }
 0x499   :  { %v3783_v23 = vmul.f32 %v13272_v6, %v15426_v45  ;;  %v3809_v24 = vmul.f32 %v15595_v4, %v3779_v15  ;;  %v3835_v20 = vadd.f32 %v15606_v12, %v3805_v10  ;;  %13275 = vtanh.f32 %v3831_v3 }
 0x49a   :  { %v3784_v30 = vmul.f32 %v13272_v6, %v15429_v57  ;;  %v3810_v26 = vmul.f32 %v15595_v4, %v3780_v44  ;;  %v3836_v48 = vadd.f32 %v15606_v12, %v3806_v35  ;;  %13277 = vtanh.f32 %v3832_v9 }
 0x49b   :  { %v3785_v36 = vmul.f32 %v13272_v6, %v15432_v7  ;;  %v3811_v29 = vmul.f32 %v15595_v4, %v3781_v56  ;;  %v3837_v63 = vadd.f32 %v15606_v12, %v3807_v11  ;;  %13279 = vtanh.f32 %v3833_v47 }
 0x49c   :  { %v3786_v45 = vmul.f32 %v13272_v6, %v15435_v17  ;;  %v3812_v46 = vmul.f32 %v15595_v4, %v3782_v31  ;;  %v3838_v50 = vadd.f32 %v15606_v12, %v3808_v19  ;;  %13281 = vtanh.f32 %v3834_v8 }
 0x49d   :  { %v3813_v57 = vmul.f32 %v15595_v4, %v3783_v23  ;;  %v3839_v0 = vadd.f32 %v15606_v12, %v3809_v24  ;;  %13283 = vtanh.f32 %v3835_v20  ;;  %v3814_v41 = vmul.f32 %v15595_v4, %v3784_v30 }
 0x49e   :  { %v3840_v7 = vadd.f32 %v15606_v12, %v3810_v26  ;;  %13285 = vtanh.f32 %v3836_v48  ;;  %v3815_v22 = vmul.f32 %v15595_v4, %v3785_v36  ;;  %v3841_v32 = vadd.f32 %v15606_v12, %v3811_v29 }
 0x49f   :  { %13287 = vtanh.f32 %v3837_v63  ;;  %v3816_v17 = vmul.f32 %v15595_v4, %v3786_v45  ;;  %v3842_v59 = vadd.f32 %v15606_v12, %v3812_v46  ;;  %v3817_v40 = vmul.f32 %v15595_v4, %v15567_v39 }
 0x4a0   :  { %13289 = vtanh.f32 %v3838_v50  ;;  %v3843_v60 = vadd.f32 %v15606_v12, %v3813_v57  ;;  %v3818_v25 = vmul.f32 %v15595_v4, %v15570_v52  ;;  %v3844_v6 = vadd.f32 %v15606_v12, %v3814_v41 }
 0x4a1   :  { %13291 = vtanh.f32 %v3839_v0  ;;  %v3819_v51 = vmul.f32 %v15595_v4, %v15573_v54  ;;  %v3845_v55 = vadd.f32 %v15606_v12, %v3815_v22  ;;  %v3820_v39 = vmul.f32 %v15595_v4, %v15576_v5 }
 0x4a2   :  { %v13274_v14 = vpop.eup %13273  ;;  %13293 = vtanh.f32 %v3840_v7  ;;  %v3846_v61 = vadd.f32 %v15606_v12, %v3816_v17  ;;  %v3821_v33 = vmul.f32 %v15595_v4, %v15579_v42  ;;  %v3847_v1 = vadd.f32 %v15606_v12, %v3817_v40 }
 0x4a3   :  { %v13276_v27 = vpop.eup %13275  ;;  %13295 = vtanh.f32 %v3841_v32  ;;  %3880 = vst [vmem:[#allocation2] sm:$0xff] %v13274_v14  ;;  %v3822_v28 = vmul.f32 %v15595_v4, %v15582_v49  ;;  %v3848_v16 = vadd.f32 %v15606_v12, %v3818_v25  ;;  %v3823_v43 = vmul.f32 %v15595_v4, %v15585_v38 }
 0x4a4   :  { %v13278_v21 = vpop.eup %13277  ;;  %13297 = vtanh.f32 %v3842_v59  ;;  %3881 = vst [vmem:[#allocation2 + $0x8] sm:$0xff] %v13276_v27  ;;  %v3849_v34 = vadd.f32 %v15606_v12, %v3819_v51  ;;  %v3824_v62 = vmul.f32 %v15595_v4, %v15589_v37  ;;  %v3850_v58 = vadd.f32 %v15606_v12, %v3820_v39 }
 0x4a5   :  { %v13280_v52 = vpop.eup %13279  ;;  %13299 = vtanh.f32 %v3843_v60  ;;  %3882 = vst [vmem:[#allocation2 + $0x10] sm:$0xff] %v13278_v21  ;;  %v3851_v2 = vadd.f32 %v15606_v12, %v3821_v33  ;;  %v3852_v38 = vadd.f32 %v15606_v12, %v3822_v28  ;;  %v3853_v44 = vadd.f32 %v15606_v12, %v3823_v43 }
 0x4a6   :  { %v13282_v54 = vpop.eup %13281  ;;  %13301 = vtanh.f32 %v3844_v6  ;;  %3883 = vst [vmem:[#allocation2 + $0x18] sm:$0xff] %v13280_v52  ;;  %v3854_v35 = vadd.f32 %v15606_v12, %v3824_v62 }
 0x4a7   :  { %v13284_v5 = vpop.eup %13283  ;;  %13303 = vtanh.f32 %v3845_v55  ;;  %3884 = vst [vmem:[#allocation2 + $0x20] sm:$0xff] %v13282_v54 }
 0x4a8   :  { %v13286_v42 = vpop.eup %13285  ;;  %13305 = vtanh.f32 %v3846_v61  ;;  %3885 = vst [vmem:[#allocation2 + $0x28] sm:$0xff] %v13284_v5 }
 0x4a9   :  { %v13288_v49 = vpop.eup %13287  ;;  %13307 = vtanh.f32 %v3847_v1  ;;  %3886 = vst [vmem:[#allocation2 + $0x30] sm:$0xff] %v13286_v42 }
 0x4aa   :  { %v13290_v53 = vpop.eup %13289  ;;  %13309 = vtanh.f32 %v3848_v16  ;;  %3887 = vst [vmem:[#allocation2 + $0x38] sm:$0xff] %v13288_v49  ;;  %v3905_v15 = vld [vmem:[#allocation2] ss:$2 sm:$0xf] }
 0x4ab   :  { %v3907_v10 = vld [vmem:[#allocation2 + $0x1] ss:$2 sm:$0xf]  ;;  %v13292_v3 = vpop.eup %13291  ;;  %13311 = vtanh.f32 %v3849_v34  ;;  %3888 = vst [vmem:[#allocation2 + $0x40] sm:$0xff] %v13290_v53 }
 0x4ac   :  { %v3908_v37 = vmax.f32 %v3905_v15, %v3907_v10  ;;  %v13294_v4 = vpop.eup %13293  ;;  %13313 = vtanh.f32 %v3850_v58  ;;  %3889 = vst [vmem:[#allocation2 + $0x48] sm:$0xff] %v13292_v3  ;;  %v3910_v9 = vld [vmem:[#allocation2 + $0xa] ss:$2 sm:$0xf] }
 0x4ad   :  { %v3912_v56 = vld [vmem:[#allocation2 + $0xb] ss:$2 sm:$0xf]  ;;  %v13296_v11 = vpop.eup %13295  ;;  %13315 = vtanh.f32 %v3851_v2  ;;  %v3917_v31 = vld [vmem:[#allocation2 + $0x14] ss:$2 sm:$0xf] }
 0x4ae   :  { %v3913_v47 = vmax.f32 %v3910_v9, %v3912_v56  ;;  %v3919_v19 = vld [vmem:[#allocation2 + $0x15] ss:$2 sm:$0xf]  ;;  %v13298_v8 = vpop.eup %13297  ;;  %13317 = vtanh.f32 %v3852_v38  ;;  %v3922_v24 = vld [vmem:[#allocation2 + $0x1e] ss:$2 sm:$0xf] }
 0x4af   :  { %v3920_v23 = vmax.f32 %v3917_v31, %v3919_v19  ;;  %v3924_v20 = vld [vmem:[#allocation2 + $0x1f] ss:$2 sm:$0xf]  ;;  %v13300_v30 = vpop.eup %13299  ;;  %13319 = vtanh.f32 %v3853_v44  ;;  %3892 = vst [vmem:[#allocation2 + $0x60] sm:$0xff] %v13298_v8 }
 0x4b0   :  { %v3914_v26 = vmax.f32 %v3908_v37, %v3913_v47  ;;  %v3925_v48 = vmax.f32 %v3922_v24, %v3924_v20  ;;  %v3929_v12 = vld [vmem:[#allocation2 + $0x28] ss:$2 sm:$0xf]  ;;  %v3931_v36 = vld [vmem:[#allocation2 + $0x29] ss:$2 sm:$0xf]  ;;  %v13302_v29 = vpop.eup %13301  ;;  %13321 = vtanh.f32 %v3854_v35 }
 0x4b1   :  { %3893 = vst [vmem:[#allocation2 + $0x68] sm:$0xff] %v13300_v30  ;;  %v3932_v63 = vmax.f32 %v3929_v12, %v3931_v36  ;;  %v13304_v45 = vpop.eup %13303  ;;  %3894 = vst [vmem:[#allocation2 + $0x70] sm:$0xff] %v13302_v29  ;;  %v3934_v50 = vld [vmem:[#allocation2 + $0x32] ss:$2 sm:$0xf]  ;;  %v4277_v12 = vld [vmem:[#allocation3 + $0x1] sm:$0xff] }
 0x4b2   :  { %3915 = vst [vmem:[#allocation3 + $0x12] sm:$0xf] %v3914_v26  ;;  %v3926_v46 = vmax.f32 %v3920_v23, %v3925_v48  ;;  %v3936_v57 = vld [vmem:[#allocation2 + $0x33] ss:$2 sm:$0xf]  ;;  %v13306_v0 = vpop.eup %13305  ;;  %3895 = vst [vmem:[#allocation2 + $0x78] sm:$0xff] %v13304_v45 }
 0x4b3   :  { %v3937_v41 = vmax.f32 %v3934_v50, %v3936_v57  ;;  %v3941_v7 = vld [vmem:[#allocation2 + $0x3c] ss:$2 sm:$0xf]  ;;  %v3943_v22 = vld [vmem:[#allocation2 + $0x3d] ss:$2 sm:$0xf]  ;;  %v13308_v32 = vpop.eup %13307 }
 0x4b4   :  { %3896 = vst [vmem:[#allocation2 + $0x80] sm:$0xff] %v13306_v0  ;;  %3927 = vst [vmem:[#allocation3 + $0x1a] sm:$0xf] %v3926_v46  ;;  %v3944_v17 = vmax.f32 %v3941_v7, %v3943_v22  ;;  %v3946_v59 = vld [vmem:[#allocation2 + $0x46] ss:$2 sm:$0xf]  ;;  %v13310_v60 = vpop.eup %13309 }
 0x4b5   :  { %v3948_v40 = vld [vmem:[#allocation2 + $0x47] ss:$2 sm:$0xf]  ;;  %3897 = vst [vmem:[#allocation2 + $0x88] sm:$0xff] %v13308_v32  ;;  %v3938_v14 = vmax.f32 %v3932_v63, %v3937_v41  ;;  %v13312_v6 = vpop.eup %13311  ;;  %3898 = vst [vmem:[#allocation2 + $0x90] sm:$0xff] %v13310_v60  ;;  %v9748_v36 = vld [vmem:[%s17131_s4 + $0x50] sm:$0xff] }
 0x4b6   :  { %v3949_v25 = vmax.f32 %v3946_v59, %v3948_v40  ;;  %v13314_v27 = vpop.eup %13313  ;;  %3899 = vst [vmem:[#allocation2 + $0x98] sm:$0xff] %v13312_v6  ;;  %v9749_v29 = vld [vmem:[%s17131_s4 + $0x58] sm:$0xff]  ;;  %v9766_v46 = vld [vmem:[%s17131_s4 + $0x60] sm:$0xff]  ;;  %v9767_v50 = vld [vmem:[%s17131_s4 + $0x68] sm:$0xff] }
 0x4b7   :  { %3939 = vst [vmem:[#allocation3 + $0x22] sm:$0xf] %v3938_v14  ;;  %v13316_v55 = vpop.eup %13315  ;;  %3900 = vst [vmem:[#allocation2 + $0xa0] sm:$0xff] %v13314_v27  ;;  %v15726_v63 = vld [vmem:[#allocation3 + $0x9] sm:$0xff]  ;;  %v12246_v45 = vpack.c.bf16 %v9749_v29, %v9748_v36  ;;  %v12250_v0 = vpack.c.bf16 %v9767_v50, %v9766_v46  ;;  %v15749_v22 = vld [vmem:[#allocation3 + $0x31] sm:$0xff] }
 0x4b8   :  { %v3950_v51 = vmax.f32 %v3944_v17, %v3949_v25  ;;  %v3953_v21 = vld [vmem:[#allocation2 + $0x64] ss:$2 sm:$0xf]  ;;  %v3955_v39 = vld [vmem:[#allocation2 + $0x65] ss:$2 sm:$0xf]  ;;  %v13318_v61 = vpop.eup %13317 }
 0x4b9   :  { %3901 = vst [vmem:[#allocation2 + $0xa8] sm:$0xff] %v13316_v55  ;;  %v15675_v52 = vld [vmem:[#allocation3 + $0x10] sm:$0xff]  ;;  %v3956_v33 = vmax.f32 %v3953_v21, %v3955_v39  ;;  %v3958_v1 = vld [vmem:[#allocation2 + $0x6e] ss:$2 sm:$0xf]  ;;  %v13320_v54 = vpop.eup %13319  ;;  %3902 = vst [vmem:[#allocation2 + $0xb0] sm:$0xff] %v13318_v61 }
 0x4ba   :  { %3951 = vst [vmem:[#allocation3 + $0x2a] sm:$0xf] %v3950_v51  ;;  %11428 = vmatprep.mubr.msk.f32.mxu1 %vm155_vm1, %v15675_v52  ;;  %v3960_v28 = vld [vmem:[#allocation2 + $0x6f] ss:$2 sm:$0xf]  ;;  %v13322_v5 = vpop.eup %13321  ;;  %v15736_v57 = vld [vmem:[#allocation3 + $0x11] sm:$0xff] }
 0x4bb   :  { %v3965_v16 = vld [vmem:[#allocation2 + $0x78] ss:$2 sm:$0xf]  ;;  %v15679_v43 = vld [vmem:[#allocation3 + $0x18] sm:$0xff]  ;;  %v3961_v34 = vmax.f32 %v3958_v1, %v3960_v28  ;;  %v15759_v17 = vld [vmem:[#allocation3 + $0x41] sm:$0xff] }
 0x4bc   :  { %v3967_v42 = vld [vmem:[#allocation2 + $0x79] ss:$2 sm:$0xf]  ;;  %11429 = vmatmul.mubr.msk.f32.gmra.mrb[30].mxu1 %vm155_vm1, %v15679_v43  ;;  %v3970_v58 = vld [vmem:[#allocation2 + $0x82] ss:$2 sm:$0xf] }
 0x4bd   :  { %v3968_v62 = vmax.f32 %v3965_v16, %v3967_v42  ;;  %v3972_v49 = vld [vmem:[#allocation2 + $0x83] ss:$2 sm:$0xf]  ;;  %v3962_v2 = vmax.f32 %v3956_v33, %v3961_v34  ;;  %v3977_v38 = vld [vmem:[#allocation2 + $0x8c] ss:$2 sm:$0xf] }
 0x4be   :  { %v3973_v53 = vmax.f32 %v3970_v58, %v3972_v49  ;;  %v3979_v15 = vld [vmem:[#allocation2 + $0x8d] ss:$2 sm:$0xf]  ;;  %v3982_v44 = vld [vmem:[#allocation2 + $0x96] ss:$2 sm:$0xf] }
 0x4bf   :  { %v15683_v10 = vld [vmem:[#allocation3 + $0x20] sm:$0xff]  ;;  %v3980_v3 = vmax.f32 %v3977_v38, %v3979_v15  ;;  %3963 = vst [vmem:[#allocation3 + $0x52] sm:$0xf] %v3962_v2  ;;  %v3984_v4 = vld [vmem:[#allocation2 + $0x97] ss:$2 sm:$0xf] }
 0x4c0   :  { %11431 = vmatprep.mubr.msk.f32.mxu1 %vm155_vm1, %v15683_v10  ;;  %v3974_v37 = vmax.f32 %v3968_v62, %v3973_v53  ;;  %v3989_v35 = vld [vmem:[#allocation2 + $0xa0] ss:$2 sm:$0xf]  ;;  %v3985_v56 = vmax.f32 %v3982_v44, %v3984_v4  ;;  %v3991_v11 = vld [vmem:[#allocation2 + $0xa1] ss:$2 sm:$0xf] }
 0x4c1   :  { %v15687_v9 = vld [vmem:[#allocation3 + $0x28] sm:$0xff]  ;;  %v3992_v47 = vmax.f32 %v3989_v35, %v3991_v11  ;;  %v15741_v41 = vld [vmem:[#allocation3 + $0x19] sm:$0xff]  ;;  %v15781_v25 = vld [vmem:[#allocation3 + $0x71] sm:$0xff] }
 0x4c2   :  { %11432 = vmatmul.mubr.msk.f32.gmra.mrb[32].mxu1 %vm155_vm1, %v15687_v9  ;;  %3975 = vst [vmem:[#allocation3 + $0x5a] sm:$0xf] %v3974_v37  ;;  %v3994_v31 = vld [vmem:[#allocation2 + $0xaa] ss:$2 sm:$0xf]  ;;  %v3986_v8 = vmax.f32 %v3980_v3, %v3985_v56  ;;  %v15751_v32 = vld [vmem:[#allocation3 + $0x29] sm:$0xff] }
 0x4c3   :  { %v3996_v19 = vld [vmem:[#allocation2 + $0xab] ss:$2 sm:$0xf]  ;;  %11434 = vmatprep.mubr.msk.f32.mxu1 %vm155_vm1, %v15366_v18  ;;  %v15789_v27 = vld [vmem:[#allocation3 + $0x79] sm:$0xff]  ;;  %v9769_v21 = vld [vmem:[%s17131_s4 + $0x78] sm:$0xff] }
 0x4c4   :  { %v3997_v23 = vmax.f32 %v3994_v31, %v3996_v19  ;;  %3987 = vst [vmem:[#allocation3 + $0x62] sm:$0xf] %v3986_v8  ;;  %v15745_v7 = vld [vmem:[#allocation3 + $0x21] sm:$0xff]  ;;  %v15765_v59 = vld [vmem:[#allocation3 + $0x49] sm:$0xff]  ;;  %v9786_v33 = vld [vmem:[%s17131_s4 + $0x80] sm:$0xff] }
 0x4c5   :  { %v4539_v51 = vld [vmem:[#allocation3 + $0x2] sm:$0xff]  ;;  %v15800_v39 = vld [vmem:[#allocation3 + $0xa] sm:$0xff]  ;;  %v15810_v54 = vld [vmem:[#allocation3 + $0x12] sm:$0xff] }
 0x4c6   :  { %v3998_v24 = vmax.f32 %v3992_v47, %v3997_v23  ;;  %11435 = vmatmul.mubr.msk.f32.gmra.mrb[34].mxu1 %vm155_vm1, %v15366_v18  ;;  %v15699_v20 = vld [vmem:[#allocation3 + $0x50] sm:$0xff]  ;;  %v9768_v55 = vld [vmem:[%s17131_s4 + $0x70] sm:$0xff]  ;;  %v9787_v1 = vld [vmem:[%s17131_s4 + $0x88] sm:$0xff] }
 0x4c7   :  { %11437 = vmatprep.mubr.msk.f32.mxu1 %vm155_vm1, %v15366_v18  ;;  %v15769_v40 = vld [vmem:[#allocation3 + $0x51] sm:$0xff]  ;;  %v12254_v61 = vpack.c.bf16 %v9769_v21, %v9768_v55  ;;  %v12258_v28 = vpack.c.bf16 %v9787_v1, %v9786_v33  ;;  %v15814_v16 = vld [vmem:[#allocation3 + $0x1a] sm:$0xff]  ;;  %v15818_v5 = vld [vmem:[#allocation3 + $0x22] sm:$0xff] }
 0x4c8   :  { %3999 = vst [vmem:[#allocation3 + $0x6a] sm:$0xf] %v3998_v24  ;;  %v15822_v34 = vld [vmem:[#allocation3 + $0x32] sm:$0xff]  ;;  %v15824_v42 = vld [vmem:[#allocation3 + $0x2a] sm:$0xff]  ;;  %v15830_v62 = vld [vmem:[#allocation3 + $0x3a] sm:$0xff] }
 0x4c9   :  { %v15703_v30 = vld [vmem:[#allocation3 + $0x58] sm:$0xff]  ;;  %v15832_v58 = vld [vmem:[#allocation3 + $0x42] sm:$0xff]  ;;  %v15838_v49 = vld [vmem:[#allocation3 + $0x4a] sm:$0xff] }
 0x4ca   :  { %11438 = vmatmul.mubr.msk.f32.gmra.mrb[36].mxu1 %vm155_vm1, %v15366_v18  ;;  %v15773_v60 = vld [vmem:[#allocation3 + $0x59] sm:$0xff]  ;;  %v9788_v37 = vld [vmem:[%s17131_s4 + $0x90] sm:$0xff]  ;;  %v9789_v4 = vld [vmem:[%s17131_s4 + $0x98] sm:$0xff] }
 0x4cb   :  { %11440 = vmatprep.mubr.msk.f32.mxu1 %vm155_vm1, %v15699_v20  ;;  %v15707_v26 = vld [vmem:[#allocation3 + $0x60] sm:$0xff]  ;;  %v15842_v2 = vld [vmem:[#allocation3 + $0x52] sm:$0xff]  ;;  %v12262_v35 = vpack.c.bf16 %v9789_v4, %v9788_v37  ;;  %v9828_v29 = vld [vmem:[%s17131_s4 + $0xd0] sm:$0xff] }
 0x4cc   :  { %v15777_v14 = vld [vmem:[#allocation3 + $0x61] sm:$0xff]  ;;  %v15854_v15 = vld [vmem:[#allocation3 + $0x72] sm:$0xff] }
 0x4cd   :  { %v15846_v53 = vld [vmem:[#allocation3 + $0x5a] sm:$0xff]  ;;  %v15850_v38 = vld [vmem:[#allocation3 + $0x62] sm:$0xff]  ;;  %v9809_v19 = vld [vmem:[%s17131_s4 + $0xb8] sm:$0xff] }
 0x4ce   :  { %11441 = vmatmul.mubr.msk.f32.gmra.mrb[38].mxu1 %vm155_vm1, %v15703_v30  ;;  %v15862_v44 = vld [vmem:[#allocation3 + $0x7a] sm:$0xff]  ;;  %v9848_v55 = vld [vmem:[%s17131_s4 + $0xf0] sm:$0xff]  ;;  %v9849_v21 = vld [vmem:[%s17131_s4 + $0xf8] sm:$0xff] }
 0x4cf   :  { %11443 = vmatprep.mubr.msk.f32.mxu1 %vm155_vm1, %v15707_v26  ;;  %v15711_v48 = vld [vmem:[#allocation3 + $0x68] sm:$0xff]  ;;  %v9806_v56 = vld [vmem:[%s17131_s4 + $0xa0] sm:$0xff]  ;;  %v9807_v11 = vld [vmem:[%s17131_s4 + $0xa8] sm:$0xff] }
 0x4d0   :  { %v15783_v6 = vld [vmem:[#allocation3 + $0x69] sm:$0xff]  ;;  %v12266_v47 = vpack.c.bf16 %v9807_v11, %v9806_v56  ;;  %v15904_v31 = vld [vmem:[#allocation3] sm:$0xff]  ;;  %v9826_v23 = vld [vmem:[%s17131_s4 + $0xc0] sm:$0xff] }
 0x4d1   :  { %v15856_v3 = vld [vmem:[#allocation3 + $0x6a] sm:$0xff]  ;;  %v9827_v24 = vld [vmem:[%s17131_s4 + $0xc8] sm:$0xff]  ;;  %v9846_v46 = vld [vmem:[%s17131_s4 + $0xe0] sm:$0xff] }
 0x4d2   :  { %11444 = vmatmul.mubr.msk.f32.gmra.mrb[40].mxu1 %vm155_vm1, %v15711_v48  ;;  %v15954_v36 = vld [vmem:[#allocation3 + $0x81] sm:$0xff] }
 0x4d3   :  { %11446 = vmatprep.mubr.msk.f32.mxu1 %vm155_vm1, %v15366_v18  ;;  %v9847_v50 = vld [vmem:[%s17131_s4 + $0xe8] sm:$0xff] }
 0x4d4   :  { %v9867_v33 = vld [vmem:[%s17131_s4 + $0x108] sm:$0xff] }
 0x4d6   :  { %11447 = vmatmul.mubr.msk.f32.gmra.mrb[42].mxu1 %vm155_vm1, %v15366_v18 }
 0x4d7   :  { %11457 = vmatprep.mubr.msk.f32.mxu1 %vm155_vm1, %v4277_v12  ;;  %v12274_v12 = vpack.c.bf16 %v9827_v24, %v9826_v23 }
 0x4da   :  { %11458 = vmatmul.mubr.msk.f32.vlgmr.msra.gmra.mrb[28].mxu1 %vm155_vm1, %v15726_v63 }
 0x4db   :  { %11460 = vmatprep.mubr.msk.f32.mxu1 %vm155_vm1, %v15736_v57  ;;  %12245 = vmatpush3.bf16.msra.mxu1 %v15546_v13  ;;  %v15757_v13 = vld [vmem:[#allocation3 + $0x39] sm:$0xff] }
 0x4dc   :  { %12247 = vmatprep.subr.bf16.mxu1 %v12246_v45 }
 0x4de   :  { %11461 = vmatmul.mubr.msk.f32.gmra.mrb[30].mxu1 %vm155_vm1, %v15741_v41 }
 0x4df   :  { %11463 = vmatprep.mubr.msk.f32.mxu1 %vm155_vm1, %v15745_v7  ;;  %12249 = vmatpush3.bf16.msra.mxu1 %v12246_v45 }
 0x4e0   :  { %12251 = vmatprep.subr.bf16.mxu1 %v12250_v0 }
 0x4e2   :  { %11464 = vmatmul.mubr.msk.f32.gmra.mrb[32].mxu1 %vm155_vm1, %v15751_v32 }
 0x4e3   :  { %11466 = vmatprep.mubr.msk.f32.mxu1 %vm155_vm1, %v15749_v22 }
 0x4e6   :  { %11467 = vmatmul.mubr.msk.f32.gmra.mrb[34].mxu1 %vm155_vm1, %v15757_v13 }
 0x4e7   :  { %11469 = vmatprep.mubr.msk.f32.mxu1 %vm155_vm1, %v15759_v17 }
 0x4ea   :  { %11470 = vmatmul.mubr.msk.f32.gmra.mrb[36].mxu1 %vm155_vm1, %v15765_v59 }
 0x4eb   :  { %11472 = vmatprep.mubr.msk.f32.mxu1 %vm155_vm1, %v15769_v40 }
 0x4ee   :  { %11473 = vmatmul.mubr.msk.f32.gmra.mrb[38].mxu1 %vm155_vm1, %v15773_v60 }
 0x4ef   :  { %11475 = vmatprep.mubr.msk.f32.mxu1 %vm155_vm1, %v15777_v14 }
 0x4f2   :  { %11476 = vmatmul.mubr.msk.f32.gmra.mrb[40].mxu1 %vm155_vm1, %v15783_v6 }
 0x4f3   :  { %11478 = vmatprep.mubr.msk.f32.mxu1 %vm155_vm1, %v15781_v25 }
 0x4f6   :  { %11479 = vmatmul.mubr.msk.f32.gmra.mrb[42].mxu1 %vm155_vm1, %v15789_v27 }
 0x4f7   :  { %11489 = vmatprep.mubr.msk.f32.mxu1 %vm155_vm1, %v4539_v51  ;;  %v16000_v51 = vld [vmem:[#allocation3 + $0x82] sm:$0xff] }
 0x4fa   :  { %11490 = vmatmul.mubr.msk.f32.vlgmr.msra.gmra.mrb[28].mxu1 %vm155_vm1, %v15800_v39 }
 0x4fb   :  { %11492 = vmatprep.mubr.msk.f32.mxu1 %vm155_vm1, %v15810_v54  ;;  %12253 = vmatpush3.bf16.msra.mxu1 %v12250_v0  ;;  %v12282_v0 = vpack.c.bf16 %v9847_v50, %v9846_v46 }
 0x4fc   :  { %12255 = vmatprep.subr.bf16.mxu1 %v12254_v61 }
 0x4fe   :  { %11493 = vmatmul.mubr.msk.f32.gmra.mrb[30].mxu1 %vm155_vm1, %v15814_v16 }
 0x4ff   :  { %11495 = vmatprep.mubr.msk.f32.mxu1 %vm155_vm1, %v15818_v5  ;;  %12257 = vmatpush3.bf16.msra.mxu1 %v12254_v61  ;;  %v9866_v61 = vld [vmem:[%s17131_s4 + $0x100] sm:$0xff] }
 0x500   :  { %12259 = vmatprep.subr.bf16.mxu1 %v12258_v28  ;;  %v12290_v1 = vpack.c.bf16 %v9867_v33, %v9866_v61 }
 0x502   :  { %11496 = vmatmul.mubr.msk.f32.gmra.mrb[32].mxu1 %vm155_vm1, %v15824_v42 }
 0x503   :  { %11498 = vmatprep.mubr.msk.f32.mxu1 %vm155_vm1, %v15822_v34 }
 0x506   :  { %11499 = vmatmul.mubr.msk.f32.gmra.mrb[34].mxu1 %vm155_vm1, %v15830_v62 }
 0x507   :  { %11501 = vmatprep.mubr.msk.f32.mxu1 %vm155_vm1, %v15832_v58 }
 0x50a   :  { %11502 = vmatmul.mubr.msk.f32.gmra.mrb[36].mxu1 %vm155_vm1, %v15838_v49 }
 0x50b   :  { %11504 = vmatprep.mubr.msk.f32.mxu1 %vm155_vm1, %v15842_v2 }
 0x50e   :  { %11505 = vmatmul.mubr.msk.f32.gmra.mrb[38].mxu1 %vm155_vm1, %v15846_v53 }
 0x50f   :  { %11507 = vmatprep.mubr.msk.f32.mxu1 %vm155_vm1, %v15850_v38 }
 0x512   :  { %11508 = vmatmul.mubr.msk.f32.gmra.mrb[40].mxu1 %vm155_vm1, %v15856_v3 }
 0x513   :  { %11510 = vmatprep.mubr.msk.f32.mxu1 %vm155_vm1, %v15854_v15 }
 0x516   :  { %11511 = vmatmul.mubr.msk.f32.gmra.mrb[42].mxu1 %vm155_vm1, %v15862_v44 }
 0x517   :  { %11521 = vmatprep.mubr.msk.f32.mxu1 %vm155_vm1, %v15366_v18 }
 0x51a   :  { %11522 = vmatmul.mubr.msk.f32.vlgmr.msra.gmra.mrb[28].mxu1 %vm155_vm1, %v15675_v52 }
 0x51b   :  { %11524 = vmatprep.mubr.msk.f32.mxu1 %vm155_vm1, %v15679_v43  ;;  %12261 = vmatpush3.bf16.msra.mxu1 %v12258_v28 }
 0x51c   :  { %12263 = vmatprep.subr.bf16.mxu1 %v12262_v35 }
 0x51e   :  { %11525 = vmatmul.mubr.msk.f32.gmra.mrb[30].mxu1 %vm155_vm1, %v15683_v10 }
 0x51f   :  { %11527 = vmatprep.mubr.msk.f32.mxu1 %vm155_vm1, %v15687_v9  ;;  %12265 = vmatpush3.bf16.msra.mxu1 %v12262_v35 }
 0x520   :  { %12267 = vmatprep.subr.bf16.mxu1 %v12266_v47 }
 0x522   :  { %11528 = vmatmul.mubr.msk.f32.gmra.mrb[32].mxu1 %vm155_vm1, %v15366_v18 }
 0x523   :  { %11530 = vmatprep.mubr.msk.f32.mxu1 %vm155_vm1, %v15366_v18 }
 0x526   :  { %11531 = vmatmul.mubr.msk.f32.gmra.mrb[34].mxu1 %vm155_vm1, %v15366_v18 }
 0x527   :  { %11533 = vmatprep.mubr.msk.f32.mxu1 %vm155_vm1, %v15366_v18  ;;  %v9808_v18 = vld [vmem:[%s17131_s4 + $0xb0] sm:$0xff] }
 0x528   :  { %v12270_v8 = vpack.c.bf16 %v9809_v19, %v9808_v18 }
 0x52a   :  { %11534 = vmatmul.mubr.msk.f32.gmra.mrb[36].mxu1 %vm155_vm1, %v15699_v20 }
 0x52b   :  { %11536 = vmatprep.mubr.msk.f32.mxu1 %vm155_vm1, %v15703_v30 }
 0x52e   :  { %11537 = vmatmul.mubr.msk.f32.gmra.mrb[38].mxu1 %vm155_vm1, %v15707_v26 }
 0x52f   :  { %11539 = vmatprep.mubr.msk.f32.mxu1 %vm155_vm1, %v15711_v48 }
 0x532   :  { %11540 = vmatmul.mubr.msk.f32.gmra.mrb[40].mxu1 %vm155_vm1, %v15904_v31 }
 0x533   :  { %11542 = vmatprep.mubr.msk.f32.mxu1 %vm155_vm1, %v15904_v31 }
 0x536   :  { %11543 = vmatmul.mubr.msk.f32.gmra.mrb[42].mxu1 %vm155_vm1, %v15904_v31 }
 0x537   :  { %11553 = vmatprep.mubr.msk.f32.mxu1 %vm155_vm1, %v15726_v63  ;;  %v9829_v63 = vld [vmem:[%s17131_s4 + $0xd8] sm:$0xff] }
 0x538   :  { %v12278_v45 = vpack.c.bf16 %v9829_v63, %v9828_v29 }
 0x53a   :  { %11554 = vmatmul.mubr.msk.f32.vlgmr.msra.gmra.mrb[28].mxu1 %vm155_vm1, %v15736_v57 }
 0x53b   :  { %11556 = vmatprep.mubr.msk.f32.mxu1 %vm155_vm1, %v15741_v41  ;;  %12269 = vmatpush3.bf16.msra.mxu1 %v12266_v47 }
 0x53c   :  { %12271 = vmatprep.subr.bf16.mxu1 %v12270_v8 }
 0x53e   :  { %11557 = vmatmul.mubr.msk.f32.gmra.mrb[30].mxu1 %vm155_vm1, %v15745_v7 }
 0x53f   :  { %11559 = vmatprep.mubr.msk.f32.mxu1 %vm155_vm1, %v15751_v32  ;;  %12273 = vmatpush3.bf16.msra.mxu1 %v12270_v8 }
 0x540   :  { %12275 = vmatprep.subr.bf16.mxu1 %v12274_v12 }
 0x542   :  { %11560 = vmatmul.mubr.msk.f32.gmra.mrb[32].mxu1 %vm155_vm1, %v15749_v22 }
 0x543   :  { %11562 = vmatprep.mubr.msk.f32.mxu1 %vm155_vm1, %v15757_v13 }
 0x546   :  { %11563 = vmatmul.mubr.msk.f32.gmra.mrb[34].mxu1 %vm155_vm1, %v15759_v17 }
 0x547   :  { %11565 = vmatprep.mubr.msk.f32.mxu1 %vm155_vm1, %v15765_v59 }
 0x54a   :  { %11566 = vmatmul.mubr.msk.f32.gmra.mrb[36].mxu1 %vm155_vm1, %v15769_v40 }
 0x54b   :  { %11568 = vmatprep.mubr.msk.f32.mxu1 %vm155_vm1, %v15773_v60 }
 0x54e   :  { %11569 = vmatmul.mubr.msk.f32.gmra.mrb[38].mxu1 %vm155_vm1, %v15777_v14 }
 0x54f   :  { %11571 = vmatprep.mubr.msk.f32.mxu1 %vm155_vm1, %v15783_v6 }
 0x552   :  { %11572 = vmatmul.mubr.msk.f32.gmra.mrb[40].mxu1 %vm155_vm1, %v15781_v25 }
 0x553   :  { %11574 = vmatprep.mubr.msk.f32.mxu1 %vm155_vm1, %v15789_v27 }
 0x556   :  { %11575 = vmatmul.mubr.msk.f32.gmra.mrb[42].mxu1 %vm155_vm1, %v15954_v36 }
 0x557   :  { %11585 = vmatprep.mubr.msk.f32.mxu1 %vm155_vm1, %v15800_v39  ;;  %v12286_v39 = vpack.c.bf16 %v9849_v21, %v9848_v55 }
 0x55a   :  { %11586 = vmatmul.mubr.msk.f32.vlgmr.msra.gmra.mrb[28].mxu1 %vm155_vm1, %v15810_v54 }
 0x55b   :  { %11588 = vmatprep.mubr.msk.f32.mxu1 %vm155_vm1, %v15814_v16  ;;  %12277 = vmatpush3.bf16.msra.mxu1 %v12274_v12 }
 0x55c   :  { %12279 = vmatprep.subr.bf16.mxu1 %v12278_v45 }
 0x55e   :  { %11589 = vmatmul.mubr.msk.f32.gmra.mrb[30].mxu1 %vm155_vm1, %v15818_v5 }
 0x55f   :  { %11591 = vmatprep.mubr.msk.f32.mxu1 %vm155_vm1, %v15824_v42  ;;  %12281 = vmatpush3.bf16.msra.mxu1 %v12278_v45 }
 0x560   :  { %12283 = vmatprep.subr.bf16.mxu1 %v12282_v0 }
 0x562   :  { %11592 = vmatmul.mubr.msk.f32.gmra.mrb[32].mxu1 %vm155_vm1, %v15822_v34 }
 0x563   :  { %11594 = vmatprep.mubr.msk.f32.mxu1 %vm155_vm1, %v15830_v62 }
 0x566   :  { %11595 = vmatmul.mubr.msk.f32.gmra.mrb[34].mxu1 %vm155_vm1, %v15832_v58 }
 0x567   :  { %11597 = vmatprep.mubr.msk.f32.mxu1 %vm155_vm1, %v15838_v49 }
 0x56a   :  { %11598 = vmatmul.mubr.msk.f32.gmra.mrb[36].mxu1 %vm155_vm1, %v15842_v2 }
 0x56b   :  { %11600 = vmatprep.mubr.msk.f32.mxu1 %vm155_vm1, %v15846_v53 }
 0x56e   :  { %11601 = vmatmul.mubr.msk.f32.gmra.mrb[38].mxu1 %vm155_vm1, %v15850_v38 }
 0x56f   :  { %11603 = vmatprep.mubr.msk.f32.mxu1 %vm155_vm1, %v15856_v3 }
 0x572   :  { %11604 = vmatmul.mubr.msk.f32.gmra.mrb[40].mxu1 %vm155_vm1, %v15854_v15 }
 0x573   :  { %11606 = vmatprep.mubr.msk.f32.mxu1 %vm155_vm1, %v15862_v44 }
 0x576   :  { %11607 = vmatmul.mubr.msk.f32.gmra.mrb[42].mxu1 %vm155_vm1, %v16000_v51 }
 0x577   :  { %11617 = vmatprep.mubr.msk.f32.mxu1 %vm155_vm1, %v15675_v52  ;;  %v9868_v52 = vld [vmem:[%s17131_s4 + $0x110] sm:$0xff] }
 0x57a   :  { %11618 = vmatmul.mubr.msk.f32.vlgmr.msra.gmra.mrb[28].mxu1 %vm155_vm1, %v15679_v43  ;;  %v9869_v43 = vld [vmem:[%s17131_s4 + $0x118] sm:$0xff] }
 0x57b   :  { %11620 = vmatprep.mubr.msk.f32.mxu1 %vm155_vm1, %v15683_v10  ;;  %12285 = vmatpush3.bf16.msra.mxu1 %v12282_v0  ;;  %v12294_v10 = vpack.c.bf16 %v9869_v43, %v9868_v52 }
 0x57c   :  { %12287 = vmatprep.subr.bf16.mxu1 %v12286_v39 }
 0x57e   :  { %11621 = vmatmul.mubr.msk.f32.gmra.mrb[30].mxu1 %vm155_vm1, %v15687_v9  ;;  %v17154_v9 = vmov 0.0|0.0  }
 0x57f   :  { %11623 = vmatprep.mubr.msk.f32.mxu1 %vm155_vm1, %v15904_v31  ;;  %12289 = vmatpush3.bf16.msra.mxu1 %v12286_v39 }
 0x580   :  { %12291 = vmatprep.subr.bf16.mxu1 %v12290_v1 }
 0x582   :  { %11624 = vmatmul.mubr.msk.f32.gmra.mrb[32].mxu1 %vm155_vm1, %v15904_v31 }
 0x583   :  { %11626 = vmatprep.mubr.msk.f32.mxu1 %vm155_vm1, %v15904_v31 }
 0x586   :  { %11627 = vmatmul.mubr.msk.f32.gmra.mrb[34].mxu1 %vm155_vm1, %v15904_v31 }
 0x587   :  { %11629 = vmatprep.mubr.msk.f32.mxu1 %vm155_vm1, %v15699_v20  ;;  %v5864_v20 = vld [vmem:[#allocation3 + $0x89] sm:$0xff] }
 0x58a   :  { %11630 = vmatmul.mubr.msk.f32.gmra.mrb[36].mxu1 %vm155_vm1, %v15703_v30  ;;  %v6126_v30 = vld [vmem:[#allocation3 + $0x8a] sm:$0xff] }
 0x58b   :  { %11632 = vmatprep.mubr.msk.f32.mxu1 %vm155_vm1, %v15707_v26  ;;  %v16119_v26 = vpop.permute.xlu1 %6407 }
 0x58e   :  { %11633 = vmatmul.mubr.msk.f32.gmra.mrb[38].mxu1 %vm155_vm1, %v15711_v48  ;;  %v16121_v48 = vpop.permute.xlu0 %6412 }
 0x58f   :  { %11635 = vmatprep.mubr.msk.f32.mxu1 %vm155_vm1, %v15904_v31 }
 0x592   :  { %11636 = vmatmul.mubr.msk.f32.gmra.mrb[40].mxu1 %vm155_vm1, %v15904_v31 }
 0x593   :  { %11638 = vmatprep.mubr.msk.f32.mxu1 %vm155_vm1, %v15904_v31 }
 0x596   :  { %11639 = vmatmul.mubr.msk.f32.gmra.mrb[42].mxu1 %vm155_vm1, %v15904_v31 }
 0x597   :  { %11649 = vmatprep.mubr.msk.f32.mxu1 %vm155_vm1, %v15736_v57  ;;  %v16123_v57 = vpop.permute.xlu1 %6417 }
 0x59a   :  { %11650 = vmatmul.mubr.msk.f32.vlgmr.msra.gmra.mrb[28].mxu1 %vm155_vm1, %v15741_v41  ;;  %v16125_v41 = vpop.permute.xlu0 %6422 }
 0x59b   :  { %11652 = vmatprep.mubr.msk.f32.mxu1 %vm155_vm1, %v15745_v7  ;;  %12293 = vmatpush3.bf16.msra.mxu1 %v12290_v1 }
 0x59c   :  { %12295 = vmatprep.subr.bf16.mxu1 %v12294_v10 }
 0x59e   :  { %11653 = vmatmul.mubr.msk.f32.gmra.mrb[30].mxu1 %vm155_vm1, %v15751_v32 }
 0x59f   :  { %11655 = vmatprep.mubr.msk.f32.mxu1 %vm155_vm1, %v15749_v22  ;;  %12297 = vmatpush3.bf16.msra.mxu1 %v12294_v10  ;;  %v16127_v22 = vpop.permute.xlu1 %6427 }
 0x5a0   :  { %12298 = vmatprep.subr.bf16.mxu1 %v17154_v9 }
 0x5a2   :  { %11656 = vmatmul.mubr.msk.f32.gmra.mrb[32].mxu1 %vm155_vm1, %v15757_v13 }
 0x5a3   :  { %11658 = vmatprep.mubr.msk.f32.mxu1 %vm155_vm1, %v15759_v17  ;;  %v16147_v28 = vpop.permute.xlu1 %6437 }
 0x5a6   :  { %11659 = vmatmul.mubr.msk.f32.gmra.mrb[34].mxu1 %vm155_vm1, %v15765_v59  ;;  %v16135_v59 = vpop.permute.xlu0 %6432 }
 0x5a7   :  { %11661 = vmatprep.mubr.msk.f32.mxu1 %vm155_vm1, %v15769_v40 }
 0x5aa   :  { %11662 = vmatmul.mubr.msk.f32.gmra.mrb[36].mxu1 %vm155_vm1, %v15773_v60 }
 0x5ab   :  { %11664 = vmatprep.mubr.msk.f32.mxu1 %vm155_vm1, %v15777_v14 }
 0x5ae   :  { %11665 = vmatmul.mubr.msk.f32.gmra.mrb[38].mxu1 %vm155_vm1, %v15783_v6 }
 0x5af   :  { %11667 = vmatprep.mubr.msk.f32.mxu1 %vm155_vm1, %v15781_v25 }
 0x5b2   :  { %11668 = vmatmul.mubr.msk.f32.gmra.mrb[40].mxu1 %vm155_vm1, %v15789_v27 }
 0x5b3   :  { %11670 = vmatprep.mubr.msk.f32.mxu1 %vm155_vm1, %v15954_v36 }
 0x5b6   :  { %11671 = vmatmul.mubr.msk.f32.gmra.mrb[42].mxu1 %vm155_vm1, %v5864_v20 }
 0x5b7   :  { %11681 = vmatprep.mubr.msk.f32.mxu1 %vm155_vm1, %v15810_v54 }
 0x5ba   :  { %11682 = vmatmul.mubr.msk.f32.vlgmr.msra.gmra.mrb[28].mxu1 %vm155_vm1, %v15814_v16 }
 0x5bb   :  { %11684 = vmatprep.mubr.msk.f32.mxu1 %vm155_vm1, %v15818_v5 }
 0x5be   :  { %11685 = vmatmul.mubr.msk.f32.gmra.mrb[30].mxu1 %vm155_vm1, %v15824_v42 }
 0x5bf   :  { %11687 = vmatprep.mubr.msk.f32.mxu1 %vm155_vm1, %v15822_v34  ;;  %v16151_v34 = vpop.permute.xlu0 %6442 }
 0x5c2   :  { %11688 = vmatmul.mubr.msk.f32.gmra.mrb[32].mxu1 %vm155_vm1, %v15830_v62 }
 0x5c3   :  { %11690 = vmatprep.mubr.msk.f32.mxu1 %vm155_vm1, %v15832_v58  ;;  %v16173_v11 = vpop.permute.xlu0 %6452 }
 0x5c6   :  { %11691 = vmatmul.mubr.msk.f32.gmra.mrb[34].mxu1 %vm155_vm1, %v15838_v49 }
 0x5c7   :  { %11693 = vmatprep.mubr.msk.f32.mxu1 %vm155_vm1, %v15842_v2  ;;  %v16189_v50 = vpop.permute.xlu0 %6462 }
 0x5ca   :  { %11694 = vmatmul.mubr.msk.f32.gmra.mrb[36].mxu1 %vm155_vm1, %v15846_v53 }
 0x5cb   :  { %11696 = vmatprep.mubr.msk.f32.mxu1 %vm155_vm1, %v15850_v38 }
 0x5ce   :  { %11697 = vmatmul.mubr.msk.f32.gmra.mrb[38].mxu1 %vm155_vm1, %v15856_v3  ;;  %v16163_v3 = vpop.permute.xlu1 %6447 }
 0x5cf   :  { %11699 = vmatprep.mubr.msk.f32.mxu1 %vm155_vm1, %v15854_v15 }
 0x5d2   :  { %11700 = vmatmul.mubr.msk.f32.gmra.mrb[40].mxu1 %vm155_vm1, %v15862_v44  ;;  %v16185_v29 = vpop.permute.xlu1 %6457 }
 0x5d3   :  { %11702 = vmatprep.mubr.msk.f32.mxu1 %vm155_vm1, %v16000_v51 }
 0x5d6   :  { %11703 = vmatmul.mubr.msk.f32.gmra.mrb[42].mxu1 %vm155_vm1, %v6126_v30  ;;  %v16201_v52 = vpop.permute.xlu1 %6467 }
 0x5d7   :  { %11713 = vmatprep.mubr.msk.f32.mxu1 %vm13415_vm0, %v15904_v31 }
 0x68d   :  { %v11683_v7 = vpop.f32.mrb[28].mxu1 }
 0x68e   :  { %v16130_v32 = vadd.f32 %v15904_v31, %v11683_v7  ;;  %v6262_v13 = vpop.f32.mrb[29].mxu1 }
 0x68f   :  { %v16133_v17 = vadd.f32 %v15904_v31, %v6262_v13  ;;  %v16207_v13 = vpop.permute.xlu0 %6472 }
 0x690   :  { %v6486_v40 = vmul.f32 %v16130_v32, %v16121_v48 }
 0x691   :  { %v6485_v60 = vmul.f32 %v16133_v17, %v16119_v26  ;;  %v11686_v14 = vpop.f32.mrb[30].mxu1 }
 0x692   :  { %v6272_v25 = vpop.f32.mrb[31].mxu1  ;;  %v16142_v6 = vadd.f32 %v15904_v31, %v11686_v14 }
 0x693   :  { %v16145_v27 = vadd.f32 %v15904_v31, %v6272_v25  ;;  %v6501_v54 = vadd.f32 %v6486_v40, %v6485_v60 }
 0x694   :  { %v6488_v49 = vmul.f32 %v16142_v6, %v16125_v41 }
 0x695   :  { %v6487_v16 = vmul.f32 %v16145_v27, %v16123_v57  ;;  %v11689_v5 = vpop.f32.mrb[32].mxu1 }
 0x696   :  { %v6282_v42 = vpop.f32.mrb[33].mxu1  ;;  %v16154_v62 = vadd.f32 %v15904_v31, %v11689_v5 }
 0x697   :  { %v16157_v58 = vadd.f32 %v15904_v31, %v6282_v42  ;;  %v6502_v2 = vadd.f32 %v6501_v54, %v6487_v16 }
 0x698   :  { %v6490_v35 = vmul.f32 %v16154_v62, %v16135_v59 }
 0x699   :  { %v11692_v53 = vpop.f32.mrb[34].mxu1  ;;  %v6489_v38 = vmul.f32 %v16157_v58, %v16127_v22  ;;  %v6503_v15 = vadd.f32 %v6502_v2, %v6488_v49  ;;  %v16213_v49 = vpop.permute.xlu1 %6477  ;;  %v6795_v2 = vld [vmem:[%s17134_s7] sm:$0xff] }
 0x69a   :  { %v6292_v44 = vpop.f32.mrb[35].mxu1  ;;  %v16166_v37 = vadd.f32 %v15904_v31, %v11692_v53  ;;  %v6796_v53 = vld [vmem:[%s17134_s7 + $0x8] sm:$0xff] }
 0x69b   :  { %v16169_v4 = vadd.f32 %v15904_v31, %v6292_v44  ;;  %v6504_v56 = vadd.f32 %v6503_v15, %v6489_v38  ;;  %v6797_v38 = vld [vmem:[%s17134_s7 + $0x10] sm:$0xff] }
 0x69c   :  { %v6492_v12 = vmul.f32 %v16166_v37, %v16151_v34 }
 0x69d   :  { %v11695_v47 = vpop.f32.mrb[36].mxu1  ;;  %v6491_v18 = vmul.f32 %v16169_v4, %v16147_v28  ;;  %v6505_v19 = vadd.f32 %v6504_v56, %v6490_v35  ;;  %v12299_v35 = vpack.c.bf16 %v6796_v53, %v6795_v2  ;;  %v6798_v56 = vld [vmem:[%s17134_s7 + $0x18] sm:$0xff] }
 0x69e   :  { %v6302_v8 = vpop.f32.mrb[37].mxu1  ;;  %v16178_v23 = vadd.f32 %v15904_v31, %v11695_v47  ;;  %v16228_v47 = vpop.permute.xlu0 %6482 }
 0x69f   :  { %v16181_v24 = vadd.f32 %v15904_v31, %v6302_v8  ;;  %v6506_v36 = vadd.f32 %v6505_v19, %v6491_v18  ;;  %12300 = vmatpush3.bf16.msra.mxu1 %v12299_v35  ;;  %v12302_v8 = vpack.c.bf16 %v6798_v56, %v6797_v38 }
 0x6a0   :  { %v6494_v21 = vmul.f32 %v16178_v23, %v16173_v11  ;;  %12301 = vmatprep.subr.bf16.mxu1 %v17154_v9 }
 0x6a1   :  { %v11698_v63 = vpop.f32.mrb[38].mxu1  ;;  %v6493_v45 = vmul.f32 %v16181_v24, %v16163_v3  ;;  %v6507_v46 = vadd.f32 %v6506_v36, %v6492_v12  ;;  %v9901_v12 = vld [vmem:[%s17134_s7 + $0x20] sm:$0xff]  ;;  %v9902_v36 = vld [vmem:[%s17134_s7 + $0x28] sm:$0xff] }
 0x6a2   :  { %v6312_v0 = vpop.f32.mrb[39].mxu1  ;;  %v16192_v51 = vadd.f32 %v15904_v31, %v11698_v63 }
 0x6a3   :  { %v16195_v55 = vadd.f32 %v15904_v31, %v6312_v0  ;;  %v6508_v39 = vadd.f32 %v6507_v46, %v6493_v45  ;;  %12303 = vmatpush3.bf16.msra.mxu1 %v12302_v8  ;;  %v12305_v46 = vpack.c.bf16 %v9902_v36, %v9901_v12 }
 0x6a4   :  { %v6496_v30 = vmul.f32 %v16192_v51, %v16189_v50  ;;  %12304 = vmatprep.subr.bf16.mxu1 %v17154_v9 }
 0x6a5   :  { %v11701_v61 = vpop.f32.mrb[40].mxu1  ;;  %v6495_v33 = vmul.f32 %v16195_v55, %v16185_v29  ;;  %v6509_v1 = vadd.f32 %v6508_v39, %v6494_v21 }
 0x6a6   :  { %v6322_v43 = vpop.f32.mrb[41].mxu1  ;;  %v12507_v10 = vadd.f32 %v15904_v31, %v11701_v61  ;;  %11714 = vmatmul.mubr.msk.f32.vlgmr.msra.gmra.mrb[44].mxu1 %vm155_vm1, %v15904_v31 }
 0x6a7   :  { %v12510_v20 = vadd.f32 %v15904_v31, %v6322_v43  ;;  %v6510_v7 = vadd.f32 %v6509_v1, %v6495_v33  ;;  %12306 = vmatpush3.bf16.msra.mxu1 %v12305_v46  ;;  %11716 = vmatprep.mubr.msk.f32.mxu1 %vm13415_vm0, %v15904_v31 }
 0x6a8   :  { %v6498_v5 = vmul.f32 %v12507_v10, %v16207_v13  ;;  %12307 = vmatprep.subr.bf16.mxu1 %v17154_v9 }
 0x6a9   :  { %v11704_v40 = vpop.f32.mrb[42].mxu1  ;;  %v6497_v60 = vmul.f32 %v12510_v20, %v16201_v52  ;;  %v6511_v14 = vadd.f32 %v6510_v7, %v6496_v30 }
 0x6aa   :  { %v6332_v25 = vpop.f32.mrb[43].mxu1  ;;  %v12513_v54 = vadd.f32 %v15904_v31, %v11704_v40  ;;  %11717 = vmatmul.mubr.msk.f32.gmra.mrb[46].mxu1 %vm155_vm1, %v15904_v31 }
 0x6ab   :  { %v12516_v16 = vadd.f32 %v15904_v31, %v6332_v25  ;;  %v6512_v42 = vadd.f32 %v6511_v14, %v6497_v60  ;;  %11719 = vmatprep.mubr.msk.f32.mxu1 %vm13415_vm0, %v15904_v31 }
 0x6ac   :  { %v6500_v18 = vmul.f32 %v12513_v54, %v16228_v47 }
 0x6ad   :  { %v6499_v15 = vmul.f32 %v12516_v16, %v16213_v49  ;;  %v6513_v44 = vadd.f32 %v6512_v42, %v6498_v5 }
 0x6af   :  { %v6514_v19 = vadd.f32 %v6513_v44, %v6499_v15 }
 0x6b1   :  { %v6515_v63 = vadd.f32 %v6514_v19, %v6500_v18 }
 0x6b3   :  { %v6516_v45 = vrot.slane %v6515_v63, 4 }
 0x6b5   :  { %v6517_v0 = vadd.f32 %v6516_v45, %v6515_v63 }
 0x6b7   :  { %v6518_v21 = vrot.slane %v6517_v0, 2 }
 0x6b9   :  { %v6519_v39 = vadd.f32 %v6518_v21, %v6517_v0 }
 0x6bb   :  { %v6520_v61 = vrot.slane %v6519_v39, 1 }
 0x6bd   :  { %v6521_v33 = vadd.f32 %v6520_v61, %v6519_v39 }
 0x6bf   :  { %v6522_v1 = vmul.f32 0.013888889, %v6521_v33 }
 0x6c1   :  { %v16249_v43 = vsub.f32 %v16133_v17, %v6522_v1  ;;  %v16252_v30 = vsub.f32 %v16130_v32, %v6522_v1  ;;  %v16255_v7 = vsub.f32 %v16145_v27, %v6522_v1  ;;  %v16258_v40 = vsub.f32 %v16142_v6, %v6522_v1 }
 0x6c2   :  { %v16261_v60 = vsub.f32 %v16157_v58, %v6522_v1  ;;  %v16264_v14 = vsub.f32 %v16154_v62, %v6522_v1  ;;  %v16267_v25 = vsub.f32 %v16169_v4, %v6522_v1  ;;  %v16270_v17 = vsub.f32 %v16166_v37, %v6522_v1 }
 0x6c3   :  { %v16273_v32 = vsub.f32 %v16181_v24, %v6522_v1  ;;  %v16276_v27 = vsub.f32 %v16178_v23, %v6522_v1  ;;  %v16279_v6 = vsub.f32 %v16195_v55, %v6522_v1  ;;  %v16282_v58 = vsub.f32 %v16192_v51, %v6522_v1 }
 0x6c4   :  { %v16284_v62 = vsub.f32 %v12510_v20, %v6522_v1  ;;  %v16286_v5 = vsub.f32 %v12507_v10, %v6522_v1  ;;  %v16288_v4 = vsub.f32 %v12516_v16, %v6522_v1  ;;  %v16290_v37 = vsub.f32 %v12513_v54, %v6522_v1  ;;  %v9903_v10 = vld [vmem:[%s17134_s7 + $0x30] sm:$0xff]  ;;  %v9904_v54 = vld [vmem:[%s17134_s7 + $0x38] sm:$0xff] }
 0x6c5   :  { %v6539_v24 = vmul.f32 %v16249_v43, %v16249_v43  ;;  %v6540_v23 = vmul.f32 %v16252_v30, %v16252_v30  ;;  %v6541_v55 = vmul.f32 %v16255_v7, %v16255_v7  ;;  %v6542_v16 = vmul.f32 %v16258_v40, %v16258_v40 }
 0x6c6   :  { %v6543_v42 = vmul.f32 %v16261_v60, %v16261_v60  ;;  %v6545_v44 = vmul.f32 %v16267_v25, %v16267_v25  ;;  %v6547_v8 = vmul.f32 %v16273_v32, %v16273_v32  ;;  %v6548_v36 = vmul.f32 %v16276_v27, %v16276_v27 }
 0x6c7   :  { %v6555_v51 = vmul.f32 %v6539_v24, %v16119_v26  ;;  %v6556_v20 = vmul.f32 %v6540_v23, %v16121_v48  ;;  %v6557_v2 = vmul.f32 %v6541_v55, %v16123_v57  ;;  %v12308_v26 = vpack.c.bf16 %v9904_v54, %v9903_v10 }
 0x6c8   :  { %v6544_v48 = vmul.f32 %v16264_v14, %v16264_v14  ;;  %v6558_v38 = vmul.f32 %v6542_v16, %v16125_v41  ;;  %v6559_v35 = vmul.f32 %v6543_v42, %v16127_v22  ;;  %v6546_v57 = vmul.f32 %v16270_v17, %v16270_v17 }
 0x6c9   :  { %v6571_v53 = vadd.f32 %v6556_v20, %v6555_v51  ;;  %12309 = vmatpush3.bf16.msra.mxu1 %v12308_v26  ;;  %v6561_v41 = vmul.f32 %v6545_v44, %v16147_v28  ;;  %v6549_v22 = vmul.f32 %v16279_v6, %v16279_v6  ;;  %v6563_v46 = vmul.f32 %v6547_v8, %v16163_v3  ;;  %v9886_v8 = vld [vmem:[%s17132_s5] ss:$0 sm:$0xff] }
 0x6ca   :  { %12310 = vmatprep.subr.bf16.mxu1 %v17154_v9  ;;  %v6560_v18 = vmul.f32 %v6544_v48, %v16135_v59  ;;  %v6562_v63 = vmul.f32 %v6546_v57, %v16151_v34  ;;  %v6550_v59 = vmul.f32 %v16282_v58, %v16282_v58  ;;  %v6564_v21 = vmul.f32 %v6548_v36, %v16173_v11 }
 0x6cb   :  { %v6572_v15 = vadd.f32 %v6571_v53, %v6557_v2  ;;  %v6551_v28 = vmul.f32 %v16284_v62, %v16284_v62  ;;  %v6565_v61 = vmul.f32 %v6549_v22, %v16185_v29  ;;  %v6552_v34 = vmul.f32 %v16286_v5, %v16286_v5 }
 0x6cc   :  { %v6566_v1 = vmul.f32 %v6550_v59, %v16189_v50  ;;  %v6553_v3 = vmul.f32 %v16288_v4, %v16288_v4  ;;  %v6554_v11 = vmul.f32 %v16290_v37, %v16290_v37 }
 0x6cd   :  { %v6573_v56 = vadd.f32 %v6572_v15, %v6558_v38  ;;  %v6567_v23 = vmul.f32 %v6551_v28, %v16201_v52  ;;  %v6568_v51 = vmul.f32 %v6552_v34, %v16207_v13 }
 0x6ce   :  { %v6569_v29 = vmul.f32 %v6553_v3, %v16213_v49  ;;  %v6570_v54 = vmul.f32 %v6554_v11, %v16228_v47 }
 0x6cf   :  { %v6574_v19 = vadd.f32 %v6573_v56, %v6559_v35 }
 0x6d1   :  { %v6575_v12 = vadd.f32 %v6574_v19, %v6560_v18 }
 0x6d3   :  { %v6576_v45 = vadd.f32 %v6575_v12, %v6561_v41 }
 0x6d5   :  { %v6577_v0 = vadd.f32 %v6576_v45, %v6562_v63 }
 0x6d7   :  { %v6578_v39 = vadd.f32 %v6577_v0, %v6563_v46 }
 0x6d9   :  { %v6579_v33 = vadd.f32 %v6578_v39, %v6564_v21 }
 0x6db   :  { %v6580_v24 = vadd.f32 %v6579_v33, %v6565_v61 }
 0x6dd   :  { %v6581_v55 = vadd.f32 %v6580_v24, %v6566_v1 }
 0x6df   :  { %v6582_v20 = vadd.f32 %v6581_v55, %v6567_v23 }
 0x6e1   :  { %v6583_v10 = vadd.f32 %v6582_v20, %v6568_v51 }
 0x6e3   :  { %v6584_v16 = vadd.f32 %v6583_v10, %v6569_v29 }
 0x6e5   :  { %v6585_v50 = vadd.f32 %v6584_v16, %v6570_v54 }
 0x6e7   :  { %v6586_v42 = vrot.slane %v6585_v50, 4 }
 0x6e9   :  { %v6587_v2 = vadd.f32 %v6586_v42, %v6585_v50 }
 0x6eb   :  { %v6588_v53 = vrot.slane %v6587_v2, 2 }
 0x6ed   :  { %v6589_v26 = vadd.f32 %v6588_v53, %v6587_v2 }
 0x6ef   :  { %v6590_v48 = vrot.slane %v6589_v26, 1 }
 0x6f1   :  { %v6591_v52 = vadd.f32 %v6590_v48, %v6589_v26 }
 0x6f3   :  { %v6592_v38 = vmul.f32 0.013888889, %v6591_v52 }
 0x6f5   :  { %v6593_v15 = vadd.f32 1e-05, %v6592_v38 }
 0x6f7   :  { %13323 = vrsqrt.f32 %v6593_v15 }
 0x701   :  { %v13324_v44 = vpop.eup %13323 }
 0x702   :  { %v6595_v13 = vmul.f32 %v13324_v44, %v16249_v43  ;;  %v6596_v35 = vmul.f32 %v13324_v44, %v16252_v30  ;;  %v6597_v49 = vmul.f32 %v13324_v44, %v16255_v7  ;;  %v6598_v47 = vmul.f32 %v13324_v44, %v16258_v40 }
 0x703   :  { %v6599_v56 = vmul.f32 %v13324_v44, %v16261_v60  ;;  %v6600_v57 = vmul.f32 %v13324_v44, %v16264_v14  ;;  %v6601_v18 = vmul.f32 %v13324_v44, %v16267_v25  ;;  %v6602_v19 = vmul.f32 %v13324_v44, %v16270_v17 }
 0x704   :  { %v6603_v43 = vmul.f32 %v13324_v44, %v16273_v32  ;;  %v6604_v30 = vmul.f32 %v13324_v44, %v16276_v27  ;;  %v6605_v7 = vmul.f32 %v13324_v44, %v16279_v6  ;;  %v6606_v40 = vmul.f32 %v13324_v44, %v16282_v58  ;;  %v9887_v32 = vld [vmem:[%s17132_s5 + $0x1] ss:$0 sm:$0xff] }
 0x705   :  { %v6607_v60 = vmul.f32 %v13324_v44, %v16284_v62  ;;  %v6608_v14 = vmul.f32 %v13324_v44, %v16286_v5  ;;  %v6609_v25 = vmul.f32 %v13324_v44, %v16288_v4  ;;  %v6610_v17 = vmul.f32 %v13324_v44, %v16290_v37 }
 0x706   :  { %v6616_v41 = vmul.f32 %v9886_v8, %v6595_v13  ;;  %v6617_v12 = vmul.f32 %v9886_v8, %v6596_v35  ;;  %v6618_v36 = vmul.f32 %v9886_v8, %v6597_v49  ;;  %v6619_v27 = vmul.f32 %v9886_v8, %v6598_v47 }
 0x707   :  { %v6620_v63 = vmul.f32 %v9886_v8, %v6599_v56  ;;  %v6621_v45 = vmul.f32 %v9886_v8, %v6600_v57  ;;  %v6622_v22 = vmul.f32 %v9886_v8, %v6601_v18  ;;  %v6623_v46 = vmul.f32 %v9886_v8, %v6602_v19 }
 0x708   :  { %v6637_v6 = vadd.f32 %v9887_v32, %v6616_v41  ;;  %v6638_v58 = vadd.f32 %v9887_v32, %v6617_v12  ;;  %v6639_v62 = vadd.f32 %v9887_v32, %v6618_v36  ;;  %v6640_v5 = vadd.f32 %v9887_v32, %v6619_v27 }
 0x709   :  { %v6624_v0 = vmul.f32 %v9886_v8, %v6603_v43  ;;  %v6641_v4 = vadd.f32 %v9887_v32, %v6620_v63  ;;  %v6625_v37 = vmul.f32 %v9886_v8, %v6604_v30  ;;  %v6642_v59 = vadd.f32 %v9887_v32, %v6621_v45 }
 0x70a   :  { %13325 = vtanh.f32 %v6637_v6  ;;  %v6626_v21 = vmul.f32 %v9886_v8, %v6605_v7  ;;  %v6643_v39 = vadd.f32 %v9887_v32, %v6622_v22  ;;  %v6627_v28 = vmul.f32 %v9886_v8, %v6606_v40 }
 0x70b   :  { %13327 = vtanh.f32 %v6638_v58  ;;  %v6644_v61 = vadd.f32 %v9887_v32, %v6623_v46  ;;  %v6628_v33 = vmul.f32 %v9886_v8, %v6607_v60  ;;  %v6645_v34 = vadd.f32 %v9887_v32, %v6624_v0 }
 0x70c   :  { %13329 = vtanh.f32 %v6639_v62  ;;  %v6629_v1 = vmul.f32 %v9886_v8, %v6608_v14  ;;  %v6646_v24 = vadd.f32 %v9887_v32, %v6625_v37  ;;  %v6630_v3 = vmul.f32 %v9886_v8, %v6609_v25 }
 0x70d   :  { %13331 = vtanh.f32 %v6640_v5  ;;  %v6647_v23 = vadd.f32 %v9887_v32, %v6626_v21  ;;  %v6631_v55 = vmul.f32 %v9886_v8, %v6610_v17  ;;  %v6648_v11 = vadd.f32 %v9887_v32, %v6627_v28 }
 0x70e   :  { %13333 = vtanh.f32 %v6641_v4  ;;  %v6649_v51 = vadd.f32 %v9887_v32, %v6628_v33  ;;  %v6650_v20 = vadd.f32 %v9887_v32, %v6629_v1  ;;  %v6651_v10 = vadd.f32 %v9887_v32, %v6630_v3 }
 0x70f   :  { %13335 = vtanh.f32 %v6642_v59  ;;  %v6652_v16 = vadd.f32 %v9887_v32, %v6631_v55 }
 0x710   :  { %13337 = vtanh.f32 %v6643_v39 }
 0x711   :  { %13339 = vtanh.f32 %v6644_v61 }
 0x712   :  { %13341 = vtanh.f32 %v6645_v34 }
 0x713   :  { %13343 = vtanh.f32 %v6646_v24 }
 0x714   :  { %v13326_v29 = vpop.eup %13325  ;;  %13345 = vtanh.f32 %v6647_v23 }
 0x715   :  { %v13328_v54 = vpop.eup %13327  ;;  %13347 = vtanh.f32 %v6648_v11  ;;  %6669 = vst [vmem:[#allocation4] sm:$0xff] %v13326_v29 }
 0x716   :  { %v13330_v50 = vpop.eup %13329  ;;  %13349 = vtanh.f32 %v6649_v51  ;;  %6670 = vst [vmem:[#allocation4 + $0x8] sm:$0xff] %v13328_v54 }
 0x717   :  { %v13332_v42 = vpop.eup %13331  ;;  %13351 = vtanh.f32 %v6650_v20  ;;  %6671 = vst [vmem:[#allocation4 + $0x10] sm:$0xff] %v13330_v50  ;;  %v9918_v50 = vld [vmem:[%s17134_s7 + $0x40] sm:$0xff] }
 0x718   :  { %v13334_v2 = vpop.eup %13333  ;;  %13353 = vtanh.f32 %v6651_v10  ;;  %6672 = vst [vmem:[#allocation4 + $0x18] sm:$0xff] %v13332_v42  ;;  %v9919_v42 = vld [vmem:[%s17134_s7 + $0x48] sm:$0xff] }
 0x719   :  { %v13336_v53 = vpop.eup %13335  ;;  %13355 = vtanh.f32 %v6652_v16  ;;  %6673 = vst [vmem:[#allocation4 + $0x20] sm:$0xff] %v13334_v2  ;;  %v6994_v2 = vld [vmem:[#allocation5 + $0x1] sm:$0xff] }
 0x71a   :  { %v13338_v26 = vpop.eup %13337  ;;  %6674 = vst [vmem:[#allocation4 + $0x28] sm:$0xff] %v13336_v53  ;;  %v12311_v53 = vpack.c.bf16 %v9919_v42, %v9918_v50  ;;  %v16652_v50 = vld [vmem:[#allocation5 + $0x67] sm:$0xff] }
 0x71b   :  { %v13340_v48 = vpop.eup %13339  ;;  %v9920_v26 = vld [vmem:[%s17134_s7 + $0x50] sm:$0xff]  ;;  %v9969_v42 = vld [vmem:[%s17134_s7 + $0xa0] sm:$0xff] }
 0x71c   :  { %v13342_v52 = vpop.eup %13341  ;;  %v6685_v38 = vld [vmem:[#allocation4] ss:$2 sm:$0x7]  ;;  %v6687_v15 = vld [vmem:[#allocation4 + $0x1] ss:$2 sm:$0x7] }
 0x71d   :  { %v13344_v44 = vpop.eup %13343  ;;  %6677 = vst [vmem:[#allocation4 + $0x40] sm:$0xff] %v13342_v52  ;;  %v6688_v13 = vmax.f32 %v6685_v38, %v6687_v15  ;;  %v6690_v35 = vld [vmem:[#allocation4 + $0x8] ss:$2 sm:$0x7]  ;;  %v9921_v48 = vld [vmem:[%s17134_s7 + $0x58] sm:$0xff] }
 0x71e   :  { %v6692_v49 = vld [vmem:[#allocation4 + $0x9] ss:$2 sm:$0x7]  ;;  %v13346_v47 = vpop.eup %13345  ;;  %6678 = vst [vmem:[#allocation4 + $0x48] sm:$0xff] %v13344_v44  ;;  %v12314_v52 = vpack.c.bf16 %v9921_v48, %v9920_v26  ;;  %v9971_v26 = vld [vmem:[%s17134_s7 + $0xb0] sm:$0xff]  ;;  %v9972_v48 = vld [vmem:[%s17134_s7 + $0xb8] sm:$0xff] }
 0x71f   :  { %v6693_v56 = vmax.f32 %v6690_v35, %v6692_v49  ;;  %v6697_v57 = vld [vmem:[#allocation4 + $0x10] ss:$2 sm:$0x7]  ;;  %v6699_v18 = vld [vmem:[#allocation4 + $0x11] ss:$2 sm:$0x7]  ;;  %v13348_v19 = vpop.eup %13347 }
 0x720   :  { %6679 = vst [vmem:[#allocation4 + $0x50] sm:$0xff] %v13346_v47  ;;  %v6700_v8 = vmax.f32 %v6697_v57, %v6699_v18  ;;  %v6702_v43 = vld [vmem:[#allocation4 + $0x18] ss:$2 sm:$0x7]  ;;  %v13350_v7 = vpop.eup %13349  ;;  %6680 = vst [vmem:[#allocation4 + $0x58] sm:$0xff] %v13348_v19  ;;  %v16466_v35 = vld [vmem:[#allocation5 + $0x29] sm:$0xff] }
 0x721   :  { %v6704_v30 = vld [vmem:[#allocation4 + $0x19] ss:$2 sm:$0x7]  ;;  %v6694_v40 = vmax.f32 %v6688_v13, %v6693_v56  ;;  %v6709_v14 = vld [vmem:[#allocation4 + $0x20] ss:$2 sm:$0x7]  ;;  %v13352_v17 = vpop.eup %13351 }
 0x722   :  { %v6705_v60 = vmax.f32 %v6702_v43, %v6704_v30  ;;  %v6711_v25 = vld [vmem:[#allocation4 + $0x21] ss:$2 sm:$0x7]  ;;  %6681 = vst [vmem:[#allocation4 + $0x60] sm:$0xff] %v13350_v7  ;;  %v13354_v36 = vpop.eup %13353  ;;  %6682 = vst [vmem:[#allocation4 + $0x68] sm:$0xff] %v13352_v17  ;;  %v16472_v49 = vld [vmem:[#allocation5 + $0x31] sm:$0xff] }
 0x723   :  { %v6712_v41 = vmax.f32 %v6709_v14, %v6711_v25  ;;  %v6714_v12 = vld [vmem:[#allocation4 + $0x28] ss:$2 sm:$0x7]  ;;  %v6716_v32 = vld [vmem:[#allocation4 + $0x29] ss:$2 sm:$0x7]  ;;  %v13356_v6 = vpop.eup %13355 }
 0x724   :  { %6695 = vst [vmem:[#allocation5 + $0x10] sm:$0x7] %v6694_v40  ;;  %v6706_v27 = vmax.f32 %v6700_v8, %v6705_v60  ;;  %v6717_v63 = vmax.f32 %v6714_v12, %v6716_v32  ;;  %v6721_v58 = vld [vmem:[#allocation4 + $0x40] ss:$2 sm:$0x7]  ;;  %v16476_v47 = vld [vmem:[#allocation3] sm:$0xff] }
 0x725   :  { %v6723_v22 = vld [vmem:[#allocation4 + $0x41] ss:$2 sm:$0x7]  ;;  %v6726_v46 = vld [vmem:[#allocation4 + $0x48] ss:$2 sm:$0x7] }
 0x726   :  { %6707 = vst [vmem:[#allocation5 + $0x17] sm:$0x7] %v6706_v27  ;;  %v6718_v45 = vmax.f32 %v6712_v41, %v6717_v63  ;;  %v6724_v62 = vmax.f32 %v6721_v58, %v6723_v22  ;;  %v6728_v5 = vld [vmem:[#allocation4 + $0x49] ss:$2 sm:$0x7]  ;;  %v16460_v13 = vld [vmem:[#allocation5 + $0x21] sm:$0xff] }
 0x727   :  { %v6729_v0 = vmax.f32 %v6726_v46, %v6728_v5  ;;  %v6733_v4 = vld [vmem:[#allocation4 + $0x50] ss:$2 sm:$0x7]  ;;  %v6735_v37 = vld [vmem:[#allocation4 + $0x51] ss:$2 sm:$0x7] }
 0x728   :  { %6719 = vst [vmem:[#allocation5 + $0x1e] sm:$0x7] %v6718_v45  ;;  %v6736_v59 = vmax.f32 %v6733_v4, %v6735_v37  ;;  %v6738_v21 = vld [vmem:[#allocation4 + $0x58] ss:$2 sm:$0x7]  ;;  %v16510_v8 = vld [vmem:[#allocation5 + $0x61] sm:$0xff] }
 0x729   :  { %v6740_v39 = vld [vmem:[#allocation4 + $0x59] ss:$2 sm:$0x7]  ;;  %v6730_v28 = vmax.f32 %v6724_v62, %v6729_v0  ;;  %v6745_v33 = vld [vmem:[#allocation4 + $0x60] ss:$2 sm:$0x7] }
 0x72a   :  { %v6741_v61 = vmax.f32 %v6738_v21, %v6740_v39  ;;  %v6747_v34 = vld [vmem:[#allocation4 + $0x61] ss:$2 sm:$0x7]  ;;  %v6750_v24 = vld [vmem:[#allocation4 + $0x68] ss:$2 sm:$0x7] }
 0x72b   :  { %v6748_v1 = vmax.f32 %v6745_v33, %v6747_v34  ;;  %v6752_v3 = vld [vmem:[#allocation4 + $0x69] ss:$2 sm:$0x7]  ;;  %6731 = vst [vmem:[#allocation5 + $0x41] sm:$0x7] %v6730_v28  ;;  %v16480_v56 = vld [vmem:[#allocation5 + $0x39] sm:$0xff] }
 0x72c   :  { %v6742_v23 = vmax.f32 %v6736_v59, %v6741_v61  ;;  %v6753_v55 = vmax.f32 %v6750_v24, %v6752_v3  ;;  %v16441_v38 = vld [vmem:[#allocation5 + $0x9] sm:$0xff]  ;;  %v16504_v19 = vld [vmem:[#allocation5 + $0x59] sm:$0xff] }
 0x72d   :  { %v16369_v11 = vld [vmem:[#allocation5 + $0x10] sm:$0xff]  ;;  %v9935_v43 = vld [vmem:[%s17134_s7 + $0x60] sm:$0xff]  ;;  %v9936_v30 = vld [vmem:[%s17134_s7 + $0x68] sm:$0xff] }
 0x72e   :  { %11720 = vmatmul.mubr.msk.f32.gmra.mrb[48].mxu1 %vm155_vm1, %v16369_v11  ;;  %6743 = vst [vmem:[#allocation5 + $0x48] sm:$0x7] %v6742_v23  ;;  %v6754_v51 = vmax.f32 %v6748_v1, %v6753_v55  ;;  %v16448_v15 = vld [vmem:[#allocation5 + $0x11] sm:$0xff]  ;;  %v7220_v7 = vld [vmem:[#allocation5 + $0x2] sm:$0xff]  ;;  %v12317_v40 = vpack.c.bf16 %v9936_v30, %v9935_v43  ;;  %v7231_v22 = vld [vmem:[#allocation5 + $0x5a] sm:$0xff] }
 0x72f   :  { %11722 = vmatprep.mubr.msk.f32.mxu1 %vm13415_vm0, %v15904_v31  ;;  %v16375_v20 = vld [vmem:[#allocation5 + $0x18] sm:$0xff]  ;;  %v16381_v29 = vld [vmem:[#allocation5 + $0x20] sm:$0xff]  ;;  %v9937_v60 = vld [vmem:[%s17134_s7 + $0x70] sm:$0xff] }
 0x730   :  { %6755 = vst [vmem:[#allocation5 + $0x4f] sm:$0x7] %v6754_v51  ;;  %v16454_v44 = vld [vmem:[#allocation5 + $0x19] sm:$0xff]  ;;  %v7221_v17 = vld [vmem:[#allocation5 + $0xa] sm:$0xff]  ;;  %v7224_v32 = vld [vmem:[#allocation5 + $0x22] sm:$0xff] }
 0x731   :  { %v9938_v14 = vld [vmem:[%s17134_s7 + $0x78] sm:$0xff]  ;;  %v7225_v36 = vld [vmem:[#allocation5 + $0x2a] sm:$0xff]  ;;  %v7232_v62 = vld [vmem:[#allocation5 + $0x62] sm:$0xff] }
 0x732   :  { %11723 = vmatmul.mubr.msk.f32.gmra.mrb[50].mxu1 %vm155_vm1, %v16375_v20  ;;  %v16399_v10 = vld [vmem:[#allocation5 + $0x40] sm:$0xff]  ;;  %v12320_v25 = vpack.c.bf16 %v9938_v14, %v9937_v60  ;;  %v7222_v41 = vld [vmem:[#allocation5 + $0x12] sm:$0xff]  ;;  %v9953_v5 = vld [vmem:[%s17134_s7 + $0x88] sm:$0xff] }
 0x733   :  { %11725 = vmatprep.mubr.msk.f32.mxu1 %vm13415_vm0, %v15904_v31  ;;  %v7223_v12 = vld [vmem:[#allocation5 + $0x1a] sm:$0xff]  ;;  %v7226_v27 = vld [vmem:[#allocation5 + $0x32] sm:$0xff]  ;;  %v7446_v0 = vld [vmem:[#allocation5 + $0x7] sm:$0xff] }
 0x734   :  { %v7227_v63 = vld [vmem:[#allocation5 + $0x3a] sm:$0xff]  ;;  %v7230_v58 = vld [vmem:[#allocation5 + $0x52] sm:$0xff]  ;;  %v16604_v33 = vld [vmem:[#allocation5 + $0x27] sm:$0xff] }
 0x735   :  { %v16486_v57 = vld [vmem:[#allocation5 + $0x41] sm:$0xff]  ;;  %v9954_v37 = vld [vmem:[%s17134_s7 + $0x90] sm:$0xff]  ;;  %v9955_v59 = vld [vmem:[%s17134_s7 + $0x98] sm:$0xff] }
 0x736   :  { %11726 = vmatmul.mubr.msk.f32.gmra.mrb[52].mxu1 %vm155_vm1, %v16381_v29  ;;  %v7228_v6 = vld [vmem:[#allocation5 + $0x42] sm:$0xff]  ;;  %v12326_v21 = vpack.c.bf16 %v9955_v59, %v9954_v37  ;;  %v16585_v39 = vld [vmem:[#allocation5 + $0xf] sm:$0xff]  ;;  %v16592_v28 = vld [vmem:[#allocation5 + $0x17] sm:$0xff] }
 0x737   :  { %11728 = vmatprep.mubr.msk.f32.mxu1 %vm13415_vm0, %v15904_v31  ;;  %v16405_v54 = vld [vmem:[#allocation5 + $0x48] sm:$0xff]  ;;  %v16411_v16 = vld [vmem:[#allocation5 + $0x50] sm:$0xff]  ;;  %v9952_v46 = vld [vmem:[%s17134_s7 + $0x80] sm:$0xff] }
 0x738   :  { %v16498_v18 = vld [vmem:[#allocation5 + $0x51] sm:$0xff]  ;;  %v12323_v4 = vpack.c.bf16 %v9953_v5, %v9952_v46  ;;  %v16598_v61 = vld [vmem:[#allocation5 + $0x1f] sm:$0xff]  ;;  %v16628_v3 = vld [vmem:[#allocation5 + $0x47] sm:$0xff] }
 0x739   :  { %v7229_v45 = vld [vmem:[#allocation5 + $0x4a] sm:$0xff]  ;;  %v16616_v1 = vld [vmem:[#allocation5 + $0x37] sm:$0xff]  ;;  %v16622_v24 = vld [vmem:[#allocation5 + $0x3f] sm:$0xff] }
 0x73a   :  { %11729 = vmatmul.mubr.msk.f32.gmra.mrb[54].mxu1 %vm155_vm1, %v15904_v31  ;;  %v16610_v34 = vld [vmem:[#allocation5 + $0x2f] sm:$0xff]  ;;  %v16640_v55 = vld [vmem:[#allocation5 + $0x57] sm:$0xff]  ;;  %v16646_v51 = vld [vmem:[#allocation5 + $0x5f] sm:$0xff] }
 0x73b   :  { %11731 = vmatprep.mubr.msk.f32.mxu1 %vm13415_vm0, %v15904_v31  ;;  %v16634_v23 = vld [vmem:[#allocation5 + $0x4f] sm:$0xff]  ;;  %v9986_v43 = vld [vmem:[%s17134_s7 + $0xc0] sm:$0xff]  ;;  %v9989_v60 = vld [vmem:[%s17134_s7 + $0xd8] sm:$0xff] }
 0x73c   :  { %v9987_v30 = vld [vmem:[%s17134_s7 + $0xc8] sm:$0xff] }
 0x73d   :  { %v8362_v5 = vld [vmem:[#allocation5 + $0x6f] sm:$0xff] }
 0x73e   :  { %11732 = vmatmul.mubr.msk.f32.gmra.mrb[56].mxu1 %vm155_vm1, %v15904_v31 }
 0x73f   :  { %11734 = vmatprep.mubr.msk.f32.mxu1 %vm13415_vm0, %v15904_v31 }
 0x742   :  { %11735 = vmatmul.mubr.msk.f32.gmra.mrb[58].mxu1 %vm155_vm1, %v15904_v31 }
 0x743   :  { %11737 = vmatprep.mubr.msk.f32.mxu1 %vm13415_vm0, %v15904_v31 }
 0x746   :  { %11738 = vmatmul.mubr.msk.f32.gmra.mrb[60].mxu1 %vm155_vm1, %v16399_v10 }
 0x747   :  { %11740 = vmatprep.mubr.msk.f32.mxu1 %vm13415_vm0, %v15904_v31 }
 0x74a   :  { %11741 = vmatmul.mubr.msk.f32.gmra.mrb[62].mxu1 %vm155_vm1, %v16405_v54 }
 0x74b   :  { %11743 = vmatprep.mubr.msk.f32.mxu1 %vm13415_vm0, %v15904_v31 }
 0x74e   :  { %11744 = vmatmul.mubr.msk.f32.gmra.mrb[64].mxu1 %vm155_vm1, %v16411_v16 }
 0x74f   :  { %11746 = vmatprep.mubr.msk.f32.mxu1 %vm13415_vm0, %v15904_v31 }
 0x752   :  { %11747 = vmatmul.mubr.msk.f32.gmra.mrb[66].mxu1 %vm155_vm1, %v15904_v31 }
 0x753   :  { %11749 = vmatprep.mubr.msk.f32.mxu1 %vm13415_vm0, %v15904_v31 }
 0x756   :  { %11750 = vmatmul.mubr.msk.f32.gmra.mrb[68].mxu1 %vm155_vm1, %v15904_v31 }
 0x757   :  { %11760 = vmatprep.mubr.msk.f32.mxu1 %vm13415_vm0, %v15904_v31 }
 0x75a   :  { %11761 = vmatmul.mubr.msk.f32.vlgmr.msra.gmra.mrb[44].mxu1 %vm155_vm1, %v6994_v2  ;;  %v9970_v2 = vld [vmem:[%s17134_s7 + $0xa8] sm:$0xff] }
 0x75b   :  { %12312 = vmatpush3.bf16.msra.mxu1 %v12311_v53  ;;  %11763 = vmatprep.mubr.msk.f32.mxu1 %vm13415_vm0, %v15904_v31  ;;  %v12329_v53 = vpack.c.bf16 %v9970_v2, %v9969_v42 }
 0x75c   :  { %12313 = vmatprep.subr.bf16.mxu1 %v17154_v9 }
 0x75e   :  { %11764 = vmatmul.mubr.msk.f32.gmra.mrb[46].mxu1 %vm155_vm1, %v16441_v38 }
 0x75f   :  { %11766 = vmatprep.mubr.msk.f32.mxu1 %vm13415_vm0, %v15904_v31  ;;  %12315 = vmatpush3.bf16.msra.mxu1 %v12314_v52  ;;  %v12332_v52 = vpack.c.bf16 %v9972_v48, %v9971_v26 }
 0x760   :  { %12316 = vmatprep.subr.bf16.mxu1 %v17154_v9 }
 0x762   :  { %11767 = vmatmul.mubr.msk.f32.gmra.mrb[48].mxu1 %vm155_vm1, %v16448_v15 }
 0x763   :  { %11769 = vmatprep.mubr.msk.f32.mxu1 %vm13415_vm0, %v15904_v31 }
 0x766   :  { %11770 = vmatmul.mubr.msk.f32.gmra.mrb[50].mxu1 %vm155_vm1, %v16454_v44 }
 0x767   :  { %11772 = vmatprep.mubr.msk.f32.mxu1 %vm13415_vm0, %v15904_v31 }
 0x76a   :  { %11773 = vmatmul.mubr.msk.f32.gmra.mrb[52].mxu1 %vm155_vm1, %v16460_v13 }
 0x76b   :  { %11775 = vmatprep.mubr.msk.f32.mxu1 %vm13415_vm0, %v15904_v31 }
 0x76e   :  { %11776 = vmatmul.mubr.msk.f32.gmra.mrb[54].mxu1 %vm155_vm1, %v16466_v35 }
 0x76f   :  { %11778 = vmatprep.mubr.msk.f32.mxu1 %vm13415_vm0, %v15904_v31  ;;  %v16492_v31 = vld [vmem:[#allocation5 + $0x49] sm:$0xff] }
 0x772   :  { %11779 = vmatmul.mubr.msk.f32.gmra.mrb[56].mxu1 %vm155_vm1, %v16472_v49 }
 0x773   :  { %11781 = vmatprep.mubr.msk.f32.mxu1 %vm13415_vm0, %v16476_v47 }
 0x776   :  { %11782 = vmatmul.mubr.msk.f32.gmra.mrb[58].mxu1 %vm155_vm1, %v16480_v56 }
 0x777   :  { %11784 = vmatprep.mubr.msk.f32.mxu1 %vm13415_vm0, %v16476_v47 }
 0x77a   :  { %11785 = vmatmul.mubr.msk.f32.gmra.mrb[60].mxu1 %vm155_vm1, %v16486_v57 }
 0x77b   :  { %11787 = vmatprep.mubr.msk.f32.mxu1 %vm13415_vm0, %v16476_v47 }
 0x77e   :  { %11788 = vmatmul.mubr.msk.f32.gmra.mrb[62].mxu1 %vm155_vm1, %v16492_v31 }
 0x77f   :  { %11790 = vmatprep.mubr.msk.f32.mxu1 %vm13415_vm0, %v16476_v47 }
 0x782   :  { %11791 = vmatmul.mubr.msk.f32.gmra.mrb[64].mxu1 %vm155_vm1, %v16498_v18 }
 0x783   :  { %11793 = vmatprep.mubr.msk.f32.mxu1 %vm13415_vm0, %v16476_v47 }
 0x786   :  { %11794 = vmatmul.mubr.msk.f32.gmra.mrb[66].mxu1 %vm155_vm1, %v16504_v19 }
 0x787   :  { %11796 = vmatprep.mubr.msk.f32.mxu1 %vm13415_vm0, %v16476_v47 }
 0x78a   :  { %11797 = vmatmul.mubr.msk.f32.gmra.mrb[68].mxu1 %vm155_vm1, %v16510_v8 }
 0x78b   :  { %11807 = vmatprep.mubr.msk.f32.mxu1 %vm13415_vm0, %v16476_v47 }
 0x78e   :  { %11808 = vmatmul.mubr.msk.f32.vlgmr.msra.gmra.mrb[44].mxu1 %vm155_vm1, %v7220_v7  ;;  %v12335_v7 = vpack.c.bf16 %v9987_v30, %v9986_v43 }
 0x78f   :  { %12318 = vmatpush3.bf16.msra.mxu1 %v12317_v40  ;;  %11810 = vmatprep.mubr.msk.f32.mxu1 %vm13415_vm0, %v16476_v47  ;;  %v9988_v40 = vld [vmem:[%s17134_s7 + $0xd0] sm:$0xff] }
 0x790   :  { %12319 = vmatprep.subr.bf16.mxu1 %v17154_v9  ;;  %v12338_v14 = vpack.c.bf16 %v9989_v60, %v9988_v40 }
 0x792   :  { %11811 = vmatmul.mubr.msk.f32.gmra.mrb[46].mxu1 %vm155_vm1, %v7221_v17  ;;  %v8130_v17 = vld [vmem:[#allocation5 + $0x3e] sm:$0xff] }
 0x793   :  { %11813 = vmatprep.mubr.msk.f32.mxu1 %vm13415_vm0, %v16476_v47  ;;  %12321 = vmatpush3.bf16.msra.mxu1 %v12320_v25  ;;  %v8129_v25 = vld [vmem:[#allocation5 + $0x36] sm:$0xff] }
 0x794   :  { %12322 = vmatprep.subr.bf16.mxu1 %v17154_v9 }
 0x796   :  { %11814 = vmatmul.mubr.msk.f32.gmra.mrb[48].mxu1 %vm155_vm1, %v7222_v41  ;;  %v8131_v41 = vld [vmem:[#allocation5 + $0x46] sm:$0xff] }
 0x797   :  { %11816 = vmatprep.mubr.msk.f32.mxu1 %vm13415_vm0, %v16476_v47 }
 0x79a   :  { %11817 = vmatmul.mubr.msk.f32.gmra.mrb[50].mxu1 %vm155_vm1, %v7223_v12  ;;  %v8132_v12 = vld [vmem:[#allocation5 + $0x4e] sm:$0xff] }
 0x79b   :  { %11819 = vmatprep.mubr.msk.f32.mxu1 %vm13415_vm0, %v16476_v47 }
 0x79e   :  { %11820 = vmatmul.mubr.msk.f32.gmra.mrb[52].mxu1 %vm155_vm1, %v7224_v32  ;;  %v8133_v32 = vld [vmem:[#allocation5 + $0x56] sm:$0xff] }
 0x79f   :  { %11822 = vmatprep.mubr.msk.f32.mxu1 %vm13415_vm0, %v16476_v47 }
 0x7a2   :  { %11823 = vmatmul.mubr.msk.f32.gmra.mrb[54].mxu1 %vm155_vm1, %v7225_v36  ;;  %v8134_v36 = vld [vmem:[#allocation5 + $0x5e] sm:$0xff] }
 0x7a3   :  { %11825 = vmatprep.mubr.msk.f32.mxu1 %vm13415_vm0, %v16476_v47 }
 0x7a6   :  { %11826 = vmatmul.mubr.msk.f32.gmra.mrb[56].mxu1 %vm155_vm1, %v7226_v27  ;;  %v8135_v27 = vld [vmem:[#allocation5 + $0x66] sm:$0xff] }
 0x7a7   :  { %11828 = vmatprep.mubr.msk.f32.mxu1 %vm13415_vm0, %v16476_v47 }
 0x7aa   :  { %11829 = vmatmul.mubr.msk.f32.gmra.mrb[58].mxu1 %vm155_vm1, %v7227_v63  ;;  %v8136_v63 = vld [vmem:[#allocation5 + $0x6e] sm:$0xff] }
 0x7ab   :  { %11831 = vmatprep.mubr.msk.f32.mxu1 %vm13415_vm0, %v16476_v47 }
 0x7ae   :  { %11832 = vmatmul.mubr.msk.f32.gmra.mrb[60].mxu1 %vm155_vm1, %v7228_v6  ;;  %v10020_v6 = vld [vmem:[%s17134_s7 + $0x100] sm:$0xff] }
 0x7af   :  { %11834 = vmatprep.mubr.msk.f32.mxu1 %vm13415_vm0, %v16476_v47 }
 0x7b2   :  { %11835 = vmatmul.mubr.msk.f32.gmra.mrb[62].mxu1 %vm155_vm1, %v7229_v45  ;;  %v10021_v45 = vld [vmem:[%s17134_s7 + $0x108] sm:$0xff] }
 0x7b3   :  { %11837 = vmatprep.mubr.msk.f32.mxu1 %vm13415_vm0, %v16476_v47 }
 0x7b6   :  { %11838 = vmatmul.mubr.msk.f32.gmra.mrb[64].mxu1 %vm155_vm1, %v7230_v58  ;;  %v12347_v58 = vpack.c.bf16 %v10021_v45, %v10020_v6  ;;  %v10042_v6 = vld [vmem:[%s17137_s10 + $0x38] sm:$0xff] }
 0x7b7   :  { %11840 = vmatprep.mubr.msk.f32.mxu1 %vm13415_vm0, %v16476_v47 }
 0x7ba   :  { %11841 = vmatmul.mubr.msk.f32.gmra.mrb[66].mxu1 %vm155_vm1, %v7231_v22  ;;  %v10022_v22 = vld [vmem:[%s17134_s7 + $0x110] sm:$0xff] }
 0x7bb   :  { %11843 = vmatprep.mubr.msk.f32.mxu1 %vm13415_vm0, %v16476_v47 }
 0x7be   :  { %11844 = vmatmul.mubr.msk.f32.gmra.mrb[68].mxu1 %vm155_vm1, %v7232_v62  ;;  %v10023_v62 = vld [vmem:[%s17134_s7 + $0x118] sm:$0xff] }
 0x7bf   :  { %11854 = vmatprep.mubr.msk.f32.mxu1 %vm13415_vm0, %v16476_v47  ;;  %v12350_v46 = vpack.c.bf16 %v10023_v62, %v10022_v22 }
 0x7c2   :  { %11855 = vmatmul.mubr.msk.f32.vlgmr.msra.gmra.mrb[44].mxu1 %vm155_vm1, %v7446_v0 }
 0x7c3   :  { %12324 = vmatpush3.bf16.msra.mxu1 %v12323_v4  ;;  %11857 = vmatprep.mubr.msk.f32.mxu1 %vm13415_vm0, %v16476_v47  ;;  %v16967_v4 = vpop.permute.xlu0 %8835 }
 0x7c4   :  { %12325 = vmatprep.subr.bf16.mxu1 %v17154_v9 }
 0x7c6   :  { %11858 = vmatmul.mubr.msk.f32.gmra.mrb[46].mxu1 %vm155_vm1, %v16585_v39 }
 0x7c7   :  { %11860 = vmatprep.mubr.msk.f32.mxu1 %vm13415_vm0, %v16476_v47  ;;  %12327 = vmatpush3.bf16.msra.mxu1 %v12326_v21 }
 0x7c8   :  { %12328 = vmatprep.subr.bf16.mxu1 %v17154_v9 }
 0x7ca   :  { %11861 = vmatmul.mubr.msk.f32.gmra.mrb[48].mxu1 %vm155_vm1, %v16592_v28 }
 0x7cb   :  { %11863 = vmatprep.mubr.msk.f32.mxu1 %vm13415_vm0, %v16476_v47 }
 0x7ce   :  { %11864 = vmatmul.mubr.msk.f32.gmra.mrb[50].mxu1 %vm155_vm1, %v16598_v61 }
 0x7cf   :  { %11866 = vmatprep.mubr.msk.f32.mxu1 %vm13415_vm0, %v16476_v47 }
 0x7d2   :  { %11867 = vmatmul.mubr.msk.f32.gmra.mrb[52].mxu1 %vm155_vm1, %v16604_v33 }
 0x7d3   :  { %11869 = vmatprep.mubr.msk.f32.mxu1 %vm13415_vm0, %v16476_v47 }
 0x7d6   :  { %11870 = vmatmul.mubr.msk.f32.gmra.mrb[54].mxu1 %vm155_vm1, %v16610_v34 }
 0x7d7   :  { %11872 = vmatprep.mubr.msk.f32.mxu1 %vm13415_vm0, %v16476_v47 }
 0x7da   :  { %11873 = vmatmul.mubr.msk.f32.gmra.mrb[56].mxu1 %vm155_vm1, %v16616_v1 }
 0x7db   :  { %11875 = vmatprep.mubr.msk.f32.mxu1 %vm13415_vm0, %v16476_v47 }
 0x7de   :  { %11876 = vmatmul.mubr.msk.f32.gmra.mrb[58].mxu1 %vm155_vm1, %v16622_v24 }
 0x7df   :  { %11878 = vmatprep.mubr.msk.f32.mxu1 %vm13415_vm0, %v16476_v47 }
 0x7e2   :  { %11879 = vmatmul.mubr.msk.f32.gmra.mrb[60].mxu1 %vm155_vm1, %v16628_v3 }
 0x7e3   :  { %11881 = vmatprep.mubr.msk.f32.mxu1 %vm13415_vm0, %v16476_v47 }
 0x7e6   :  { %11882 = vmatmul.mubr.msk.f32.gmra.mrb[62].mxu1 %vm155_vm1, %v16634_v23 }
 0x7e7   :  { %11884 = vmatprep.mubr.msk.f32.mxu1 %vm13415_vm0, %v16476_v47 }
 0x7ea   :  { %11885 = vmatmul.mubr.msk.f32.gmra.mrb[64].mxu1 %vm155_vm1, %v16640_v55 }
 0x7eb   :  { %11887 = vmatprep.mubr.msk.f32.mxu1 %vm13415_vm0, %v16476_v47 }
 0x7ee   :  { %11888 = vmatmul.mubr.msk.f32.gmra.mrb[66].mxu1 %vm155_vm1, %v16646_v51 }
 0x7ef   :  { %11890 = vmatprep.mubr.msk.f32.mxu1 %vm13415_vm0, %v16476_v47 }
 0x7f2   :  { %11891 = vmatmul.mubr.msk.f32.gmra.mrb[68].mxu1 %vm155_vm1, %v16652_v50 }
 0x7f3   :  { %11901 = vmatprep.mubr.msk.f32.mxu1 %vm13415_vm0, %v16476_v47 }
 0x7f6   :  { %11902 = vmatmul.mubr.msk.f32.vlgmr.msra.gmra.mrb[44].mxu1 %vm155_vm1, %v16476_v47 }
 0x7f7   :  { %12330 = vmatpush3.bf16.msra.mxu1 %v12329_v53  ;;  %11904 = vmatprep.mubr.msk.f32.mxu1 %vm13415_vm0, %v16476_v47 }
 0x7f8   :  { %12331 = vmatprep.subr.bf16.mxu1 %v17154_v9 }
 0x7fa   :  { %11905 = vmatmul.mubr.msk.f32.gmra.mrb[46].mxu1 %vm155_vm1, %v16369_v11 }
 0x7fb   :  { %11907 = vmatprep.mubr.msk.f32.mxu1 %vm13415_vm0, %v16476_v47  ;;  %12333 = vmatpush3.bf16.msra.mxu1 %v12332_v52 }
 0x7fc   :  { %12334 = vmatprep.subr.bf16.mxu1 %v17154_v9 }
 0x7fe   :  { %11908 = vmatmul.mubr.msk.f32.gmra.mrb[48].mxu1 %vm155_vm1, %v16375_v20 }
 0x7ff   :  { %11910 = vmatprep.mubr.msk.f32.mxu1 %vm13415_vm0, %v16476_v47 }
 0x802   :  { %11911 = vmatmul.mubr.msk.f32.gmra.mrb[50].mxu1 %vm155_vm1, %v16381_v29 }
 0x803   :  { %11913 = vmatprep.mubr.msk.f32.mxu1 %vm13415_vm0, %v16476_v47 }
 0x806   :  { %11914 = vmatmul.mubr.msk.f32.gmra.mrb[52].mxu1 %vm155_vm1, %v16476_v47 }
 0x807   :  { %11916 = vmatprep.mubr.msk.f32.mxu1 %vm13415_vm0, %v16476_v47 }
 0x80a   :  { %11917 = vmatmul.mubr.msk.f32.gmra.mrb[54].mxu1 %vm155_vm1, %v16476_v47 }
 0x80b   :  { %11919 = vmatprep.mubr.msk.f32.mxu1 %vm13415_vm0, %v16476_v47 }
 0x80e   :  { %11920 = vmatmul.mubr.msk.f32.gmra.mrb[56].mxu1 %vm155_vm1, %v16476_v47 }
 0x80f   :  { %11922 = vmatprep.mubr.msk.f32.mxu1 %vm13415_vm0, %v16476_v47 }
 0x812   :  { %11923 = vmatmul.mubr.msk.f32.gmra.mrb[58].mxu1 %vm155_vm1, %v16399_v10 }
 0x813   :  { %11925 = vmatprep.mubr.msk.f32.mxu1 %vm13415_vm0, %v16476_v47 }
 0x816   :  { %11926 = vmatmul.mubr.msk.f32.gmra.mrb[60].mxu1 %vm155_vm1, %v16405_v54 }
 0x817   :  { %11928 = vmatprep.mubr.msk.f32.mxu1 %vm13415_vm0, %v16476_v47 }
 0x81a   :  { %11929 = vmatmul.mubr.msk.f32.gmra.mrb[62].mxu1 %vm155_vm1, %v16411_v16 }
 0x81b   :  { %11931 = vmatprep.mubr.msk.f32.mxu1 %vm13415_vm0, %v16476_v47 }
 0x81e   :  { %11932 = vmatmul.mubr.msk.f32.gmra.mrb[64].mxu1 %vm155_vm1, %v16476_v47 }
 0x81f   :  { %11934 = vmatprep.mubr.msk.f32.mxu1 %vm13415_vm0, %v16476_v47 }
 0x822   :  { %11935 = vmatmul.mubr.msk.f32.gmra.mrb[66].mxu1 %vm155_vm1, %v16476_v47 }
 0x823   :  { %11937 = vmatprep.mubr.msk.f32.mxu1 %vm13415_vm0, %v16476_v47 }
 0x826   :  { %11938 = vmatmul.mubr.msk.f32.gmra.mrb[68].mxu1 %vm155_vm1, %v16476_v47 }
 0x827   :  { %11948 = vmatprep.mubr.msk.f32.mxu1 %vm13415_vm0, %v16476_v47 }
 0x82a   :  { %11949 = vmatmul.mubr.msk.f32.vlgmr.msra.gmra.mrb[44].mxu1 %vm155_vm1, %v16441_v38  ;;  %v7910_v38 = vld [vmem:[#allocation5 + $0x69] sm:$0xff] }
 0x82b   :  { %12336 = vmatpush3.bf16.msra.mxu1 %v12335_v7  ;;  %11951 = vmatprep.mubr.msk.f32.mxu1 %vm13415_vm0, %v16476_v47 }
 0x82c   :  { %12337 = vmatprep.subr.bf16.mxu1 %v17154_v9 }
 0x82e   :  { %11952 = vmatmul.mubr.msk.f32.gmra.mrb[46].mxu1 %vm155_vm1, %v16448_v15  ;;  %v10003_v15 = vld [vmem:[%s17134_s7 + $0xe0] sm:$0xff] }
 0x82f   :  { %11954 = vmatprep.mubr.msk.f32.mxu1 %vm13415_vm0, %v16476_v47  ;;  %12339 = vmatpush3.bf16.msra.mxu1 %v12338_v14 }
 0x830   :  { %12340 = vmatprep.subr.bf16.mxu1 %v17154_v9 }
 0x832   :  { %11955 = vmatmul.mubr.msk.f32.gmra.mrb[48].mxu1 %vm155_vm1, %v16454_v44  ;;  %v10004_v44 = vld [vmem:[%s17134_s7 + $0xe8] sm:$0xff] }
 0x833   :  { %11957 = vmatprep.mubr.msk.f32.mxu1 %vm13415_vm0, %v16476_v47 }
 0x836   :  { %11958 = vmatmul.mubr.msk.f32.gmra.mrb[50].mxu1 %vm155_vm1, %v16460_v13  ;;  %v12341_v13 = vpack.c.bf16 %v10004_v44, %v10003_v15 }
 0x837   :  { %11960 = vmatprep.mubr.msk.f32.mxu1 %vm13415_vm0, %v16476_v47 }
 0x83a   :  { %11961 = vmatmul.mubr.msk.f32.gmra.mrb[52].mxu1 %vm155_vm1, %v16466_v35  ;;  %v10005_v35 = vld [vmem:[%s17134_s7 + $0xf0] sm:$0xff] }
 0x83b   :  { %11963 = vmatprep.mubr.msk.f32.mxu1 %vm13415_vm0, %v16476_v47 }
 0x83e   :  { %11964 = vmatmul.mubr.msk.f32.gmra.mrb[54].mxu1 %vm155_vm1, %v16472_v49  ;;  %v10006_v49 = vld [vmem:[%s17134_s7 + $0xf8] sm:$0xff] }
 0x83f   :  { %11966 = vmatprep.mubr.msk.f32.mxu1 %vm13415_vm0, %v16476_v47 }
 0x842   :  { %11967 = vmatmul.mubr.msk.f32.gmra.mrb[56].mxu1 %vm155_vm1, %v16480_v56  ;;  %v8124_v56 = vld [vmem:[#allocation5 + $0xe] sm:$0xff] }
 0x843   :  { %11969 = vmatprep.mubr.msk.f32.mxu1 %vm13415_vm0, %v16476_v47 }
 0x846   :  { %11970 = vmatmul.mubr.msk.f32.gmra.mrb[58].mxu1 %vm155_vm1, %v16486_v57  ;;  %v12344_v57 = vpack.c.bf16 %v10006_v49, %v10005_v35 }
 0x847   :  { %11972 = vmatprep.mubr.msk.f32.mxu1 %vm13415_vm0, %v16476_v47 }
 0x84a   :  { %11973 = vmatmul.mubr.msk.f32.gmra.mrb[60].mxu1 %vm155_vm1, %v16492_v31  ;;  %v8125_v31 = vld [vmem:[#allocation5 + $0x16] sm:$0xff] }
 0x84b   :  { %11975 = vmatprep.mubr.msk.f32.mxu1 %vm13415_vm0, %v16476_v47 }
 0x84e   :  { %11976 = vmatmul.mubr.msk.f32.gmra.mrb[62].mxu1 %vm155_vm1, %v16498_v18  ;;  %v8126_v18 = vld [vmem:[#allocation5 + $0x1e] sm:$0xff] }
 0x84f   :  { %11978 = vmatprep.mubr.msk.f32.mxu1 %vm13415_vm0, %v16476_v47 }
 0x852   :  { %11979 = vmatmul.mubr.msk.f32.gmra.mrb[64].mxu1 %vm155_vm1, %v16504_v19  ;;  %v8127_v19 = vld [vmem:[#allocation5 + $0x26] sm:$0xff] }
 0x853   :  { %11981 = vmatprep.mubr.msk.f32.mxu1 %vm13415_vm0, %v16476_v47 }
 0x856   :  { %11982 = vmatmul.mubr.msk.f32.gmra.mrb[66].mxu1 %vm155_vm1, %v16510_v8  ;;  %v8128_v8 = vld [vmem:[#allocation5 + $0x2e] sm:$0xff] }
 0x857   :  { %11984 = vmatprep.mubr.msk.f32.mxu1 %vm13415_vm0, %v16476_v47 }
 0x85a   :  { %11985 = vmatmul.mubr.msk.f32.gmra.mrb[68].mxu1 %vm155_vm1, %v7910_v38 }
 0x85b   :  { %11995 = vmatprep.mubr.msk.f32.mxu1 %vm13415_vm0, %v16476_v47 }
 0x85e   :  { %11996 = vmatmul.mubr.msk.f32.vlgmr.msra.gmra.mrb[44].mxu1 %vm155_vm1, %v8124_v56 }
 0x85f   :  { %12342 = vmatpush3.bf16.msra.mxu1 %v12341_v13  ;;  %11998 = vmatprep.mubr.msk.f32.mxu1 %vm13415_vm0, %v16476_v47 }
 0x860   :  { %12343 = vmatprep.subr.bf16.mxu1 %v17154_v9 }
 0x862   :  { %11999 = vmatmul.mubr.msk.f32.gmra.mrb[46].mxu1 %vm155_vm1, %v8125_v31 }
 0x863   :  { %12001 = vmatprep.mubr.msk.f32.mxu1 %vm13415_vm0, %v16476_v47  ;;  %12345 = vmatpush3.bf16.msra.mxu1 %v12344_v57 }
 0x864   :  { %12346 = vmatprep.subr.bf16.mxu1 %v17154_v9 }
 0x866   :  { %12002 = vmatmul.mubr.msk.f32.gmra.mrb[48].mxu1 %vm155_vm1, %v8126_v18 }
 0x867   :  { %12004 = vmatprep.mubr.msk.f32.mxu1 %vm13415_vm0, %v16476_v47 }
 0x86a   :  { %12005 = vmatmul.mubr.msk.f32.gmra.mrb[50].mxu1 %vm155_vm1, %v8127_v19 }
 0x86b   :  { %12007 = vmatprep.mubr.msk.f32.mxu1 %vm13415_vm0, %v16476_v47 }
 0x86e   :  { %12008 = vmatmul.mubr.msk.f32.gmra.mrb[52].mxu1 %vm155_vm1, %v8128_v8 }
 0x86f   :  { %12010 = vmatprep.mubr.msk.f32.mxu1 %vm13415_vm0, %v16476_v47 }
 0x872   :  { %12011 = vmatmul.mubr.msk.f32.gmra.mrb[54].mxu1 %vm155_vm1, %v8129_v25 }
 0x873   :  { %12013 = vmatprep.mubr.msk.f32.mxu1 %vm13415_vm0, %v16476_v47 }
 0x876   :  { %12014 = vmatmul.mubr.msk.f32.gmra.mrb[56].mxu1 %vm155_vm1, %v8130_v17 }
 0x877   :  { %12016 = vmatprep.mubr.msk.f32.mxu1 %vm13415_vm0, %v16476_v47 }
 0x87a   :  { %12017 = vmatmul.mubr.msk.f32.gmra.mrb[58].mxu1 %vm155_vm1, %v8131_v41 }
 0x87b   :  { %12019 = vmatprep.mubr.msk.f32.mxu1 %vm13415_vm0, %v16476_v47 }
 0x87e   :  { %12020 = vmatmul.mubr.msk.f32.gmra.mrb[60].mxu1 %vm155_vm1, %v8132_v12  ;;  %v10039_v12 = vld [vmem:[%s17137_s10 + $0x20] sm:$0xff] }
 0x87f   :  { %12022 = vmatprep.mubr.msk.f32.mxu1 %vm13415_vm0, %v16476_v47 }
 0x882   :  { %12023 = vmatmul.mubr.msk.f32.gmra.mrb[62].mxu1 %vm155_vm1, %v8133_v32  ;;  %v10040_v32 = vld [vmem:[%s17137_s10 + $0x28] sm:$0xff] }
 0x883   :  { %12025 = vmatprep.mubr.msk.f32.mxu1 %vm13415_vm0, %v16476_v47 }
 0x886   :  { %12026 = vmatmul.mubr.msk.f32.gmra.mrb[64].mxu1 %vm155_vm1, %v8134_v36  ;;  %v10041_v36 = vld [vmem:[%s17137_s10 + $0x30] sm:$0xff] }
 0x887   :  { %12028 = vmatprep.mubr.msk.f32.mxu1 %vm13415_vm0, %v16476_v47  ;;  %v12356_v22 = vpack.c.bf16 %v10042_v6, %v10041_v36 }
 0x88a   :  { %12029 = vmatmul.mubr.msk.f32.gmra.mrb[66].mxu1 %vm155_vm1, %v8135_v27 }
 0x88b   :  { %12031 = vmatprep.mubr.msk.f32.mxu1 %vm13415_vm0, %v16476_v47 }
 0x88e   :  { %12032 = vmatmul.mubr.msk.f32.gmra.mrb[68].mxu1 %vm155_vm1, %v8136_v63  ;;  %v12353_v63 = vpack.c.bf16 %v10040_v32, %v10039_v12 }
 0x88f   :  { %12042 = vmatprep.mubr.msk.f32.mxu1 %vm13415_vm0, %v16476_v47 }
 0x892   :  { %12043 = vmatmul.mubr.msk.f32.vlgmr.msra.gmra.mrb[44].mxu1 %vm155_vm1, %v16585_v39 }
 0x893   :  { %12348 = vmatpush3.bf16.msra.mxu1 %v12347_v58  ;;  %12045 = vmatprep.mubr.msk.f32.mxu1 %vm13415_vm0, %v16476_v47 }
 0x894   :  { %12349 = vmatprep.subr.bf16.mxu1 %v17154_v9 }
 0x896   :  { %12046 = vmatmul.mubr.msk.f32.gmra.mrb[46].mxu1 %vm155_vm1, %v16592_v28 }
 0x897   :  { %12048 = vmatprep.mubr.msk.f32.mxu1 %vm13415_vm0, %v16476_v47  ;;  %12351 = vmatpush3.bf16.msra.mxu1 %v12350_v46 }
 0x898   :  { %12352 = vmatprep.subr.bf16.mxu1 %v17154_v9 }
 0x89a   :  { %12049 = vmatmul.mubr.msk.f32.gmra.mrb[48].mxu1 %vm155_vm1, %v16598_v61 }
 0x89b   :  { %12051 = vmatprep.mubr.msk.f32.mxu1 %vm13415_vm0, %v16476_v47 }
 0x89e   :  { %12052 = vmatmul.mubr.msk.f32.gmra.mrb[50].mxu1 %vm155_vm1, %v16604_v33 }
 0x89f   :  { %12054 = vmatprep.mubr.msk.f32.mxu1 %vm13415_vm0, %v16476_v47 }
 0x8a2   :  { %12055 = vmatmul.mubr.msk.f32.gmra.mrb[52].mxu1 %vm155_vm1, %v16610_v34 }
 0x8a3   :  { %12057 = vmatprep.mubr.msk.f32.mxu1 %vm13415_vm0, %v16476_v47 }
 0x8a6   :  { %12058 = vmatmul.mubr.msk.f32.gmra.mrb[54].mxu1 %vm155_vm1, %v16616_v1 }
 0x8a7   :  { %12060 = vmatprep.mubr.msk.f32.mxu1 %vm13415_vm0, %v16476_v47 }
 0x8aa   :  { %12061 = vmatmul.mubr.msk.f32.gmra.mrb[56].mxu1 %vm155_vm1, %v16622_v24 }
 0x8ab   :  { %12063 = vmatprep.mubr.msk.f32.mxu1 %vm13415_vm0, %v16476_v47 }
 0x8ae   :  { %12064 = vmatmul.mubr.msk.f32.gmra.mrb[58].mxu1 %vm155_vm1, %v16628_v3 }
 0x8af   :  { %12066 = vmatprep.mubr.msk.f32.mxu1 %vm13415_vm0, %v16476_v47 }
 0x8b2   :  { %12067 = vmatmul.mubr.msk.f32.gmra.mrb[60].mxu1 %vm155_vm1, %v16634_v23 }
 0x8b3   :  { %12069 = vmatprep.mubr.msk.f32.mxu1 %vm13415_vm0, %v16476_v47 }
 0x8b6   :  { %12070 = vmatmul.mubr.msk.f32.gmra.mrb[62].mxu1 %vm155_vm1, %v16640_v55  ;;  %v16983_v55 = vpop.permute.xlu0 %8845 }
 0x8b7   :  { %12072 = vmatprep.mubr.msk.f32.mxu1 %vm13415_vm0, %v16476_v47 }
 0x8ba   :  { %12073 = vmatmul.mubr.msk.f32.gmra.mrb[64].mxu1 %vm155_vm1, %v16646_v51  ;;  %v16997_v40 = vpop.permute.xlu0 %8855 }
 0x8bb   :  { %12075 = vmatprep.mubr.msk.f32.mxu1 %vm13415_vm0, %v16476_v47 }
 0x8be   :  { %12076 = vmatmul.mubr.msk.f32.gmra.mrb[66].mxu1 %vm155_vm1, %v16652_v50  ;;  %v17009_v18 = vpop.permute.xlu0 %8865 }
 0x8bf   :  { %12078 = vmatprep.mubr.msk.f32.mxu1 %vm13415_vm0, %v16476_v47 }
 0x8c2   :  { %12079 = vmatmul.mubr.msk.f32.gmra.mrb[68].mxu1 %vm155_vm1, %v8362_v5 }
 0x8c3   :  { %12089 = vmatprep.mubr.msk.f32.mxu1 %vm13415_vm0, %v16476_v47 }
 0x8c6   :  { %12090 = vmatmul.mubr.msk.f32.vlgmr.msra.gmra.mrb[44].mxu1 %vm155_vm1, %v16369_v11 }
 0x8c7   :  { %12092 = vmatprep.mubr.msk.f32.mxu1 %vm13415_vm0, %v16476_v47  ;;  %12354 = vmatpush3.bf16.msra.mxu1 %v12353_v63 }
 0x8c8   :  { %12355 = vmatprep.subr.bf16.mxu1 %v17154_v9 }
 0x8ca   :  { %12093 = vmatmul.mubr.msk.f32.gmra.mrb[46].mxu1 %vm155_vm1, %v16375_v20 }
 0x8cb   :  { %12095 = vmatprep.mubr.msk.f32.mxu1 %vm13415_vm0, %v16476_v47  ;;  %12357 = vmatpush3.bf16.msra.mxu1 %v12356_v22 }
 0x8cc   :  { %12358 = vmatprep.subr.bf16.mxu1 %v17154_v9 }
 0x8ce   :  { %12096 = vmatmul.mubr.msk.f32.gmra.mrb[48].mxu1 %vm155_vm1, %v16381_v29 }
 0x8cf   :  { %12098 = vmatprep.mubr.msk.f32.mxu1 %vm13415_vm0, %v16476_v47 }
 0x8d2   :  { %12099 = vmatmul.mubr.msk.f32.gmra.mrb[50].mxu1 %vm155_vm1, %v16476_v47 }
 0x8d3   :  { %12101 = vmatprep.mubr.msk.f32.mxu1 %vm13415_vm0, %v16476_v47 }
 0x8d6   :  { %12102 = vmatmul.mubr.msk.f32.gmra.mrb[52].mxu1 %vm155_vm1, %v16476_v47 }
 0x8d7   :  { %12104 = vmatprep.mubr.msk.f32.mxu1 %vm13415_vm0, %v16476_v47 }
 0x8da   :  { %12105 = vmatmul.mubr.msk.f32.gmra.mrb[54].mxu1 %vm155_vm1, %v16476_v47 }
 0x8db   :  { %12107 = vmatprep.mubr.msk.f32.mxu1 %vm13415_vm0, %v16476_v47 }
 0x8de   :  { %12108 = vmatmul.mubr.msk.f32.gmra.mrb[56].mxu1 %vm155_vm1, %v16399_v10  ;;  %v16962_v10 = vpop.permute.xlu1 %8830 }
 0x8df   :  { %12110 = vmatprep.mubr.msk.f32.mxu1 %vm13415_vm0, %v16476_v47 }
 0x8e2   :  { %12111 = vmatmul.mubr.msk.f32.gmra.mrb[58].mxu1 %vm155_vm1, %v16405_v54  ;;  %v16976_v33 = vpop.permute.xlu1 %8840 }
 0x8e3   :  { %12113 = vmatprep.mubr.msk.f32.mxu1 %vm13415_vm0, %v16476_v47 }
 0x8e6   :  { %12114 = vmatmul.mubr.msk.f32.gmra.mrb[60].mxu1 %vm155_vm1, %v16411_v16  ;;  %v16990_v26 = vpop.permute.xlu1 %8850 }
 0x8e7   :  { %12116 = vmatprep.mubr.msk.f32.mxu1 %vm13415_vm0, %v16476_v47 }
 0x8ea   :  { %12117 = vmatmul.mubr.msk.f32.gmra.mrb[62].mxu1 %vm155_vm1, %v16476_v47  ;;  %v17004_v13 = vpop.permute.xlu1 %8860 }
 0x8eb   :  { %12119 = vmatprep.mubr.msk.f32.mxu1 %vm13415_vm0, %v16476_v47 }
 0x8ee   :  { %12120 = vmatmul.mubr.msk.f32.gmra.mrb[64].mxu1 %vm155_vm1, %v16476_v47  ;;  %v17022_v27 = vpop.permute.xlu1 %8870 }
 0x8ef   :  { %12122 = vmatprep.mubr.msk.f32.mxu1 %vm13415_vm0, %v16476_v47 }
 0x8f2   :  { %12123 = vmatmul.mubr.msk.f32.gmra.mrb[66].mxu1 %vm155_vm1, %v16476_v47 }
 0x8f3   :  { %12125 = vmatprep.mubr.msk.f32.mxu1 %vm13415_vm0, %v16476_v47 }
 0x8f6   :  { %12126 = vmatmul.mubr.msk.f32.gmra.mrb[68].mxu1 %vm155_vm1, %v16476_v47 }
 0x8f7   :  { %12136 = vmatprep.mubr.msk.f32.mxu1 %vm13415_vm0, %v16476_v47 }
 0x999   :  { %v8712_v11 = vpop.f32.mrb[44].mxu1 }
 0x99a   :  { %v12091_v20 = vpop.f32.mrb[45].mxu1  ;;  %v16960_v29 = vadd.f32 %v16476_v47, %v8712_v11  ;;  %v17030_v11 = vpop.permute.xlu0 %8875 }
 0x99c   :  { %v8893_v37 = vmul.f32 %v16960_v29, %v16962_v10 }
 0x99d   :  { %v8717_v54 = vpop.f32.mrb[46].mxu1 }
 0x99e   :  { %v16965_v16 = vadd.f32 %v16476_v47, %v8717_v54  ;;  %v12094_v0 = vpop.f32.mrb[47].mxu1 }
 0x9a0   :  { %v8894_v59 = vmul.f32 %v16965_v16, %v16967_v4 }
 0x9a1   :  { %v8722_v21 = vpop.f32.mrb[48].mxu1 }
 0x9a2   :  { %v16974_v39 = vadd.f32 %v16476_v47, %v8722_v21  ;;  %v12097_v28 = vpop.f32.mrb[49].mxu1  ;;  %v8906_v61 = vadd.f32 %v8894_v59, %v8893_v37  ;;  %v17035_v21 = vpop.permute.xlu1 %8880 }
 0x9a4   :  { %v8895_v34 = vmul.f32 %v16974_v39, %v16976_v33 }
 0x9a5   :  { %v8727_v1 = vpop.f32.mrb[50].mxu1 }
 0x9a6   :  { %v16981_v24 = vadd.f32 %v16476_v47, %v8727_v1  ;;  %v12100_v3 = vpop.f32.mrb[51].mxu1  ;;  %v8907_v23 = vadd.f32 %v8906_v61, %v8895_v34 }
 0x9a8   :  { %v8896_v51 = vmul.f32 %v16981_v24, %v16983_v55 }
 0x9a9   :  { %v8732_v50 = vpop.f32.mrb[52].mxu1 }
 0x9aa   :  { %v16988_v42 = vadd.f32 %v16476_v47, %v8732_v50  ;;  %v12103_v2 = vpop.f32.mrb[53].mxu1  ;;  %v8908_v53 = vadd.f32 %v8907_v23, %v8896_v51  ;;  %v8886_v23 = vpop.permute.xlu0 %8885 }
 0x9ac   :  { %v8897_v48 = vmul.f32 %v16988_v42, %v16990_v26 }
 0x9ad   :  { %v8737_v52 = vpop.f32.mrb[54].mxu1 }
 0x9ae   :  { %v16995_v43 = vadd.f32 %v16476_v47, %v8737_v52  ;;  %v12106_v30 = vpop.f32.mrb[55].mxu1  ;;  %v8909_v7 = vadd.f32 %v8908_v53, %v8897_v48  ;;  %v8891_v52 = vpop.permute.xlu1 %8890 }
 0x9b0   :  { %v8898_v60 = vmul.f32 %v16995_v43, %v16997_v40 }
 0x9b1   :  { %v8742_v14 = vpop.f32.mrb[56].mxu1 }
 0x9b2   :  { %v17002_v38 = vadd.f32 %v16476_v47, %v8742_v14  ;;  %v12109_v15 = vpop.f32.mrb[57].mxu1  ;;  %v8910_v44 = vadd.f32 %v8909_v7, %v8898_v60 }
 0x9b4   :  { %v8899_v35 = vmul.f32 %v17002_v38, %v17004_v13 }
 0x9b5   :  { %v8747_v49 = vpop.f32.mrb[58].mxu1 }
 0x9b6   :  { %v12540_v56 = vadd.f32 %v16476_v47, %v8747_v49  ;;  %v12112_v57 = vpop.f32.mrb[59].mxu1  ;;  %v8911_v31 = vadd.f32 %v8910_v44, %v8899_v35 }
 0x9b8   :  { %v8900_v19 = vmul.f32 %v12540_v56, %v17009_v18 }
 0x9b9   :  { %v8752_v8 = vpop.f32.mrb[60].mxu1 }
 0x9ba   :  { %v12543_v25 = vadd.f32 %v16476_v47, %v8752_v8  ;;  %v12115_v17 = vpop.f32.mrb[61].mxu1  ;;  %v8912_v41 = vadd.f32 %v8911_v31, %v8900_v19 }
 0x9bc   :  { %v8901_v45 = vmul.f32 %v12543_v25, %v17022_v27 }
 0x9bd   :  { %v8757_v58 = vpop.f32.mrb[62].mxu1 }
 0x9be   :  { %v12546_v62 = vadd.f32 %v16476_v47, %v8757_v58  ;;  %v12118_v46 = vpop.f32.mrb[63].mxu1  ;;  %v8913_v5 = vadd.f32 %v8912_v41, %v8901_v45 }
 0x9c0   :  { %v8902_v20 = vmul.f32 %v12546_v62, %v17030_v11 }
 0x9c1   :  { %v8762_v54 = vpop.f32.mrb[64].mxu1 }
 0x9c2   :  { %v12549_v0 = vadd.f32 %v16476_v47, %v8762_v54  ;;  %v12121_v37 = vpop.f32.mrb[65].mxu1  ;;  %v8914_v59 = vadd.f32 %v8913_v5, %v8902_v20 }
 0x9c4   :  { %v8903_v28 = vmul.f32 %v12549_v0, %v17035_v21 }
 0x9c5   :  { %v8767_v61 = vpop.f32.mrb[66].mxu1 }
 0x9c6   :  { %v12552_v34 = vadd.f32 %v16476_v47, %v8767_v61  ;;  %v12124_v1 = vpop.f32.mrb[67].mxu1  ;;  %v8915_v3 = vadd.f32 %v8914_v59, %v8903_v28 }
 0x9c8   :  { %v8904_v51 = vmul.f32 %v12552_v34, %v8886_v23 }
 0x9c9   :  { %v8772_v50 = vpop.f32.mrb[68].mxu1 }
 0x9ca   :  { %v12555_v2 = vadd.f32 %v16476_v47, %v8772_v50  ;;  %v8916_v53 = vadd.f32 %v8915_v3, %v8904_v51  ;;  %v12127_v48 = vpop.f32.mrb[69].mxu1 }
 0x9cc   :  { %v8905_v30 = vmul.f32 %v12555_v2, %v8891_v52 }
 0x9ce   :  { %v8917_v7 = vadd.f32 %v8916_v53, %v8905_v30 }
 0x9d0   :  { %v8918_v60 = vrot.slane %v8917_v7, 4 }
 0x9d2   :  { %v8919_v14 = vadd.f32 %v8918_v60, %v8917_v7 }
 0x9d4   :  { %v8920_v15 = vrot.slane %v8919_v14, 2 }
 0x9d6   :  { %v8921_v44 = vadd.f32 %v8920_v15, %v8919_v14 }
 0x9d8   :  { %v8922_v35 = vrot.slane %v8921_v44, 1 }
 0x9da   :  { %v8923_v49 = vadd.f32 %v8922_v35, %v8921_v44 }
 0x9dc   :  { %v8924_v57 = vmul.f32 0.02, %v8923_v49 }
 0x9de   :  { %v8925_v31 = vsub.f32 %v16960_v29, %v8924_v57  ;;  %v8926_v19 = vsub.f32 %v16965_v16, %v8924_v57  ;;  %v8927_v8 = vsub.f32 %v16974_v39, %v8924_v57  ;;  %v8928_v47 = vsub.f32 %v16981_v24, %v8924_v57 }
 0x9df   :  { %v8929_v17 = vsub.f32 %v16988_v42, %v8924_v57  ;;  %v8930_v41 = vsub.f32 %v16995_v43, %v8924_v57  ;;  %v8931_v12 = vsub.f32 %v17002_v38, %v8924_v57  ;;  %v8932_v32 = vsub.f32 %v12540_v56, %v8924_v57 }
 0x9e0   :  { %v8933_v36 = vsub.f32 %v12543_v25, %v8924_v57  ;;  %v8934_v63 = vsub.f32 %v12546_v62, %v8924_v57  ;;  %v8935_v6 = vsub.f32 %v12549_v0, %v8924_v57  ;;  %v8936_v45 = vsub.f32 %v12552_v34, %v8924_v57 }
 0x9e1   :  { %v8937_v58 = vsub.f32 %v12555_v2, %v8924_v57  ;;  %v8938_v22 = vmul.f32 %v8925_v31, %v8925_v31  ;;  %v8939_v29 = vmul.f32 %v8926_v19, %v8926_v19  ;;  %v8940_v46 = vmul.f32 %v8927_v8, %v8927_v8 }
 0x9e2   :  { %v8941_v24 = vmul.f32 %v8928_v47, %v8928_v47  ;;  %v8942_v5 = vmul.f32 %v8929_v17, %v8929_v17  ;;  %v8943_v20 = vmul.f32 %v8930_v41, %v8930_v41  ;;  %v8944_v25 = vmul.f32 %v8931_v12, %v8931_v12 }
 0x9e3   :  { %v8951_v16 = vmul.f32 %v8938_v22, %v16962_v10  ;;  %v8952_v39 = vmul.f32 %v8939_v29, %v16967_v4  ;;  %v8953_v42 = vmul.f32 %v8940_v46, %v16976_v33  ;;  %v8945_v0 = vmul.f32 %v8932_v32, %v8932_v32 }
 0x9e4   :  { %v8954_v38 = vmul.f32 %v8941_v24, %v16983_v55  ;;  %v8955_v62 = vmul.f32 %v8942_v5, %v16990_v26  ;;  %v8956_v37 = vmul.f32 %v8943_v20, %v16997_v40  ;;  %v8946_v10 = vmul.f32 %v8933_v36, %v8933_v36 }
 0x9e5   :  { %v8964_v43 = vadd.f32 %v8952_v39, %v8951_v16  ;;  %v8957_v4 = vmul.f32 %v8944_v25, %v17004_v13  ;;  %v8947_v61 = vmul.f32 %v8934_v63, %v8934_v63  ;;  %v8958_v33 = vmul.f32 %v8945_v0, %v17009_v18 }
 0x9e6   :  { %v8948_v1 = vmul.f32 %v8935_v6, %v8935_v6  ;;  %v8959_v55 = vmul.f32 %v8946_v10, %v17022_v27  ;;  %v8949_v51 = vmul.f32 %v8936_v45, %v8936_v45  ;;  %v8950_v2 = vmul.f32 %v8937_v58, %v8937_v58 }
 0x9e7   :  { %v8965_v56 = vadd.f32 %v8964_v43, %v8953_v42  ;;  %v8960_v26 = vmul.f32 %v8947_v61, %v17030_v11 }
 0x9e8   :  { %v8961_v40 = vmul.f32 %v8948_v1, %v17035_v21  ;;  %v8962_v48 = vmul.f32 %v8949_v51, %v8886_v23  ;;  %v8963_v13 = vmul.f32 %v8950_v2, %v8891_v52  ;;  %v10037_v23 = vld [vmem:[%s17135_s8] ss:$0 sm:$0xff] }
 0x9e9   :  { %v8966_v54 = vadd.f32 %v8965_v56, %v8954_v38 }
 0x9eb   :  { %v8967_v59 = vadd.f32 %v8966_v54, %v8955_v62 }
 0x9ed   :  { %v8968_v28 = vadd.f32 %v8967_v59, %v8956_v37 }
 0x9ef   :  { %v8969_v34 = vadd.f32 %v8968_v28, %v8957_v4 }
 0x9f1   :  { %v8970_v3 = vadd.f32 %v8969_v34, %v8958_v33 }
 0x9f3   :  { %v8971_v50 = vadd.f32 %v8970_v3, %v8959_v55 }
 0x9f5   :  { %v8972_v53 = vadd.f32 %v8971_v50, %v8960_v26 }
 0x9f7   :  { %v8973_v30 = vadd.f32 %v8972_v53, %v8961_v40 }
 0x9f9   :  { %v8974_v7 = vadd.f32 %v8973_v30, %v8962_v48 }
 0x9fb   :  { %v8975_v60 = vadd.f32 %v8974_v7, %v8963_v13 }
 0x9fd   :  { %v8976_v14 = vrot.slane %v8975_v60, 4 }
 0x9ff   :  { %v8977_v18 = vadd.f32 %v8976_v14, %v8975_v60 }
 0xa01   :  { %v8978_v15 = vrot.slane %v8977_v18, 2 }
 0xa03   :  { %v8979_v44 = vadd.f32 %v8978_v15, %v8977_v18 }
 0xa05   :  { %v8980_v35 = vrot.slane %v8979_v44, 1 }
 0xa07   :  { %v8981_v27 = vadd.f32 %v8980_v35, %v8979_v44 }
 0xa09   :  { %v8982_v49 = vmul.f32 0.02, %v8981_v27 }
 0xa0b   :  { %v8983_v57 = vadd.f32 1e-05, %v8982_v49 }
 0xa0d   :  { %13357 = vrsqrt.f32 %v8983_v57 }
 0xa17   :  { %v13358_v11 = vpop.eup %13357 }
 0xa18   :  { %v8985_v22 = vmul.f32 %v13358_v11, %v8925_v31  ;;  %v8986_v29 = vmul.f32 %v13358_v11, %v8926_v19  ;;  %v8987_v46 = vmul.f32 %v13358_v11, %v8927_v8  ;;  %v8988_v21 = vmul.f32 %v13358_v11, %v8928_v47  ;;  %v10038_v31 = vld [vmem:[%s17135_s8 + $0x1] ss:$0 sm:$0xff] }
 0xa19   :  { %v8989_v52 = vmul.f32 %v13358_v11, %v8929_v17  ;;  %v8990_v16 = vmul.f32 %v13358_v11, %v8930_v41  ;;  %v8991_v39 = vmul.f32 %v13358_v11, %v8931_v12  ;;  %v8992_v24 = vmul.f32 %v13358_v11, %v8932_v32 }
 0xa1a   :  { %v8993_v5 = vmul.f32 %v13358_v11, %v8933_v36  ;;  %v8994_v42 = vmul.f32 %v13358_v11, %v8934_v63  ;;  %v8995_v43 = vmul.f32 %v13358_v11, %v8935_v6  ;;  %v8996_v20 = vmul.f32 %v13358_v11, %v8936_v45 }
 0xa1b   :  { %v8997_v38 = vmul.f32 %v13358_v11, %v8937_v58  ;;  %v9003_v56 = vmul.f32 %v10037_v23, %v8985_v22  ;;  %v9004_v25 = vmul.f32 %v10037_v23, %v8986_v29  ;;  %v9005_v62 = vmul.f32 %v10037_v23, %v8987_v46 }
 0xa1c   :  { %v9006_v19 = vmul.f32 %v10037_v23, %v8988_v21  ;;  %v9007_v8 = vmul.f32 %v10037_v23, %v8989_v52  ;;  %v9008_v47 = vmul.f32 %v10037_v23, %v8990_v16  ;;  %v9009_v41 = vmul.f32 %v10037_v23, %v8991_v39 }
 0xa1d   :  { %v9021_v54 = vadd.f32 %v10038_v31, %v9003_v56  ;;  %v9022_v17 = vadd.f32 %v10038_v31, %v9004_v25  ;;  %v9023_v12 = vadd.f32 %v10038_v31, %v9005_v62  ;;  %v9010_v32 = vmul.f32 %v10037_v23, %v8992_v24 }
 0xa1e   :  { %v9024_v36 = vadd.f32 %v10038_v31, %v9006_v19  ;;  %v9011_v63 = vmul.f32 %v10037_v23, %v8993_v5  ;;  %v9025_v6 = vadd.f32 %v10038_v31, %v9007_v8  ;;  %v9012_v45 = vmul.f32 %v10037_v23, %v8994_v42  ;;  %v9108_v8 = vld [vmem:[%s17137_s10] sm:$0xff] }
 0xa1f   :  { %13359 = vtanh.f32 %v9021_v54  ;;  %v9026_v58 = vadd.f32 %v10038_v31, %v9008_v47  ;;  %v9013_v0 = vmul.f32 %v10037_v23, %v8995_v43  ;;  %v9027_v37 = vadd.f32 %v10038_v31, %v9009_v41  ;;  %v9109_v47 = vld [vmem:[%s17137_s10 + $0x8] sm:$0xff]  ;;  %v9111_v41 = vld [vmem:[%s17137_s10 + $0x18] sm:$0xff] }
 0xa20   :  { %13361 = vtanh.f32 %v9022_v17  ;;  %v9014_v59 = vmul.f32 %v10037_v23, %v8996_v20  ;;  %v9028_v10 = vadd.f32 %v10038_v31, %v9010_v32  ;;  %v9015_v4 = vmul.f32 %v10037_v23, %v8997_v38  ;;  %v9110_v17 = vld [vmem:[%s17137_s10 + $0x10] sm:$0xff] }
 0xa21   :  { %13363 = vtanh.f32 %v9023_v12  ;;  %v9029_v28 = vadd.f32 %v10038_v31, %v9011_v63  ;;  %v9030_v61 = vadd.f32 %v10038_v31, %v9012_v45  ;;  %v9031_v33 = vadd.f32 %v10038_v31, %v9013_v0  ;;  %v10045_v63 = vld [vmem:[%s17137_s10 + $0x40] sm:$0xff]  ;;  %v10048_v0 = vld [vmem:[%s17137_s10 + $0x58] sm:$0xff] }
 0xa22   :  { %13365 = vtanh.f32 %v9024_v36  ;;  %v9032_v34 = vadd.f32 %v10038_v31, %v9014_v59  ;;  %v9033_v1 = vadd.f32 %v10038_v31, %v9015_v4  ;;  %v12359_v54 = vpack.c.bf16 %v9109_v47, %v9108_v8  ;;  %v13389_v36 = vld [vmem:[#allocation3] sm:$0xff] }
 0xa23   :  { %13367 = vtanh.f32 %v9025_v6  ;;  %v12362_v32 = vpack.c.bf16 %v9111_v41, %v9110_v17  ;;  %v10046_v6 = vld [vmem:[%s17137_s10 + $0x48] sm:$0xff] }
 0xa24   :  { %13369 = vtanh.f32 %v9026_v58  ;;  %v12365_v45 = vpack.c.bf16 %v10046_v6, %v10045_v63  ;;  %v10047_v58 = vld [vmem:[%s17137_s10 + $0x50] sm:$0xff]  ;;  %v10051_v4 = vld [vmem:[%s17137_s10 + $0x68] sm:$0xff] }
 0xa25   :  { %13371 = vtanh.f32 %v9027_v37  ;;  %v12368_v59 = vpack.c.bf16 %v10048_v0, %v10047_v58 }
 0xa26   :  { %13373 = vtanh.f32 %v9028_v10  ;;  %v10050_v10 = vld [vmem:[%s17137_s10 + $0x60] sm:$0xff] }
 0xa27   :  { %13375 = vtanh.f32 %v9029_v28  ;;  %v12371_v28 = vpack.c.bf16 %v10051_v4, %v10050_v10 }
 0xa28   :  { %13377 = vtanh.f32 %v9030_v61  ;;  %v10052_v61 = vld [vmem:[%s17137_s10 + $0x70] sm:$0xff] }
 0xa29   :  { %v13360_v55 = vpop.eup %13359  ;;  %13379 = vtanh.f32 %v9031_v33  ;;  %v10053_v33 = vld [vmem:[%s17137_s10 + $0x78] sm:$0xff] }
 0xa2a   :  { %v13362_v3 = vpop.eup %13361  ;;  %13381 = vtanh.f32 %v9032_v34  ;;  %9047 = vst [vmem:[#allocation6] sm:$0xff] %v13360_v55 }
 0xa2b   :  { %v13364_v51 = vpop.eup %13363  ;;  %13383 = vtanh.f32 %v9033_v1  ;;  %9048 = vst [vmem:[#allocation6 + $0x8] sm:$0xff] %v13362_v3  ;;  %v12374_v1 = vpack.c.bf16 %v10053_v33, %v10052_v61 }
 0xa2c   :  { %v13366_v26 = vpop.eup %13365  ;;  %9049 = vst [vmem:[#allocation6 + $0x10] sm:$0xff] %v13364_v51 }
 0xa2d   :  { %v13368_v50 = vpop.eup %13367  ;;  %9050 = vst [vmem:[#allocation6 + $0x18] sm:$0xff] %v13366_v26 }
 0xa2e   :  { %v13370_v2 = vpop.eup %13369 }
 0xa2f   :  { %v13372_v40 = vpop.eup %13371 }
 0xa30   :  { %v13374_v53 = vpop.eup %13373  ;;  %9053 = vst [vmem:[#allocation6 + $0x30] sm:$0xff] %v13372_v40 }
 0xa31   :  { %v13376_v48 = vpop.eup %13375  ;;  %9054 = vst [vmem:[#allocation6 + $0x38] sm:$0xff] %v13374_v53  ;;  %v9060_v30 = vld [vmem:[#allocation6] ss:$2 sm:$0x3] }
 0xa32   :  { %v9062_v13 = vld [vmem:[#allocation6 + $0x1] ss:$2 sm:$0x3]  ;;  %v13378_v7 = vpop.eup %13377  ;;  %9055 = vst [vmem:[#allocation6 + $0x40] sm:$0xff] %v13376_v48 }
 0xa33   :  { %v9063_v60 = vmax.f32 %v9060_v30, %v9062_v13  ;;  %v9065_v14 = vld [vmem:[#allocation6 + $0x7] ss:$2 sm:$0x3]  ;;  %v9067_v18 = vld [vmem:[#allocation6 + $0x8] ss:$2 sm:$0x3]  ;;  %v13380_v15 = vpop.eup %13379 }
 0xa34   :  { %9056 = vst [vmem:[#allocation6 + $0x48] sm:$0xff] %v13378_v7  ;;  %v9068_v44 = vmax.f32 %v9065_v14, %v9067_v18  ;;  %v9072_v35 = vld [vmem:[#allocation6 + $0xe] ss:$2 sm:$0x3]  ;;  %v13382_v49 = vpop.eup %13381  ;;  %v10055_v13 = vld [vmem:[%s17138_s11] ss:$0 sm:$0xff] }
 0xa35   :  { %v9074_v27 = vld [vmem:[#allocation6 + $0xf] ss:$2 sm:$0x3]  ;;  %v9077_v11 = vld [vmem:[#allocation6 + $0x15] ss:$2 sm:$0x3]  ;;  %v13384_v29 = vpop.eup %13383 }
 0xa36   :  { %v9075_v57 = vmax.f32 %v9072_v35, %v9074_v27  ;;  %v9079_v22 = vld [vmem:[#allocation6 + $0x16] ss:$2 sm:$0x3]  ;;  %v9069_v46 = vmax.f32 %v9063_v60, %v9068_v44 }
 0xa37   :  { %v9080_v21 = vmax.f32 %v9077_v11, %v9079_v22  ;;  %v9084_v23 = vld [vmem:[#allocation6 + $0x31] ss:$2 sm:$0x3]  ;;  %v9086_v52 = vld [vmem:[#allocation6 + $0x32] ss:$2 sm:$0x3] }
 0xa38   :  { %9070 = vst [vmem:[#allocation7] sm:$0x3] %v9069_v46  ;;  %v9087_v39 = vmax.f32 %v9084_v23, %v9086_v52  ;;  %v9089_v24 = vld [vmem:[#allocation6 + $0x38] ss:$2 sm:$0x3] }
 0xa39   :  { %v9081_v16 = vmax.f32 %v9075_v57, %v9080_v21  ;;  %v9091_v5 = vld [vmem:[#allocation6 + $0x39] ss:$2 sm:$0x3]  ;;  %v9096_v43 = vld [vmem:[#allocation6 + $0x3f] ss:$2 sm:$0x3] }
 0xa3a   :  { %v9092_v42 = vmax.f32 %v9089_v24, %v9091_v5  ;;  %v9098_v20 = vld [vmem:[#allocation6 + $0x40] ss:$2 sm:$0x3] }
 0xa3b   :  { %9082 = vst [vmem:[#allocation7 + $0x2] sm:$0x3] %v9081_v16  ;;  %v9099_v38 = vmax.f32 %v9096_v43, %v9098_v20  ;;  %v9101_v56 = vld [vmem:[#allocation6 + $0x46] ss:$2 sm:$0x3] }
 0xa3c   :  { %v9103_v25 = vld [vmem:[#allocation6 + $0x47] ss:$2 sm:$0x3]  ;;  %v9093_v62 = vmax.f32 %v9087_v39, %v9092_v42 }
 0xa3d   :  { %v9104_v31 = vmax.f32 %v9101_v56, %v9103_v25 }
 0xa3e   :  { %9094 = vst [vmem:[#allocation7 + $0x4] sm:$0x3] %v9093_v62 }
 0xa3f   :  { %v9105_v19 = vmax.f32 %v9099_v38, %v9104_v31 }
 0xa41   :  { %9106 = vst [vmem:[#allocation7 + $0x6] sm:$0x3] %v9105_v19 }
 0xa45   :  { %v9113_v12 = vld [vmem:[#allocation7 + $0x1] ss:$4 sm:$0x3]  ;;  %v9107_v37 = vld [vmem:[#allocation7] ss:$4 sm:$0x3] }
 0xa46   :  { %12137 = vmatmul.mubr.msk.f32.vlgmr.msra.gmra.mrb[70].mxu1 %vm155_vm1, %v9113_v12 }
 0xa47   :  { %12360 = vmatpush3.bf16.msra.mxu1 %v12359_v54  ;;  %12147 = vmatprep.mubr.msk.f32.mxu1 %vm13415_vm0, %v13389_v36 }
 0xa48   :  { %12361 = vmatprep.subr.bf16.mxu1 %v17154_v9  ;;  %v9266_v34 = vld [vmem:[#allocation7 + $0x2] ss:$4 sm:$0x3]  ;;  %v9347_v55 = vld [vmem:[#allocation7 + $0x3] ss:$4 sm:$0x3] }
 0xa4b   :  { %12363 = vmatpush3.bf16.msra.mxu1 %v12362_v32 }
 0xa4c   :  { %12364 = vmatprep.subr.bf16.mxu1 %v17154_v9 }
 0xa4e   :  { %12148 = vmatmul.mubr.msk.f32.vlgmr.msra.gmra.mrb[72].mxu1 %vm155_vm1, %v9107_v37 }
 0xa4f   :  { %12366 = vmatpush3.bf16.msra.mxu1 %v12365_v45  ;;  %12158 = vmatprep.mubr.msk.f32.mxu1 %vm13415_vm0, %v13389_v36 }
 0xa50   :  { %12367 = vmatprep.subr.bf16.mxu1 %v17154_v9 }
 0xa53   :  { %12369 = vmatpush3.bf16.msra.mxu1 %v12368_v59 }
 0xa54   :  { %12370 = vmatprep.subr.bf16.mxu1 %v17154_v9 }
 0xa56   :  { %12159 = vmatmul.mubr.msk.f32.vlgmr.msra.gmra.mrb[74].mxu1 %vm155_vm1, %v9266_v34 }
 0xa57   :  { %12372 = vmatpush3.bf16.msra.mxu1 %v12371_v28  ;;  %12169 = vmatprep.mubr.msk.f32.mxu1 %vm13415_vm0, %v13389_v36 }
 0xa58   :  { %12373 = vmatprep.subr.bf16.mxu1 %v17154_v9 }
 0xa5b   :  { %12375 = vmatpush3.bf16.msra.mxu1 %v12374_v1 }
 0xa5e   :  { %12170 = vmatmul.mubr.msk.f32.vlgmr.msra.gmra.mrb[76].mxu1 %vm155_vm1, %v9347_v55 }
 0xb19   :  { %v9188_v3 = vpop.f32.mrb[70].mxu1 }
 0xb1a   :  { %v12138_v51 = vpop.f32.mrb[71].mxu1 }
 0xb21   :  { %v9261_v26 = vpop.f32.mrb[72].mxu1 }
 0xb22   :  { %v9262_v50 = vadd.f32 %v9261_v26, %v9188_v3  ;;  %v12149_v2 = vpop.f32.mrb[73].mxu1 }
 0xb29   :  { %v9341_v40 = vpop.f32.mrb[74].mxu1 }
 0xb2a   :  { %v9345_v53 = vadd.f32 %v9341_v40, %v9262_v50  ;;  %v12160_v48 = vpop.f32.mrb[75].mxu1 }
 0xb31   :  { %v9422_v30 = vpop.f32.mrb[76].mxu1 }
 0xb32   :  { %v9426_v9 = vadd.f32 %v9422_v30, %v9345_v53  ;;  %v12171_v7 = vpop.f32.mrb[77].mxu1 }
 0xb34   :  { %v9434_v60 = vadd.f32 %v10055_v13, %v9426_v9 }
 0xb36   :  { %9436 = vst.msk [vmem:[#allocation8] sm:$0x3] %vm9435_vm2, %v9434_v60 }
 0xb37   :  { %13401 = shalt.err (!%p13398_p4)
}
 0xb38   :  { %s13402_s18 = scalar_lea.hbm %s17139_s12, 32 }
 0xb39   :  { %p13403_p5 = scmp.ne.s32.totalorder %s17139_s12, %s13402_s18  ;;  %p13406_p6 = scmp.lt.u32.totalorder %s13402_s18, %s17139_s12 }
 0xb3b   :  { %p13408_p7 = pnand %p13406_p6, %p13403_p5 }
 0xb3d   :  { %13411 = shalt.err (!%p13408_p7)
}
 0xb3e   :  { %9446 = dma.vmem_to_hbm [thread:$0]  %s9444_s6, 32, %s17139_s12, [#allocation9]  }
 0xb3f   :  { %13412 = dma.done.wait [#allocation9], 32  }
 0xb40   :  { %13413 = vsyncadd [#allocation9], 4294967264 }
 0xb41   :  { %9450 = vsyncpa [#allocation9], 1 }

</bundles_post_ra>
